<compile_context>
chip_gen: v5e
topology: v5e:2x2
jax: 0.10.0
libtpu: 0.0.40
codegen_flags: <defaults>
</compile_context>

<pallas_src>
import functools

import jax
import jax.numpy as jnp
from jax.experimental import pallas as pl
from jax.experimental.pallas import tpu as pltpu


# ----------------------------------------------------------------------------
# Fused kernel: conv3x3 -> maxpool3x3/s2 -> resblock0 -> resblock1, per image.
# ----------------------------------------------------------------------------
def _fused_kernel(x_ref, cw_ref, cb_ref,
                  w00_ref, b00_ref, w01_ref, b01_ref,
                  w10_ref, b10_ref, w11_ref, b11_ref,
                  o_ref, xpad, ypad, zpad,
                  *, H, W, Cin, Cout, Ho, Wo):
    f32 = jnp.float32

    def conv3x3(pad_ref, h, w, cin, wmat, bias):
        # im2col: concatenate the 9 shifted windows along the channel (lane)
        # axis once, then do ONE (h*w, 9*cin) @ (9*cin, Cout) MXU matmul.
        taps = [pad_ref[dy:dy + h, dx:dx + w, :]
                for dy in range(3) for dx in range(3)]
        patches = jnp.concatenate(taps, axis=-1).reshape(h * w, 9 * cin)
        acc = jnp.dot(patches, wmat, preferred_element_type=f32) + bias
        return acc.reshape(h, w, Cout)

    # ---- stage 1: self.conv (3x3, padding=1); zero-pad halo in VMEM --------
    xpad[...] = jnp.zeros((H + 2, W + 2, Cin), f32)
    xpad[1:H + 1, 1:W + 1, :] = x_ref[0].astype(f32)
    y = conv3x3(xpad, H, W, Cin, cw_ref[...], cb_ref[...])

    # ---- stage 2: max_pool2d(kernel=3, stride=2, padding=1) ----------------
    # -inf halo padding in VMEM (matches PyTorch's padded max-pool semantics).
    ypad[...] = jnp.full((H + 2, W + 2, Cout), -jnp.inf, f32)
    ypad[1:H + 1, 1:W + 1, :] = y
    m = ypad[0:H, 0:W, :]
    for dy in range(3):
        for dx in range(3):
            if dy == 0 and dx == 0:
                continue
            m = jnp.maximum(m, ypad[dy:dy + H, dx:dx + W, :])
    # stride-2 subsample inside the kernel (rank<=3 reshapes; no HBM writeback
    # of the dense max, no separate XLA strided-slice op).
    m = m.reshape(Ho, 2, W * Cout)[:, 0, :]          # keep even rows
    x = m.reshape(Ho, Wo, 2 * Cout)[:, :, :Cout]     # keep even cols -> (Ho,Wo,Cout)

    # ---- stages 3 & 4: pre-activation residual blocks ----------------------
    # out = x + conv1(relu(conv0(relu(x))));  relu(0)=0 so zero-pad-after-relu
    # equals relu-then-conv(padding=1).
    def res_block(inp, wa, ba, wb, bb):
        zpad[1:Ho + 1, 1:Wo + 1, :] = jnp.maximum(inp, 0.0)
        h = conv3x3(zpad, Ho, Wo, Cout, wa, ba)
        zpad[1:Ho + 1, 1:Wo + 1, :] = jnp.maximum(h, 0.0)
        return conv3x3(zpad, Ho, Wo, Cout, wb, bb) + inp

    zpad[...] = jnp.zeros((Ho + 2, Wo + 2, Cout), f32)   # borders stay zero
    x = res_block(x, w00_ref[...], b00_ref[...], w01_ref[...], b01_ref[...])
    x = res_block(x, w10_ref[...], b10_ref[...], w11_ref[...], b11_ref[...])

    # Lane-dense store: (1, Ho, Wo*Cout) with Wo*Cout a multiple of 128.
    o_ref[...] = x.reshape(1, Ho, Wo * Cout).astype(o_ref.dtype)


# ----------------------------------------------------------------------------
# Public wrapper: NCHW in, NCHW out (single fused pallas_call in between).
# ----------------------------------------------------------------------------
def conv_sequence_custom(x_nchw, p):
    N, Cin, H, W = x_nchw.shape
    Cout = p["conv_w"].shape[-1]
    # TODO(synk): odd H/W needs a slightly different in-kernel subsample; the
    # module's test shapes (and typical ConvSequence inputs) are even.
    assert H % 2 == 0 and W % 2 == 0, "even spatial dims assumed"
    Ho, Wo = (H + 1) // 2, (W + 1) // 2

    x = jnp.transpose(x_nchw, (0, 2, 3, 1))           # NCHW -> NHWC (one XLA op)

    def mat(w):   # (3,3,ci,co) HWIO -> (9*ci, co) im2col weight matrix
        return w.reshape(-1, w.shape[-1])

    def row(b):
        return b.reshape(1, -1)

    args = [x,
            mat(p["conv_w"]), row(p["conv_b"]),
            mat(p["rb0_w0"]), row(p["rb0_b0"]),
            mat(p["rb0_w1"]), row(p["rb0_b1"]),
            mat(p["rb1_w0"]), row(p["rb1_b0"]),
            mat(p["rb1_w1"]), row(p["rb1_b1"])]

    # Weights/biases use constant block indices -> DMA'd into VMEM exactly once
    # for the whole grid; only the per-image activation block is streamed.
    in_specs = [pl.BlockSpec((1, H, W, Cin), lambda n: (n, 0, 0, 0))]
    in_specs += [pl.BlockSpec(a.shape, lambda n: (0, 0)) for a in args[1:]]

    kernel = functools.partial(_fused_kernel, H=H, W=W, Cin=Cin, Cout=Cout,
                               Ho=Ho, Wo=Wo)

    out = pl.pallas_call(
        kernel,
        out_shape=jax.ShapeDtypeStruct((N, Ho, Wo * Cout), x_nchw.dtype),
        grid=(N,),
        in_specs=in_specs,
        out_specs=pl.BlockSpec((1, Ho, Wo * Cout), lambda n: (n, 0, 0)),
        scratch_shapes=[
            pltpu.VMEM((H + 2, W + 2, Cin), jnp.float32),    # zero-padded input
            pltpu.VMEM((H + 2, W + 2, Cout), jnp.float32),   # -inf-padded conv out
            pltpu.VMEM((Ho + 2, Wo + 2, Cout), jnp.float32), # zero-padded resblock
        ],
        # Batch axis is parallel so v7x's two TensorCores can split it; at
        # these shapes total VMEM use is <1 MiB so the default scoped limit is
        # fine on every generation (for production sizes: tile along H with a
        # 2-row halo and set vmem_limit_bytes for v7x's 64 MiB VMEM).
        compiler_params=pltpu.CompilerParams(
            dimension_semantics=("parallel",)),
    )(*args)

    out = out.reshape(N, Ho, Wo, Cout)
    return jnp.transpose(out, (0, 3, 1, 2))           # NHWC -> NCHW


# ----------------------------------------------------------------------------
# Deterministic parameter init (PyTorch-like kaiming-uniform bounds).
# ----------------------------------------------------------------------------
def init_params(key, c_in, c_out):
    ks = jax.random.split(key, 12)

    def w_init(k, cin, cout):
        bound = 1.0 / jnp.sqrt(jnp.float32(cin * 9))
        return jax.random.uniform(k, (3, 3, cin, cout), jnp.float32,
                                  -bound, bound)

    def b_init(k, cin, cout):
        bound = 1.0 / jnp.sqrt(jnp.float32(cin * 9))
        return jax.random.uniform(k, (cout,), jnp.float32, -bound, bound)

    return {
        "conv_w": w_init(ks[0], c_in, c_out), "conv_b": b_init(ks[1], c_in, c_out),
        "rb0_w0": w_init(ks[2], c_out, c_out), "rb0_b0": b_init(ks[3], c_out, c_out),
        "rb0_w1": w_init(ks[4], c_out, c_out), "rb0_b1": b_init(ks[5], c_out, c_out),
        "rb1_w0": w_init(ks[6], c_out, c_out), "rb1_b0": b_init(ks[7], c_out, c_out),
        "rb1_w1": w_init(ks[8], c_out, c_out), "rb1_b1": b_init(ks[9], c_out, c_out),
    }


# ----------------------------------------------------------------------------
# Pure-JAX reference (correctness check only).
# ----------------------------------------------------------------------------
def _ref_conv(x, w, b):
    y = jax.lax.conv_general_dilated(
        x, w, window_strides=(1, 1), padding=((1, 1), (1, 1)),
        dimension_numbers=("NHWC", "HWIO", "NHWC"))
    return y + b.reshape(1, 1, 1, -1)


def ref_forward(x_nchw, p):
    x = jnp.transpose(x_nchw, (0, 2, 3, 1))
    x = _ref_conv(x, p["conv_w"], p["conv_b"])
    x = jax.lax.reduce_window(
        x, -jnp.inf, jax.lax.max, (1, 3, 3, 1), (1, 2, 2, 1),
        ((0, 0), (1, 1), (1, 1), (0, 0)))
    for blk in ("rb0", "rb1"):
        h = _ref_conv(jax.nn.relu(x), p[f"{blk}_w0"], p[f"{blk}_b0"])
        x = _ref_conv(jax.nn.relu(h), p[f"{blk}_w1"], p[f"{blk}_b1"]) + x
    return jnp.transpose(x, (0, 3, 1, 2))


if __name__ == "__main__":
    key = jax.random.PRNGKey(0)
    kx, kp = jax.random.split(key)

    N, C_in, H, W = 2, 4, 16, 16
    C_out = 16

    x = jax.random.normal(kx, (N, C_in, H, W), jnp.float32)
    params = init_params(kp, C_in, C_out)

    out = jax.jit(conv_sequence_custom)(x, params)
    out = jax.block_until_ready(out)

    # shape check mirroring the module's get_output_shape assertion
    assert out.shape == (N, C_out, (H + 1) // 2, (W + 1) // 2), out.shape

    ref = ref_forward(x, params)
    assert jnp.allclose(out, ref, atol=2e-4, rtol=2e-4), (
        float(jnp.max(jnp.abs(out - ref))))

    print("KERNEL_OK")
</pallas_src>

<mosaic_0001>
module attributes {stable_mosaic.version = 11 : i64} {
  func.func @_fused_kernel(%arg0: i32, %arg1: memref<1x16x16x4xf32, #tpu.memory_space<vmem>>, %arg2: memref<36x16xf32, #tpu.memory_space<vmem>>, %arg3: memref<1x16xf32, #tpu.memory_space<vmem>>, %arg4: memref<144x16xf32, #tpu.memory_space<vmem>>, %arg5: memref<1x16xf32, #tpu.memory_space<vmem>>, %arg6: memref<144x16xf32, #tpu.memory_space<vmem>>, %arg7: memref<1x16xf32, #tpu.memory_space<vmem>>, %arg8: memref<144x16xf32, #tpu.memory_space<vmem>>, %arg9: memref<1x16xf32, #tpu.memory_space<vmem>>, %arg10: memref<144x16xf32, #tpu.memory_space<vmem>>, %arg11: memref<1x16xf32, #tpu.memory_space<vmem>>, %arg12: memref<1x8x128xf32, #tpu.memory_space<vmem>>, %arg13: memref<18x18x4xf32, #tpu.memory_space<vmem>>, %arg14: memref<18x18x16xf32, #tpu.memory_space<vmem>>, %arg15: memref<10x10x16xf32, #tpu.memory_space<vmem>>) attributes {dimension_semantics = [#tpu.dimension_semantics<parallel>], iteration_bounds = array<i64: 2>, scalar_prefetch = 0 : i64, scratch_operands = 3 : i64, tpu.core_type = #tpu.core_type<tc>, window_params = [{transform_indices = @transform_0, window_bounds = array<i64: 1, 16, 16, 4>}, {pipeline_mode = #tpu.pipeline_mode<synchronous>, transform_indices = @transform_1, window_bounds = array<i64: 36, 16>}, {pipeline_mode = #tpu.pipeline_mode<synchronous>, transform_indices = @transform_2, window_bounds = array<i64: 1, 16>}, {pipeline_mode = #tpu.pipeline_mode<synchronous>, transform_indices = @transform_3, window_bounds = array<i64: 144, 16>}, {pipeline_mode = #tpu.pipeline_mode<synchronous>, transform_indices = @transform_4, window_bounds = array<i64: 1, 16>}, {pipeline_mode = #tpu.pipeline_mode<synchronous>, transform_indices = @transform_5, window_bounds = array<i64: 144, 16>}, {pipeline_mode = #tpu.pipeline_mode<synchronous>, transform_indices = @transform_6, window_bounds = array<i64: 1, 16>}, {pipeline_mode = #tpu.pipeline_mode<synchronous>, transform_indices = @transform_7, window_bounds = array<i64: 144, 16>}, {pipeline_mode = #tpu.pipeline_mode<synchronous>, transform_indices = @transform_8, window_bounds = array<i64: 1, 16>}, {pipeline_mode = #tpu.pipeline_mode<synchronous>, transform_indices = @transform_9, window_bounds = array<i64: 144, 16>}, {pipeline_mode = #tpu.pipeline_mode<synchronous>, transform_indices = @transform_10, window_bounds = array<i64: 1, 16>}, {transform_indices = @transform_11, window_bounds = array<i64: 1, 8, 128>}]} {
    %cst = arith.constant 0.000000e+00 : f32
    %0 = vector.broadcast %cst : f32 to vector<18x18x4xf32>
    %c0 = arith.constant 0 : index
    %c0_0 = arith.constant 0 : index
    %c0_1 = arith.constant 0 : index
    %1 = vector.load %arg13[%c0, %c0_0, %c0_1] : memref<18x18x4xf32, #tpu.memory_space<vmem>>, vector<18x18x4xf32>
    tpu.vector_store %arg13[%c0, %c0_0, %c0_1], %0 {strides = array<i32>} : memref<18x18x4xf32, #tpu.memory_space<vmem>>, vector<18x18x4xf32>,
    %c0_2 = arith.constant 0 : index
    %c0_3 = arith.constant 0 : index
    %c0_4 = arith.constant 0 : index
    %c0_5 = arith.constant 0 : index
    %2 = vector.load %arg1[%c0_2, %c0_3, %c0_4, %c0_5] : memref<1x16x16x4xf32, #tpu.memory_space<vmem>>, vector<1x16x16x4xf32>
    %3 = vector.shape_cast %2 : vector<1x16x16x4xf32> to vector<16x16x4xf32>
    %c1 = arith.constant 1 : index
    %c1_6 = arith.constant 1 : index
    %c0_7 = arith.constant 0 : index
    %4 = vector.load %arg13[%c1, %c1_6, %c0_7] : memref<18x18x4xf32, #tpu.memory_space<vmem>>, vector<16x16x4xf32>
    tpu.vector_store %arg13[%c1, %c1_6, %c0_7], %3 {strides = array<i32>} : memref<18x18x4xf32, #tpu.memory_space<vmem>>, vector<16x16x4xf32>,
    %c0_8 = arith.constant 0 : index
    %c0_9 = arith.constant 0 : index
    %5 = vector.load %arg2[%c0_8, %c0_9] : memref<36x16xf32, #tpu.memory_space<vmem>>, vector<36x16xf32>
    %c0_10 = arith.constant 0 : index
    %c0_11 = arith.constant 0 : index
    %6 = vector.load %arg3[%c0_10, %c0_11] : memref<1x16xf32, #tpu.memory_space<vmem>>, vector<1x16xf32>
    %c0_12 = arith.constant 0 : index
    %c0_13 = arith.constant 0 : index
    %c0_14 = arith.constant 0 : index
    %7 = vector.load %arg13[%c0_12, %c0_13, %c0_14] : memref<18x18x4xf32, #tpu.memory_space<vmem>>, vector<16x16x4xf32>
    %c0_15 = arith.constant 0 : index
    %c1_16 = arith.constant 1 : index
    %c0_17 = arith.constant 0 : index
    %8 = vector.load %arg13[%c0_15, %c1_16, %c0_17] : memref<18x18x4xf32, #tpu.memory_space<vmem>>, vector<16x16x4xf32>
    %c0_18 = arith.constant 0 : index
    %c2 = arith.constant 2 : index
    %c0_19 = arith.constant 0 : index
    %9 = vector.load %arg13[%c0_18, %c2, %c0_19] : memref<18x18x4xf32, #tpu.memory_space<vmem>>, vector<16x16x4xf32>
    %c1_20 = arith.constant 1 : index
    %c0_21 = arith.constant 0 : index
    %c0_22 = arith.constant 0 : index
    %10 = vector.load %arg13[%c1_20, %c0_21, %c0_22] : memref<18x18x4xf32, #tpu.memory_space<vmem>>, vector<16x16x4xf32>
    %c1_23 = arith.constant 1 : index
    %c1_24 = arith.constant 1 : index
    %c0_25 = arith.constant 0 : index
    %11 = vector.load %arg13[%c1_23, %c1_24, %c0_25] : memref<18x18x4xf32, #tpu.memory_space<vmem>>, vector<16x16x4xf32>
    %c1_26 = arith.constant 1 : index
    %c2_27 = arith.constant 2 : index
    %c0_28 = arith.constant 0 : index
    %12 = vector.load %arg13[%c1_26, %c2_27, %c0_28] : memref<18x18x4xf32, #tpu.memory_space<vmem>>, vector<16x16x4xf32>
    %c2_29 = arith.constant 2 : index
    %c0_30 = arith.constant 0 : index
    %c0_31 = arith.constant 0 : index
    %13 = vector.load %arg13[%c2_29, %c0_30, %c0_31] : memref<18x18x4xf32, #tpu.memory_space<vmem>>, vector<16x16x4xf32>
    %c2_32 = arith.constant 2 : index
    %c1_33 = arith.constant 1 : index
    %c0_34 = arith.constant 0 : index
    %14 = vector.load %arg13[%c2_32, %c1_33, %c0_34] : memref<18x18x4xf32, #tpu.memory_space<vmem>>, vector<16x16x4xf32>
    %c2_35 = arith.constant 2 : index
    %c2_36 = arith.constant 2 : index
    %c0_37 = arith.constant 0 : index
    %15 = vector.load %arg13[%c2_35, %c2_36, %c0_37] : memref<18x18x4xf32, #tpu.memory_space<vmem>>, vector<16x16x4xf32>
    %16 = tpu.concatenate %7, %8, %9, %10, %11, %12, %13, %14, %15 in 2 : vector<16x16x4xf32>, vector<16x16x4xf32>, vector<16x16x4xf32>, vector<16x16x4xf32>, vector<16x16x4xf32>, vector<16x16x4xf32>, vector<16x16x4xf32>, vector<16x16x4xf32>, vector<16x16x4xf32> -> vector<16x16x36xf32>
    %17 = vector.shape_cast %16 : vector<16x16x36xf32> to vector<256x36xf32>
    %cst_38 = arith.constant dense<0.000000e+00> : vector<256x16xf32>
    %18 = tpu.matmul %17, %5, %cst_38 {dimension_numbers = #tpu.dot_dimension_numbers<[1], [0], [0], [1], [0, 0, 1, 1], [], []>} : vector<256x36xf32>, vector<36x16xf32>, vector<256x16xf32> -> vector<256x16xf32>
    %19 = vector.broadcast %6 : vector<1x16xf32> to vector<256x16xf32>
    %20 = arith.addf %18, %19 : vector<256x16xf32>
    %21 = vector.shape_cast %20 : vector<256x16xf32> to vector<16x16x16xf32>
    %cst_39 = arith.constant 0xFF800000 : f32
    %22 = vector.broadcast %cst_39 : f32 to vector<18x18x16xf32>
    %c0_40 = arith.constant 0 : index
    %c0_41 = arith.constant 0 : index
    %c0_42 = arith.constant 0 : index
    %23 = vector.load %arg14[%c0_40, %c0_41, %c0_42] : memref<18x18x16xf32, #tpu.memory_space<vmem>>, vector<18x18x16xf32>
    tpu.vector_store %arg14[%c0_40, %c0_41, %c0_42], %22 {strides = array<i32>} : memref<18x18x16xf32, #tpu.memory_space<vmem>>, vector<18x18x16xf32>,
    %c1_43 = arith.constant 1 : index
    %c1_44 = arith.constant 1 : index
    %c0_45 = arith.constant 0 : index
    %24 = vector.load %arg14[%c1_43, %c1_44, %c0_45] : memref<18x18x16xf32, #tpu.memory_space<vmem>>, vector<16x16x16xf32>
    tpu.vector_store %arg14[%c1_43, %c1_44, %c0_45], %21 {strides = array<i32>} : memref<18x18x16xf32, #tpu.memory_space<vmem>>, vector<16x16x16xf32>,
    %c0_46 = arith.constant 0 : index
    %c0_47 = arith.constant 0 : index
    %c0_48 = arith.constant 0 : index
    %25 = vector.load %arg14[%c0_46, %c0_47, %c0_48] : memref<18x18x16xf32, #tpu.memory_space<vmem>>, vector<16x16x16xf32>
    %c0_49 = arith.constant 0 : index
    %c1_50 = arith.constant 1 : index
    %c0_51 = arith.constant 0 : index
    %26 = vector.load %arg14[%c0_49, %c1_50, %c0_51] : memref<18x18x16xf32, #tpu.memory_space<vmem>>, vector<16x16x16xf32>
    %27 = arith.maximumf %25, %26 : vector<16x16x16xf32>
    %c0_52 = arith.constant 0 : index
    %c2_53 = arith.constant 2 : index
    %c0_54 = arith.constant 0 : index
    %28 = vector.load %arg14[%c0_52, %c2_53, %c0_54] : memref<18x18x16xf32, #tpu.memory_space<vmem>>, vector<16x16x16xf32>
    %29 = arith.maximumf %27, %28 : vector<16x16x16xf32>
    %c1_55 = arith.constant 1 : index
    %c0_56 = arith.constant 0 : index
    %c0_57 = arith.constant 0 : index
    %30 = vector.load %arg14[%c1_55, %c0_56, %c0_57] : memref<18x18x16xf32, #tpu.memory_space<vmem>>, vector<16x16x16xf32>
    %31 = arith.maximumf %29, %30 : vector<16x16x16xf32>
    %c1_58 = arith.constant 1 : index
    %c1_59 = arith.constant 1 : index
    %c0_60 = arith.constant 0 : index
    %32 = vector.load %arg14[%c1_58, %c1_59, %c0_60] : memref<18x18x16xf32, #tpu.memory_space<vmem>>, vector<16x16x16xf32>
    %33 = arith.maximumf %31, %32 : vector<16x16x16xf32>
    %c1_61 = arith.constant 1 : index
    %c2_62 = arith.constant 2 : index
    %c0_63 = arith.constant 0 : index
    %34 = vector.load %arg14[%c1_61, %c2_62, %c0_63] : memref<18x18x16xf32, #tpu.memory_space<vmem>>, vector<16x16x16xf32>
    %35 = arith.maximumf %33, %34 : vector<16x16x16xf32>
    %c2_64 = arith.constant 2 : index
    %c0_65 = arith.constant 0 : index
    %c0_66 = arith.constant 0 : index
    %36 = vector.load %arg14[%c2_64, %c0_65, %c0_66] : memref<18x18x16xf32, #tpu.memory_space<vmem>>, vector<16x16x16xf32>
    %37 = arith.maximumf %35, %36 : vector<16x16x16xf32>
    %c2_67 = arith.constant 2 : index
    %c1_68 = arith.constant 1 : index
    %c0_69 = arith.constant 0 : index
    %38 = vector.load %arg14[%c2_67, %c1_68, %c0_69] : memref<18x18x16xf32, #tpu.memory_space<vmem>>, vector<16x16x16xf32>
    %39 = arith.maximumf %37, %38 : vector<16x16x16xf32>
    %c2_70 = arith.constant 2 : index
    %c2_71 = arith.constant 2 : index
    %c0_72 = arith.constant 0 : index
    %40 = vector.load %arg14[%c2_70, %c2_71, %c0_72] : memref<18x18x16xf32, #tpu.memory_space<vmem>>, vector<16x16x16xf32>
    %41 = arith.maximumf %39, %40 : vector<16x16x16xf32>
    %42 = vector.shape_cast %41 : vector<16x16x16xf32> to vector<8x2x256xf32>
    %43 = vector.extract_strided_slice %42 {offsets = [0, 0, 0], sizes = [8, 1, 256], strides = [1, 1, 1]} : vector<8x2x256xf32> to vector<8x1x256xf32>
    %44 = vector.shape_cast %43 : vector<8x1x256xf32> to vector<8x256xf32>
    %45 = vector.shape_cast %44 : vector<8x256xf32> to vector<8x8x32xf32>
    %46 = vector.extract_strided_slice %45 {offsets = [0, 0, 0], sizes = [8, 8, 16], strides = [1, 1, 1]} : vector<8x8x32xf32> to vector<8x8x16xf32>
    %cst_73 = arith.constant 0.000000e+00 : f32
    %47 = vector.broadcast %cst_73 : f32 to vector<10x10x16xf32>
    %c0_74 = arith.constant 0 : index
    %c0_75 = arith.constant 0 : index
    %c0_76 = arith.constant 0 : index
    %48 = vector.load %arg15[%c0_74, %c0_75, %c0_76] : memref<10x10x16xf32, #tpu.memory_space<vmem>>, vector<10x10x16xf32>
    tpu.vector_store %arg15[%c0_74, %c0_75, %c0_76], %47 {strides = array<i32>} : memref<10x10x16xf32, #tpu.memory_space<vmem>>, vector<10x10x16xf32>,
    %c0_77 = arith.constant 0 : index
    %c0_78 = arith.constant 0 : index
    %49 = vector.load %arg4[%c0_77, %c0_78] : memref<144x16xf32, #tpu.memory_space<vmem>>, vector<144x16xf32>
    %c0_79 = arith.constant 0 : index
    %c0_80 = arith.constant 0 : index
    %50 = vector.load %arg5[%c0_79, %c0_80] : memref<1x16xf32, #tpu.memory_space<vmem>>, vector<1x16xf32>
    %c0_81 = arith.constant 0 : index
    %c0_82 = arith.constant 0 : index
    %51 = vector.load %arg6[%c0_81, %c0_82] : memref<144x16xf32, #tpu.memory_space<vmem>>, vector<144x16xf32>
    %c0_83 = arith.constant 0 : index
    %c0_84 = arith.constant 0 : index
    %52 = vector.load %arg7[%c0_83, %c0_84] : memref<1x16xf32, #tpu.memory_space<vmem>>, vector<1x16xf32>
    %cst_85 = arith.constant 0.000000e+00 : f32
    %53 = vector.broadcast %cst_85 : f32 to vector<8x8x16xf32>
    %54 = arith.maximumf %46, %53 : vector<8x8x16xf32>
    %c1_86 = arith.constant 1 : index
    %c1_87 = arith.constant 1 : index
    %c0_88 = arith.constant 0 : index
    %55 = vector.load %arg15[%c1_86, %c1_87, %c0_88] : memref<10x10x16xf32, #tpu.memory_space<vmem>>, vector<8x8x16xf32>
    tpu.vector_store %arg15[%c1_86, %c1_87, %c0_88], %54 {strides = array<i32>} : memref<10x10x16xf32, #tpu.memory_space<vmem>>, vector<8x8x16xf32>,
    %c0_89 = arith.constant 0 : index
    %c0_90 = arith.constant 0 : index
    %c0_91 = arith.constant 0 : index
    %56 = vector.load %arg15[%c0_89, %c0_90, %c0_91] : memref<10x10x16xf32, #tpu.memory_space<vmem>>, vector<8x8x16xf32>
    %c0_92 = arith.constant 0 : index
    %c1_93 = arith.constant 1 : index
    %c0_94 = arith.constant 0 : index
    %57 = vector.load %arg15[%c0_92, %c1_93, %c0_94] : memref<10x10x16xf32, #tpu.memory_space<vmem>>, vector<8x8x16xf32>
    %c0_95 = arith.constant 0 : index
    %c2_96 = arith.constant 2 : index
    %c0_97 = arith.constant 0 : index
    %58 = vector.load %arg15[%c0_95, %c2_96, %c0_97] : memref<10x10x16xf32, #tpu.memory_space<vmem>>, vector<8x8x16xf32>
    %c1_98 = arith.constant 1 : index
    %c0_99 = arith.constant 0 : index
    %c0_100 = arith.constant 0 : index
    %59 = vector.load %arg15[%c1_98, %c0_99, %c0_100] : memref<10x10x16xf32, #tpu.memory_space<vmem>>, vector<8x8x16xf32>
    %c1_101 = arith.constant 1 : index
    %c1_102 = arith.constant 1 : index
    %c0_103 = arith.constant 0 : index
    %60 = vector.load %arg15[%c1_101, %c1_102, %c0_103] : memref<10x10x16xf32, #tpu.memory_space<vmem>>, vector<8x8x16xf32>
    %c1_104 = arith.constant 1 : index
    %c2_105 = arith.constant 2 : index
    %c0_106 = arith.constant 0 : index
    %61 = vector.load %arg15[%c1_104, %c2_105, %c0_106] : memref<10x10x16xf32, #tpu.memory_space<vmem>>, vector<8x8x16xf32>
    %c2_107 = arith.constant 2 : index
    %c0_108 = arith.constant 0 : index
    %c0_109 = arith.constant 0 : index
    %62 = vector.load %arg15[%c2_107, %c0_108, %c0_109] : memref<10x10x16xf32, #tpu.memory_space<vmem>>, vector<8x8x16xf32>
    %c2_110 = arith.constant 2 : index
    %c1_111 = arith.constant 1 : index
    %c0_112 = arith.constant 0 : index
    %63 = vector.load %arg15[%c2_110, %c1_111, %c0_112] : memref<10x10x16xf32, #tpu.memory_space<vmem>>, vector<8x8x16xf32>
    %c2_113 = arith.constant 2 : index
    %c2_114 = arith.constant 2 : index
    %c0_115 = arith.constant 0 : index
    %64 = vector.load %arg15[%c2_113, %c2_114, %c0_115] : memref<10x10x16xf32, #tpu.memory_space<vmem>>, vector<8x8x16xf32>
    %65 = tpu.concatenate %56, %57, %58, %59, %60, %61, %62, %63, %64 in 2 : vector<8x8x16xf32>, vector<8x8x16xf32>, vector<8x8x16xf32>, vector<8x8x16xf32>, vector<8x8x16xf32>, vector<8x8x16xf32>, vector<8x8x16xf32>, vector<8x8x16xf32>, vector<8x8x16xf32> -> vector<8x8x144xf32>
    %66 = vector.shape_cast %65 : vector<8x8x144xf32> to vector<64x144xf32>
    %cst_116 = arith.constant dense<0.000000e+00> : vector<64x16xf32>
    %67 = tpu.matmul %66, %49, %cst_116 {dimension_numbers = #tpu.dot_dimension_numbers<[1], [0], [0], [1], [0, 0, 1, 1], [], []>} : vector<64x144xf32>, vector<144x16xf32>, vector<64x16xf32> -> vector<64x16xf32>
    %68 = vector.broadcast %50 : vector<1x16xf32> to vector<64x16xf32>
    %69 = arith.addf %67, %68 : vector<64x16xf32>
    %70 = vector.shape_cast %69 : vector<64x16xf32> to vector<8x8x16xf32>
    %cst_117 = arith.constant 0.000000e+00 : f32
    %71 = vector.broadcast %cst_117 : f32 to vector<8x8x16xf32>
    %72 = arith.maximumf %70, %71 : vector<8x8x16xf32>
    %c1_118 = arith.constant 1 : index
    %c1_119 = arith.constant 1 : index
    %c0_120 = arith.constant 0 : index
    %73 = vector.load %arg15[%c1_118, %c1_119, %c0_120] : memref<10x10x16xf32, #tpu.memory_space<vmem>>, vector<8x8x16xf32>
    tpu.vector_store %arg15[%c1_118, %c1_119, %c0_120], %72 {strides = array<i32>} : memref<10x10x16xf32, #tpu.memory_space<vmem>>, vector<8x8x16xf32>,
    %c0_121 = arith.constant 0 : index
    %c0_122 = arith.constant 0 : index
    %c0_123 = arith.constant 0 : index
    %74 = vector.load %arg15[%c0_121, %c0_122, %c0_123] : memref<10x10x16xf32, #tpu.memory_space<vmem>>, vector<8x8x16xf32>
    %c0_124 = arith.constant 0 : index
    %c1_125 = arith.constant 1 : index
    %c0_126 = arith.constant 0 : index
    %75 = vector.load %arg15[%c0_124, %c1_125, %c0_126] : memref<10x10x16xf32, #tpu.memory_space<vmem>>, vector<8x8x16xf32>
    %c0_127 = arith.constant 0 : index
    %c2_128 = arith.constant 2 : index
    %c0_129 = arith.constant 0 : index
    %76 = vector.load %arg15[%c0_127, %c2_128, %c0_129] : memref<10x10x16xf32, #tpu.memory_space<vmem>>, vector<8x8x16xf32>
    %c1_130 = arith.constant 1 : index
    %c0_131 = arith.constant 0 : index
    %c0_132 = arith.constant 0 : index
    %77 = vector.load %arg15[%c1_130, %c0_131, %c0_132] : memref<10x10x16xf32, #tpu.memory_space<vmem>>, vector<8x8x16xf32>
    %c1_133 = arith.constant 1 : index
    %c1_134 = arith.constant 1 : index
    %c0_135 = arith.constant 0 : index
    %78 = vector.load %arg15[%c1_133, %c1_134, %c0_135] : memref<10x10x16xf32, #tpu.memory_space<vmem>>, vector<8x8x16xf32>
    %c1_136 = arith.constant 1 : index
    %c2_137 = arith.constant 2 : index
    %c0_138 = arith.constant 0 : index
    %79 = vector.load %arg15[%c1_136, %c2_137, %c0_138] : memref<10x10x16xf32, #tpu.memory_space<vmem>>, vector<8x8x16xf32>
    %c2_139 = arith.constant 2 : index
    %c0_140 = arith.constant 0 : index
    %c0_141 = arith.constant 0 : index
    %80 = vector.load %arg15[%c2_139, %c0_140, %c0_141] : memref<10x10x16xf32, #tpu.memory_space<vmem>>, vector<8x8x16xf32>
    %c2_142 = arith.constant 2 : index
    %c1_143 = arith.constant 1 : index
    %c0_144 = arith.constant 0 : index
    %81 = vector.load %arg15[%c2_142, %c1_143, %c0_144] : memref<10x10x16xf32, #tpu.memory_space<vmem>>, vector<8x8x16xf32>
    %c2_145 = arith.constant 2 : index
    %c2_146 = arith.constant 2 : index
    %c0_147 = arith.constant 0 : index
    %82 = vector.load %arg15[%c2_145, %c2_146, %c0_147] : memref<10x10x16xf32, #tpu.memory_space<vmem>>, vector<8x8x16xf32>
    %83 = tpu.concatenate %74, %75, %76, %77, %78, %79, %80, %81, %82 in 2 : vector<8x8x16xf32>, vector<8x8x16xf32>, vector<8x8x16xf32>, vector<8x8x16xf32>, vector<8x8x16xf32>, vector<8x8x16xf32>, vector<8x8x16xf32>, vector<8x8x16xf32>, vector<8x8x16xf32> -> vector<8x8x144xf32>
    %84 = vector.shape_cast %83 : vector<8x8x144xf32> to vector<64x144xf32>
    %cst_148 = arith.constant dense<0.000000e+00> : vector<64x16xf32>
    %85 = tpu.matmul %84, %51, %cst_148 {dimension_numbers = #tpu.dot_dimension_numbers<[1], [0], [0], [1], [0, 0, 1, 1], [], []>} : vector<64x144xf32>, vector<144x16xf32>, vector<64x16xf32> -> vector<64x16xf32>
    %86 = vector.broadcast %52 : vector<1x16xf32> to vector<64x16xf32>
    %87 = arith.addf %85, %86 : vector<64x16xf32>
    %88 = vector.shape_cast %87 : vector<64x16xf32> to vector<8x8x16xf32>
    %89 = arith.addf %88, %46 : vector<8x8x16xf32>
    %c0_149 = arith.constant 0 : index
    %c0_150 = arith.constant 0 : index
    %90 = vector.load %arg8[%c0_149, %c0_150] : memref<144x16xf32, #tpu.memory_space<vmem>>, vector<144x16xf32>
    %c0_151 = arith.constant 0 : index
    %c0_152 = arith.constant 0 : index
    %91 = vector.load %arg9[%c0_151, %c0_152] : memref<1x16xf32, #tpu.memory_space<vmem>>, vector<1x16xf32>
    %c0_153 = arith.constant 0 : index
    %c0_154 = arith.constant 0 : index
    %92 = vector.load %arg10[%c0_153, %c0_154] : memref<144x16xf32, #tpu.memory_space<vmem>>, vector<144x16xf32>
    %c0_155 = arith.constant 0 : index
    %c0_156 = arith.constant 0 : index
    %93 = vector.load %arg11[%c0_155, %c0_156] : memref<1x16xf32, #tpu.memory_space<vmem>>, vector<1x16xf32>
    %cst_157 = arith.constant 0.000000e+00 : f32
    %94 = vector.broadcast %cst_157 : f32 to vector<8x8x16xf32>
    %95 = arith.maximumf %89, %94 : vector<8x8x16xf32>
    %c1_158 = arith.constant 1 : index
    %c1_159 = arith.constant 1 : index
    %c0_160 = arith.constant 0 : index
    %96 = vector.load %arg15[%c1_158, %c1_159, %c0_160] : memref<10x10x16xf32, #tpu.memory_space<vmem>>, vector<8x8x16xf32>
    tpu.vector_store %arg15[%c1_158, %c1_159, %c0_160], %95 {strides = array<i32>} : memref<10x10x16xf32, #tpu.memory_space<vmem>>, vector<8x8x16xf32>,
    %c0_161 = arith.constant 0 : index
    %c0_162 = arith.constant 0 : index
    %c0_163 = arith.constant 0 : index
    %97 = vector.load %arg15[%c0_161, %c0_162, %c0_163] : memref<10x10x16xf32, #tpu.memory_space<vmem>>, vector<8x8x16xf32>
    %c0_164 = arith.constant 0 : index
    %c1_165 = arith.constant 1 : index
    %c0_166 = arith.constant 0 : index
    %98 = vector.load %arg15[%c0_164, %c1_165, %c0_166] : memref<10x10x16xf32, #tpu.memory_space<vmem>>, vector<8x8x16xf32>
    %c0_167 = arith.constant 0 : index
    %c2_168 = arith.constant 2 : index
    %c0_169 = arith.constant 0 : index
    %99 = vector.load %arg15[%c0_167, %c2_168, %c0_169] : memref<10x10x16xf32, #tpu.memory_space<vmem>>, vector<8x8x16xf32>
    %c1_170 = arith.constant 1 : index
    %c0_171 = arith.constant 0 : index
    %c0_172 = arith.constant 0 : index
    %100 = vector.load %arg15[%c1_170, %c0_171, %c0_172] : memref<10x10x16xf32, #tpu.memory_space<vmem>>, vector<8x8x16xf32>
    %c1_173 = arith.constant 1 : index
    %c1_174 = arith.constant 1 : index
    %c0_175 = arith.constant 0 : index
    %101 = vector.load %arg15[%c1_173, %c1_174, %c0_175] : memref<10x10x16xf32, #tpu.memory_space<vmem>>, vector<8x8x16xf32>
    %c1_176 = arith.constant 1 : index
    %c2_177 = arith.constant 2 : index
    %c0_178 = arith.constant 0 : index
    %102 = vector.load %arg15[%c1_176, %c2_177, %c0_178] : memref<10x10x16xf32, #tpu.memory_space<vmem>>, vector<8x8x16xf32>
    %c2_179 = arith.constant 2 : index
    %c0_180 = arith.constant 0 : index
    %c0_181 = arith.constant 0 : index
    %103 = vector.load %arg15[%c2_179, %c0_180, %c0_181] : memref<10x10x16xf32, #tpu.memory_space<vmem>>, vector<8x8x16xf32>
    %c2_182 = arith.constant 2 : index
    %c1_183 = arith.constant 1 : index
    %c0_184 = arith.constant 0 : index
    %104 = vector.load %arg15[%c2_182, %c1_183, %c0_184] : memref<10x10x16xf32, #tpu.memory_space<vmem>>, vector<8x8x16xf32>
    %c2_185 = arith.constant 2 : index
    %c2_186 = arith.constant 2 : index
    %c0_187 = arith.constant 0 : index
    %105 = vector.load %arg15[%c2_185, %c2_186, %c0_187] : memref<10x10x16xf32, #tpu.memory_space<vmem>>, vector<8x8x16xf32>
    %106 = tpu.concatenate %97, %98, %99, %100, %101, %102, %103, %104, %105 in 2 : vector<8x8x16xf32>, vector<8x8x16xf32>, vector<8x8x16xf32>, vector<8x8x16xf32>, vector<8x8x16xf32>, vector<8x8x16xf32>, vector<8x8x16xf32>, vector<8x8x16xf32>, vector<8x8x16xf32> -> vector<8x8x144xf32>
    %107 = vector.shape_cast %106 : vector<8x8x144xf32> to vector<64x144xf32>
    %cst_188 = arith.constant dense<0.000000e+00> : vector<64x16xf32>
    %108 = tpu.matmul %107, %90, %cst_188 {dimension_numbers = #tpu.dot_dimension_numbers<[1], [0], [0], [1], [0, 0, 1, 1], [], []>} : vector<64x144xf32>, vector<144x16xf32>, vector<64x16xf32> -> vector<64x16xf32>
    %109 = vector.broadcast %91 : vector<1x16xf32> to vector<64x16xf32>
    %110 = arith.addf %108, %109 : vector<64x16xf32>
    %111 = vector.shape_cast %110 : vector<64x16xf32> to vector<8x8x16xf32>
    %cst_189 = arith.constant 0.000000e+00 : f32
    %112 = vector.broadcast %cst_189 : f32 to vector<8x8x16xf32>
    %113 = arith.maximumf %111, %112 : vector<8x8x16xf32>
    %c1_190 = arith.constant 1 : index
    %c1_191 = arith.constant 1 : index
    %c0_192 = arith.constant 0 : index
    %114 = vector.load %arg15[%c1_190, %c1_191, %c0_192] : memref<10x10x16xf32, #tpu.memory_space<vmem>>, vector<8x8x16xf32>
    tpu.vector_store %arg15[%c1_190, %c1_191, %c0_192], %113 {strides = array<i32>} : memref<10x10x16xf32, #tpu.memory_space<vmem>>, vector<8x8x16xf32>,
    %c0_193 = arith.constant 0 : index
    %c0_194 = arith.constant 0 : index
    %c0_195 = arith.constant 0 : index
    %115 = vector.load %arg15[%c0_193, %c0_194, %c0_195] : memref<10x10x16xf32, #tpu.memory_space<vmem>>, vector<8x8x16xf32>
    %c0_196 = arith.constant 0 : index
    %c1_197 = arith.constant 1 : index
    %c0_198 = arith.constant 0 : index
    %116 = vector.load %arg15[%c0_196, %c1_197, %c0_198] : memref<10x10x16xf32, #tpu.memory_space<vmem>>, vector<8x8x16xf32>
    %c0_199 = arith.constant 0 : index
    %c2_200 = arith.constant 2 : index
    %c0_201 = arith.constant 0 : index
    %117 = vector.load %arg15[%c0_199, %c2_200, %c0_201] : memref<10x10x16xf32, #tpu.memory_space<vmem>>, vector<8x8x16xf32>
    %c1_202 = arith.constant 1 : index
    %c0_203 = arith.constant 0 : index
    %c0_204 = arith.constant 0 : index
    %118 = vector.load %arg15[%c1_202, %c0_203, %c0_204] : memref<10x10x16xf32, #tpu.memory_space<vmem>>, vector<8x8x16xf32>
    %c1_205 = arith.constant 1 : index
    %c1_206 = arith.constant 1 : index
    %c0_207 = arith.constant 0 : index
    %119 = vector.load %arg15[%c1_205, %c1_206, %c0_207] : memref<10x10x16xf32, #tpu.memory_space<vmem>>, vector<8x8x16xf32>
    %c1_208 = arith.constant 1 : index
    %c2_209 = arith.constant 2 : index
    %c0_210 = arith.constant 0 : index
    %120 = vector.load %arg15[%c1_208, %c2_209, %c0_210] : memref<10x10x16xf32, #tpu.memory_space<vmem>>, vector<8x8x16xf32>
    %c2_211 = arith.constant 2 : index
    %c0_212 = arith.constant 0 : index
    %c0_213 = arith.constant 0 : index
    %121 = vector.load %arg15[%c2_211, %c0_212, %c0_213] : memref<10x10x16xf32, #tpu.memory_space<vmem>>, vector<8x8x16xf32>
    %c2_214 = arith.constant 2 : index
    %c1_215 = arith.constant 1 : index
    %c0_216 = arith.constant 0 : index
    %122 = vector.load %arg15[%c2_214, %c1_215, %c0_216] : memref<10x10x16xf32, #tpu.memory_space<vmem>>, vector<8x8x16xf32>
    %c2_217 = arith.constant 2 : index
    %c2_218 = arith.constant 2 : index
    %c0_219 = arith.constant 0 : index
    %123 = vector.load %arg15[%c2_217, %c2_218, %c0_219] : memref<10x10x16xf32, #tpu.memory_space<vmem>>, vector<8x8x16xf32>
    %124 = tpu.concatenate %115, %116, %117, %118, %119, %120, %121, %122, %123 in 2 : vector<8x8x16xf32>, vector<8x8x16xf32>, vector<8x8x16xf32>, vector<8x8x16xf32>, vector<8x8x16xf32>, vector<8x8x16xf32>, vector<8x8x16xf32>, vector<8x8x16xf32>, vector<8x8x16xf32> -> vector<8x8x144xf32>
    %125 = vector.shape_cast %124 : vector<8x8x144xf32> to vector<64x144xf32>
    %cst_220 = arith.constant dense<0.000000e+00> : vector<64x16xf32>
    %126 = tpu.matmul %125, %92, %cst_220 {dimension_numbers = #tpu.dot_dimension_numbers<[1], [0], [0], [1], [0, 0, 1, 1], [], []>} : vector<64x144xf32>, vector<144x16xf32>, vector<64x16xf32> -> vector<64x16xf32>
    %127 = vector.broadcast %93 : vector<1x16xf32> to vector<64x16xf32>
    %128 = arith.addf %126, %127 : vector<64x16xf32>
    %129 = vector.shape_cast %128 : vector<64x16xf32> to vector<8x8x16xf32>
    %130 = arith.addf %129, %89 : vector<8x8x16xf32>
    %131 = vector.shape_cast %130 : vector<8x8x16xf32> to vector<1x8x128xf32>
    %c0_221 = arith.constant 0 : index
    %c0_222 = arith.constant 0 : index
    %c0_223 = arith.constant 0 : index
    %132 = vector.load %arg12[%c0_221, %c0_222, %c0_223] : memref<1x8x128xf32, #tpu.memory_space<vmem>>, vector<1x8x128xf32>
    tpu.vector_store %arg12[%c0_221, %c0_222, %c0_223], %131 {strides = array<i32>} : memref<1x8x128xf32, #tpu.memory_space<vmem>>, vector<1x8x128xf32>,
    return
  }
  func.func @transform_0(%arg0: i32) -> (i32, i32, i32, i32) {
    %c0_i32 = arith.constant 0 : i32
    %c0_i32_0 = arith.constant 0 : i32
    %c0_i32_1 = arith.constant 0 : i32
    %c0_i32_2 = arith.constant 0 : i32
    return %arg0, %c0_i32, %c0_i32_0, %c0_i32_1 : i32, i32, i32, i32
  }
  func.func @transform_1(%arg0: i32) -> (i32, i32) {
    %c0_i32 = arith.constant 0 : i32
    %c0_i32_0 = arith.constant 0 : i32
    %c0_i32_1 = arith.constant 0 : i32
    return %c0_i32, %c0_i32_0 : i32, i32
  }
  func.func @transform_2(%arg0: i32) -> (i32, i32) {
    %c0_i32 = arith.constant 0 : i32
    %c0_i32_0 = arith.constant 0 : i32
    %c0_i32_1 = arith.constant 0 : i32
    return %c0_i32, %c0_i32_0 : i32, i32
  }
  func.func @transform_3(%arg0: i32) -> (i32, i32) {
    %c0_i32 = arith.constant 0 : i32
    %c0_i32_0 = arith.constant 0 : i32
    %c0_i32_1 = arith.constant 0 : i32
    return %c0_i32, %c0_i32_0 : i32, i32
  }
  func.func @transform_4(%arg0: i32) -> (i32, i32) {
    %c0_i32 = arith.constant 0 : i32
    %c0_i32_0 = arith.constant 0 : i32
    %c0_i32_1 = arith.constant 0 : i32
    return %c0_i32, %c0_i32_0 : i32, i32
  }
  func.func @transform_5(%arg0: i32) -> (i32, i32) {
    %c0_i32 = arith.constant 0 : i32
    %c0_i32_0 = arith.constant 0 : i32
    %c0_i32_1 = arith.constant 0 : i32
    return %c0_i32, %c0_i32_0 : i32, i32
  }
  func.func @transform_6(%arg0: i32) -> (i32, i32) {
    %c0_i32 = arith.constant 0 : i32
    %c0_i32_0 = arith.constant 0 : i32
    %c0_i32_1 = arith.constant 0 : i32
    return %c0_i32, %c0_i32_0 : i32, i32
  }
  func.func @transform_7(%arg0: i32) -> (i32, i32) {
    %c0_i32 = arith.constant 0 : i32
    %c0_i32_0 = arith.constant 0 : i32
    %c0_i32_1 = arith.constant 0 : i32
    return %c0_i32, %c0_i32_0 : i32, i32
  }
  func.func @transform_8(%arg0: i32) -> (i32, i32) {
    %c0_i32 = arith.constant 0 : i32
    %c0_i32_0 = arith.constant 0 : i32
    %c0_i32_1 = arith.constant 0 : i32
    return %c0_i32, %c0_i32_0 : i32, i32
  }
  func.func @transform_9(%arg0: i32) -> (i32, i32) {
    %c0_i32 = arith.constant 0 : i32
    %c0_i32_0 = arith.constant 0 : i32
    %c0_i32_1 = arith.constant 0 : i32
    return %c0_i32, %c0_i32_0 : i32, i32
  }
  func.func @transform_10(%arg0: i32) -> (i32, i32) {
    %c0_i32 = arith.constant 0 : i32
    %c0_i32_0 = arith.constant 0 : i32
    %c0_i32_1 = arith.constant 0 : i32
    return %c0_i32, %c0_i32_0 : i32, i32
  }
  func.func @transform_11(%arg0: i32) -> (i32, i32, i32) {
    %c0_i32 = arith.constant 0 : i32
    %c0_i32_0 = arith.constant 0 : i32
    %c0_i32_1 = arith.constant 0 : i32
    return %arg0, %c0_i32, %c0_i32_0 : i32, i32, i32
  }
}

</mosaic_0001>

<bundles_post_ra>
// kernel: conv_sequence_custom.1
= control target key start
LH: loop header
LB: loop body
LE: loop exit
PB: predicated region body
PF: predicated region fallthrough
CT: control target
= control target key end

     0   :  { %s7764_s17 = smov 0   ;;  %s12095_s0 = inlined_call_operand.vmem [shape: f32[2,16,16,4], index: 0, kind: input, shape index: {}]   ;;  %s12096_s1 = inlined_call_operand.vmem [shape: f32[36,16], index: 1, kind: input, shape index: {}]   ;;  %s12097_s2 = inlined_call_operand.vmem [shape: f32[1,16], index: 2, kind: input, shape index: {}]   ;;  %s12098_s3 = inlined_call_operand.vmem [shape: f32[144,16], index: 3, kind: input, shape index: {}]   ;;  %s12099_s4 = inlined_call_operand.vmem [shape: f32[1,16], index: 4, kind: input, shape index: {}]   ;;  %s12100_s5 = inlined_call_operand.vmem [shape: f32[144,16], index: 5, kind: input, shape index: {}]   ;;  %s12101_s6 = inlined_call_operand.vmem [shape: f32[1,16], index: 6, kind: input, shape index: {}]   ;;  %s12102_s7 = inlined_call_operand.vmem [shape: f32[144,16], index: 7, kind: input, shape index: {}]   ;;  %s12103_s8 = inlined_call_operand.vmem [shape: f32[1,16], index: 8, kind: input, shape index: {}]   ;;  %s12104_s9 = inlined_call_operand.vmem [shape: f32[144,16], index: 9, kind: input, shape index: {}]   ;;  %s12105_s10 = inlined_call_operand.vmem [shape: f32[1,16], index: 10, kind: input, shape index: {}]   ;;  %s12106_s11 = inlined_call_operand.vmem [shape: f32[2,8,128], index: 11, kind: output, shape index: {}]  }
   0x1 LB: > { %s7023_s18 = sadd.s32 4294967295, %s7685_s17   ;;  %p7027_p0 = scmp.ge.s32.totalorder %s7685_s17, 1  ;;  %s7685_s17 = sphi %s7764_s17, %s21_s17  }
   0x2   : > { %p337_p1 = scmp.lt.s32.totalorder %s7685_s17, 3 }
   0x4   : > { %p338_p2 = pnand %p7027_p0, %p337_p1 }
   0x6   : > { %341 = sbr.rel (%p338_p2) target bundleno = 2933 (0xb75), region = 64 }
   0xb   : > { %vm385_vm0 = vcmask 31744   ;;  %v12107_v0 = vmov 0.0   ;;  %s7688_s19 = smov 4   ;;  %p376_p3 = scmp.lt.s32.totalorder %s7023_s18, 1  ;;  %vm388_vm1 = vcmask 25600   ;;  %vm1923_vm2 = vcmask 130048  }
   0xc   : > { %386 = vst.msk [vmem:[#allocation2] sm:$0xff] %vm385_vm0, %v12107_v0  ;;  %s7689_s24 = smov 8   ;;  %s7690_s25 = smov 12   ;;  %vm2188_vm3 = vcmask 1043456   ;;  %vm1857_vm4 = vcmask 64512   ;;  %vm1890_vm5 = vcmask 97280  }
   0xd   : > { %387 = vst.msk [vmem:[#allocation2 + $0x8] sm:$0xff] %vm385_vm0, %v12107_v0  ;;  %s12523_s18 = smov (!%p376_p3, %s7023_s18), 1  ;;  %s7691_s26 = smov 16   ;;  %vm1956_vm6 = vcmask 162816   ;;  %vm2022_vm7 = vcmask 228352   ;;  %vm1989_vm8 = vcmask 195584  }
   0xe   : > { %390 = vst.msk [vmem:[#allocation2 + $0x18] sm:$0xff] %vm385_vm0, %v12107_v0  ;;  %s7098_s20 = sshll.u32 %s12523_s18, 8  ;;  %s7692_s27 = smov 20   ;;  %vm2055_vm9 = vcmask 261120   ;;  %vm2091_vm10 = vcmask 293888   ;;  %vm2307_vm11 = vcmask 123904  }
   0xf   : > { %391 = vst.msk [vmem:[#allocation2 + $0x20] sm:$0xff] %vm385_vm0, %v12107_v0  ;;  %s7845_s23 = scalar_lea.vmem %s12095_s0, %s7098_s20  ;;  %s7693_s28 = smov 24   ;;  %vm2939_vm12 = vcmask 1047556   ;;  %vm4235_vm13 = vcmask 392192   ;;  %vm4244_vm14 = vcmask 523264   ;;  %vm4253_vm15 = vcmask 654336  }
  0x10   : > { %393 = vst.msk [vmem:[#allocation2 + $0x30] sm:$0xff] %vm385_vm0, %v12107_v0  ;;  %v443_v2 = vld [vmem:[%s7845_s23 + $0x10] sm:$0xff]  ;;  %v441_v3 = vld [vmem:[%s7845_s23] sm:$0xff]  ;;  %v444_v7 = vld [vmem:[%s7845_s23 + $0x18] sm:$0xff]  ;;  %s7694_s29 = smov 32   ;;  %s7695_s30 = smov 28  }
  0x11   : > { %394 = vst.msk [vmem:[#allocation2 + $0x38] sm:$0xff] %vm385_vm0, %v12107_v0  ;;  %v442_v8 = vld [vmem:[%s7845_s23 + $0x8] sm:$0xff]  ;;  %v445_v9 = vld [vmem:[%s7845_s23 + $0x20] sm:$0xff]  ;;  %v447_v10 = vld [vmem:[%s7845_s23 + $0x30] sm:$0xff]  ;;  %s7700_s12 = smov 64   ;;  %s7701_s13 = smov 80  }
  0x12   : > { %396 = vst.msk [vmem:[#allocation2 + $0x48] sm:$0xff] %vm385_vm0, %v12107_v0  ;;  %v446_v11 = vld [vmem:[%s7845_s23 + $0x28] sm:$0xff]  ;;  %v448_v12 = vld [vmem:[%s7845_s23 + $0x38] sm:$0xff]  ;;  %v449_v14 = vld [vmem:[%s7845_s23 + $0x40] sm:$0xff]  ;;  %s7702_s14 = smov 96   ;;  %s7703_s15 = smov 112  }
  0x13   : > { %397 = vst.msk [vmem:[#allocation2 + $0x50] sm:$0xff] %vm385_vm0, %v12107_v0  ;;  %v450_v13 = vld [vmem:[%s7845_s23 + $0x48] sm:$0xff]  ;;  %v451_v15 = vld [vmem:[%s7845_s23 + $0x50] sm:$0xff]  ;;  %v453_v16 = vld [vmem:[%s7845_s23 + $0x60] sm:$0xff] }
  0x14   : > { %v544_v1 = vld [vmem:[#allocation2 + $0x1] sm:$0xff]  ;;  %399 = vst.msk [vmem:[#allocation2 + $0x60] sm:$0xff] %vm385_vm0, %v12107_v0  ;;  %v452_v18 = vld [vmem:[%s7845_s23 + $0x58] sm:$0xff]  ;;  %v455_v23 = vld [vmem:[%s7845_s23 + $0x70] sm:$0xff] }
  0x15   : > { %833 = vrot.lane.b32.xlu0 %v544_v1, %s7688_s19  ;;  %400 = vst.msk [vmem:[#allocation2 + $0x68] sm:$0xff] %vm385_vm0, %v12107_v0  ;;  %v454_v20 = vld [vmem:[%s7845_s23 + $0x68] sm:$0xff]  ;;  %v456_v22 = vld [vmem:[%s7845_s23 + $0x78] sm:$0xff]  ;;  %v457_v24 = vld [vmem:[%s7845_s23 + $0x80] sm:$0xff] }
  0x16   : > { %402 = vst.msk [vmem:[#allocation2 + $0x78] sm:$0xff] %vm385_vm0, %v12107_v0  ;;  %v459_v25 = vld [vmem:[%s7845_s23 + $0x90] sm:$0xff]  ;;  %v458_v27 = vld [vmem:[%s7845_s23 + $0x88] sm:$0xff]  ;;  %v460_v29 = vld [vmem:[%s7845_s23 + $0x98] sm:$0xff] }
  0x17   : > { %403 = vst.msk [vmem:[#allocation2 + $0x80] sm:$0xff] %vm385_vm0, %v12107_v0  ;;  %v462_v31 = vld [vmem:[%s7845_s23 + $0xa8] sm:$0xff]  ;;  %v461_v32 = vld [vmem:[%s7845_s23 + $0xa0] sm:$0xff]  ;;  %v463_v33 = vld [vmem:[%s7845_s23 + $0xb0] sm:$0xff] }
  0x18   : > { %405 = vst.msk [vmem:[#allocation2 + $0x90] sm:$0xff] %vm385_vm0, %v12107_v0  ;;  %v465_v37 = vld [vmem:[%s7845_s23 + $0xc0] sm:$0xff]  ;;  %v464_v38 = vld [vmem:[%s7845_s23 + $0xb8] sm:$0xff]  ;;  %v466_v39 = vld [vmem:[%s7845_s23 + $0xc8] sm:$0xff] }
  0x19   : > { %406 = vst.msk [vmem:[#allocation2 + $0x98] sm:$0xff] %vm385_vm0, %v12107_v0  ;;  %v468_v43 = vld [vmem:[%s7845_s23 + $0xd8] sm:$0xff]  ;;  %v467_v44 = vld [vmem:[%s7845_s23 + $0xd0] sm:$0xff]  ;;  %v469_v45 = vld [vmem:[%s7845_s23 + $0xe0] sm:$0xff] }
  0x1a   : > { %408 = vst.msk [vmem:[#allocation2 + $0xa8] sm:$0xff] %vm385_vm0, %v12107_v0  ;;  %v470_v49 = vld [vmem:[%s7845_s23 + $0xe8] sm:$0xff] }
  0x1b   : > { %409 = vst.msk [vmem:[#allocation2 + $0xb0] sm:$0xff] %vm385_vm0, %v12107_v0  ;;  %v576_v62 = vld [vmem:[#allocation2 + $0x2] sm:$0xff] }
  0x1c   : > { %411 = vst.msk [vmem:[#allocation2 + $0xc0] sm:$0xff] %vm385_vm0, %v12107_v0 }
  0x1d   : > { %412 = vst.msk [vmem:[#allocation2 + $0xc8] sm:$0xff] %vm385_vm0, %v12107_v0 }
  0x1e   : > { %414 = vst.msk [vmem:[#allocation2 + $0xd8] sm:$0xff] %vm385_vm0, %v12107_v0 }
  0x1f   : > { %415 = vst.msk [vmem:[#allocation2 + $0xe0] sm:$0xff] %vm385_vm0, %v12107_v0 }
  0x20   : > { %417 = vst.msk [vmem:[#allocation2 + $0xf0] sm:$0xff] %vm385_vm0, %v12107_v0 }
  0x21   : > { %418 = vst.msk [vmem:[#allocation2 + $0xf8] sm:$0xff] %vm385_vm0, %v12107_v0 }
  0x22   : > { %420 = vst.msk [vmem:[#allocation2 + $0x108] sm:$0xff] %vm385_vm0, %v12107_v0 }
  0x23   : > { %421 = vst.msk [vmem:[#allocation2 + $0x110] sm:$0xff] %vm385_vm0, %v12107_v0 }
  0x24   : > { %423 = vst.msk [vmem:[#allocation2 + $0x120] sm:$0xff] %vm385_vm0, %v12107_v0 }
  0x25   : > { %424 = vst.msk [vmem:[#allocation2 + $0x128] sm:$0xff] %vm385_vm0, %v12107_v0 }
  0x26   : > { %426 = vst.msk [vmem:[#allocation2 + $0x138] sm:$0xff] %vm385_vm0, %v12107_v0 }
  0x27   : > { %427 = vst.msk [vmem:[#allocation2 + $0x140] sm:$0xff] %vm385_vm0, %v12107_v0 }
  0x28   : > { %429 = vst.msk [vmem:[#allocation2 + $0x150] sm:$0xff] %vm385_vm0, %v12107_v0 }
  0x29   : > { %430 = vst.msk [vmem:[#allocation2 + $0x158] sm:$0xff] %vm385_vm0, %v12107_v0 }
  0x2a   : > { %432 = vst.msk [vmem:[#allocation2 + $0x168] sm:$0xff] %vm385_vm0, %v12107_v0 }
  0x2b   : > { %433 = vst.msk [vmem:[#allocation2 + $0x170] sm:$0xff] %vm385_vm0, %v12107_v0 }
  0x2c   : > { %435 = vst.msk [vmem:[#allocation2 + $0x180] sm:$0xff] %vm385_vm0, %v12107_v0 }
  0x2d   : > { %436 = vst.msk [vmem:[#allocation2 + $0x188] sm:$0xff] %vm385_vm0, %v12107_v0 }
  0x2e   : > { %438 = vst.msk [vmem:[#allocation2 + $0x198] sm:$0xff] %vm385_vm0, %v12107_v0 }
  0x2f   : > { %439 = vst.msk [vmem:[#allocation2 + $0x1a0] sm:$0xff] %vm385_vm0, %v12107_v0 }
  0x30   : > { %476 = vst.msk [vmem:[#allocation2 + $0x31] sm:$0xff] %vm385_vm0, %v443_v2 }
  0x31   : > { %474 = vst.msk [vmem:[#allocation2 + $0x19] sm:$0xff] %vm385_vm0, %v441_v3 }
  0x32   : > { %389 = vst.msk [vmem:[#allocation2 + $0x10] sm:$0x3] %vm388_vm1, %v12107_v0 }
  0x33   : > { %392 = vst.msk [vmem:[#allocation2 + $0x28] sm:$0x3] %vm388_vm1, %v12107_v0 }
  0x34   : > { %395 = vst.msk [vmem:[#allocation2 + $0x40] sm:$0x3] %vm388_vm1, %v12107_v0 }
  0x35   : > { %398 = vst.msk [vmem:[#allocation2 + $0x58] sm:$0x3] %vm388_vm1, %v12107_v0 }
  0x36   : > { %401 = vst.msk [vmem:[#allocation2 + $0x70] sm:$0x3] %vm388_vm1, %v12107_v0 }
  0x37   : > { %v7871_v4 = vld [vmem:[#allocation2 + $0x31] sm:$0xff]  ;;  %404 = vst.msk [vmem:[#allocation2 + $0x88] sm:$0x3] %vm388_vm1, %v12107_v0 }
  0x38   : > { %841 = vrot.lane.b32.xlu2 %v7871_v4, %s7688_s19  ;;  %v7877_v5 = vld [vmem:[#allocation2 + $0x19] sm:$0xff]  ;;  %407 = vst.msk [vmem:[#allocation2 + $0xa0] sm:$0x3] %vm388_vm1, %v12107_v0 }
  0x39   : > { %837 = vrot.lane.b32.xlu1 %v7877_v5, %s7688_s19  ;;  %v545_v6 = vld [vmem:[#allocation2 + $0x9] sm:$0xff]  ;;  %410 = vst.msk [vmem:[#allocation2 + $0xb8] sm:$0x3] %vm388_vm1, %v12107_v0 }
  0x3a   : > { %835 = vrot.lane.b32.xlu0 %v545_v6, %s7688_s19  ;;  %413 = vst.msk [vmem:[#allocation2 + $0xd0] sm:$0x3] %vm388_vm1, %v12107_v0  ;;  %v577_v1 = vld [vmem:[#allocation2 + $0xa] sm:$0xff] }
  0x3b   : > { %416 = vst.msk [vmem:[#allocation2 + $0xe8] sm:$0x3] %vm388_vm1, %v12107_v0 }
  0x3c   : > { %419 = vst.msk [vmem:[#allocation2 + $0x100] sm:$0x3] %vm388_vm1, %v12107_v0 }
  0x3d   : > { %422 = vst.msk [vmem:[#allocation2 + $0x118] sm:$0x3] %vm388_vm1, %v12107_v0 }
  0x3e   : > { %425 = vst.msk [vmem:[#allocation2 + $0x130] sm:$0x3] %vm388_vm1, %v12107_v0 }
  0x3f   : > { %428 = vst.msk [vmem:[#allocation2 + $0x148] sm:$0x3] %vm388_vm1, %v12107_v0 }
  0x40   : > { %431 = vst.msk [vmem:[#allocation2 + $0x160] sm:$0x3] %vm388_vm1, %v12107_v0 }
  0x41   : > { %434 = vst.msk [vmem:[#allocation2 + $0x178] sm:$0x3] %vm388_vm1, %v12107_v0 }
  0x42   : > { %437 = vst.msk [vmem:[#allocation2 + $0x190] sm:$0x3] %vm388_vm1, %v12107_v0 }
  0x43   : > { %440 = vst.msk [vmem:[#allocation2 + $0x1a8] sm:$0x3] %vm388_vm1, %v12107_v0  ;;  %vm4271_vm1 = vcmask 916480  }
  0x44   : > { %477 = vst.msk [vmem:[#allocation2 + $0x39] sm:$0xff] %vm385_vm0, %v444_v7 }
  0x45   : > { %475 = vst.msk [vmem:[#allocation2 + $0x21] sm:$0xff] %vm385_vm0, %v442_v8 }
  0x46   : > { %478 = vst.msk [vmem:[#allocation2 + $0x49] sm:$0xff] %vm385_vm0, %v445_v9 }
  0x47   : > { %480 = vst.msk [vmem:[#allocation2 + $0x61] sm:$0xff] %vm385_vm0, %v447_v10 }
  0x48   : > { %479 = vst.msk [vmem:[#allocation2 + $0x51] sm:$0xff] %vm385_vm0, %v446_v11 }
  0x49   : > { %481 = vst.msk [vmem:[#allocation2 + $0x69] sm:$0xff] %vm385_vm0, %v448_v12 }
  0x4a   : > { %483 = vst.msk [vmem:[#allocation2 + $0x81] sm:$0xff] %vm385_vm0, %v450_v13 }
  0x4b   : > { %v7923_v17 = vld [vmem:[#allocation2 + $0x39] sm:$0xff]  ;;  %482 = vst.msk [vmem:[#allocation2 + $0x79] sm:$0xff] %vm385_vm0, %v449_v14 }
  0x4c   : > { %843 = vrot.lane.b32.xlu2 %v7923_v17, %s7688_s19  ;;  %v7929_v19 = vld [vmem:[#allocation2 + $0x21] sm:$0xff]  ;;  %484 = vst.msk [vmem:[#allocation2 + $0x91] sm:$0xff] %vm385_vm0, %v451_v15  ;;  %v8080_v6 = vld [vmem:[#allocation2 + $0x32] sm:$0xff] }
  0x4d   : > { %839 = vrot.lane.b32.xlu1 %v7929_v19, %s7688_s19  ;;  %v7935_v21 = vld [vmem:[#allocation2 + $0x49] sm:$0xff]  ;;  %486 = vst.msk [vmem:[#allocation2 + $0xa9] sm:$0xff] %vm385_vm0, %v453_v16  ;;  %v8078_v3 = vld [vmem:[#allocation2 + $0x1a] sm:$0xff] }
  0x4e   : > { %845 = vrot.lane.b32.xlu0 %v7935_v21, %s7688_s19  ;;  %485 = vst.msk [vmem:[#allocation2 + $0x99] sm:$0xff] %vm385_vm0, %v452_v18  ;;  %v7947_v26 = vld [vmem:[#allocation2 + $0x61] sm:$0xff] }
  0x4f   : > { %487 = vst.msk [vmem:[#allocation2 + $0xb1] sm:$0xff] %vm385_vm0, %v454_v20  ;;  %v7951_v28 = vld [vmem:[#allocation2 + $0x51] sm:$0xff]  ;;  %v8076_v2 = vld [vmem:[#allocation2 + $0x22] sm:$0xff]  ;;  %v8092_v9 = vld [vmem:[#allocation2 + $0x3a] sm:$0xff] }
  0x50   : > { %489 = vst.msk [vmem:[#allocation2 + $0xc9] sm:$0xff] %vm385_vm0, %v456_v22  ;;  %v7955_v30 = vld [vmem:[#allocation2 + $0x69] sm:$0xff]  ;;  %v8094_v10 = vld [vmem:[#allocation2 + $0x52] sm:$0xff] }
  0x51   : > { %488 = vst.msk [vmem:[#allocation2 + $0xc1] sm:$0xff] %vm385_vm0, %v455_v23  ;;  %v7972_v34 = vld [vmem:[#allocation2 + $0x81] sm:$0xff]  ;;  %v8090_v8 = vld [vmem:[#allocation2 + $0x4a] sm:$0xff] }
  0x52   : > { %490 = vst.msk [vmem:[#allocation2 + $0xd9] sm:$0xff] %vm385_vm0, %v457_v24  ;;  %v7974_v35 = vld [vmem:[#allocation2 + $0x79] sm:$0xff]  ;;  %v8104_v12 = vld [vmem:[#allocation2 + $0x6a] sm:$0xff]  ;;  %v8106_v13 = vld [vmem:[#allocation2 + $0x62] sm:$0xff] }
  0x53   : > { %492 = vst.msk [vmem:[#allocation2 + $0xf1] sm:$0xff] %vm385_vm0, %v459_v25  ;;  %v7976_v36 = vld [vmem:[#allocation2 + $0x91] sm:$0xff]  ;;  %v8108_v14 = vld [vmem:[#allocation2 + $0x7a] sm:$0xff]  ;;  %v8122_v20 = vld [vmem:[#allocation2 + $0x82] sm:$0xff] }
  0x54   : > { %849 = vrot.lane.b32.xlu2 %v7947_v26, %s7688_s19  ;;  %491 = vst.msk [vmem:[#allocation2 + $0xe1] sm:$0xff] %vm385_vm0, %v458_v27  ;;  %v7990_v40 = vld [vmem:[#allocation2 + $0xa9] sm:$0xff] }
  0x55   : > { %847 = vrot.lane.b32.xlu1 %v7951_v28, %s7688_s19  ;;  %493 = vst.msk [vmem:[#allocation2 + $0xf9] sm:$0xff] %vm385_vm0, %v460_v29  ;;  %v7992_v41 = vld [vmem:[#allocation2 + $0x99] sm:$0xff] }
  0x56   : > { %851 = vrot.lane.b32.xlu0 %v7955_v30, %s7688_s19  ;;  %495 = vst.msk [vmem:[#allocation2 + $0x111] sm:$0xff] %vm385_vm0, %v462_v31  ;;  %v7994_v42 = vld [vmem:[#allocation2 + $0xb1] sm:$0xff]  ;;  %v8124_v22 = vld [vmem:[#allocation2 + $0x9a] sm:$0xff] }
  0x57   : > { %494 = vst.msk [vmem:[#allocation2 + $0x109] sm:$0xff] %vm385_vm0, %v461_v32  ;;  %v8008_v46 = vld [vmem:[#allocation2 + $0xc9] sm:$0xff]  ;;  %v8120_v18 = vld [vmem:[#allocation2 + $0x92] sm:$0xff] }
  0x58   : > { %496 = vst.msk [vmem:[#allocation2 + $0x121] sm:$0xff] %vm385_vm0, %v463_v33  ;;  %v8010_v47 = vld [vmem:[#allocation2 + $0xc1] sm:$0xff]  ;;  %v8138_v27 = vld [vmem:[#allocation2 + $0xb2] sm:$0xff]  ;;  %v8140_v29 = vld [vmem:[#allocation2 + $0xaa] sm:$0xff] }
  0x59   : > { %498 = vst.msk [vmem:[#allocation2 + $0x139] sm:$0xff] %vm385_vm0, %v465_v37  ;;  %v8012_v48 = vld [vmem:[#allocation2 + $0xd9] sm:$0xff]  ;;  %v8142_v31 = vld [vmem:[#allocation2 + $0xc2] sm:$0xff] }
  0x5a   : > { %497 = vst.msk [vmem:[#allocation2 + $0x129] sm:$0xff] %vm385_vm0, %v464_v38  ;;  %v8022_v50 = vld [vmem:[#allocation2 + $0xf1] sm:$0xff] }
  0x5b   : > { %499 = vst.msk [vmem:[#allocation2 + $0x141] sm:$0xff] %vm385_vm0, %v466_v39  ;;  %v8024_v51 = vld [vmem:[#allocation2 + $0xe1] sm:$0xff]  ;;  %v8158_v39 = vld [vmem:[#allocation2 + $0xca] sm:$0xff] }
  0x5c   : > { %855 = vrot.lane.b32.xlu2 %v7972_v34, %s7688_s19  ;;  %501 = vst.msk [vmem:[#allocation2 + $0x159] sm:$0xff] %vm385_vm0, %v468_v43  ;;  %v8026_v52 = vld [vmem:[#allocation2 + $0xf9] sm:$0xff]  ;;  %v8160_v43 = vld [vmem:[#allocation2 + $0xe2] sm:$0xff] }
  0x5d   : > { %853 = vrot.lane.b32.xlu1 %v7974_v35, %s7688_s19  ;;  %500 = vst.msk [vmem:[#allocation2 + $0x151] sm:$0xff] %vm385_vm0, %v467_v44  ;;  %v8034_v53 = vld [vmem:[#allocation2 + $0x111] sm:$0xff]  ;;  %v8156_v38 = vld [vmem:[#allocation2 + $0xda] sm:$0xff] }
  0x5e   : > { %857 = vrot.lane.b32.xlu0 %v7976_v36, %s7688_s19  ;;  %502 = vst.msk [vmem:[#allocation2 + $0x169] sm:$0xff] %vm385_vm0, %v469_v45  ;;  %v8036_v54 = vld [vmem:[#allocation2 + $0x109] sm:$0xff] }
  0x5f   : > { %503 = vst.msk [vmem:[#allocation2 + $0x171] sm:$0xff] %vm385_vm0, %v470_v49  ;;  %v8038_v55 = vld [vmem:[#allocation2 + $0x121] sm:$0xff]  ;;  %v8178_v0 = vld [vmem:[#allocation2 + $0x10a] sm:$0xff] }
  0x60   : > { %v8046_v56 = vld [vmem:[#allocation2 + $0x139] sm:$0xff] }
  0x61   : > { %v8048_v57 = vld [vmem:[#allocation2 + $0x129] sm:$0xff] }
  0x62   : > { %v8050_v58 = vld [vmem:[#allocation2 + $0x141] sm:$0xff] }
  0x63   : > { %v8058_v59 = vld [vmem:[#allocation2 + $0x159] sm:$0xff] }
  0x64   : > { %861 = vrot.lane.b32.xlu2 %v7990_v40, %s7688_s19  ;;  %v8060_v60 = vld [vmem:[#allocation2 + $0x151] sm:$0xff] }
  0x65   : > { %859 = vrot.lane.b32.xlu1 %v7992_v41, %s7688_s19  ;;  %v8062_v61 = vld [vmem:[#allocation2 + $0x169] sm:$0xff] }
  0x66   : > { %863 = vrot.lane.b32.xlu0 %v7994_v42, %s7688_s19  ;;  %v8070_v63 = vld [vmem:[#allocation2 + $0x171] sm:$0xff] }
  0x6c   : > { %867 = vrot.lane.b32.xlu2 %v8008_v46, %s7688_s19 }
  0x6d   : > { %865 = vrot.lane.b32.xlu1 %v8010_v47, %s7688_s19 }
  0x6e   : > { %869 = vrot.lane.b32.xlu0 %v8012_v48, %s7688_s19 }
  0x74   : > { %873 = vrot.lane.b32.xlu2 %v8022_v50, %s7688_s19 }
  0x75   : > { %871 = vrot.lane.b32.xlu1 %v8024_v51, %s7688_s19 }
  0x76   : > { %875 = vrot.lane.b32.xlu0 %v8026_v52, %s7688_s19 }
  0x7c   : > { %879 = vrot.lane.b32.xlu2 %v8034_v53, %s7688_s19 }
  0x7d   : > { %877 = vrot.lane.b32.xlu1 %v8036_v54, %s7688_s19 }
  0x7e   : > { %881 = vrot.lane.b32.xlu0 %v8038_v55, %s7688_s19 }
  0x84   : > { %885 = vrot.lane.b32.xlu2 %v8046_v56, %s7688_s19 }
  0x85   : > { %883 = vrot.lane.b32.xlu1 %v8048_v57, %s7688_s19 }
  0x86   : > { %887 = vrot.lane.b32.xlu0 %v8050_v58, %s7688_s19 }
  0x87   : > { %v8112_v15 = vpop.permute.xlu0 %833 }
  0x88   : > { %12142 = vst [vmem:[#allocation7_spill] sm:$0xff] %v8112_v15  ;;  %v8246_v15 = vld [vmem:[#allocation2 + $0x20] sm:$0xff] }
  0x89   : > { %12171 = vst [vmem:[#allocation36_spill] sm:$0xff] %v8246_v15 }
  0x8c   : > { %891 = vrot.lane.b32.xlu2 %v8058_v59, %s7688_s19 }
  0x8d   : > { %889 = vrot.lane.b32.xlu1 %v8060_v60, %s7688_s19 }
  0x8e   : > { %893 = vrot.lane.b32.xlu0 %v8062_v61, %s7688_s19 }
  0x92   : > { %v8084_v7 = vpop.permute.xlu2 %841 }
  0x93   : > { %12140 = vst [vmem:[#allocation5_spill] sm:$0xff] %v8084_v7  ;;  %v8214_v7 = vld [vmem:[#allocation2 + $0x152] sm:$0xff] }
  0x94   : > { %961 = vrot.lane.b32.xlu2 %v576_v62, %s7689_s24  ;;  %v8174_v62 = vld [vmem:[#allocation2 + $0xfa] sm:$0xff]  ;;  %12161 = vst [vmem:[#allocation26_spill] sm:$0xff] %v8214_v7 }
  0x95   : > { %895 = vrot.lane.b32.xlu1 %v8070_v63, %s7688_s19 }
  0x96   : > { %963 = vrot.lane.b32.xlu0 %v577_v1, %s7689_s24  ;;  %v8176_v1 = vld [vmem:[#allocation2 + $0xf2] sm:$0xff] }
  0x9c   : > { %967 = vrot.lane.b32.xlu2 %v8076_v2, %s7689_s24 }
  0x9d   : > { %965 = vrot.lane.b32.xlu1 %v8078_v3, %s7689_s24 }
  0x9e   : > { %969 = vrot.lane.b32.xlu0 %v8080_v6, %s7689_s24 }
  0xa4   : > { %973 = vrot.lane.b32.xlu2 %v8090_v8, %s7689_s24 }
  0xa5   : > { %971 = vrot.lane.b32.xlu1 %v8092_v9, %s7689_s24 }
  0xa6   : > { %975 = vrot.lane.b32.xlu0 %v8094_v10, %s7689_s24  ;;  %v8102_v11 = vpop.permute.xlu2 %843 }
  0xa7   : > { %12141 = vst [vmem:[#allocation6_spill] sm:$0xff] %v8102_v11  ;;  %v8212_v11 = vld [vmem:[#allocation2 + $0x13a] sm:$0xff] }
  0xab   : > { %v8130_v23 = vpop.permute.xlu1 %837 }
  0xac   : > { %979 = vrot.lane.b32.xlu2 %v8104_v12, %s7689_s24  ;;  %12144 = vst [vmem:[#allocation9_spill] sm:$0xff] %v8130_v23  ;;  %v8136_v25 = vpop.permute.xlu0 %835  ;;  %v8230_v23 = vld [vmem:[#allocation2 + $0x15a] sm:$0xff] }
  0xad   : > { %977 = vrot.lane.b32.xlu1 %v8106_v13, %s7689_s24  ;;  %12146 = vst [vmem:[#allocation11_spill] sm:$0xff] %v8136_v25  ;;  %v8232_v25 = vld [vmem:[#allocation2 + $0x172] sm:$0xff] }
  0xae   : > { %981 = vrot.lane.b32.xlu0 %v8108_v14, %s7689_s24  ;;  %v8118_v16 = vpop.permute.xlu2 %849  ;;  %12166 = vst [vmem:[#allocation31_spill] sm:$0xff] %v8230_v23 }
  0xaf   : > { %12143 = vst [vmem:[#allocation8_spill] sm:$0xff] %v8118_v16  ;;  %v8194_v16 = vld [vmem:[#allocation2 + $0x112] sm:$0xff] }
  0xb0   : > { %12167 = vst [vmem:[#allocation32_spill] sm:$0xff] %v8232_v25 }
  0xb4   : > { %985 = vrot.lane.b32.xlu2 %v8120_v18, %s7689_s24 }
  0xb5   : > { %983 = vrot.lane.b32.xlu1 %v8122_v20, %s7689_s24 }
  0xb6   : > { %987 = vrot.lane.b32.xlu0 %v8124_v22, %s7689_s24  ;;  %v8134_v24 = vpop.permute.xlu2 %855 }
  0xb7   : > { %12145 = vst [vmem:[#allocation10_spill] sm:$0xff] %v8134_v24 }
  0xbc   : > { %991 = vrot.lane.b32.xlu2 %v8138_v27, %s7689_s24 }
  0xbd   : > { %989 = vrot.lane.b32.xlu1 %v8140_v29, %s7689_s24 }
  0xbe   : > { %993 = vrot.lane.b32.xlu0 %v8142_v31, %s7689_s24  ;;  %v8150_v32 = vpop.permute.xlu2 %861 }
  0xbf   : > { %12147 = vst [vmem:[#allocation12_spill] sm:$0xff] %v8150_v32  ;;  %v8152_v33 = vpop.permute.xlu1 %839 }
  0xc0   : > { %12148 = vst [vmem:[#allocation13_spill] sm:$0xff] %v8152_v33  ;;  %v8154_v37 = vpop.permute.xlu0 %845  ;;  %v8228_v33 = vld [vmem:[#allocation2 + $0x16a] sm:$0xff] }
  0xc1   : > { %12149 = vst [vmem:[#allocation14_spill] sm:$0xff] %v8154_v37  ;;  %v8210_v37 = vld [vmem:[#allocation2 + $0x142] sm:$0xff] }
  0xc2   : > { %12160 = vst [vmem:[#allocation25_spill] sm:$0xff] %v8210_v37 }
  0xc3   : > { %12165 = vst [vmem:[#allocation30_spill] sm:$0xff] %v8228_v33 }
  0xc4   : > { %997 = vrot.lane.b32.xlu2 %v8156_v38, %s7689_s24 }
  0xc5   : > { %995 = vrot.lane.b32.xlu1 %v8158_v39, %s7689_s24 }
  0xc6   : > { %999 = vrot.lane.b32.xlu0 %v8160_v43, %s7689_s24  ;;  %v8168_v44 = vpop.permute.xlu2 %867 }
  0xc7   : > { %12150 = vst [vmem:[#allocation15_spill] sm:$0xff] %v8168_v44  ;;  %v8170_v45 = vpop.permute.xlu1 %847 }
  0xc8   : > { %12151 = vst [vmem:[#allocation16_spill] sm:$0xff] %v8170_v45  ;;  %v8172_v49 = vpop.permute.xlu0 %851  ;;  %v8196_v45 = vld [vmem:[#allocation2 + $0x12a] sm:$0xff] }
  0xc9   : > { %12152 = vst [vmem:[#allocation17_spill] sm:$0xff] %v8172_v49  ;;  %v8192_v49 = vld [vmem:[#allocation2 + $0x122] sm:$0xff] }
  0xca   : > { %12156 = vst [vmem:[#allocation21_spill] sm:$0xff] %v8196_v45 }
  0xcc   : > { %1003 = vrot.lane.b32.xlu2 %v8174_v62, %s7689_s24 }
  0xcd   : > { %1001 = vrot.lane.b32.xlu1 %v8176_v1, %s7689_s24 }
  0xce   : > { %1005 = vrot.lane.b32.xlu0 %v8178_v0, %s7689_s24  ;;  %v8186_v44 = vpop.permute.xlu2 %873 }
  0xcf   : > { %12153 = vst [vmem:[#allocation18_spill] sm:$0xff] %v8186_v44  ;;  %v8188_v32 = vpop.permute.xlu1 %853 }
  0xd0   : > { %12154 = vst [vmem:[#allocation19_spill] sm:$0xff] %v8188_v32  ;;  %v8190_v24 = vpop.permute.xlu0 %857 }
  0xd1   : > { %12155 = vst [vmem:[#allocation20_spill] sm:$0xff] %v8190_v24 }
  0xd4   : > { %1009 = vrot.lane.b32.xlu2 %v8192_v49, %s7689_s24 }
  0xd5   : > { %1007 = vrot.lane.b32.xlu1 %v8194_v16, %s7689_s24 }
  0xd6   : > { %1011 = vrot.lane.b32.xlu0 %v8196_v45, %s7689_s24  ;;  %v8204_v44 = vpop.permute.xlu2 %879  ;;  %v8327_v45 = vld [vmem:[#allocation2 + $0xe0] sm:$0xff] }
  0xd7   : > { %12157 = vst [vmem:[#allocation22_spill] sm:$0xff] %v8204_v44  ;;  %v8206_v32 = vpop.permute.xlu1 %859 }
  0xd8   : > { %12158 = vst [vmem:[#allocation23_spill] sm:$0xff] %v8206_v32  ;;  %v8208_v24 = vpop.permute.xlu0 %863 }
  0xd9   : > { %12159 = vst [vmem:[#allocation24_spill] sm:$0xff] %v8208_v24 }
  0xda   : > { %12196 = vst [vmem:[#allocation61_spill] sm:$0xff] %v8327_v45 }
  0xdc   : > { %1015 = vrot.lane.b32.xlu2 %v8210_v37, %s7689_s24  ;;  %v8265_v37 = vld [vmem:[#allocation2 + $0x50] sm:$0xff] }
  0xdd   : > { %1013 = vrot.lane.b32.xlu1 %v8212_v11, %s7689_s24  ;;  %12177 = vst [vmem:[#allocation42_spill] sm:$0xff] %v8265_v37 }
  0xde   : > { %1017 = vrot.lane.b32.xlu0 %v8214_v7, %s7689_s24  ;;  %v8222_v44 = vpop.permute.xlu2 %885  ;;  %v8248_v7 = vld [vmem:[#allocation2 + $0x18] sm:$0xff] }
  0xdf   : > { %12162 = vst [vmem:[#allocation27_spill] sm:$0xff] %v8222_v44  ;;  %v8224_v32 = vpop.permute.xlu1 %865 }
  0xe0   : > { %12163 = vst [vmem:[#allocation28_spill] sm:$0xff] %v8224_v32  ;;  %v8226_v24 = vpop.permute.xlu0 %869 }
  0xe1   : > { %12164 = vst [vmem:[#allocation29_spill] sm:$0xff] %v8226_v24 }
  0xe2   : > { %12172 = vst [vmem:[#allocation37_spill] sm:$0xff] %v8248_v7 }
  0xe4   : > { %1021 = vrot.lane.b32.xlu2 %v8228_v33, %s7689_s24  ;;  %v516_v33 = vld [vmem:[#allocation2 + $0x30] sm:$0xff] }
  0xe5   : > { %1019 = vrot.lane.b32.xlu1 %v8230_v23, %s7689_s24  ;;  %v517_v23 = vld [vmem:[#allocation2 + $0x38] sm:$0xff] }
  0xe6   : > { %1023 = vrot.lane.b32.xlu0 %v8232_v25, %s7689_s24  ;;  %v8240_v44 = vpop.permute.xlu2 %891 }
  0xe7   : > { %12168 = vst [vmem:[#allocation33_spill] sm:$0xff] %v8240_v44  ;;  %v8242_v32 = vpop.permute.xlu1 %871 }
  0xe8   : > { %12169 = vst [vmem:[#allocation34_spill] sm:$0xff] %v8242_v32  ;;  %v8244_v24 = vpop.permute.xlu0 %875 }
  0xe9   : > { %12170 = vst [vmem:[#allocation35_spill] sm:$0xff] %v8244_v24  ;;  %v8261_v24 = vld [vmem:[#allocation2 + $0x48] sm:$0xff] }
  0xea   : > { %12176 = vst [vmem:[#allocation41_spill] sm:$0xff] %v8261_v24 }
  0xec   : > { %1091 = vrot.lane.b32.xlu2 %v8246_v15, %s7690_s25 }
  0xed   : > { %1089 = vrot.lane.b32.xlu1 %v8248_v7, %s7690_s25  ;;  %v520_v7 = vld [vmem:[#allocation2 + $0x60] sm:$0xff] }
  0xee   : > { %1093 = vrot.lane.b32.xlu0 %v516_v33, %s7690_s25  ;;  %v8255_v25 = vpop.permute.xlu2 %961 }
  0xef   : > { %12173 = vst [vmem:[#allocation38_spill] sm:$0xff] %v8255_v25  ;;  %v8257_v44 = vpop.permute.xlu1 %877  ;;  %v8280_v25 = vld [vmem:[#allocation2 + $0x78] sm:$0xff] }
  0xf0   : > { %12174 = vst [vmem:[#allocation39_spill] sm:$0xff] %v8257_v44  ;;  %v8259_v32 = vpop.permute.xlu0 %881 }
  0xf1   : > { %12175 = vst [vmem:[#allocation40_spill] sm:$0xff] %v8259_v32  ;;  %v8276_v32 = vld [vmem:[#allocation2 + $0x68] sm:$0xff] }
  0xf2   : > { %12181 = vst [vmem:[#allocation46_spill] sm:$0xff] %v8276_v32 }
  0xf3   : > { %12182 = vst [vmem:[#allocation47_spill] sm:$0xff] %v8280_v25 }
  0xf4   : > { %1097 = vrot.lane.b32.xlu2 %v8261_v24, %s7690_s25  ;;  %v472_v24 = vld [vmem:[%s7845_s23 + $0xf8] sm:$0xff] }
  0xf5   : > { %1095 = vrot.lane.b32.xlu1 %v517_v23, %s7690_s25  ;;  %505 = vst.msk [vmem:[#allocation2 + $0x189] sm:$0xff] %vm385_vm0, %v472_v24 }
  0xf6   : > { %1099 = vrot.lane.b32.xlu0 %v8265_v37, %s7690_s25  ;;  %v8270_v33 = vpop.permute.xlu2 %967  ;;  %v523_v37 = vld [vmem:[#allocation2 + $0x80] sm:$0xff] }
  0xf7   : > { %12178 = vst [vmem:[#allocation43_spill] sm:$0xff] %v8270_v33  ;;  %v8272_v15 = vpop.permute.xlu1 %883 }
  0xf8   : > { %12179 = vst [vmem:[#allocation44_spill] sm:$0xff] %v8272_v15  ;;  %v8274_v44 = vpop.permute.xlu0 %887 }
  0xf9   : > { %12180 = vst [vmem:[#allocation45_spill] sm:$0xff] %v8274_v44  ;;  %v8291_v44 = vld [vmem:[#allocation2 + $0x90] sm:$0xff] }
  0xfa   : > { %12186 = vst [vmem:[#allocation51_spill] sm:$0xff] %v8291_v44 }
  0xfc   : > { %1103 = vrot.lane.b32.xlu2 %v8276_v32, %s7690_s25  ;;  %v8295_v32 = vld [vmem:[#allocation2 + $0x98] sm:$0xff] }
  0xfd   : > { %1101 = vrot.lane.b32.xlu1 %v520_v7, %s7690_s25  ;;  %12187 = vst [vmem:[#allocation52_spill] sm:$0xff] %v8295_v32 }
  0xfe   : > { %1105 = vrot.lane.b32.xlu0 %v8280_v25, %s7690_s25  ;;  %v8285_v23 = vpop.permute.xlu2 %973  ;;  %v526_v25 = vld [vmem:[#allocation2 + $0xa8] sm:$0xff] }
  0xff   : > { %12183 = vst [vmem:[#allocation48_spill] sm:$0xff] %v8285_v23  ;;  %v8287_v33 = vpop.permute.xlu1 %889  ;;  %v8306_v23 = vld [vmem:[#allocation2 + $0xb0] sm:$0xff] }
 0x100   : > { %12184 = vst [vmem:[#allocation49_spill] sm:$0xff] %v8287_v33  ;;  %v8289_v15 = vpop.permute.xlu0 %893 }
 0x101   : > { %12185 = vst [vmem:[#allocation50_spill] sm:$0xff] %v8289_v15 }
 0x102   : > { %12191 = vst [vmem:[#allocation56_spill] sm:$0xff] %v8306_v23 }
 0x104   : > { %1109 = vrot.lane.b32.xlu2 %v8291_v44, %s7690_s25  ;;  %v8310_v44 = vld [vmem:[#allocation2 + $0xc0] sm:$0xff] }
 0x105   : > { %1107 = vrot.lane.b32.xlu1 %v523_v37, %s7690_s25 }
 0x106   : > { %1111 = vrot.lane.b32.xlu0 %v8295_v32, %s7690_s25  ;;  %v8300_v7 = vpop.permute.xlu2 %979  ;;  %v529_v32 = vld [vmem:[#allocation2 + $0xc8] sm:$0xff] }
 0x107   : > { %12188 = vst [vmem:[#allocation53_spill] sm:$0xff] %v8300_v7  ;;  %v8302_v33 = vpop.permute.xlu1 %895 }
 0x108   : > { %12189 = vst [vmem:[#allocation54_spill] sm:$0xff] %v8302_v33  ;;  %v8304_v15 = vpop.permute.xlu0 %963 }
 0x109   : > { %12190 = vst [vmem:[#allocation55_spill] sm:$0xff] %v8304_v15  ;;  %v8321_v15 = vld [vmem:[#allocation2 + $0xd8] sm:$0xff] }
 0x10a   : > { %12195 = vst [vmem:[#allocation60_spill] sm:$0xff] %v8321_v15 }
 0x10c   : > { %1115 = vrot.lane.b32.xlu2 %v8306_v23, %s7690_s25  ;;  %v471_v23 = vld [vmem:[%s7845_s23 + $0xf0] sm:$0xff] }
 0x10d   : > { %1113 = vrot.lane.b32.xlu1 %v526_v25, %s7690_s25  ;;  %504 = vst.msk [vmem:[#allocation2 + $0x181] sm:$0xff] %vm385_vm0, %v471_v23 }
 0x10e   : > { %1117 = vrot.lane.b32.xlu0 %v8310_v44, %s7690_s25  ;;  %v8315_v37 = vpop.permute.xlu2 %985 }
 0x10f   : > { %12192 = vst [vmem:[#allocation57_spill] sm:$0xff] %v8315_v37  ;;  %v8317_v7 = vpop.permute.xlu1 %965 }
 0x110   : > { %12193 = vst [vmem:[#allocation58_spill] sm:$0xff] %v8317_v7  ;;  %v8319_v33 = vpop.permute.xlu0 %969  ;;  %v8340_v7 = vld [vmem:[#allocation2 + $0xf8] sm:$0xff] }
 0x111   : > { %12194 = vst [vmem:[#allocation59_spill] sm:$0xff] %v8319_v33 }
 0x112   : > { %12200 = vst [vmem:[#allocation65_spill] sm:$0xff] %v8340_v7 }
 0x114   : > { %1121 = vrot.lane.b32.xlu2 %v8321_v15, %s7690_s25  ;;  %v532_v15 = vld [vmem:[#allocation2 + $0xf0] sm:$0xff] }
 0x115   : > { %1119 = vrot.lane.b32.xlu1 %v529_v32, %s7690_s25  ;;  %v8344_v32 = vld [vmem:[#allocation2 + $0x108] sm:$0xff] }
 0x116   : > { %1123 = vrot.lane.b32.xlu0 %v8327_v45, %s7690_s25  ;;  %v8333_v25 = vpop.permute.xlu2 %991  ;;  %12201 = vst [vmem:[#allocation66_spill] sm:$0xff] %v8344_v32  ;;  %v543_v45 = vld [vmem:[#allocation2 + $0x170] sm:$0xff] }
 0x117   : > { %12197 = vst [vmem:[#allocation62_spill] sm:$0xff] %v8333_v25  ;;  %v8336_v37 = vpop.permute.xlu1 %971 }
 0x118   : > { %12198 = vst [vmem:[#allocation63_spill] sm:$0xff] %v8336_v37  ;;  %v8338_v33 = vpop.permute.xlu0 %975  ;;  %v535_v37 = vld [vmem:[#allocation2 + $0x110] sm:$0xff] }
 0x119   : > { %12199 = vst [vmem:[#allocation64_spill] sm:$0xff] %v8338_v33  ;;  %v8355_v33 = vld [vmem:[#allocation2 + $0x120] sm:$0xff] }
 0x11a   : > { %12205 = vst [vmem:[#allocation70_spill] sm:$0xff] %v8355_v33 }
 0x11c   : > { %1127 = vrot.lane.b32.xlu2 %v8340_v7, %s7690_s25  ;;  %v8359_v7 = vld [vmem:[#allocation2 + $0x128] sm:$0xff] }
 0x11d   : > { %1125 = vrot.lane.b32.xlu1 %v532_v15, %s7690_s25  ;;  %12206 = vst [vmem:[#allocation71_spill] sm:$0xff] %v8359_v7 }
 0x11e   : > { %1129 = vrot.lane.b32.xlu0 %v8344_v32, %s7690_s25  ;;  %v8349_v23 = vpop.permute.xlu2 %997  ;;  %v538_v32 = vld [vmem:[#allocation2 + $0x138] sm:$0xff] }
 0x11f   : > { %12202 = vst [vmem:[#allocation67_spill] sm:$0xff] %v8349_v23  ;;  %v8351_v24 = vpop.permute.xlu1 %977 }
 0x120   : > { %12203 = vst [vmem:[#allocation68_spill] sm:$0xff] %v8351_v24  ;;  %v8353_v25 = vpop.permute.xlu0 %981 }
 0x121   : > { %12204 = vst [vmem:[#allocation69_spill] sm:$0xff] %v8353_v25  ;;  %v8370_v25 = vld [vmem:[#allocation2 + $0x140] sm:$0xff] }
 0x122   : > { %12210 = vst [vmem:[#allocation75_spill] sm:$0xff] %v8370_v25 }
 0x124   : > { %1133 = vrot.lane.b32.xlu2 %v8355_v33, %s7690_s25  ;;  %v8374_v33 = vld [vmem:[#allocation2 + $0x150] sm:$0xff] }
 0x125   : > { %1131 = vrot.lane.b32.xlu1 %v535_v37, %s7690_s25  ;;  %12211 = vst [vmem:[#allocation76_spill] sm:$0xff] %v8374_v33 }
 0x126   : > { %1135 = vrot.lane.b32.xlu0 %v8359_v7, %s7690_s25  ;;  %v8364_v15 = vpop.permute.xlu2 %1003  ;;  %v541_v7 = vld [vmem:[#allocation2 + $0x158] sm:$0xff] }
 0x127   : > { %12207 = vst [vmem:[#allocation72_spill] sm:$0xff] %v8364_v15  ;;  %v8366_v23 = vpop.permute.xlu1 %983 }
 0x128   : > { %12208 = vst [vmem:[#allocation73_spill] sm:$0xff] %v8366_v23  ;;  %v8368_v24 = vpop.permute.xlu0 %987 }
 0x129   : > { %12209 = vst [vmem:[#allocation74_spill] sm:$0xff] %v8368_v24  ;;  %v542_v24 = vld [vmem:[#allocation2 + $0x168] sm:$0xff] }
 0x12c   : > { %1139 = vrot.lane.b32.xlu2 %v8370_v25, %s7690_s25 }
 0x12d   : > { %1137 = vrot.lane.b32.xlu1 %v538_v32, %s7690_s25 }
 0x12e   : > { %1141 = vrot.lane.b32.xlu0 %v8374_v33, %s7690_s25  ;;  %v8379_v37 = vpop.permute.xlu2 %1009 }
 0x12f   : > { %12212 = vst [vmem:[#allocation77_spill] sm:$0xff] %v8379_v37  ;;  %v8381_v15 = vpop.permute.xlu1 %989  ;;  %v8394_v37 = vld [vmem:[#allocation2 + $0x188] sm:$0xff] }
 0x130   : > { %12213 = vst [vmem:[#allocation78_spill] sm:$0xff] %v8381_v15  ;;  %v8383_v23 = vpop.permute.xlu0 %993  ;;  %v8396_v15 = vld [vmem:[#allocation2 + $0x180] sm:$0xff] }
 0x131   : > { %12214 = vst [vmem:[#allocation79_spill] sm:$0xff] %v8383_v23  ;;  %v12299_v23 = vld [vmem:[#allocation75_spill] sm:$0xff] }
 0x134   : > { %1145 = vrot.lane.b32.xlu2 %v542_v24, %s7690_s25 }
 0x135   : > { %1143 = vrot.lane.b32.xlu1 %v541_v7, %s7690_s25 }
 0x136   : > { %1147 = vrot.lane.b32.xlu0 %v543_v45, %s7690_s25  ;;  %v8388_v25 = vpop.permute.xlu2 %1015 }
 0x137   : > { %12215 = vst [vmem:[#allocation80_spill] sm:$0xff] %v8388_v25  ;;  %v8390_v32 = vpop.permute.xlu1 %995 }
 0x138   : > { %12216 = vst [vmem:[#allocation81_spill] sm:$0xff] %v8390_v32  ;;  %v8392_v33 = vpop.permute.xlu0 %999  ;;  %v739_v32 = vld [vmem:[#allocation2 + $0x49] sm:$0xff] }
 0x139   : > { %12217 = vst [vmem:[#allocation82_spill] sm:$0xff] %v8392_v33 }
 0x13c   : > { %1151 = vrot.lane.b32.xlu2 %v8394_v37, %s7690_s25 }
 0x13d   : > { %1149 = vrot.lane.b32.xlu1 %v8396_v15, %s7690_s25 }
 0x13e   : > { %v8402_v24 = vpop.permute.xlu2 %1021  ;;  %1217 = vrot.lane.b32.xlu0 %v7877_v5, %s7691_s26 }
 0x13f   : > { %12218 = vst [vmem:[#allocation83_spill] sm:$0xff] %v8402_v24  ;;  %v8406_v45 = vpop.permute.xlu1 %1001 }
 0x140   : > { %12219 = vst [vmem:[#allocation84_spill] sm:$0xff] %v8406_v45  ;;  %v8408_v7 = vpop.permute.xlu0 %1005 }
 0x141   : > { %12220 = vst [vmem:[#allocation85_spill] sm:$0xff] %v8408_v7  ;;  %v8676_v7 = vld [vmem:[#allocation2 + $0x18a] sm:$0xff] }
 0x144   : > { %1221 = vrot.lane.b32.xlu2 %v7871_v4, %s7691_s26 }
 0x145   : > { %1219 = vrot.lane.b32.xlu1 %v7929_v19, %s7691_s26 }
 0x146   : > { %1223 = vrot.lane.b32.xlu0 %v7923_v17, %s7691_s26  ;;  %v8416_v25 = vpop.permute.xlu2 %1091 }
 0x147   : > { %v8418_v24 = vpop.permute.xlu1 %1007 }
 0x148   : > { %12221 = vst [vmem:[#allocation86_spill] sm:$0xff] %v8418_v24  ;;  %v8420_v33 = vpop.permute.xlu0 %1011  ;;  %v8552_v24 = vld [vmem:[#allocation2 + $0x189] sm:$0xff] }
 0x149   : > { %12222 = vst [vmem:[#allocation87_spill] sm:$0xff] %v8420_v33  ;;  %v727_v33 = vld [vmem:[#allocation2 + $0x138] sm:$0xff] }
 0x14c   : > { %1227 = vrot.lane.b32.xlu2 %v7951_v28, %s7691_s26 }
 0x14d   : > { %1225 = vrot.lane.b32.xlu1 %v7935_v21, %s7691_s26 }
 0x14e   : > { %1229 = vrot.lane.b32.xlu0 %v7947_v26, %s7691_s26  ;;  %v8428_v4 = vpop.permute.xlu2 %1097 }
 0x14f   : > { %v8430_v5 = vpop.permute.xlu1 %1013 }
 0x150   : > { %12223 = vst [vmem:[#allocation88_spill] sm:$0xff] %v8430_v5  ;;  %v8432_v17 = vpop.permute.xlu0 %1017 }
 0x151   : > { %12224 = vst [vmem:[#allocation89_spill] sm:$0xff] %v8432_v17 }
 0x154   : > { %1233 = vrot.lane.b32.xlu2 %v7974_v35, %s7691_s26 }
 0x155   : > { %1231 = vrot.lane.b32.xlu1 %v7955_v30, %s7691_s26 }
 0x156   : > { %1235 = vrot.lane.b32.xlu0 %v7972_v34, %s7691_s26  ;;  %v8440_v19 = vpop.permute.xlu2 %1103 }
 0x157   : > { %v8442_v21 = vpop.permute.xlu1 %1019 }
 0x158   : > { %12225 = vst [vmem:[#allocation90_spill] sm:$0xff] %v8442_v21  ;;  %v8444_v26 = vpop.permute.xlu0 %1023 }
 0x159   : > { %12226 = vst [vmem:[#allocation91_spill] sm:$0xff] %v8444_v26 }
 0x15c   : > { %1239 = vrot.lane.b32.xlu2 %v7992_v41, %s7691_s26 }
 0x15d   : > { %1237 = vrot.lane.b32.xlu1 %v7976_v36, %s7691_s26 }
 0x15e   : > { %1241 = vrot.lane.b32.xlu0 %v7990_v40, %s7691_s26  ;;  %v8452_v28 = vpop.permute.xlu2 %1109 }
 0x15f   : > { %v8454_v30 = vpop.permute.xlu1 %1089 }
 0x160   : > { %v8456_v34 = vpop.permute.xlu0 %1093 }
 0x164   : > { %1245 = vrot.lane.b32.xlu2 %v8010_v47, %s7691_s26 }
 0x165   : > { %1243 = vrot.lane.b32.xlu1 %v7994_v42, %s7691_s26 }
 0x166   : > { %1247 = vrot.lane.b32.xlu0 %v8008_v46, %s7691_s26  ;;  %v8464_v35 = vpop.permute.xlu2 %1115 }
 0x167   : > { %12227 = vst [vmem:[#allocation92_spill] sm:$0xff] %v8464_v35  ;;  %v8466_v36 = vpop.permute.xlu1 %1095  ;;  %v735_v35 = vld [vmem:[#allocation2 + $0x198] sm:$0xff] }
 0x168   : > { %v8468_v40 = vpop.permute.xlu0 %1099 }
 0x16c   : > { %1251 = vrot.lane.b32.xlu2 %v8024_v51, %s7691_s26 }
 0x16d   : > { %1249 = vrot.lane.b32.xlu1 %v8012_v48, %s7691_s26 }
 0x16e   : > { %1253 = vrot.lane.b32.xlu0 %v8022_v50, %s7691_s26  ;;  %v8476_v41 = vpop.permute.xlu2 %1121 }
 0x16f   : > { %12228 = vst [vmem:[#allocation93_spill] sm:$0xff] %v8476_v41  ;;  %v8478_v42 = vpop.permute.xlu1 %1101  ;;  %v741_v41 = vld [vmem:[#allocation2 + $0x61] sm:$0xff] }
 0x170   : > { %v8480_v46 = vpop.permute.xlu0 %1105 }
 0x174   : > { %1257 = vrot.lane.b32.xlu2 %v8036_v54, %s7691_s26 }
 0x175   : > { %1255 = vrot.lane.b32.xlu1 %v8026_v52, %s7691_s26 }
 0x176   : > { %1259 = vrot.lane.b32.xlu0 %v8034_v53, %s7691_s26  ;;  %v8488_v47 = vpop.permute.xlu2 %1127  ;;  %v12232_v53 = vmov 0.0  }
 0x177   : > { %12229 = vst [vmem:[#allocation94_spill] sm:$0xff] %v8488_v47  ;;  %v8490_v48 = vpop.permute.xlu1 %1107 }
 0x178   : > { %v8492_v50 = vpop.permute.xlu0 %1111  ;;  %4800 = vst.msk [vmem:[#allocation4] sm:$0xff] %vm1923_vm2, %v12232_v53 }
 0x179   : > { %4802 = vst.msk [vmem:[#allocation4 + $0x10] sm:$0xff] %vm1923_vm2, %v12232_v53 }
 0x17a   : > { %4804 = vst.msk [vmem:[#allocation4 + $0x20] sm:$0xff] %vm1923_vm2, %v12232_v53 }
 0x17b   : > { %4806 = vst.msk [vmem:[#allocation4 + $0x30] sm:$0xff] %vm1923_vm2, %v12232_v53 }
 0x17c   : > { %1263 = vrot.lane.b32.xlu2 %v8048_v57, %s7691_s26  ;;  %4808 = vst.msk [vmem:[#allocation4 + $0x40] sm:$0xff] %vm1923_vm2, %v12232_v53 }
 0x17d   : > { %1261 = vrot.lane.b32.xlu1 %v8038_v55, %s7691_s26  ;;  %4810 = vst.msk [vmem:[#allocation4 + $0x50] sm:$0xff] %vm1923_vm2, %v12232_v53 }
 0x17e   : > { %1265 = vrot.lane.b32.xlu0 %v8046_v56, %s7691_s26  ;;  %v8500_v51 = vpop.permute.xlu2 %1133  ;;  %4812 = vst.msk [vmem:[#allocation4 + $0x60] sm:$0xff] %vm1923_vm2, %v12232_v53 }
 0x17f   : > { %12230 = vst [vmem:[#allocation95_spill] sm:$0xff] %v8500_v51  ;;  %v8502_v52 = vpop.permute.xlu1 %1113 }
 0x180   : > { %12231 = vst [vmem:[#allocation96_spill] sm:$0xff] %v8502_v52  ;;  %v8506_v54 = vpop.permute.xlu0 %1117  ;;  %v784_v52 = vld [vmem:[#allocation2 + $0xe2] sm:$0xff] }
 0x181   : > { %12233 = vst [vmem:[#allocation97_spill] sm:$0xff] %v8506_v54  ;;  %v780_v54 = vld [vmem:[#allocation2 + $0xb2] sm:$0xff] }
 0x182   : > { %4814 = vst.msk [vmem:[#allocation4 + $0x70] sm:$0xff] %vm1923_vm2, %v12232_v53 }
 0x183   : > { %4816 = vst.msk [vmem:[#allocation4 + $0x80] sm:$0xff] %vm1923_vm2, %v12232_v53 }
 0x184   : > { %1269 = vrot.lane.b32.xlu2 %v8060_v60, %s7691_s26  ;;  %4818 = vst.msk [vmem:[#allocation4 + $0x90] sm:$0xff] %vm1923_vm2, %v12232_v53  ;;  %v12271_v53 = vld [vmem:[#allocation46_spill] sm:$0xff] }
 0x185   : > { %1267 = vrot.lane.b32.xlu1 %v8050_v58, %s7691_s26  ;;  %v8538_v58 = vld [vmem:[#allocation2 + $0x181] sm:$0xff] }
 0x186   : > { %1271 = vrot.lane.b32.xlu0 %v8058_v59, %s7691_s26  ;;  %v8526_v55 = vpop.permute.xlu2 %1139 }
 0x187   : > { %12234 = vst [vmem:[#allocation98_spill] sm:$0xff] %v8526_v55  ;;  %v8530_v56 = vpop.permute.xlu1 %1119  ;;  %v770_v55 = vld [vmem:[#allocation2 + $0x3a] sm:$0xff] }
 0x188   : > { %12235 = vst [vmem:[#allocation99_spill] sm:$0xff] %v8530_v56  ;;  %v8534_v57 = vpop.permute.xlu0 %1123  ;;  %v746_v56 = vld [vmem:[#allocation2 + $0x99] sm:$0xff] }
 0x189   : > { %12236 = vst [vmem:[#allocation100_spill] sm:$0xff] %v8534_v57  ;;  %v738_v57 = vld [vmem:[#allocation2 + $0x39] sm:$0xff] }
 0x18c   : > { %1275 = vrot.lane.b32.xlu2 %v8070_v63, %s7691_s26 }
 0x18d   : > { %1273 = vrot.lane.b32.xlu1 %v8062_v61, %s7691_s26 }
 0x18e   : > { %1277 = vrot.lane.b32.xlu0 %v8538_v58, %s7691_s26  ;;  %v8546_v59 = vpop.permute.xlu2 %1145 }
 0x18f   : > { %12237 = vst [vmem:[#allocation101_spill] sm:$0xff] %v8546_v59  ;;  %v8548_v60 = vpop.permute.xlu1 %1125  ;;  %v12267_v59 = vld [vmem:[#allocation41_spill] sm:$0xff] }
 0x190   : > { %12238 = vst [vmem:[#allocation102_spill] sm:$0xff] %v8548_v60  ;;  %v8550_v26 = vpop.permute.xlu0 %1129  ;;  %v12286_v60 = vld [vmem:[#allocation66_spill] sm:$0xff] }
 0x191   : > { %12239 = vst [vmem:[#allocation103_spill] sm:$0xff] %v8550_v26  ;;  %v705_v26 = vld [vmem:[#allocation2 + $0x30] sm:$0xff] }
 0x194   : > { %1345 = vrot.lane.b32.xlu2 %v8078_v3, %s7692_s27 }
 0x195   : > { %1279 = vrot.lane.b32.xlu1 %v8552_v24, %s7691_s26 }
 0x196   : > { %1347 = vrot.lane.b32.xlu0 %v8076_v2, %s7692_s27  ;;  %v8560_v61 = vpop.permute.xlu2 %1151 }
 0x197   : > { %12240 = vst [vmem:[#allocation104_spill] sm:$0xff] %v8560_v61  ;;  %v8562_v63 = vpop.permute.xlu1 %1131 }
 0x198   : > { %12241 = vst [vmem:[#allocation105_spill] sm:$0xff] %v8562_v63  ;;  %v8564_v51 = vpop.permute.xlu0 %1135 }
 0x199   : > { %12242 = vst [vmem:[#allocation106_spill] sm:$0xff] %v8564_v51  ;;  %v12258_v51 = vld [vmem:[#allocation26_spill] sm:$0xff] }
 0x19c   : > { %1351 = vrot.lane.b32.xlu2 %v8092_v9, %s7692_s27 }
 0x19d   : > { %1349 = vrot.lane.b32.xlu1 %v8080_v6, %s7692_s27 }
 0x19e   : > { %1353 = vrot.lane.b32.xlu0 %v8090_v8, %s7692_s27  ;;  %v8572_v3 = vpop.permute.xlu2 %1221 }
 0x19f   : > { %v8574_v21 = vpop.permute.xlu1 %1137 }
 0x1a0   : > { %12243 = vst [vmem:[#allocation107_spill] sm:$0xff] %v8574_v21  ;;  %v8576_v2 = vpop.permute.xlu0 %1141  ;;  %v12252_v21 = vld [vmem:[#allocation21_spill] sm:$0xff] }
 0x1a1   : > { %12244 = vst [vmem:[#allocation108_spill] sm:$0xff] %v8576_v2  ;;  %v724_v2 = vld [vmem:[#allocation2 + $0x110] sm:$0xff] }
 0x1a4   : > { %1357 = vrot.lane.b32.xlu2 %v8106_v13, %s7692_s27 }
 0x1a5   : > { %1355 = vrot.lane.b32.xlu1 %v8094_v10, %s7692_s27 }
 0x1a6   : > { %1359 = vrot.lane.b32.xlu0 %v8104_v12, %s7692_s27  ;;  %v8584_v9 = vpop.permute.xlu2 %1227 }
 0x1a7   : > { %v8586_v6 = vpop.permute.xlu1 %1143 }
 0x1a8   : > { %12245 = vst [vmem:[#allocation109_spill] sm:$0xff] %v8586_v6  ;;  %v8588_v8 = vpop.permute.xlu0 %1147  ;;  %v712_v6 = vld [vmem:[#allocation2 + $0x80] sm:$0xff] }
 0x1a9   : > { %12246 = vst [vmem:[#allocation110_spill] sm:$0xff] %v8588_v8 }
 0x1ac   : > { %1363 = vrot.lane.b32.xlu2 %v8122_v20, %s7692_s27 }
 0x1ad   : > { %1361 = vrot.lane.b32.xlu1 %v8108_v14, %s7692_s27 }
 0x1ae   : > { %1365 = vrot.lane.b32.xlu0 %v8120_v18, %s7692_s27  ;;  %v8596_v13 = vpop.permute.xlu2 %1233 }
 0x1af   : > { %v8598_v10 = vpop.permute.xlu1 %1149 }
 0x1b0   : > { %12247 = vst [vmem:[#allocation111_spill] sm:$0xff] %v8598_v10  ;;  %v8600_v12 = vpop.permute.xlu0 %1217  ;;  %v12257_v10 = vld [vmem:[#allocation31_spill] sm:$0xff] }
 0x1b4   : > { %1369 = vrot.lane.b32.xlu2 %v8140_v29, %s7692_s27 }
 0x1b5   : > { %1367 = vrot.lane.b32.xlu1 %v8124_v22, %s7692_s27 }
 0x1b6   : > { %1371 = vrot.lane.b32.xlu0 %v8138_v27, %s7692_s27  ;;  %v8608_v20 = vpop.permute.xlu2 %1239 }
 0x1b7   : > { %v8610_v14 = vpop.permute.xlu1 %1219 }
 0x1b8   : > { %v8612_v18 = vpop.permute.xlu0 %1223 }
 0x1bc   : > { %1375 = vrot.lane.b32.xlu2 %v8158_v39, %s7692_s27 }
 0x1bd   : > { %1373 = vrot.lane.b32.xlu1 %v8142_v31, %s7692_s27 }
 0x1be   : > { %1377 = vrot.lane.b32.xlu0 %v8156_v38, %s7692_s27  ;;  %v8620_v29 = vpop.permute.xlu2 %1245 }
 0x1bf   : > { %12248 = vst [vmem:[#allocation112_spill] sm:$0xff] %v8620_v29  ;;  %v8622_v22 = vpop.permute.xlu1 %1225  ;;  %v510_v29 = vld [vmem:[%s12096_s1 + $0x20] sm:$0xf] }
 0x1c0   : > { %v8624_v27 = vpop.permute.xlu0 %1229  ;;  %7031 = vmatpush.msk.msra.mxu0 %vm2188_vm3, %v510_v29  ;;  %7099 = vmatpush.msk.msra.mxu3 %vm2188_vm3, %v510_v29 }
 0x1c4   : > { %1381 = vrot.lane.b32.xlu2 %v8176_v1, %s7692_s27 }
 0x1c5   : > { %1379 = vrot.lane.b32.xlu1 %v8160_v43, %s7692_s27 }
 0x1c6   : > { %1383 = vrot.lane.b32.xlu0 %v8174_v62, %s7692_s27  ;;  %v8632_v39 = vpop.permute.xlu2 %1251 }
 0x1c7   : > { %12249 = vst [vmem:[#allocation113_spill] sm:$0xff] %v8632_v39  ;;  %v8634_v31 = vpop.permute.xlu1 %1231  ;;  %v737_v39 = vld [vmem:[#allocation2 + $0x31] sm:$0xff] }
 0x1c8   : > { %v8636_v38 = vpop.permute.xlu0 %1235 }
 0x1cc   : > { %1387 = vrot.lane.b32.xlu2 %v8194_v16, %s7692_s27  ;;  %v12253_v16 = vld [vmem:[#allocation25_spill] sm:$0xff] }
 0x1cd   : > { %1385 = vrot.lane.b32.xlu1 %v8178_v0, %s7692_s27 }
 0x1ce   : > { %1389 = vrot.lane.b32.xlu0 %v8192_v49, %s7692_s27  ;;  %v8644_v1 = vpop.permute.xlu2 %1257 }
 0x1cf   : > { %12250 = vst [vmem:[#allocation114_spill] sm:$0xff] %v8644_v1  ;;  %v8646_v43 = vpop.permute.xlu1 %1237  ;;  %v706_v1 = vld [vmem:[#allocation2 + $0x38] sm:$0xff] }
 0x1d0   : > { %v8648_v62 = vpop.permute.xlu0 %1241 }
 0x1d1   : > { %12251 = vst [vmem:[#allocation115_spill] sm:$0xff] %v8648_v62  ;;  %v751_v62 = vld [vmem:[#allocation2 + $0xd9] sm:$0xff] }
 0x1d4   : > { %1393 = vrot.lane.b32.xlu2 %v8212_v11, %s7692_s27  ;;  %v12259_v11 = vld [vmem:[#allocation30_spill] sm:$0xff] }
 0x1d5   : > { %1391 = vrot.lane.b32.xlu1 %v12252_v21, %s7692_s27 }
 0x1d6   : > { %1395 = vrot.lane.b32.xlu0 %v12253_v16, %s7692_s27  ;;  %v8656_v61 = vpop.permute.xlu2 %1263 }
 0x1d7   : > { %12254 = vst [vmem:[#allocation21_spill] sm:$0xff] %v8656_v61  ;;  %v8658_v0 = vpop.permute.xlu1 %1243  ;;  %v8674_v61 = vld [vmem:[#allocation2 + $0x182] sm:$0xff] }
 0x1d8   : > { %12255 = vst [vmem:[#allocation25_spill] sm:$0xff] %v8658_v0  ;;  %v8660_v49 = vpop.permute.xlu0 %1247 }
 0x1d9   : > { %12256 = vst [vmem:[#allocation116_spill] sm:$0xff] %v8660_v49  ;;  %v731_v49 = vld [vmem:[#allocation2 + $0x168] sm:$0xff] }
 0x1dc   : > { %1399 = vrot.lane.b32.xlu2 %v12257_v10, %s7692_s27  ;;  %v12263_v10 = vld [vmem:[#allocation32_spill] sm:$0xff] }
 0x1dd   : > { %1397 = vrot.lane.b32.xlu1 %v12258_v51, %s7692_s27 }
 0x1de   : > { %1401 = vrot.lane.b32.xlu0 %v12259_v11, %s7692_s27  ;;  %v8668_v8 = vpop.permute.xlu2 %1269 }
 0x1df   : > { %12260 = vst [vmem:[#allocation31_spill] sm:$0xff] %v8668_v8  ;;  %v8670_v21 = vpop.permute.xlu1 %1249  ;;  %v718_v8 = vld [vmem:[#allocation2 + $0xc8] sm:$0xff] }
 0x1e0   : > { %12261 = vst [vmem:[#allocation26_spill] sm:$0xff] %v8670_v21  ;;  %v8672_v16 = vpop.permute.xlu0 %1253  ;;  %v740_v21 = vld [vmem:[#allocation2 + $0x51] sm:$0xff] }
 0x1e1   : > { %12262 = vst [vmem:[#allocation30_spill] sm:$0xff] %v8672_v16 }
 0x1e4   : > { %1405 = vrot.lane.b32.xlu2 %v8674_v61, %s7692_s27 }
 0x1e5   : > { %1403 = vrot.lane.b32.xlu1 %v12263_v10, %s7692_s27 }
 0x1e6   : > { %1407 = vrot.lane.b32.xlu0 %v8676_v7, %s7692_s27  ;;  %v8684_v51 = vpop.permute.xlu2 %1275 }
 0x1e7   : > { %12264 = vst [vmem:[#allocation32_spill] sm:$0xff] %v8684_v51  ;;  %v8686_v11 = vpop.permute.xlu1 %1255  ;;  %v709_v51 = vld [vmem:[#allocation2 + $0x60] sm:$0xff] }
 0x1e8   : > { %12265 = vst [vmem:[#allocation117_spill] sm:$0xff] %v8686_v11  ;;  %v8688_v63 = vpop.permute.xlu0 %1259  ;;  %v715_v11 = vld [vmem:[#allocation2 + $0xa8] sm:$0xff] }
 0x1e9   : > { %12266 = vst [vmem:[#allocation118_spill] sm:$0xff] %v8688_v63  ;;  %v12270_v63 = vld [vmem:[#allocation42_spill] sm:$0xff] }
 0x1ec   : > { %1475 = vrot.lane.b32.xlu2 %v706_v1, %s7693_s28 }
 0x1ed   : > { %1473 = vrot.lane.b32.xlu1 %v705_v26, %s7693_s28 }
 0x1ee   : > { %1477 = vrot.lane.b32.xlu0 %v12267_v59, %s7693_s28  ;;  %v8694_v10 = vpop.permute.xlu2 %1345 }
 0x1ef   : > { %v8696_v17 = vpop.permute.xlu1 %1261 }
 0x1f0   : > { %12268 = vst [vmem:[#allocation41_spill] sm:$0xff] %v8696_v17  ;;  %v8698_v45 = vpop.permute.xlu0 %1265 }
 0x1f1   : > { %12269 = vst [vmem:[#allocation119_spill] sm:$0xff] %v8698_v45  ;;  %v12274_v45 = vld [vmem:[#allocation47_spill] sm:$0xff] }
 0x1f4   : > { %1481 = vrot.lane.b32.xlu2 %v709_v51, %s7693_s28  ;;  %v12275_v51 = vld [vmem:[#allocation51_spill] sm:$0xff] }
 0x1f5   : > { %1479 = vrot.lane.b32.xlu1 %v12270_v63, %s7693_s28 }
 0x1f6   : > { %1483 = vrot.lane.b32.xlu0 %v12271_v53, %s7693_s28  ;;  %v8705_v1 = vpop.permute.xlu2 %1351 }
 0x1f7   : > { %v8707_v26 = vpop.permute.xlu1 %1267 }
 0x1f8   : > { %12272 = vst [vmem:[#allocation42_spill] sm:$0xff] %v8707_v26  ;;  %v8709_v59 = vpop.permute.xlu0 %1271  ;;  %v769_v26 = vld [vmem:[#allocation2 + $0x32] sm:$0xff] }
 0x1f9   : > { %12273 = vst [vmem:[#allocation46_spill] sm:$0xff] %v8709_v59  ;;  %v12278_v59 = vld [vmem:[#allocation52_spill] sm:$0xff] }
 0x1fc   : > { %1487 = vrot.lane.b32.xlu2 %v712_v6, %s7693_s28  ;;  %v12279_v6 = vld [vmem:[#allocation56_spill] sm:$0xff] }
 0x1fd   : > { %1485 = vrot.lane.b32.xlu1 %v12274_v45, %s7693_s28 }
 0x1fe   : > { %1489 = vrot.lane.b32.xlu0 %v12275_v51, %s7693_s28  ;;  %v8716_v17 = vpop.permute.xlu2 %1357 }
 0x1ff   : > { %v8718_v63 = vpop.permute.xlu1 %1273 }
 0x200   : > { %12276 = vst [vmem:[#allocation47_spill] sm:$0xff] %v8718_v63  ;;  %v8720_v53 = vpop.permute.xlu0 %1277  ;;  %v721_v63 = vld [vmem:[#allocation2 + $0xf0] sm:$0xff] }
 0x201   : > { %12277 = vst [vmem:[#allocation51_spill] sm:$0xff] %v8720_v53 }
 0x204   : > { %1493 = vrot.lane.b32.xlu2 %v715_v11, %s7693_s28  ;;  %v12281_v11 = vld [vmem:[#allocation60_spill] sm:$0xff] }
 0x205   : > { %1491 = vrot.lane.b32.xlu1 %v12278_v59, %s7693_s28 }
 0x206   : > { %1495 = vrot.lane.b32.xlu0 %v12279_v6, %s7693_s28  ;;  %v8727_v47 = vpop.permute.xlu2 %1363 }
 0x207   : > { %v8729_v45 = vpop.permute.xlu1 %1279 }
 0x208   : > { %12280 = vst [vmem:[#allocation52_spill] sm:$0xff] %v8729_v45  ;;  %v8731_v51 = vpop.permute.xlu0 %1347  ;;  %v12283_v45 = vld [vmem:[#allocation61_spill] sm:$0xff] }
 0x20c   : > { %1499 = vrot.lane.b32.xlu2 %v718_v8, %s7693_s28  ;;  %v12284_v8 = vld [vmem:[#allocation65_spill] sm:$0xff] }
 0x20d   : > { %1497 = vrot.lane.b32.xlu1 %v8310_v44, %s7693_s28 }
 0x20e   : > { %1501 = vrot.lane.b32.xlu0 %v12281_v11, %s7693_s28  ;;  %v8738_v53 = vpop.permute.xlu2 %1369 }
 0x20f   : > { %12282 = vst [vmem:[#allocation56_spill] sm:$0xff] %v8738_v53  ;;  %v8740_v59 = vpop.permute.xlu1 %1349  ;;  %v782_v53 = vld [vmem:[#allocation2 + $0xca] sm:$0xff] }
 0x210   : > { %v8742_v6 = vpop.permute.xlu0 %1353 }
 0x214   : > { %1505 = vrot.lane.b32.xlu2 %v721_v63, %s7693_s28  ;;  %v12287_v63 = vld [vmem:[#allocation70_spill] sm:$0xff] }
 0x215   : > { %1503 = vrot.lane.b32.xlu1 %v12283_v45, %s7693_s28 }
 0x216   : > { %1507 = vrot.lane.b32.xlu0 %v12284_v8, %s7693_s28  ;;  %v8749_v16 = vpop.permute.xlu2 %1375 }
 0x217   : > { %12285 = vst [vmem:[#allocation60_spill] sm:$0xff] %v8749_v16  ;;  %v8751_v44 = vpop.permute.xlu1 %1355  ;;  %v730_v16 = vld [vmem:[#allocation2 + $0x158] sm:$0xff] }
 0x218   : > { %v8753_v11 = vpop.permute.xlu0 %1359 }
 0x21c   : > { %1511 = vrot.lane.b32.xlu2 %v724_v2, %s7693_s28  ;;  %v12289_v2 = vld [vmem:[#allocation71_spill] sm:$0xff] }
 0x21d   : > { %1509 = vrot.lane.b32.xlu1 %v12286_v60, %s7693_s28 }
 0x21e   : > { %1513 = vrot.lane.b32.xlu0 %v12287_v63, %s7693_s28  ;;  %v8760_v5 = vpop.permute.xlu2 %1381 }
 0x21f   : > { %12288 = vst [vmem:[#allocation61_spill] sm:$0xff] %v8760_v5  ;;  %v8762_v45 = vpop.permute.xlu1 %1361 }
 0x220   : > { %v8764_v8 = vpop.permute.xlu0 %1365 }
 0x224   : > { %1729 = vrot.lane.b32.xlu2 %v769_v26, %s7694_s29 }
 0x225   : > { %1601 = vrot.lane.b32.xlu1 %v737_v39, %s7695_s30 }
 0x226   : > { %1515 = vrot.lane.b32.xlu0 %v12289_v2, %s7693_s28  ;;  %v8770_v60 = vpop.permute.xlu2 %1387 }
 0x227   : > { %12290 = vst [vmem:[#allocation65_spill] sm:$0xff] %v8770_v60  ;;  %v8772_v63 = vpop.permute.xlu1 %1367  ;;  %v771_v60 = vld [vmem:[#allocation2 + $0x4a] sm:$0xff] }
 0x228   : > { %12291 = vst [vmem:[#allocation66_spill] sm:$0xff] %v8772_v63  ;;  %v8774_v5 = vpop.permute.xlu0 %1371  ;;  %v12321_v63 = vld [vmem:[#allocation38_spill] sm:$0xff] }
 0x229   : > { %12292 = vst [vmem:[#allocation70_spill] sm:$0xff] %v8774_v5 }
 0x22c   : > { %1731 = vrot.lane.b32.xlu2 %v770_v55, %s7694_s29 }
 0x22d   : > { %1603 = vrot.lane.b32.xlu1 %v738_v57, %s7695_s30 }
 0x22e   : > { %1517 = vrot.lane.b32.xlu0 %v727_v33, %s7693_s28  ;;  %v8779_v26 = vpop.permute.xlu2 %1393 }
 0x22f   : > { %12293 = vst [vmem:[#allocation71_spill] sm:$0xff] %v8779_v26  ;;  %v8781_v39 = vpop.permute.xlu1 %1373  ;;  %v772_v26 = vld [vmem:[#allocation2 + $0x52] sm:$0xff] }
 0x230   : > { %12294 = vst [vmem:[#allocation120_spill] sm:$0xff] %v8781_v39  ;;  %v8783_v2 = vpop.permute.xlu0 %1377  ;;  %v747_v39 = vld [vmem:[#allocation2 + $0xa9] sm:$0xff] }
 0x231   : > { %12295 = vst [vmem:[#allocation121_spill] sm:$0xff] %v8783_v2  ;;  %v742_v2 = vld [vmem:[#allocation2 + $0x69] sm:$0xff] }
 0x234   : > { %1733 = vrot.lane.b32.xlu2 %v771_v60, %s7694_s29 }
 0x235   : > { %1605 = vrot.lane.b32.xlu1 %v739_v32, %s7695_s30 }
 0x236   : > { %1607 = vrot.lane.b32.xlu0 %v740_v21, %s7695_s30  ;;  %v8788_v55 = vpop.permute.xlu2 %1399 }
 0x237   : > { %12296 = vst [vmem:[#allocation122_spill] sm:$0xff] %v8788_v55  ;;  %v8790_v57 = vpop.permute.xlu1 %1379  ;;  %v773_v55 = vld [vmem:[#allocation2 + $0x62] sm:$0xff] }
 0x238   : > { %12297 = vst [vmem:[#allocation123_spill] sm:$0xff] %v8790_v57  ;;  %v8792_v33 = vpop.permute.xlu0 %1383  ;;  %v12303_v57 = vld [vmem:[#allocation76_spill] sm:$0xff] }
 0x239   : > { %12298 = vst [vmem:[#allocation124_spill] sm:$0xff] %v8792_v33  ;;  %v774_v33 = vld [vmem:[#allocation2 + $0x6a] sm:$0xff] }
 0x23c   : > { %1519 = vrot.lane.b32.xlu2 %v12299_v23, %s7693_s28 }
 0x23d   : > { %1735 = vrot.lane.b32.xlu1 %v772_v26, %s7694_s29 }
 0x23e   : > { %1609 = vrot.lane.b32.xlu0 %v741_v41, %s7695_s30  ;;  %v8798_v60 = vpop.permute.xlu2 %1405 }
 0x23f   : > { %12300 = vst [vmem:[#allocation75_spill] sm:$0xff] %v8798_v60  ;;  %v8800_v32 = vpop.permute.xlu1 %1385  ;;  %v743_v60 = vld [vmem:[#allocation2 + $0x79] sm:$0xff] }
 0x240   : > { %12301 = vst [vmem:[#allocation125_spill] sm:$0xff] %v8800_v32  ;;  %v8802_v21 = vpop.permute.xlu0 %1389  ;;  %v775_v32 = vld [vmem:[#allocation2 + $0x7a] sm:$0xff] }
 0x241   : > { %12302 = vst [vmem:[#allocation126_spill] sm:$0xff] %v8802_v21  ;;  %v744_v21 = vld [vmem:[#allocation2 + $0x81] sm:$0xff] }
 0x244   : > { %1521 = vrot.lane.b32.xlu2 %v12303_v57, %s7693_s28 }
 0x245   : > { %1737 = vrot.lane.b32.xlu1 %v773_v55, %s7694_s29 }
 0x246   : > { %1611 = vrot.lane.b32.xlu0 %v742_v2, %s7695_s30  ;;  %v8808_v23 = vpop.permute.xlu2 %1475 }
 0x247   : > { %v8810_v26 = vpop.permute.xlu1 %1391 }
 0x248   : > { %12304 = vst [vmem:[#allocation76_spill] sm:$0xff] %v8810_v26  ;;  %v8812_v41 = vpop.permute.xlu0 %1395  ;;  %v776_v26 = vld [vmem:[#allocation2 + $0x82] sm:$0xff] }
 0x249   : > { %12305 = vst [vmem:[#allocation127_spill] sm:$0xff] %v8812_v41  ;;  %v745_v41 = vld [vmem:[#allocation2 + $0x91] sm:$0xff] }
 0x24c   : > { %1613 = vrot.lane.b32.xlu2 %v743_v60, %s7695_s30 }
 0x24d   : > { %1739 = vrot.lane.b32.xlu1 %v774_v33, %s7694_s29 }
 0x24e   : > { %1741 = vrot.lane.b32.xlu0 %v775_v32, %s7694_s29  ;;  %v8817_v57 = vpop.permute.xlu2 %1481 }
 0x24f   : > { %v8819_v55 = vpop.permute.xlu1 %1397 }
 0x250   : > { %12306 = vst [vmem:[#allocation128_spill] sm:$0xff] %v8819_v55  ;;  %v8821_v2 = vpop.permute.xlu0 %1401  ;;  %v777_v55 = vld [vmem:[#allocation2 + $0x92] sm:$0xff] }
 0x251   : > { %12307 = vst [vmem:[#allocation129_spill] sm:$0xff] %v8821_v2  ;;  %v778_v2 = vld [vmem:[#allocation2 + $0x9a] sm:$0xff] }
 0x254   : > { %1615 = vrot.lane.b32.xlu2 %v744_v21, %s7695_s30 }
 0x255   : > { %1523 = vrot.lane.b32.xlu1 %v730_v16, %s7693_s28 }
 0x256   : > { %1743 = vrot.lane.b32.xlu0 %v776_v26, %s7694_s29  ;;  %v8826_v60 = vpop.permute.xlu2 %1487 }
 0x257   : > { %v8828_v33 = vpop.permute.xlu1 %1403 }
 0x258   : > { %12308 = vst [vmem:[#allocation130_spill] sm:$0xff] %v8828_v33  ;;  %v8830_v32 = vpop.permute.xlu0 %1407  ;;  %v732_v33 = vld [vmem:[#allocation2 + $0x170] sm:$0xff] }
 0x259   : > { %12309 = vst [vmem:[#allocation131_spill] sm:$0xff] %v8830_v32  ;;  %v779_v32 = vld [vmem:[#allocation2 + $0xaa] sm:$0xff] }
 0x25c   : > { %1617 = vrot.lane.b32.xlu2 %v745_v41, %s7695_s30 }
 0x25d   : > { %1525 = vrot.lane.b32.xlu1 %v731_v49, %s7693_s28 }
 0x25e   : > { %1745 = vrot.lane.b32.xlu0 %v777_v55, %s7694_s29  ;;  %v8835_v21 = vpop.permute.xlu2 %1493 }
 0x25f   : > { %v8837_v16 = vpop.permute.xlu1 %1473 }
 0x260   : > { %v8839_v26 = vpop.permute.xlu0 %1477 }
 0x264   : > { %1747 = vrot.lane.b32.xlu2 %v778_v2, %s7694_s29 }
 0x265   : > { %1619 = vrot.lane.b32.xlu1 %v746_v56, %s7695_s30 }
 0x266   : > { %1527 = vrot.lane.b32.xlu0 %v732_v33, %s7693_s28  ;;  %v8844_v41 = vpop.permute.xlu2 %1499 }
 0x267   : > { %12310 = vst [vmem:[#allocation132_spill] sm:$0xff] %v8844_v41  ;;  %v8846_v49 = vpop.permute.xlu1 %1479  ;;  %v507_v41 = vld [vmem:[%s12096_s1 + $0x8] sm:$0xff] }
 0x268   : > { %v8848_v55 = vpop.permute.xlu0 %1483 }
 0x26c   : > { %1749 = vrot.lane.b32.xlu2 %v779_v32, %s7694_s29  ;;  %v748_v32 = vld [vmem:[#allocation2 + $0xb1] sm:$0xff] }
 0x26d   : > { %1621 = vrot.lane.b32.xlu1 %v747_v39, %s7695_s30  ;;  %v509_v39 = vld [vmem:[%s12096_s1 + $0x18] sm:$0xff] }
 0x26e   : > { %1529 = vrot.lane.b32.xlu0 %v8396_v15, %s7693_s28  ;;  %v8854_v2 = vpop.permute.xlu2 %1505  ;;  %v508_v15 = vld [vmem:[%s12096_s1 + $0x10] sm:$0xff]  ;;  %2204 = vmatpush.msra.mxu0 %v509_v39 }
 0x26f   : > { %12311 = vst [vmem:[#allocation133_spill] sm:$0xff] %v8854_v2  ;;  %v8856_v56 = vpop.permute.xlu1 %1485  ;;  %v749_v2 = vld [vmem:[#allocation2 + $0xc1] sm:$0xff]  ;;  %7100 = vmatpush.msra.mxu3 %v509_v39 }
 0x270   : > { %v8858_v33 = vpop.permute.xlu0 %1489  ;;  %2205 = vmatpush.msra.mxu0 %v508_v15  ;;  %v781_v39 = vld [vmem:[#allocation2 + $0xc2] sm:$0xff] }
 0x271   : > { %7101 = vmatpush.msra.mxu3 %v508_v15 }
 0x272   : > { %2206 = vmatpush.msra.mxu0 %v507_v41 }
 0x273   : > { %7102 = vmatpush.msra.mxu3 %v507_v41 }
 0x274   : > { %1751 = vrot.lane.b32.xlu2 %v780_v54, %s7694_s29  ;;  %v506_v54 = vld [vmem:[%s12096_s1] sm:$0xff] }
 0x275   : > { %1623 = vrot.lane.b32.xlu1 %v748_v32, %s7695_s30  ;;  %2207 = vmatpush.msra.mxu0 %v506_v54  ;;  %v750_v32 = vld [vmem:[#allocation2 + $0xc9] sm:$0xff] }
 0x276   : > { %1625 = vrot.lane.b32.xlu0 %v749_v2, %s7695_s30  ;;  %v8875_v29 = vpop.permute.xlu2 %1511  ;;  %7103 = vmatpush.msra.mxu3 %v506_v54 }
 0x277   : > { %12312 = vst [vmem:[#allocation134_spill] sm:$0xff] %v8875_v29  ;;  %v8877_v5 = vpop.permute.xlu1 %1491 }
 0x278   : > { %v8879_v0 = vpop.permute.xlu0 %1495 }
 0x279   : > { %12313 = vst [vmem:[#allocation135_spill] sm:$0xff] %v8879_v0  ;;  %v736_v0 = vld [vmem:[#allocation2 + $0x1a0] sm:$0xff] }
 0x27c   : > { %1531 = vrot.lane.b32.xlu2 %v8394_v37, %s7693_s28 }
 0x27d   : > { %1753 = vrot.lane.b32.xlu1 %v781_v39, %s7694_s29  ;;  %v752_v39 = vld [vmem:[#allocation2 + $0xe1] sm:$0xff] }
 0x27e   : > { %1627 = vrot.lane.b32.xlu0 %v750_v32, %s7695_s30  ;;  %v1730_v2 = vpop.permute.xlu2 %1729  ;;  %v783_v32 = vld [vmem:[#allocation2 + $0xda] sm:$0xff] }
 0x27f   : > { %v8888_v15 = vpop.permute.xlu1 %1497 }
 0x280   : > { %12314 = vst [vmem:[#allocation136_spill] sm:$0xff] %v8888_v15  ;;  %v8890_v29 = vpop.permute.xlu0 %1501  ;;  %v12320_v15 = vld [vmem:[#allocation7_spill] sm:$0xff] }
 0x281   : > { %12315 = vst [vmem:[#allocation137_spill] sm:$0xff] %v8890_v29 }
 0x284   : > { %1533 = vrot.lane.b32.xlu2 %v735_v35, %s7693_s28  ;;  %v512_v35 = vld [vmem:[#allocation2] sm:$0xff] }
 0x285   : > { %1755 = vrot.lane.b32.xlu1 %v782_v53, %s7694_s29 }
 0x286   : > { %1629 = vrot.lane.b32.xlu0 %v751_v62, %s7695_s30  ;;  %v1732_v41 = vpop.permute.xlu2 %1731 }
 0x287   : > { %v8895_v37 = vpop.permute.xlu1 %1503 }
 0x288   : > { %12316 = vst [vmem:[#allocation138_spill] sm:$0xff] %v8895_v37  ;;  %v8897_v54 = vpop.permute.xlu0 %1507  ;;  %v753_v37 = vld [vmem:[#allocation2 + $0xf1] sm:$0xff] }
 0x289   : > { %12317 = vst [vmem:[#allocation139_spill] sm:$0xff] %v8897_v54  ;;  %v1825_v54 = vsel %vm385_vm0, %v512_v35, %v12320_v15 }
 0x28c   : > { %1631 = vrot.lane.b32.xlu2 %v752_v39, %s7695_s30  ;;  %v1858_v39 = vsel %vm1857_vm4, %v1825_v54, %v12321_v63  ;;  %v513_v54 = vld [vmem:[#allocation2 + $0x8] sm:$0xff] }
 0x28d   : > { %1757 = vrot.lane.b32.xlu1 %v783_v32, %s7694_s29  ;;  %v785_v32 = vld [vmem:[#allocation2 + $0xf2] sm:$0xff] }
 0x28e   : > { %1759 = vrot.lane.b32.xlu0 %v784_v52, %s7694_s29  ;;  %v8902_v29 = vpop.permute.xlu2 %1733  ;;  %v1891_v52 = vsel %vm1890_vm5, %v1858_v39, %v8454_v30  ;;  %v786_v39 = vld [vmem:[#allocation2 + $0xfa] sm:$0xff] }
 0x28f   : > { %v8904_v53 = vpop.permute.xlu1 %1509 }
 0x290   : > { %12318 = vst [vmem:[#allocation140_spill] sm:$0xff] %v8904_v53  ;;  %v8906_v62 = vpop.permute.xlu0 %1513  ;;  %v1924_v53 = vsel %vm1923_vm2, %v1891_v52, %v8600_v12  ;;  %v12324_v52 = vld [vmem:[#allocation55_spill] sm:$0xff] }
 0x291   : > { %12319 = vst [vmem:[#allocation141_spill] sm:$0xff] %v8906_v62  ;;  %v1957_v15 = vsel %vm1956_vm6, %v1924_v53, %v8694_v10  ;;  %v12323_v10 = vld [vmem:[#allocation11_spill] sm:$0xff] }
 0x292   : > { %v1990_v30 = vsel %vm1989_vm8, %v1957_v15, %v8837_v16  ;;  %v1826_v53 = vsel %vm385_vm0, %v513_v54, %v12323_v10  ;;  %v755_v62 = vld [vmem:[#allocation2 + $0x109] sm:$0xff] }
 0x294   : > { %1633 = vrot.lane.b32.xlu2 %v753_v37, %s7695_s30 }
 0x295   : > { %1535 = vrot.lane.b32.xlu1 %v736_v0, %s7693_s28 }
 0x296   : > { %1761 = vrot.lane.b32.xlu0 %v785_v32, %s7694_s29  ;;  %v8921_v63 = vpop.permute.xlu2 %1519  ;;  %v754_v32 = vld [vmem:[#allocation2 + $0xf9] sm:$0xff] }
 0x297   : > { %12322 = vst [vmem:[#allocation7_spill] sm:$0xff] %v8921_v63  ;;  %v1602_v37 = vpop.permute.xlu1 %1601  ;;  %v1859_v63 = vsel %vm1857_vm4, %v1826_v53, %v12324_v52 }
 0x298   : > { %v2023_v12 = vsel %vm2022_vm7, %v1990_v30, %v1602_v37  ;;  %v8926_v35 = vpop.permute.xlu0 %1515  ;;  %v1892_v16 = vsel %vm1890_vm5, %v1859_v63, %v8416_v25 }
 0x299   : > { %v2056_v0 = vsel %vm2055_vm9, %v2023_v12, %v1730_v2  ;;  %v1925_v15 = vsel %vm1923_vm2, %v1892_v16, %v8610_v14  ;;  %v787_v14 = vld [vmem:[#allocation2 + $0x10a] sm:$0xff] }
 0x29a   : > { %7032 = vmatmul.msk.f32.vlgmr.msra.gmra.mxu0 %vm2091_vm10, %v2056_v0  ;;  %v1958_v2 = vsel %vm1956_vm6, %v1925_v15, %v8731_v51  ;;  %v12325_v0 = vld [vmem:[#allocation9_spill] sm:$0xff]  ;;  %v756_v51 = vld [vmem:[#allocation2 + $0x111] sm:$0xff] }
 0x29b   : > { %v1991_v30 = vsel %vm1989_vm8, %v1958_v2, %v8808_v23 }
 0x29c   : > { %1763 = vrot.lane.b32.xlu2 %v786_v39, %s7694_s29  ;;  %v12326_v39 = vld [vmem:[#allocation37_spill] sm:$0xff] }
 0x29d   : > { %1635 = vrot.lane.b32.xlu1 %v754_v32, %s7695_s30  ;;  %v1827_v10 = vsel %vm385_vm0, %v12326_v39, %v12325_v0  ;;  %v762_v32 = vld [vmem:[#allocation2 + $0x159] sm:$0xff] }
 0x29e   : > { %1637 = vrot.lane.b32.xlu0 %v755_v62, %s7695_s30  ;;  %v8943_v54 = vpop.permute.xlu2 %1521  ;;  %v12327_v62 = vld [vmem:[#allocation58_spill] sm:$0xff]  ;;  %v794_v39 = vld [vmem:[#allocation2 + $0x15a] sm:$0xff] }
 0x29f   : > { %v1604_v37 = vpop.permute.xlu1 %1603  ;;  %v1860_v53 = vsel %vm1857_vm4, %v1827_v10, %v12327_v62  ;;  %v763_v10 = vld [vmem:[#allocation2 + $0x169] sm:$0xff] }
 0x2a0   : > { %v2024_v25 = vsel %vm2022_vm7, %v1991_v30, %v1604_v37  ;;  %v8948_v63 = vpop.permute.xlu0 %1517  ;;  %v1893_v23 = vsel %vm1890_vm5, %v1860_v53, %v8456_v34  ;;  %v12328_v37 = vld [vmem:[#allocation13_spill] sm:$0xff] }
 0x2a1   : > { %v2057_v12 = vsel %vm2055_vm9, %v2024_v25, %v1732_v41  ;;  %v1926_v41 = vsel %vm1923_vm2, %v1893_v23, %v8572_v3  ;;  %v12329_v25 = vld [vmem:[#allocation36_spill] sm:$0xff] }
 0x2a2   : > { %7033 = vmatmul.msk.f32.gmra.mxu0 %vm2091_vm10, %v2057_v12  ;;  %v1959_v52 = vsel %vm1956_vm6, %v1926_v41, %v8740_v59  ;;  %v1828_v3 = vsel %vm385_vm0, %v12329_v25, %v12328_v37  ;;  %v12330_v59 = vld [vmem:[#allocation43_spill] sm:$0xff]  ;;  %v789_v25 = vld [vmem:[#allocation2 + $0x122] sm:$0xff] }
 0x2a3   : > { %v1992_v15 = vsel %vm1989_vm8, %v1959_v52, %v8839_v26  ;;  %v1861_v0 = vsel %vm1857_vm4, %v1828_v3, %v12330_v59  ;;  %v7650_v41 = vld [vmem:[#allocation2 + $0x30] sm:$0xff]  ;;  %v12331_v52 = vld [vmem:[#allocation5_spill] sm:$0xff] }
 0x2a4   : > { %1765 = vrot.lane.b32.xlu2 %v787_v14, %s7694_s29  ;;  %v788_v14 = vld [vmem:[#allocation2 + $0x112] sm:$0xff]  ;;  %v1894_v26 = vsel %vm1890_vm5, %v1861_v0, %v8466_v36 }
 0x2a5   : > { %1639 = vrot.lane.b32.xlu1 %v756_v51, %s7695_s30  ;;  %v1927_v51 = vsel %vm1923_vm2, %v1894_v26, %v8612_v18  ;;  %v12333_v26 = vld [vmem:[#allocation6_spill] sm:$0xff] }
 0x2a6   : > { %1651 = vrot.lane.b32.xlu0 %v762_v32, %s7695_s30  ;;  %v8966_v16 = vpop.permute.xlu2 %1613  ;;  %v1960_v62 = vsel %vm1956_vm6, %v1927_v51, %v8705_v1  ;;  %v757_v1 = vld [vmem:[#allocation2 + $0x121] sm:$0xff]  ;;  %v12334_v51 = vld [vmem:[#allocation63_spill] sm:$0xff] }
 0x2a7   : > { %v1606_v2 = vpop.permute.xlu1 %1605 }
 0x2a8   : > { %v2025_v34 = vsel %vm2022_vm7, %v1992_v15, %v1606_v2  ;;  %v1608_v30 = vpop.permute.xlu0 %1607  ;;  %v1829_v15 = vsel %vm385_vm0, %v7650_v41, %v12331_v52  ;;  %v12332_v2 = vld [vmem:[#allocation59_spill] sm:$0xff] }
 0x2a9   : > { %v2058_v12 = vsel %vm2055_vm9, %v2025_v34, %v8902_v29  ;;  %v1993_v29 = vsel %vm1989_vm8, %v1960_v62, %v8846_v49  ;;  %v1862_v34 = vsel %vm1857_vm4, %v1829_v15, %v12332_v2  ;;  %v795_v49 = vld [vmem:[#allocation2 + $0x16a] sm:$0xff] }
 0x2aa   : > { %7034 = vmatmul.msk.f32.gmra.mxu0 %vm2091_vm10, %v2058_v12  ;;  %v2026_v36 = vsel %vm2022_vm7, %v1993_v29, %v1608_v30  ;;  %v1895_v37 = vsel %vm1890_vm5, %v1862_v34, %v8428_v4  ;;  %v12335_v2 = vld [vmem:[#allocation14_spill] sm:$0xff] }
 0x2ab   : > { %v1928_v30 = vsel %vm1923_vm2, %v1895_v37, %v8622_v22 }
 0x2ac   : > { %1767 = vrot.lane.b32.xlu2 %v788_v14, %s7694_s29  ;;  %v1961_v3 = vsel %vm1956_vm6, %v1928_v30, %v8742_v6  ;;  %v796_v6 = vld [vmem:[#allocation2 + $0x172] sm:$0xff] }
 0x2ad   : > { %1779 = vrot.lane.b32.xlu1 %v794_v39, %s7694_s29  ;;  %v1994_v12 = vsel %vm1989_vm8, %v1961_v3, %v8817_v57  ;;  %v7651_v39 = vld [vmem:[#allocation2 + $0x38] sm:$0xff] }
 0x2ae   : > { %1653 = vrot.lane.b32.xlu0 %v763_v10, %s7695_s30  ;;  %v8990_v53 = vpop.permute.xlu2 %1615  ;;  %v1830_v10 = vsel %vm385_vm0, %v7651_v39, %v12333_v26  ;;  %v764_v57 = vld [vmem:[#allocation2 + $0x171] sm:$0xff] }
 0x2af   : > { %v1736_v32 = vpop.permute.xlu1 %1735  ;;  %v1863_v62 = vsel %vm1857_vm4, %v1830_v10, %v12334_v51  ;;  %v12338_v39 = vld [vmem:[#allocation64_spill] sm:$0xff] }
 0x2b0   : > { %v1610_v23 = vpop.permute.xlu0 %1609  ;;  %v2059_v18 = vsel %vm2055_vm9, %v2026_v36, %v1736_v32  ;;  %v1896_v29 = vsel %vm1890_vm5, %v1863_v62, %v8468_v40  ;;  %v758_v36 = vld [vmem:[#allocation2 + $0x129] sm:$0xff] }
 0x2b1   : > { %v2027_v4 = vsel %vm2022_vm7, %v1994_v12, %v1610_v23  ;;  %v1929_v32 = vsel %vm1923_vm2, %v1896_v29, %v8584_v9  ;;  %v760_v29 = vld [vmem:[#allocation2 + $0x141] sm:$0xff] }
 0x2b2   : > { %7035 = vmatmul.msk.f32.gmra.mxu0 %vm2091_vm10, %v2059_v18  ;;  %v1962_v23 = vsel %vm1956_vm6, %v1929_v32, %v8751_v44  ;;  %v790_v44 = vld [vmem:[#allocation2 + $0x12a] sm:$0xff]  ;;  %v12339_v32 = vld [vmem:[#allocation8_spill] sm:$0xff] }
 0x2b3   : > { %v1995_v18 = vsel %vm1989_vm8, %v1962_v23, %v8848_v55 }
 0x2b4   : > { %1641 = vrot.lane.b32.xlu2 %v757_v1, %s7695_s30  ;;  %v7652_v1 = vld [vmem:[#allocation2 + $0x48] sm:$0xff] }
 0x2b5   : > { %1781 = vrot.lane.b32.xlu1 %v795_v49, %s7694_s29  ;;  %v1831_v34 = vsel %vm385_vm0, %v7652_v1, %v12335_v2  ;;  %v12336_v49 = vld [vmem:[#allocation48_spill] sm:$0xff]  ;;  %v12341_v1 = vld [vmem:[#allocation17_spill] sm:$0xff] }
 0x2b6   : > { %1769 = vrot.lane.b32.xlu0 %v789_v25, %s7694_s29  ;;  %v9010_v14 = vpop.permute.xlu2 %1617  ;;  %v1864_v55 = vsel %vm1857_vm4, %v1831_v34, %v12336_v49  ;;  %v799_v49 = vld [vmem:[#allocation2 + $0x19a] sm:$0xff] }
 0x2b7   : > { %v1738_v59 = vpop.permute.xlu1 %1737  ;;  %v1897_v37 = vsel %vm1890_vm5, %v1864_v55, %v8478_v42 }
 0x2b8   : > { %v1612_v0 = vpop.permute.xlu0 %1611  ;;  %v2060_v22 = vsel %vm2055_vm9, %v2027_v4, %v1738_v59  ;;  %v1930_v25 = vsel %vm1923_vm2, %v1897_v37, %v8624_v27  ;;  %v791_v59 = vld [vmem:[#allocation2 + $0x13a] sm:$0xff] }
 0x2b9   : > { %v2028_v40 = vsel %vm2022_vm7, %v1995_v18, %v1612_v0  ;;  %v1963_v30 = vsel %vm1956_vm6, %v1930_v25, %v8716_v17  ;;  %v7653_v0 = vld [vmem:[#allocation2 + $0x50] sm:$0xff]  ;;  %v792_v18 = vld [vmem:[#allocation2 + $0x142] sm:$0xff] }
 0x2ba   : > { %7036 = vmatmul.msk.f32.gmra.mxu0 %vm2091_vm10, %v2060_v22  ;;  %v1996_v12 = vsel %vm1989_vm8, %v1963_v30, %v8856_v56  ;;  %v12337_v22 = vld [vmem:[#allocation16_spill] sm:$0xff] }
 0x2bb   : > { %v1832_v17 = vsel %vm385_vm0, %v7653_v0, %v12337_v22  ;;  %v761_v25 = vld [vmem:[#allocation2 + $0x151] sm:$0xff]  ;;  %v768_v22 = vld [vmem:[#allocation2 + $0x1a1] sm:$0xff] }
 0x2bc   : > { %1783 = vrot.lane.b32.xlu2 %v796_v6, %s7694_s29  ;;  %v1865_v26 = vsel %vm1857_vm4, %v1832_v17, %v12338_v39 }
 0x2bd   : > { %1655 = vrot.lane.b32.xlu1 %v764_v57, %s7695_s30  ;;  %v1898_v56 = vsel %vm1890_vm5, %v1865_v26, %v8440_v19  ;;  %v800_v26 = vld [vmem:[#allocation2 + $0x1a2] sm:$0xff] }
 0x2be   : > { %1643 = vrot.lane.b32.xlu0 %v758_v36, %s7695_s30  ;;  %v9030_v41 = vpop.permute.xlu2 %1747  ;;  %v7654_v36 = vld [vmem:[#allocation2 + $0x60] sm:$0xff] }
 0x2bf   : > { %v1740_v52 = vpop.permute.xlu1 %1739 }
 0x2c0   : > { %v1742_v15 = vpop.permute.xlu0 %1741  ;;  %v2061_v9 = vsel %vm2055_vm9, %v2028_v40, %v1740_v52 }
 0x2c2   : > { %7037 = vmatmul.msk.f32.gmra.mxu0 %vm2091_vm10, %v2061_v9 }
 0x2c4   : > { %1657 = vrot.lane.b32.xlu2 %v8538_v58, %s7695_s30  ;;  %v2029_v58 = vsel %vm2022_vm7, %v1996_v12, %v8966_v16  ;;  %v1931_v16 = vsel %vm1923_vm2, %v1898_v56, %v8634_v31 }
 0x2c5   : > { %1771 = vrot.lane.b32.xlu1 %v790_v44, %s7694_s29  ;;  %v2062_v27 = vsel %vm2055_vm9, %v2029_v58, %v1742_v15  ;;  %v1964_v10 = vsel %vm1956_vm6, %v1931_v16, %v8753_v11  ;;  %v1833_v11 = vsel %vm385_vm0, %v7654_v36, %v12339_v32  ;;  %v12347_v32 = vld [vmem:[#allocation66_spill] sm:$0xff] }
 0x2c6   : > { %1785 = vrot.lane.b32.xlu0 %v8674_v61, %s7694_s29  ;;  %v9050_v3 = vpop.permute.xlu2 %1749  ;;  %v759_v61 = vld [vmem:[#allocation2 + $0x139] sm:$0xff]  ;;  %v1997_v51 = vsel %vm1989_vm8, %v1964_v10, %v8826_v60 }
 0x2c7   : > { %v9054_v42 = vpop.permute.xlu1 %1523  ;;  %v2030_v19 = vsel %vm2022_vm7, %v1997_v51, %v8990_v53  ;;  %v7657_v51 = vld [vmem:[#allocation2 + $0x80] sm:$0xff] }
 0x2c8   : > { %v1744_v4 = vpop.permute.xlu0 %1743 }
 0x2c9   : > { %v2063_v31 = vsel %vm2055_vm9, %v2030_v19, %v1744_v4  ;;  %v7656_v4 = vld [vmem:[#allocation2 + $0x78] sm:$0xff] }
 0x2ca   : > { %7038 = vmatmul.msk.f32.gmra.mxu0 %vm2091_vm10, %v2062_v27 }
 0x2cc   : > { %1773 = vrot.lane.b32.xlu2 %v791_v59, %s7694_s29 }
 0x2cd   : > { %1645 = vrot.lane.b32.xlu1 %v759_v61, %s7695_s30  ;;  %v793_v61 = vld [vmem:[#allocation2 + $0x152] sm:$0xff] }
 0x2ce   : > { %1659 = vrot.lane.b32.xlu0 %v8552_v24, %s7695_s30  ;;  %v9074_v6 = vpop.permute.xlu2 %1751  ;;  %v12340_v24 = vld [vmem:[#allocation68_spill] sm:$0xff] }
 0x2cf   : > { %v9078_v62 = vpop.permute.xlu1 %1525  ;;  %v1866_v23 = vsel %vm1857_vm4, %v1833_v11, %v12340_v24  ;;  %v12348_v24 = vld [vmem:[#allocation135_spill] sm:$0xff] }
 0x2d0   : > { %v1746_v57 = vpop.permute.xlu0 %1745  ;;  %v1899_v60 = vsel %vm1890_vm5, %v1866_v23, %v8480_v46  ;;  %v7655_v46 = vld [vmem:[#allocation2 + $0x68] sm:$0xff] }
 0x2d1   : > { %v1932_v53 = vsel %vm1923_vm2, %v1899_v60, %v8596_v13  ;;  %v1834_v2 = vsel %vm385_vm0, %v7655_v46, %v12341_v1  ;;  %v12351_v1 = vld [vmem:[#allocation96_spill] sm:$0xff] }
 0x2d2   : > { %7039 = vmatmul.msk.f32.gmra.mxu0 %vm2091_vm10, %v2063_v31  ;;  %v1965_v40 = vsel %vm1956_vm6, %v1932_v53, %v8762_v45 }
 0x2d3   : > { %v1998_v15 = vsel %vm1989_vm8, %v1965_v40, %v8858_v33  ;;  %v767_v33 = vld [vmem:[#allocation2 + $0x199] sm:$0xff]  ;;  %v7658_v40 = vld [vmem:[#allocation2 + $0x90] sm:$0xff] }
 0x2d4   : > { %1647 = vrot.lane.b32.xlu2 %v760_v29, %s7695_s30  ;;  %v2031_v13 = vsel %vm2022_vm7, %v1998_v15, %v9010_v14  ;;  %v12349_v15 = vld [vmem:[#allocation20_spill] sm:$0xff] }
 0x2d5   : > { %1787 = vrot.lane.b32.xlu1 %v8676_v7, %s7694_s29  ;;  %v12342_v7 = vld [vmem:[#allocation53_spill] sm:$0xff]  ;;  %v2064_v44 = vsel %vm2055_vm9, %v2031_v13, %v1746_v57  ;;  %v12352_v13 = vld [vmem:[#allocation115_spill] sm:$0xff] }
 0x2d6   : > { %1775 = vrot.lane.b32.xlu0 %v792_v18, %s7694_s29  ;;  %v9098_v52 = vpop.permute.xlu2 %1531  ;;  %v1867_v45 = vsel %vm1857_vm4, %v1834_v2, %v12342_v7 }
 0x2d7   : > { %v1620_v9 = vpop.permute.xlu1 %1619  ;;  %v1900_v55 = vsel %vm1890_vm5, %v1867_v45, %v8490_v48  ;;  %v12353_v45 = vld [vmem:[#allocation56_spill] sm:$0xff] }
 0x2d8   : > { %v9106_v34 = vpop.permute.xlu0 %1527  ;;  %v1933_v37 = vsel %vm1923_vm2, %v1900_v55, %v8636_v38  ;;  %v12343_v38 = vld [vmem:[#allocation19_spill] sm:$0xff] }
 0x2d9   : > { %v1966_v14 = vsel %vm1956_vm6, %v1933_v37, %v8727_v47  ;;  %v1835_v27 = vsel %vm385_vm0, %v7656_v4, %v12343_v38  ;;  %v12344_v47 = vld [vmem:[#allocation69_spill] sm:$0xff]  ;;  %v12356_v38 = vld [vmem:[#allocation74_spill] sm:$0xff] }
 0x2da   : > { %7040 = vmatmul.msk.f32.gmra.mxu0 %vm2091_vm10, %v2064_v44  ;;  %v1999_v30 = vsel %vm1989_vm8, %v1966_v14, %v8877_v5  ;;  %v1868_v0 = vsel %vm1857_vm4, %v1835_v27, %v12344_v47  ;;  %v12357_v47 = vld [vmem:[#allocation92_spill] sm:$0xff] }
 0x2db   : > { %v2032_v12 = vsel %vm2022_vm7, %v1999_v30, %v1620_v9  ;;  %v1901_v17 = vsel %vm1890_vm5, %v1868_v0, %v8452_v28  ;;  %v1837_v9 = vsel %vm385_vm0, %v7658_v40, %v12349_v15  ;;  %v7659_v30 = vld [vmem:[#allocation2 + $0x98] sm:$0xff]  ;;  %v7661_v15 = vld [vmem:[#allocation2 + $0xb0] sm:$0xff] }
 0x2dc   : > { %1789 = vrot.lane.b32.xlu2 %v799_v49, %s7694_s29  ;;  %v2065_v5 = vsel %vm2055_vm9, %v2032_v12, %v9030_v41  ;;  %v1934_v39 = vsel %vm1923_vm2, %v1901_v17, %v8646_v43  ;;  %v12345_v43 = vld [vmem:[#allocation10_spill] sm:$0xff]  ;;  %v7696_v49 = vmov -inf   ;;  %v12355_v12 = vld [vmem:[#allocation23_spill] sm:$0xff] }
 0x2dd   : > { %1661 = vrot.lane.b32.xlu1 %v767_v33, %s7695_s30  ;;  %v1967_v56 = vsel %vm1956_vm6, %v1934_v39, %v8764_v8  ;;  %v1836_v19 = vsel %vm385_vm0, %v7657_v51, %v12345_v43  ;;  %v12346_v8 = vld [vmem:[#allocation73_spill] sm:$0xff]  ;;  %2309 = vst.msk [vmem:[#allocation3 + $0x18] sm:$0xff] %vm1923_vm2, %v7696_v49  ;;  %v12359_v17 = vld [vmem:[#allocation70_spill] sm:$0xff]  ;;  %v12360_v39 = vld [vmem:[#allocation132_spill] sm:$0xff] }
 0x2de   : > { %1649 = vrot.lane.b32.xlu0 %v761_v25, %s7695_s30  ;;  %v9124_v48 = vpop.permute.xlu2 %1533  ;;  %v2000_v16 = vsel %vm1989_vm8, %v1967_v56, %v8835_v21  ;;  %v1869_v31 = vsel %vm1857_vm4, %v1836_v19, %v12346_v8  ;;  %2310 = vst.msk [vmem:[#allocation3 + $0x20] sm:$0xff] %vm1923_vm2, %v7696_v49  ;;  %v7660_v51 = vld [vmem:[#allocation2 + $0xa8] sm:$0xff]  ;;  %v12361_v43 = vld [vmem:[#allocation12_spill] sm:$0xff] }
 0x2df   : > { %v1622_v58 = vpop.permute.xlu1 %1621  ;;  %v1902_v29 = vsel %vm1890_vm5, %v1869_v31, %v8492_v50  ;;  %2305 = vst.msk [vmem:[#allocation3] sm:$0xff] %vm1923_vm2, %v7696_v49  ;;  %v1839_v19 = vsel %vm385_vm0, %v7660_v51, %v12361_v43  ;;  %v12363_v31 = vld [vmem:[#allocation97_spill] sm:$0xff]  ;;  %v7663_v51 = vld [vmem:[#allocation2 + $0xc8] sm:$0xff]  ;;  %v12379_v43 = vld [vmem:[#allocation15_spill] sm:$0xff] }
 0x2e0   : > { %v9128_v59 = vpop.permute.xlu0 %1529  ;;  %v2033_v41 = vsel %vm2022_vm7, %v2000_v16, %v1622_v58  ;;  %v1935_v36 = vsel %vm1923_vm2, %v1902_v29, %v8608_v20  ;;  %v12350_v20 = vld [vmem:[#allocation57_spill] sm:$0xff]  ;;  %2306 = vst.msk [vmem:[#allocation3 + $0x8] sm:$0xff] %vm1923_vm2, %v7696_v49  ;;  %v1838_v58 = vsel %vm385_vm0, %v7659_v30, %v12355_v12 }
 0x2e1   : > { %v2066_v21 = vsel %vm2055_vm9, %v2033_v41, %v9050_v3  ;;  %v1968_v11 = vsel %vm1956_vm6, %v1935_v36, %v12347_v32  ;;  %v1870_v46 = vsel %vm1857_vm4, %v1837_v9, %v12350_v20  ;;  %2312 = vst.msk [vmem:[#allocation3 + $0x30] sm:$0xff] %vm1923_vm2, %v7696_v49  ;;  %v1871_v27 = vsel %vm1857_vm4, %v1838_v58, %v12356_v38  ;;  %v12364_v36 = vld [vmem:[#allocation112_spill] sm:$0xff]  ;;  %v7662_v58 = vld [vmem:[#allocation2 + $0xc0] sm:$0xff] }
 0x2e2   : > { %7041 = vmatmul.msk.f32.gmra.mxu0 %vm2091_vm10, %v2065_v5  ;;  %v2001_v23 = vsel %vm1989_vm8, %v1968_v11, %v12348_v24  ;;  %v1903_v2 = vsel %vm1890_vm5, %v1870_v46, %v12351_v1  ;;  %2313 = vst.msk [vmem:[#allocation3 + $0x38] sm:$0xff] %vm1923_vm2, %v7696_v49  ;;  %v1904_v0 = vsel %vm1890_vm5, %v1871_v27, %v12357_v47  ;;  %v12358_v5 = vld [vmem:[#allocation25_spill] sm:$0xff]  ;;  %v12365_v11 = vld [vmem:[#allocation120_spill] sm:$0xff]  ;;  %v12368_v46 = vld [vmem:[#allocation62_spill] sm:$0xff] }
 0x2e3   : > { %v1936_v7 = vsel %vm1923_vm2, %v1903_v2, %v12352_v13  ;;  %2315 = vst.msk [vmem:[#allocation3 + $0x48] sm:$0xff] %vm1923_vm2, %v7696_v49  ;;  %v12367_v9 = vld [vmem:[#allocation24_spill] sm:$0xff]  ;;  %v12369_v2 = vld [vmem:[#allocation99_spill] sm:$0xff] }
 0x2e4   : > { %1663 = vrot.lane.b32.xlu2 %v768_v22, %s7695_s30  ;;  %v1969_v44 = vsel %vm1956_vm6, %v1936_v7, %v12353_v45  ;;  %v1937_v22 = vsel %vm1923_vm2, %v1904_v0, %v12358_v5  ;;  %2316 = vst.msk [vmem:[#allocation3 + $0x50] sm:$0xff] %vm1923_vm2, %v7696_v49  ;;  %v1840_v20 = vsel %vm385_vm0, %v7661_v15, %v12367_v9  ;;  %v12370_v7 = vld [vmem:[#allocation116_spill] sm:$0xff]  ;;  %v12375_v0 = vld [vmem:[#allocation93_spill] sm:$0xff]  ;;  %v12384_v9 = vld [vmem:[#allocation98_spill] sm:$0xff]  ;;  %s7699_s30 = smov 48  }
 0x2e5   : > { %1777 = vrot.lane.b32.xlu1 %v793_v61, %s7694_s29  ;;  %v1970_v61 = vsel %vm1956_vm6, %v1937_v22, %v12359_v17  ;;  %2318 = vst.msk [vmem:[#allocation3 + $0x60] sm:$0xff] %vm1923_vm2, %v7696_v49  ;;  %v1873_v1 = vsel %vm1857_vm4, %v1840_v20, %v12368_v46  ;;  %v12373_v38 = vld [vmem:[#allocation28_spill] sm:$0xff]  ;;  %v9310_v22 = vld [vmem:[%s12097_s2] ss:$0 sm:$0xff]  ;;  %v12376_v17 = vld [vmem:[#allocation26_spill] sm:$0xff] }
 0x2e6   : > { %1791 = vrot.lane.b32.xlu0 %v800_v26, %s7694_s29  ;;  %v9147_v28 = vpop.permute.xlu2 %1631  ;;  %v2003_v26 = vsel %vm1989_vm8, %v1970_v61, %v12360_v39  ;;  %2319 = vst.msk [vmem:[#allocation3 + $0x68] sm:$0xff] %vm1923_vm2, %v7696_v49  ;;  %v1906_v13 = vsel %vm1890_vm5, %v1873_v1, %v12369_v2  ;;  %v1841_v27 = vsel %vm385_vm0, %v7662_v58, %v12373_v38  ;;  %v12377_v39 = vld [vmem:[#allocation121_spill] sm:$0xff] }
 0x2e7   : > { %v1624_v10 = vpop.permute.xlu1 %1623  ;;  %2321 = vst.msk [vmem:[#allocation3 + $0x78] sm:$0xff] %vm1923_vm2, %v7696_v49  ;;  %v1939_v45 = vsel %vm1923_vm2, %v1906_v13, %v12370_v7  ;;  %v12385_v46 = vld [vmem:[#allocation113_spill] sm:$0xff]  ;;  %v12387_v13 = vld [vmem:[#allocation123_spill] sm:$0xff] }
 0x2e8   : > { %v1626_v57 = vpop.permute.xlu0 %1625  ;;  %v2034_v18 = vsel %vm2022_vm7, %v2001_v23, %v1624_v10  ;;  %2322 = vst.msk [vmem:[#allocation3 + $0x80] sm:$0xff] %vm1923_vm2, %v7696_v49  ;;  %v12366_v23 = vld [vmem:[#allocation137_spill] sm:$0xff] }
 0x2e9   : > { %v2067_v50 = vsel %vm2055_vm9, %v2034_v18, %v9074_v6  ;;  %v12354_v6 = vld [vmem:[#allocation136_spill] sm:$0xff]  ;;  %2324 = vst.msk [vmem:[#allocation3 + $0x90] sm:$0xff] %vm1923_vm2, %v7696_v49 }
 0x2ea   : > { %7042 = vmatmul.msk.f32.gmra.mxu0 %vm2091_vm10, %v2066_v21  ;;  %v2002_v55 = vsel %vm1989_vm8, %v1969_v44, %v12354_v6  ;;  %2325 = vst.msk [vmem:[#allocation3 + $0x98] sm:$0xff] %vm1923_vm2, %v7696_v49  ;;  %v12371_v44 = vld [vmem:[#allocation60_spill] sm:$0xff] }
 0x2eb   : > { %v2035_v37 = vsel %vm2022_vm7, %v2002_v55, %v1626_v57  ;;  %v12362_v57 = vld [vmem:[#allocation78_spill] sm:$0xff]  ;;  %2327 = vst.msk [vmem:[#allocation3 + $0xa8] sm:$0xff] %vm1923_vm2, %v7696_v49  ;;  %v1972_v6 = vsel %vm1956_vm6, %v1939_v45, %v12371_v44  ;;  %v12388_v45 = vld [vmem:[#allocation127_spill] sm:$0xff] }
 0x2ec   : > { %v1872_v8 = vsel %vm1857_vm4, %v1839_v19, %v12362_v57  ;;  %2328 = vst.msk [vmem:[#allocation3 + $0xb0] sm:$0xff] %vm1923_vm2, %v7696_v49  ;;  %v1842_v19 = vsel %vm385_vm0, %v7663_v51, %v12379_v43  ;;  %v12394_v51 = vld [vmem:[#allocation102_spill] sm:$0xff] }
 0x2ed   : > { %v1905_v21 = vsel %vm1890_vm5, %v1872_v8, %v12363_v31  ;;  %2330 = vst.msk [vmem:[#allocation3 + $0xc0] sm:$0xff] %vm1923_vm2, %v7696_v49 }
 0x2ee   : > { %v9165_v53 = vpop.permute.xlu2 %1633  ;;  %v1938_v32 = vsel %vm1923_vm2, %v1905_v21, %v12364_v36  ;;  %2331 = vst.msk [vmem:[#allocation3 + $0xc8] sm:$0xff] %vm1923_vm2, %v7696_v49  ;;  %v7664_v36 = vld [vmem:[#allocation2 + $0x128] sm:$0xff] }
 0x2ef   : > { %v1754_v60 = vpop.permute.xlu1 %1753  ;;  %v1971_v24 = vsel %vm1956_vm6, %v1938_v32, %v12365_v11  ;;  %2333 = vst.msk [vmem:[#allocation3 + $0xd8] sm:$0xff] %vm1923_vm2, %v7696_v49  ;;  %v12380_v32 = vld [vmem:[#allocation44_spill] sm:$0xff] }
 0x2f0   : > { %v1628_v3 = vpop.permute.xlu0 %1627  ;;  %v2068_v14 = vsel %vm2055_vm9, %v2035_v37, %v1754_v60  ;;  %v2004_v18 = vsel %vm1989_vm8, %v1971_v24, %v12366_v23  ;;  %2334 = vst.msk [vmem:[#allocation3 + $0xe0] sm:$0xff] %vm1923_vm2, %v7696_v49  ;;  %v1850_v11 = vsel %vm385_vm0, %v7664_v36, %v12380_v32  ;;  %v12381_v24 = vld [vmem:[#allocation81_spill] sm:$0xff] }
 0x2f1   : > { %v2036_v16 = vsel %vm2022_vm7, %v2003_v26, %v1628_v3  ;;  %2336 = vst.msk [vmem:[#allocation3 + $0xf0] sm:$0xff] %vm1923_vm2, %v7696_v49  ;;  %v1875_v23 = vsel %vm1857_vm4, %v1842_v19, %v12381_v24 }
 0x2f2   : > { %7043 = vmatmul.msk.f32.gmra.mxu0 %vm2091_vm10, %v2067_v50  ;;  %2337 = vst.msk [vmem:[#allocation3 + $0xf8] sm:$0xff] %vm1923_vm2, %v7696_v49 }
 0x2f3   : > { %2339 = vst.msk [vmem:[#allocation3 + $0x108] sm:$0xff] %vm1923_vm2, %v7696_v49 }
 0x2f4   : > { %2340 = vst.msk [vmem:[#allocation3 + $0x110] sm:$0xff] %vm1923_vm2, %v7696_v49 }
 0x2f5   : > { %2342 = vst.msk [vmem:[#allocation3 + $0x120] sm:$0xff] %vm1923_vm2, %v7696_v49 }
 0x2f6   : > { %v9194_v4 = vpop.permute.xlu2 %1763  ;;  %2343 = vst.msk [vmem:[#allocation3 + $0x128] sm:$0xff] %vm1923_vm2, %v7696_v49 }
 0x2f7   : > { %v1756_v33 = vpop.permute.xlu1 %1755  ;;  %2345 = vst.msk [vmem:[#allocation3 + $0x138] sm:$0xff] %vm1923_vm2, %v7696_v49 }
 0x2f8   : > { %v1630_v25 = vpop.permute.xlu0 %1629  ;;  %v2069_v10 = vsel %vm2055_vm9, %v2036_v16, %v1756_v33  ;;  %v12372_v33 = vld [vmem:[#allocation138_spill] sm:$0xff]  ;;  %2346 = vst.msk [vmem:[#allocation3 + $0x140] sm:$0xff] %vm1923_vm2, %v7696_v49 }
 0x2f9   : > { %v2037_v3 = vsel %vm2022_vm7, %v2004_v18, %v1630_v25  ;;  %v2005_v37 = vsel %vm1989_vm8, %v1972_v6, %v12372_v33  ;;  %2348 = vst.msk [vmem:[#allocation3 + $0x150] sm:$0xff] %vm1923_vm2, %v7696_v49  ;;  %v12382_v18 = vld [vmem:[#allocation87_spill] sm:$0xff] }
 0x2fa   : > { %7044 = vmatmul.msk.f32.gmra.mxu0 %vm2091_vm10, %v2068_v14  ;;  %v2038_v14 = vsel %vm2022_vm7, %v2005_v37, %v9147_v28  ;;  %v12374_v28 = vld [vmem:[#allocation79_spill] sm:$0xff]  ;;  %2349 = vst.msk [vmem:[#allocation3 + $0x158] sm:$0xff] %vm1923_vm2, %v7696_v49 }
 0x2fb   : > { %v1874_v47 = vsel %vm1857_vm4, %v1841_v27, %v12374_v28  ;;  %2351 = vst.msk [vmem:[#allocation3 + $0x168] sm:$0xff] %vm1923_vm2, %v7696_v49  ;;  %v12389_v6 = vld [vmem:[#allocation139_spill] sm:$0xff]  ;;  %v7665_v27 = vld [vmem:[#allocation2 + $0xd8] sm:$0xff]  ;;  %v12390_v28 = vld [vmem:[#allocation29_spill] sm:$0xff] }
 0x2fc   : > { %v1907_v5 = vsel %vm1890_vm5, %v1874_v47, %v12375_v0  ;;  %2352 = vst.msk [vmem:[#allocation3 + $0x170] sm:$0xff] %vm1923_vm2, %v7696_v49  ;;  %v1843_v47 = vsel %vm385_vm0, %v7665_v27, %v12390_v28 }
 0x2fd   : > { %v1940_v61 = vsel %vm1923_vm2, %v1907_v5, %v12376_v17  ;;  %2354 = vst.msk [vmem:[#allocation3 + $0x180] sm:$0xff] %vm1923_vm2, %v7696_v49  ;;  %v7666_v5 = vld [vmem:[#allocation2 + $0x138] sm:$0xff]  ;;  %v12391_v17 = vld [vmem:[#allocation27_spill] sm:$0xff] }
 0x2fe   : > { %v9236_v29 = vpop.permute.xlu2 %1765  ;;  %v1973_v26 = vsel %vm1956_vm6, %v1940_v61, %v12377_v39  ;;  %2355 = vst.msk [vmem:[#allocation3 + $0x188] sm:$0xff] %vm1923_vm2, %v7696_v49  ;;  %v1851_v61 = vsel %vm385_vm0, %v7666_v5, %v12391_v17  ;;  %v12392_v39 = vld [vmem:[#allocation67_spill] sm:$0xff]  ;;  %v12410_v17 = vld [vmem:[#allocation134_spill] sm:$0xff] }
 0x2ff   : > { %v1758_v56 = vpop.permute.xlu1 %1757  ;;  %2357 = vst.msk [vmem:[#allocation3 + $0x198] sm:$0xff] %vm1923_vm2, %v7696_v49 }
 0x300   : > { %v1760_v41 = vpop.permute.xlu0 %1759  ;;  %v2070_v40 = vsel %vm2055_vm9, %v2037_v3, %v1758_v56  ;;  %v12378_v56 = vld [vmem:[#allocation133_spill] sm:$0xff]  ;;  %2358 = vst.msk [vmem:[#allocation3 + $0x1a0] sm:$0xff] %vm1923_vm2, %v7696_v49  ;;  %v1883_v3 = vsel %vm1857_vm4, %v1850_v11, %v12382_v18  ;;  %v12400_v18 = vld [vmem:[#allocation140_spill] sm:$0xff] }
 0x301   : > { %v2071_v12 = vsel %vm2055_vm9, %v2038_v14, %v1760_v41  ;;  %v2006_v16 = vsel %vm1989_vm8, %v1973_v26, %v12378_v56  ;;  %v1916_v20 = vsel %vm1890_vm5, %v1883_v3, %v12384_v9  ;;  %2311 = vst.msk [vmem:[#allocation3 + $0x28] sm:$0x3] %vm2307_vm11, %v7696_v49  ;;  %v1876_v26 = vsel %vm1857_vm4, %v1843_v47, %v12392_v39  ;;  %v12398_v11 = vld [vmem:[#allocation61_spill] sm:$0xff]  ;;  %v12408_v47 = vld [vmem:[#allocation124_spill] sm:$0xff]  ;;  %v2393_v39 = vld [vmem:[#allocation3] sm:$0xff] }
 0x302   : > { %7045 = vmatmul.msk.f32.gmra.mxu0 %vm2091_vm10, %v2069_v10  ;;  %v2039_v57 = vsel %vm2022_vm7, %v2006_v16, %v9165_v53  ;;  %2308 = vst.msk [vmem:[#allocation3 + $0x10] sm:$0x3] %vm2307_vm11, %v7696_v49  ;;  %v12393_v16 = vld [vmem:[#allocation88_spill] sm:$0xff]  ;;  %v1909_v43 = vsel %vm1890_vm5, %v1876_v26, %v12394_v51  ;;  %v12412_v51 = vmov 0.0  }
 0x303   : > { %2314 = vst.msk [vmem:[#allocation3 + $0x40] sm:$0x3] %vm2307_vm11, %v7696_v49  ;;  %v2425_v26 = vld [vmem:[#allocation3 + $0x1] sm:$0xff] }
 0x304   : > { %2317 = vst.msk [vmem:[#allocation3 + $0x58] sm:$0x3] %vm2307_vm11, %v7696_v49 }
 0x305   : > { %2320 = vst.msk [vmem:[#allocation3 + $0x70] sm:$0x3] %vm2307_vm11, %v7696_v49 }
 0x306   : > { %v9279_v55 = vpop.permute.xlu2 %1767  ;;  %2323 = vst.msk [vmem:[#allocation3 + $0x88] sm:$0x3] %vm2307_vm11, %v7696_v49 }
 0x307   : > { %v9250_v60 = vpop.permute.xlu1 %1535  ;;  %2326 = vst.msk [vmem:[#allocation3 + $0xa0] sm:$0x3] %vm2307_vm11, %v7696_v49 }
 0x308   : > { %v1762_v50 = vpop.permute.xlu0 %1761  ;;  %2329 = vst.msk [vmem:[#allocation3 + $0xb8] sm:$0x3] %vm2307_vm11, %v7696_v49 }
 0x309   : > { %v2072_v53 = vsel %vm2055_vm9, %v2039_v57, %v1762_v50  ;;  %v12386_v50 = vld [vmem:[#allocation42_spill] sm:$0xff]  ;;  %v12395_v57 = vld [vmem:[#allocation108_spill] sm:$0xff]  ;;  %2332 = vst.msk [vmem:[#allocation3 + $0xd0] sm:$0x3] %vm2307_vm11, %v7696_v49 }
 0x30a   : > { %7046 = vmatmul.msk.f32.gmra.mxu0 %vm2091_vm10, %v2070_v40  ;;  %v12383_v40 = vld [vmem:[#allocation100_spill] sm:$0xff]  ;;  %v1949_v2 = vsel %vm1923_vm2, %v1916_v20, %v12386_v50  ;;  %2335 = vst.msk [vmem:[#allocation3 + $0xe8] sm:$0x3] %vm2307_vm11, %v7696_v49  ;;  %v12401_v50 = vld [vmem:[#allocation34_spill] sm:$0xff] }
 0x30b   : > { %v1908_v15 = vsel %vm1890_vm5, %v1875_v23, %v12383_v40  ;;  %v1982_v44 = vsel %vm1956_vm6, %v1949_v2, %v12388_v45  ;;  %v12399_v23 = vld [vmem:[#allocation128_spill] sm:$0xff]  ;;  %2338 = vst.msk [vmem:[#allocation3 + $0x100] sm:$0x3] %vm2307_vm11, %v7696_v49 }
 0x30c   : > { %v1941_v1 = vsel %vm1923_vm2, %v1908_v15, %v12385_v46  ;;  %v2015_v37 = vsel %vm1989_vm8, %v1982_v44, %v9054_v42  ;;  %2341 = vst.msk [vmem:[#allocation3 + $0x118] sm:$0x3] %vm2307_vm11, %v7696_v49  ;;  %v7668_v44 = vld [vmem:[#allocation2 + $0x140] sm:$0xff] }
 0x30d   : > { %v1974_v7 = vsel %vm1956_vm6, %v1941_v1, %v12387_v13  ;;  %v7667_v1 = vld [vmem:[#allocation2 + $0xe0] sm:$0xff]  ;;  %2344 = vst.msk [vmem:[#allocation3 + $0x130] sm:$0x3] %vm2307_vm11, %v7696_v49  ;;  %v12402_v13 = vld [vmem:[#allocation82_spill] sm:$0xff] }
 0x30e   : > { %v9332_v8 = vpop.permute.xlu2 %1641  ;;  %v2007_v33 = vsel %vm1989_vm8, %v1974_v7, %v12389_v6  ;;  %v1844_v2 = vsel %vm385_vm0, %v7667_v1, %v12401_v50  ;;  %2347 = vst.msk [vmem:[#allocation3 + $0x148] sm:$0x3] %vm2307_vm11, %v7696_v49  ;;  %v12403_v6 = vld [vmem:[#allocation45_spill] sm:$0xff] }
 0x30f   : > { %v1636_v25 = vpop.permute.xlu1 %1635  ;;  %v1877_v7 = vsel %vm1857_vm4, %v1844_v2, %v12402_v13  ;;  %2350 = vst.msk [vmem:[#allocation3 + $0x160] sm:$0x3] %vm2307_vm11, %v7696_v49 }
 0x310   : > { %v9289_v30 = vpop.permute.xlu0 %1637  ;;  %v2040_v14 = vsel %vm2022_vm7, %v2007_v33, %v1636_v25  ;;  %v1852_v33 = vsel %vm385_vm0, %v7668_v44, %v12403_v6  ;;  %2353 = vst.msk [vmem:[#allocation3 + $0x178] sm:$0x3] %vm2307_vm11, %v7696_v49 }
 0x311   : > { %v2073_v56 = vsel %vm2055_vm9, %v2040_v14, %v9194_v4  ;;  %v12397_v4 = vld [vmem:[#allocation31_spill] sm:$0xff]  ;;  %2356 = vst.msk [vmem:[#allocation3 + $0x190] sm:$0x3] %vm2307_vm11, %v7696_v49 }
 0x312   : > { %7047 = vmatmul.msk.f32.gmra.mxu0 %vm2091_vm10, %v2071_v12  ;;  %2359 = vst.msk [vmem:[#allocation3 + $0x1a8] sm:$0x3] %vm2307_vm11, %v7696_v49 }
 0x313   : > { %4801 = vst.msk [vmem:[#allocation4 + $0x8] sm:$0x3] %vm2307_vm11, %v12412_v51 }
 0x314   : > { %4803 = vst.msk [vmem:[#allocation4 + $0x18] sm:$0x3] %vm2307_vm11, %v12412_v51 }
 0x315   : > { %4805 = vst.msk [vmem:[#allocation4 + $0x28] sm:$0x3] %vm2307_vm11, %v12412_v51 }
 0x316   : > { %v1784_v19 = vpop.permute.xlu2 %1783  ;;  %4807 = vst.msk [vmem:[#allocation4 + $0x38] sm:$0x3] %vm2307_vm11, %v12412_v51 }
 0x317   : > { %v2209_v41 = vpop.f32.mrf.mxu0  ;;  %v9326_v10 = vpop.permute.xlu1 %1639  ;;  %4809 = vst.msk [vmem:[#allocation4 + $0x48] sm:$0x3] %vm2307_vm11, %v12412_v51 }
 0x318   : > { %v2210_v31 = vadd.f32 %v9310_v22, %v2209_v41  ;;  %v1652_v21 = vpop.permute.xlu0 %1651  ;;  %v1884_v41 = vsel %vm1857_vm4, %v1851_v61, %v12393_v16  ;;  %4811 = vst.msk [vmem:[#allocation4 + $0x58] sm:$0x3] %vm2307_vm11, %v12412_v51 }
 0x319   : > { %v2048_v12 = vsel %vm2022_vm7, %v2015_v37, %v1652_v21  ;;  %v12396_v21 = vld [vmem:[#allocation30_spill] sm:$0xff]  ;;  %4813 = vst.msk [vmem:[#allocation4 + $0x68] sm:$0x3] %vm2307_vm11, %v12412_v51 }
 0x31a   : > { %2361 = vst.msk [vmem:[#allocation3 + $0x19] sm:$0xff] %vm1923_vm2, %v2210_v31  ;;  %7048 = vmatmul.msk.f32.gmra.mxu0 %vm2091_vm10, %v2072_v53  ;;  %v1917_v31 = vsel %vm1890_vm5, %v1884_v41, %v12395_v57  ;;  %v1942_v36 = vsel %vm1923_vm2, %v1909_v43, %v12396_v21  ;;  %v12404_v37 = vld [vmem:[#allocation94_spill] sm:$0xff] }
 0x31b   : > { %v1950_v32 = vsel %vm1923_vm2, %v1917_v31, %v12397_v4  ;;  %v1975_v24 = vsel %vm1956_vm6, %v1942_v36, %v12398_v11  ;;  %v1910_v14 = vsel %vm1890_vm5, %v1877_v7, %v12404_v37  ;;  %v2457_v36 = vmax.f32 %v2393_v39, %v2425_v26  ;;  %v2489_v4 = vld [vmem:[#allocation3 + $0x2] sm:$0xff]  ;;  %v12413_v11 = vld [vmem:[#allocation18_spill] sm:$0xff]  ;;  %4815 = vst.msk [vmem:[#allocation4 + $0x78] sm:$0x3] %vm2307_vm11, %v12412_v51 }
 0x31c   : > { %v1983_v53 = vsel %vm1956_vm6, %v1950_v32, %v12399_v23  ;;  %v2008_v3 = vsel %vm1989_vm8, %v1975_v24, %v12400_v18  ;;  %v7669_v32 = vld [vmem:[#allocation2 + $0xf0] sm:$0xff]  ;;  %4817 = vst.msk [vmem:[#allocation4 + $0x88] sm:$0x3] %vm2307_vm11, %v12412_v51  ;;  %v7671_v26 = vld [vmem:[#allocation2 + $0xf8] sm:$0xff] }
 0x31d   : > { %v2016_v40 = vsel %vm1989_vm8, %v1983_v53, %v9078_v62  ;;  %v2041_v15 = vsel %vm2022_vm7, %v2008_v3, %v9289_v30  ;;  %v1845_v24 = vsel %vm385_vm0, %v7669_v32, %v12413_v11  ;;  %v7670_v23 = vld [vmem:[#allocation2 + $0x150] sm:$0xff]  ;;  %v12414_v53 = vld [vmem:[#allocation49_spill] sm:$0xff]  ;;  %v12415_v3 = vld [vmem:[#allocation84_spill] sm:$0xff]  ;;  %v2521_v2 = vmax.f32 %v2457_v36, %v2489_v4  ;;  %4819 = vst.msk [vmem:[#allocation4 + $0x98] sm:$0x3] %vm2307_vm11, %v12412_v51 }
 0x31e   : > { %v2074_v45 = vsel %vm2055_vm9, %v2041_v15, %v9236_v29  ;;  %v12407_v29 = vld [vmem:[#allocation109_spill] sm:$0xff]  ;;  %v1853_v18 = vsel %vm385_vm0, %v7670_v23, %v12414_v53  ;;  %v12420_v7 = vld [vmem:[#allocation47_spill] sm:$0xff]  ;;  %v7672_v36 = vld [vmem:[#allocation2 + $0x108] sm:$0xff] }
 0x31f   : > { %v2212_v58 = vpop.f32.mrf.mxu0  ;;  %v1780_v38 = vpop.permute.xlu1 %1779  ;;  %v12417_v15 = vld [vmem:[#allocation101_spill] sm:$0xff]  ;;  %v7673_v23 = vld [vmem:[#allocation2 + $0x158] sm:$0xff] }
 0x320   : > { %v2213_v0 = vadd.f32 %v9310_v22, %v2212_v58  ;;  %v1654_v42 = vpop.permute.xlu0 %1653  ;;  %v2081_v25 = vsel %vm2055_vm9, %v2048_v12, %v1780_v38  ;;  %v12405_v12 = vld [vmem:[#allocation80_spill] sm:$0xff]  ;;  %v12406_v38 = vld [vmem:[#allocation117_spill] sm:$0xff] }
 0x321   : > { %7057 = vmatmul.msk.f32.vlgmr.msra.gmra.mxu3 %vm2091_vm10, %v2081_v25  ;;  %v2049_v9 = vsel %vm2022_vm7, %v2016_v40, %v1654_v42  ;;  %v1885_v58 = vsel %vm1857_vm4, %v1852_v33, %v12405_v12  ;;  %v1943_v27 = vsel %vm1923_vm2, %v1910_v14, %v12406_v38  ;;  %v1658_v42 = vpop.permute.xlu2 %1657  ;;  %v12409_v25 = vld [vmem:[#allocation46_spill] sm:$0xff]  ;;  %v12421_v33 = vld [vmem:[#allocation125_spill] sm:$0xff] }
 0x322   : > { %2362 = vst.msk [vmem:[#allocation3 + $0x21] sm:$0xff] %vm1923_vm2, %v2213_v0  ;;  %7049 = vmatmul.msk.f32.gmra.mxu0 %vm2091_vm10, %v2073_v56  ;;  %v1918_v28 = vsel %vm1890_vm5, %v1885_v58, %v12407_v29  ;;  %v1976_v0 = vsel %vm1956_vm6, %v1943_v27, %v12408_v47  ;;  %v12411_v56 = vld [vmem:[#allocation122_spill] sm:$0xff]  ;;  %v12422_v14 = vld [vmem:[#allocation129_spill] sm:$0xff] }
 0x323   : > { %v1951_v5 = vsel %vm1923_vm2, %v1918_v28, %v12409_v25  ;;  %v2009_v61 = vsel %vm1989_vm8, %v1976_v0, %v12410_v17  ;;  %v2395_v6 = vld [vmem:[#allocation3 + $0x18] sm:$0xff]  ;;  %v12423_v58 = vld [vmem:[#allocation141_spill] sm:$0xff] }
 0x324   : > { %v1984_v16 = vsel %vm1956_vm6, %v1951_v5, %v12411_v56  ;;  %v2042_v41 = vsel %vm2022_vm7, %v2009_v61, %v9326_v10  ;;  %v2585_v17 = vmax.f32 %v2521_v2, %v2395_v6  ;;  %v2427_v39 = vld [vmem:[#allocation3 + $0x19] sm:$0xff]  ;;  %v12426_v51 = vld [vmem:[#allocation105_spill] sm:$0xff] }
 0x325   : > { %v2017_v43 = vsel %vm1989_vm8, %v1984_v16, %v9106_v34  ;;  %v2075_v10 = vsel %vm2055_vm9, %v2042_v41, %v9279_v55  ;;  %v1878_v55 = vsel %vm1857_vm4, %v1845_v24, %v12415_v3  ;;  %v12424_v56 = vld [vmem:[#allocation35_spill] sm:$0xff]  ;;  %v12429_v4 = vld [vmem:[#allocation65_spill] sm:$0xff] }
 0x326   : > { %v12430_v53 = vld [vmem:[#allocation33_spill] sm:$0xff] }
 0x327   : > { %v1782_v20 = vpop.permute.xlu1 %1781  ;;  %v2215_v46 = vpop.f32.mrf.mxu0  ;;  %v12431_v3 = vld [vmem:[#allocation85_spill] sm:$0xff] }
 0x328   : > { %v9428_v62 = vpop.permute.xlu0 %1769  ;;  %v2082_v30 = vsel %vm2055_vm9, %v2049_v9, %v1782_v20  ;;  %v12418_v20 = vld [vmem:[#allocation103_spill] sm:$0xff]  ;;  %v2216_v50 = vadd.f32 %v9310_v22, %v2215_v46 }
 0x329   : > { %7058 = vmatmul.msk.f32.gmra.mxu3 %vm2091_vm10, %v2082_v30  ;;  %v1911_v1 = vsel %vm1890_vm5, %v1878_v55, %v12418_v20  ;;  %v12419_v30 = vld [vmem:[#allocation114_spill] sm:$0xff]  ;;  %v9517_v46 = vpop.permute.xlu2 %1773  ;;  %v7697_v20 = vmov 1983009808  }
 0x32a   : > { %7050 = vmatmul.msk.f32.gmra.mxu0 %vm2091_vm10, %v2074_v45  ;;  %v1944_v13 = vsel %vm1923_vm2, %v1911_v1, %v12419_v30  ;;  %2363 = vst.msk [vmem:[#allocation3 + $0x31] sm:$0xff] %vm1923_vm2, %v2216_v50  ;;  %v2491_v41 = vld [vmem:[#allocation3 + $0x1a] sm:$0xff]  ;;  %v2942_v1 = vunpack.c.l.s4 %v7697_v20 }
 0x32b   : > { %v1977_v37 = vsel %vm1956_vm6, %v1944_v13, %v12421_v33 }
 0x32c   : > { %v2010_v38 = vsel %vm1989_vm8, %v1977_v37, %v12423_v58 }
 0x32d   : > { %v2043_v47 = vsel %vm2022_vm7, %v2010_v38, %v9332_v8  ;;  %v1846_v8 = vsel %vm385_vm0, %v7671_v26, %v12424_v56  ;;  %v7674_v26 = vld [vmem:[#allocation2 + $0x110] sm:$0xff]  ;;  %v12438_v56 = vld [vmem:[#allocation22_spill] sm:$0xff] }
 0x32f   : > { %v1656_v57 = vpop.permute.xlu1 %1655  ;;  %v2218_v31 = vpop.f32.mrf.mxu0 }
 0x330   : > { %v2050_v49 = vsel %vm2022_vm7, %v2017_v43, %v1656_v57  ;;  %v9476_v21 = vpop.permute.xlu0 %1643  ;;  %v2219_v44 = vadd.f32 %v9310_v22, %v2218_v31  ;;  %v2459_v43 = vmax.f32 %v2395_v6, %v2427_v39  ;;  %v2649_v57 = vmax.f32 %v2585_v17, %v2427_v39  ;;  %v12427_v31 = vld [vmem:[#allocation118_spill] sm:$0xff]  ;;  %v12433_v6 = vld [vmem:[#allocation95_spill] sm:$0xff] }
 0x331   : > { %v2083_v34 = vsel %vm2055_vm9, %v2050_v49, %v1784_v19  ;;  %v12416_v19 = vld [vmem:[#allocation89_spill] sm:$0xff]  ;;  %v9557_v50 = vpop.permute.xlu2 %1647  ;;  %v9589_v39 = vunpack.c.0.s8 %v2942_v1 }
 0x332   : > { %7051 = vmatmul.msk.f32.gmra.mxu0 %vm2091_vm10, %v2075_v10  ;;  %7059 = vmatmul.msk.f32.gmra.mxu3 %vm2091_vm10, %v2083_v34  ;;  %v1886_v40 = vsel %vm1857_vm4, %v1853_v18, %v12416_v19  ;;  %2364 = vst.msk [vmem:[#allocation3 + $0x39] sm:$0xff] %vm1923_vm2, %v2219_v44  ;;  %v12428_v10 = vld [vmem:[#allocation39_spill] sm:$0xff]  ;;  %v2523_v11 = vmax.f32 %v2459_v43, %v2491_v41  ;;  %v12432_v44 = vld [vmem:[#allocation90_spill] sm:$0xff] }
 0x333   : > { %v1919_v9 = vsel %vm1890_vm5, %v1886_v40, %v12417_v15  ;;  %v1847_v34 = vsel %vm385_vm0, %v7672_v36, %v12428_v10  ;;  %v2713_v24 = vmax.f32 %v2649_v57, %v2491_v41  ;;  %v1854_v18 = vsel %vm385_vm0, %v7673_v23, %v12430_v53  ;;  %v7676_v53 = vld [vmem:[#allocation2 + $0x120] sm:$0xff] }
 0x334   : > { %v1952_v45 = vsel %vm1923_vm2, %v1919_v9, %v12420_v7  ;;  %v1880_v55 = vsel %vm1857_vm4, %v1847_v34, %v12431_v3  ;;  %v9555_v9 = vld [vmem:[#allocation3 + $0x30] sm:$0xff] }
 0x335   : > { %v1985_v12 = vsel %vm1956_vm6, %v1952_v45, %v12422_v14  ;;  %v2587_v7 = vmax.f32 %v2523_v11, %v9555_v9  ;;  %v2778_v45 = vmax.f32 %v2713_v24, %v9555_v9  ;;  %v1913_v33 = vsel %vm1890_vm5, %v1880_v55, %v12433_v6  ;;  %v9569_v14 = vld [vmem:[#allocation3 + $0x31] sm:$0xff]  ;;  %v12442_v55 = vld [vmem:[#allocation83_spill] sm:$0xff] }
 0x336   : > { %v2018_v27 = vsel %vm1989_vm8, %v1985_v12, %v9128_v59  ;;  %v2076_v59 = vsel %vm2055_vm9, %v2043_v47, %v9428_v62  ;;  %v7677_v6 = vld [vmem:[#allocation2 + $0x170] sm:$0xff] }
 0x337   : > { %v1772_v29 = vpop.permute.xlu1 %1771  ;;  %v2221_v28 = vpop.f32.mrf.mxu0  ;;  %v2051_v0 = vsel %vm2022_vm7, %v2018_v27, %v1658_v42  ;;  %v12425_v42 = vld [vmem:[#allocation72_spill] sm:$0xff]  ;;  %v2651_v38 = vmax.f32 %v2587_v7, %v9569_v14  ;;  %v2842_v27 = vmax.f32 %v2778_v45, %v9569_v14 }
 0x338   : > { %v2222_v25 = vadd.f32 %v9310_v22, %v2221_v28  ;;  %v1786_v5 = vpop.permute.xlu0 %1785  ;;  %v1879_v16 = vsel %vm1857_vm4, %v1846_v8, %v12425_v42  ;;  %v12435_v28 = vld [vmem:[#allocation32_spill] sm:$0xff]  ;;  %v1848_v8 = vsel %vm385_vm0, %v7674_v26, %v12438_v56  ;;  %v12439_v42 = vld [vmem:[#allocation130_spill] sm:$0xff]  ;;  %v12451_v26 = vld [vmem:[#allocation75_spill] sm:$0xff] }
 0x339   : > { %v2084_v61 = vsel %vm2055_vm9, %v2051_v0, %v1786_v5  ;;  %v1912_v62 = vsel %vm1890_vm5, %v1879_v16, %v12426_v51  ;;  %v9571_v12 = vld [vmem:[#allocation3 + $0x32] sm:$0xff]  ;;  %v1790_v45 = vpop.permute.xlu2 %1789 }
 0x33a   : > { %2365 = vst.msk [vmem:[#allocation3 + $0x49] sm:$0xff] %vm1923_vm2, %v2222_v25  ;;  %7052 = vmatmul.msk.f32.gmra.mxu0 %vm2091_vm10, %v2076_v59  ;;  %7060 = vmatmul.msk.f32.gmra.mxu3 %vm2091_vm10, %v2084_v61  ;;  %v1945_v49 = vsel %vm1923_vm2, %v1912_v62, %v12427_v31  ;;  %v12436_v0 = vld [vmem:[#allocation41_spill] sm:$0xff]  ;;  %v12437_v5 = vld [vmem:[#allocation126_spill] sm:$0xff]  ;;  %v2715_v59 = vmax.f32 %v2651_v38, %v9571_v12 }
 0x33b   : > { %v1978_v32 = vsel %vm1956_vm6, %v1945_v49, %v12429_v4  ;;  %v2906_v61 = vmax.f32 %v2842_v27, %v9571_v12  ;;  %v7675_v31 = vld [vmem:[#allocation2 + $0x168] sm:$0xff]  ;;  %v7698_v27 = vmov 1934713408  }
 0x33c   : > { %v2011_v19 = vsel %vm1989_vm8, %v1978_v32, %v8926_v35  ;;  %v1887_v35 = vsel %vm1857_vm4, %v1854_v18, %v12432_v44  ;;  %v12440_v49 = vld [vmem:[#allocation50_spill] sm:$0xff]  ;;  %v12441_v18 = vld [vmem:[#allocation40_spill] sm:$0xff] }
 0x33d   : > { %v2044_v2 = vsel %vm2022_vm7, %v2011_v19, %v9476_v21  ;;  %v12434_v21 = vld [vmem:[#allocation110_spill] sm:$0xff]  ;;  %v2938_v57 = vrot.slane %v2906_v61, 4  ;;  %v1855_v36 = vsel %vm385_vm0, %v7675_v31, %v12440_v49  ;;  %v2944_v23 = vperm.slane %v2906_v61, %v9589_v39 }
 0x33e   : > { %v2077_v37 = vsel %vm2055_vm9, %v2044_v2, %v1772_v29  ;;  %v1920_v58 = vsel %vm1890_vm5, %v1887_v35, %v12434_v21  ;;  %v1946_v29 = vsel %vm1923_vm2, %v1913_v33, %v12436_v0  ;;  %v1849_v3 = vsel %vm385_vm0, %v7676_v53, %v12441_v18  ;;  %v12444_v2 = vld [vmem:[#allocation106_spill] sm:$0xff]  ;;  %v12453_v18 = vld [vmem:[#allocation77_spill] sm:$0xff] }
 0x33f   : > { %v1646_v40 = vpop.permute.xlu1 %1645  ;;  %v2224_v15 = vpop.f32.mrf.mxu0  ;;  %v1953_v47 = vsel %vm1923_vm2, %v1920_v58, %v12435_v28  ;;  %v1979_v17 = vsel %vm1956_vm6, %v1946_v29, %v12437_v5  ;;  %v1888_v19 = vsel %vm1857_vm4, %v1855_v36, %v12442_v55  ;;  %v2940_v35 = vsel %vm2939_vm12, 0.0, %v2938_v57  ;;  %v12446_v33 = vld [vmem:[#allocation54_spill] sm:$0xff]  ;;  %v12448_v58 = vld [vmem:[#allocation51_spill] sm:$0xff] }
 0x340   : > { %v2225_v30 = vadd.f32 %v9310_v22, %v2224_v15  ;;  %v1660_v13 = vpop.permute.xlu0 %1659  ;;  %v1986_v16 = vsel %vm1956_vm6, %v1953_v47, %v12439_v42  ;;  %v2012_v41 = vsel %vm1989_vm8, %v1979_v17, %v8948_v63  ;;  %v2964_v28 = vunpack.c.l.s4 %v7698_v27  ;;  %v12449_v47 = vld [vmem:[#allocation76_spill] sm:$0xff] }
 0x341   : > { %v9583_v25 = vld [vmem:[#allocation3 + $0x48] sm:$0xff]  ;;  %v2019_v51 = vsel %vm1989_vm8, %v1986_v16, %v9098_v52  ;;  %v2045_v62 = vsel %vm2022_vm7, %v2012_v41, %v1646_v40  ;;  %v12443_v40 = vld [vmem:[#allocation86_spill] sm:$0xff]  ;;  %v2961_v5 = vrot.slane %v2944_v23, 4  ;;  %v2948_v16 = vperm.slane %v2940_v35, %v9589_v39 }
 0x342   : > { %2366 = vst.msk [vmem:[#allocation3 + $0x51] sm:$0xff] %vm1923_vm2, %v2225_v30  ;;  %7053 = vmatmul.msk.f32.gmra.mxu0 %vm2091_vm10, %v2077_v37  ;;  %v2780_v43 = vmax.f32 %v2715_v59, %v9583_v25  ;;  %v2052_v10 = vsel %vm2022_vm7, %v2019_v51, %v1660_v13  ;;  %v9604_v32 = vld [vmem:[#allocation3 + $0x49] sm:$0xff]  ;;  %v1881_v15 = vsel %vm1857_vm4, %v1848_v8, %v12443_v40  ;;  %v12445_v13 = vld [vmem:[#allocation111_spill] sm:$0xff] }
 0x343   : > { %v2078_v20 = vsel %vm2055_vm9, %v2045_v62, %v9517_v46  ;;  %v1914_v30 = vsel %vm1890_vm5, %v1881_v15, %v12444_v2  ;;  %v1921_v7 = vsel %vm1890_vm5, %v1888_v19, %v12445_v13  ;;  %v1856_v46 = vsel %vm385_vm0, %v7677_v6, %v12446_v33  ;;  %v12447_v37 = vld [vmem:[#allocation21_spill] sm:$0xff]  ;;  %v12450_v59 = vld [vmem:[#allocation91_spill] sm:$0xff]  ;;  %v12454_v19 = vld [vmem:[#allocation104_spill] sm:$0xff] }
 0x344   : > { %v2844_v24 = vmax.f32 %v2780_v43, %v9604_v32  ;;  %v1947_v21 = vsel %vm1923_vm2, %v1914_v30, %v12447_v37  ;;  %v1954_v38 = vsel %vm1923_vm2, %v1921_v7, %v12448_v58  ;;  %v1889_v61 = vsel %vm1857_vm4, %v1856_v46, %v12450_v59  ;;  %v12452_v8 = vld [vmem:[#allocation7_spill] sm:$0xff]  ;;  %v12457_v13 = vld [vmem:[#allocation52_spill] sm:$0xff] }
 0x345   : > { %v1980_v0 = vsel %vm1956_vm6, %v1947_v21, %v12449_v47  ;;  %v1987_v56 = vsel %vm1956_vm6, %v1954_v38, %v12451_v26  ;;  %v2461_v51 = vmax.f32 %v9555_v9, %v9569_v14  ;;  %v2973_v53 = vrot.slane %v2948_v16, 4  ;;  %v12459_v6 = vld [vmem:[#allocation131_spill] sm:$0xff] }
 0x346   : > { %v2013_v42 = vsel %vm1989_vm8, %v1980_v0, %v12452_v8  ;;  %v2020_v57 = vsel %vm1989_vm8, %v1987_v56, %v9124_v48  ;;  %v1882_v55 = vsel %vm1857_vm4, %v1849_v3, %v12453_v18  ;;  %v1922_v40 = vsel %vm1890_vm5, %v1889_v61, %v12454_v19  ;;  %v12456_v3 = vld [vmem:[#allocation119_spill] sm:$0xff] }
 0x347   : > { %v1788_v34 = vpop.permute.xlu1 %1787  ;;  %v2227_v4 = vpop.f32.mrf.mxu0  ;;  %v2046_v31 = vsel %vm2022_vm7, %v2013_v42, %v9557_v50  ;;  %v1955_v7 = vsel %vm1923_vm2, %v1922_v40, %v12457_v13  ;;  %vm4262_vm0 = vcmask 785408  }
 0x348   : > { %v2228_v63 = vadd.f32 %v9310_v22, %v2227_v4  ;;  %v1776_v11 = vpop.permute.xlu0 %1775  ;;  %v2085_v52 = vsel %vm2055_vm9, %v2052_v10, %v1788_v34  ;;  %v9655_v10 = vunpack.c.0.s8 %v2964_v28  ;;  %v1988_v33 = vsel %vm1956_vm6, %v1955_v7, %v12459_v6 }
 0x349   : > { %7061 = vmatmul.msk.f32.gmra.mxu3 %vm2091_vm10, %v2085_v52  ;;  %v9619_v1 = vld [vmem:[#allocation3 + $0x4a] sm:$0xff]  ;;  %v2525_v52 = vmax.f32 %v2461_v51, %v9571_v12  ;;  %v2079_v48 = vsel %vm2055_vm9, %v2046_v31, %v1776_v11  ;;  %v12455_v11 = vld [vmem:[#allocation107_spill] sm:$0xff]  ;;  %v2021_v58 = vsel %vm1989_vm8, %v1988_v33, %v9250_v60 }
 0x34a   : > { %2367 = vst.msk [vmem:[#allocation3 + $0x61] sm:$0xff] %vm1923_vm2, %v2228_v63  ;;  %7054 = vmatmul.msk.f32.gmra.mxu0 %vm2091_vm10, %v2078_v20  ;;  %v2908_v44 = vmax.f32 %v2844_v24, %v9619_v1 }
 0x34b   : > { %v2589_v12 = vmax.f32 %v2525_v52, %v9583_v25 }
 0x34c   : > { %v2954_v29 = vperm.slane %v2908_v44, %v9589_v39  ;;  %v2949_v17 = vrot.slane %v2908_v44, 4  ;;  %v12458_v44 = vld [vmem:[#allocation71_spill] sm:$0xff] }
 0x34d   : > { %v2653_v38 = vmax.f32 %v2589_v12, %v9604_v32 }
 0x34e   : > { %v2959_v41 = vrot.slane %v2954_v29, 4  ;;  %v9648_v62 = vsel %vm2939_vm12, %v2954_v29, %v2961_v5  ;;  %v2950_v43 = vsel %vm2939_vm12, 0.0, %v2949_v17 }
 0x34f   : > { %v1662_v49 = vpop.permute.xlu1 %1661  ;;  %v2230_v36 = vpop.f32.mrf.mxu0  ;;  %v2958_v34 = vperm.slane %v2950_v43, %v9589_v39  ;;  %v2717_v60 = vmax.f32 %v2653_v38, %v9619_v1 }
 0x350   : > { %v2053_v4 = vsel %vm2022_vm7, %v2020_v57, %v1662_v49  ;;  %v2231_v9 = vadd.f32 %v9310_v22, %v2230_v36  ;;  %v1650_v14 = vpop.permute.xlu0 %1649  ;;  %v2960_v63 = vsel %vm2939_vm12, %v2959_v41, %v2944_v23  ;;  %v1915_v23 = vsel %vm1890_vm5, %v1882_v55, %v12455_v11 }
 0x351   : > { %v2086_v24 = vsel %vm2055_vm9, %v2053_v4, %v1790_v45  ;;  %v9665_v50 = vperm.slane %v2960_v63, %v9655_v10  ;;  %v2971_v20 = vrot.slane %v2958_v34, 4  ;;  %v9679_v2 = vsel %vm2939_vm12, %v2958_v34, %v2973_v53  ;;  %v1664_v45 = vpop.permute.xlu2 %1663  ;;  %v2559_v29 = vld [vmem:[#allocation3 + $0x60] sm:$0xff] }
 0x352   : > { %2368 = vst.msk [vmem:[#allocation3 + $0x69] sm:$0xff] %vm1923_vm2, %v2231_v9  ;;  %7055 = vmatmul.msk.f32.gmra.mxu0 %vm2091_vm10, %v2079_v48  ;;  %7062 = vmatmul.msk.f32.gmra.mxu3 %vm2091_vm10, %v2086_v24  ;;  %v1948_v30 = vsel %vm1923_vm2, %v1915_v23, %v12456_v3  ;;  %v2054_v27 = vsel %vm2022_vm7, %v2021_v58, %v1664_v45  ;;  %v2623_v42 = vld [vmem:[#allocation3 + $0x61] sm:$0xff] }
 0x353   : > { %v2983_v15 = vrot.slane %v9665_v50, 4  ;;  %v1981_v35 = vsel %vm1956_vm6, %v1948_v30, %v12458_v44  ;;  %v9691_v37 = vsel %vm2939_vm12, %v2971_v20, %v2948_v16  ;;  %v2782_v56 = vmax.f32 %v2717_v60, %v2559_v29 }
 0x354   : > { %v2014_v21 = vsel %vm1989_vm8, %v1981_v35, %v8943_v54  ;;  %v2463_v54 = vmax.f32 %v9583_v25, %v9604_v32  ;;  %v2465_v40 = vmax.f32 %v2559_v29, %v2623_v42 }
 0x355   : > { %v2984_v46 = vsel %vm2939_vm12, 0.0, %v2983_v15  ;;  %v2047_v28 = vsel %vm2022_vm7, %v2014_v21, %v1650_v14  ;;  %v2846_v41 = vmax.f32 %v2782_v56, %v2623_v42 }
 0x356   : > { %3779 = vrot.lane.b32.xlu1 %v2984_v46, %s7691_s26  ;;  %v2527_v26 = vmax.f32 %v2463_v54, %v9619_v1 }
 0x357   : > { %v1778_v47 = vpop.permute.xlu1 %1777  ;;  %v2233_v0 = vpop.f32.mrf.mxu0 }
 0x358   : > { %v2080_v5 = vsel %vm2055_vm9, %v2047_v28, %v1778_v47  ;;  %v2234_v17 = vadd.f32 %v9310_v22, %v2233_v0  ;;  %v1792_v59 = vpop.permute.xlu0 %1791  ;;  %v2591_v8 = vmax.f32 %v2527_v26, %v2559_v29 }
 0x359   : > { %v2087_v61 = vsel %vm2055_vm9, %v2054_v27, %v1792_v59  ;;  %v2687_v16 = vld [vmem:[#allocation3 + $0x62] sm:$0xff] }
 0x35a   : > { %2369 = vst.msk [vmem:[#allocation3 + $0x79] sm:$0xff] %vm1923_vm2, %v2234_v17  ;;  %7056 = vmatmul.msk.f32.gmra.mxu0 %vm2091_vm10, %v2080_v5  ;;  %7063 = vmatmul.msk.f32.gmra.mxu3 %vm2091_vm10, %v2087_v61  ;;  %v2655_v32 = vmax.f32 %v2591_v8, %v2623_v42  ;;  %v2910_v43 = vmax.f32 %v2846_v41, %v2687_v16 }
 0x35b   : > { %v2529_v13 = vmax.f32 %v2465_v40, %v2687_v16 }
 0x35c   : > { %v2719_v31 = vmax.f32 %v2655_v32, %v2687_v16  ;;  %v3043_v36 = vrot.slane %v2910_v43, 4  ;;  %v3048_v14 = vperm.slane %v2910_v43, %v9589_v39 }
 0x35e   : > { %v3044_v63 = vsel %vm2939_vm12, 0.0, %v3043_v36  ;;  %v3065_v18 = vrot.slane %v3048_v14, 4 }
 0x35f   : > { %v2236_v51 = vpop.f32.mrf.mxu0  ;;  %v3052_v24 = vperm.slane %v3044_v63, %v9589_v39 }
 0x360   : > { %v2237_v25 = vadd.f32 %v9310_v22, %v2236_v51 }
 0x361   : > { %v2752_v57 = vld [vmem:[#allocation3 + $0x78] sm:$0xff]  ;;  %v3077_v20 = vrot.slane %v3052_v24, 4 }
 0x362   : > { %2370 = vst.msk [vmem:[#allocation3 + $0x81] sm:$0xff] %vm1923_vm2, %v2237_v25  ;;  %v2784_v49 = vmax.f32 %v2719_v31, %v2752_v57  ;;  %v2816_v4 = vld [vmem:[#allocation3 + $0x79] sm:$0xff]  ;;  %v2593_v35 = vmax.f32 %v2529_v13, %v2752_v57 }
 0x363   : > { %v2467_v28 = vmax.f32 %v2752_v57, %v2816_v4 }
 0x364   : > { %v2848_v9 = vmax.f32 %v2784_v49, %v2816_v4  ;;  %v2657_v21 = vmax.f32 %v2593_v35, %v2816_v4 }
 0x367   : > { %v2239_v34 = vpop.f32.mrf.mxu0 }
 0x368   : > { %v2240_v1 = vadd.f32 %v9310_v22, %v2239_v34 }
 0x369   : > { %v2880_v52 = vld [vmem:[#allocation3 + $0x7a] sm:$0xff] }
 0x36a   : > { %2371 = vst.msk [vmem:[#allocation3 + $0x91] sm:$0xff] %vm1923_vm2, %v2240_v1  ;;  %v2912_v48 = vmax.f32 %v2848_v9, %v2880_v52  ;;  %v2721_v47 = vmax.f32 %v2657_v21, %v2880_v52  ;;  %v2531_v0 = vmax.f32 %v2467_v28, %v2880_v52 }
 0x36c   : > { %v3058_v53 = vperm.slane %v2912_v48, %v9589_v39  ;;  %v3053_v55 = vrot.slane %v2912_v48, 4 }
 0x36e   : > { %v3063_v19 = vrot.slane %v3058_v53, 4  ;;  %v9720_v12 = vsel %vm2939_vm12, %v3058_v53, %v3065_v18  ;;  %v3054_v11 = vsel %vm2939_vm12, 0.0, %v3053_v55 }
 0x36f   : > { %v2242_v23 = vpop.f32.mrf.mxu0  ;;  %v3062_v15 = vperm.slane %v3054_v11, %v9589_v39 }
 0x370   : > { %v2243_v3 = vadd.f32 %v9310_v22, %v2242_v23  ;;  %v3064_v30 = vsel %vm2939_vm12, %v3063_v19, %v3048_v14 }
 0x371   : > { %v9727_v7 = vperm.slane %v3064_v30, %v9655_v10  ;;  %v3075_v45 = vrot.slane %v3062_v15, 4  ;;  %v9730_v44 = vsel %vm2939_vm12, %v3062_v15, %v3077_v20  ;;  %v2563_v38 = vld [vmem:[#allocation3 + $0x90] sm:$0xff] }
 0x372   : > { %2372 = vst.msk [vmem:[#allocation3 + $0x99] sm:$0xff] %vm1923_vm2, %v2243_v3  ;;  %v2786_v29 = vmax.f32 %v2721_v47, %v2563_v38  ;;  %v2595_v5 = vmax.f32 %v2531_v0, %v2563_v38  ;;  %v2627_v17 = vld [vmem:[#allocation3 + $0x91] sm:$0xff] }
 0x373   : > { %v3087_v6 = vrot.slane %v9727_v7, 4  ;;  %v9735_v33 = vsel %vm2939_vm12, %v3075_v45, %v3052_v24  ;;  %v2469_v63 = vmax.f32 %v2563_v38, %v2627_v17 }
 0x374   : > { %v2850_v54 = vmax.f32 %v2786_v29, %v2627_v17  ;;  %v2659_v26 = vmax.f32 %v2595_v5, %v2627_v17 }
 0x375   : > { %v3088_v46 = vsel %vm2939_vm12, 0.0, %v3087_v6 }
 0x376   : > { %3781 = vrot.lane.b32.xlu2 %v3088_v46, %s7691_s26 }
 0x377   : > { %v2245_v58 = vpop.f32.mrf.mxu0 }
 0x378   : > { %v2246_v27 = vadd.f32 %v9310_v22, %v2245_v58 }
 0x379   : > { %v2691_v59 = vld [vmem:[#allocation3 + $0x92] sm:$0xff] }
 0x37a   : > { %2373 = vst.msk [vmem:[#allocation3 + $0xa9] sm:$0xff] %vm1923_vm2, %v2246_v27  ;;  %v2914_v56 = vmax.f32 %v2850_v54, %v2691_v59  ;;  %v2723_v42 = vmax.f32 %v2659_v26, %v2691_v59  ;;  %v2533_v40 = vmax.f32 %v2469_v63, %v2691_v59 }
 0x37c   : > { %v3147_v41 = vrot.slane %v2914_v56, 4  ;;  %v3152_v57 = vperm.slane %v2914_v56, %v9589_v39 }
 0x37e   : > { %v3148_v31 = vsel %vm2939_vm12, 0.0, %v3147_v41  ;;  %v3169_v1 = vrot.slane %v3152_v57, 4 }
 0x37f   : > { %v2248_v60 = vpop.f32.mrf.mxu0  ;;  %v3156_v34 = vperm.slane %v3148_v31, %v9589_v39 }
 0x380   : > { %v2249_v61 = vadd.f32 %v9310_v22, %v2248_v60 }
 0x381   : > { %v2756_v8 = vld [vmem:[#allocation3 + $0xa8] sm:$0xff]  ;;  %v3181_v18 = vrot.slane %v3156_v34, 4 }
 0x382   : > { %2374 = vst.msk [vmem:[#allocation3 + $0xb1] sm:$0xff] %vm1923_vm2, %v2249_v61  ;;  %v2788_v16 = vmax.f32 %v2723_v42, %v2756_v8  ;;  %v2820_v25 = vld [vmem:[#allocation3 + $0xa9] sm:$0xff]  ;;  %v2597_v20 = vmax.f32 %v2533_v40, %v2756_v8 }
 0x383   : > { %v2471_v21 = vmax.f32 %v2756_v8, %v2820_v25 }
 0x384   : > { %v2852_v43 = vmax.f32 %v2788_v16, %v2820_v25  ;;  %v2661_v45 = vmax.f32 %v2597_v20, %v2820_v25 }
 0x387   : > { %v2251_v51 = vpop.f32.mrf.mxu0 }
 0x388   : > { %v2252_v32 = vadd.f32 %v9310_v22, %v2251_v51 }
 0x389   : > { %v2884_v49 = vld [vmem:[#allocation3 + $0xaa] sm:$0xff] }
 0x38a   : > { %2375 = vst.msk [vmem:[#allocation3 + $0xc1] sm:$0xff] %vm1923_vm2, %v2252_v32  ;;  %v2916_v36 = vmax.f32 %v2852_v43, %v2884_v49  ;;  %v2725_v58 = vmax.f32 %v2661_v45, %v2884_v49  ;;  %v2535_v38 = vmax.f32 %v2471_v21, %v2884_v49 }
 0x38c   : > { %v3162_v4 = vperm.slane %v2916_v36, %v9589_v39  ;;  %v3157_v9 = vrot.slane %v2916_v36, 4 }
 0x38e   : > { %v3167_v14 = vrot.slane %v3162_v4, 4  ;;  %v9750_v52 = vsel %vm2939_vm12, %v3162_v4, %v3169_v1  ;;  %v3158_v48 = vsel %vm2939_vm12, 0.0, %v3157_v9 }
 0x38f   : > { %v2254_v24 = vpop.f32.mrf.mxu0  ;;  %v3166_v53 = vperm.slane %v3158_v48, %v9589_v39 }
 0x390   : > { %v2255_v55 = vadd.f32 %v9310_v22, %v2254_v24  ;;  %v3168_v19 = vsel %vm2939_vm12, %v3167_v14, %v3152_v57 }
 0x391   : > { %v9757_v11 = vperm.slane %v3168_v19, %v9655_v10  ;;  %v3179_v23 = vrot.slane %v3166_v53, 4  ;;  %v9760_v15 = vsel %vm2939_vm12, %v3166_v53, %v3181_v18  ;;  %v2567_v6 = vld [vmem:[#allocation3 + $0xc0] sm:$0xff] }
 0x392   : > { %2376 = vst.msk [vmem:[#allocation3 + $0xc9] sm:$0xff] %vm1923_vm2, %v2255_v55  ;;  %v2790_v27 = vmax.f32 %v2725_v58, %v2567_v6  ;;  %v2599_v28 = vmax.f32 %v2535_v38, %v2567_v6  ;;  %v2631_v47 = vld [vmem:[#allocation3 + $0xc1] sm:$0xff] }
 0x393   : > { %v3191_v3 = vrot.slane %v9757_v11, 4  ;;  %v9765_v30 = vsel %vm2939_vm12, %v3179_v23, %v3156_v34 }
 0x394   : > { %v2854_v29 = vmax.f32 %v2790_v27, %v2631_v47  ;;  %v2663_v59 = vmax.f32 %v2599_v28, %v2631_v47 }
 0x395   : > { %v3192_v13 = vsel %vm2939_vm12, 0.0, %v3191_v3 }
 0x396   : > { %3783 = vrot.lane.b32.xlu0 %v3192_v13, %s7691_s26  ;;  %v2473_v13 = vmax.f32 %v2567_v6, %v2631_v47 }
 0x397   : > { %v2257_v35 = vpop.f32.mrf.mxu0 }
 0x398   : > { %v2258_v46 = vadd.f32 %v9310_v22, %v2257_v35 }
 0x399   : > { %v2695_v0 = vld [vmem:[#allocation3 + $0xc2] sm:$0xff] }
 0x39a   : > { %2377 = vst.msk [vmem:[#allocation3 + $0xd9] sm:$0xff] %vm1923_vm2, %v2258_v46  ;;  %v2918_v54 = vmax.f32 %v2854_v29, %v2695_v0  ;;  %v2727_v61 = vmax.f32 %v2663_v59, %v2695_v0  ;;  %v2537_v21 = vmax.f32 %v2473_v13, %v2695_v0 }
 0x39c   : > { %v3251_v8 = vrot.slane %v2918_v54, 4  ;;  %v3256_v32 = vperm.slane %v2918_v54, %v9589_v39 }
 0x39e   : > { %v3252_v43 = vsel %vm2939_vm12, 0.0, %v3251_v8  ;;  %v3273_v4 = vrot.slane %v3256_v32, 4 }
 0x39f   : > { %v2260_v5 = vpop.f32.mrf.mxu0  ;;  %v3260_v49 = vperm.slane %v3252_v43, %v9589_v39 }
 0x3a0   : > { %v2261_v17 = vadd.f32 %v9310_v22, %v2260_v5 }
 0x3a1   : > { %v2760_v60 = vld [vmem:[#allocation3 + $0xd8] sm:$0xff]  ;;  %v3285_v18 = vrot.slane %v3260_v49, 4 }
 0x3a2   : > { %2378 = vst.msk [vmem:[#allocation3 + $0xe1] sm:$0xff] %vm1923_vm2, %v2261_v17  ;;  %v2792_v56 = vmax.f32 %v2727_v61, %v2760_v60  ;;  %v2824_v41 = vld [vmem:[#allocation3 + $0xd9] sm:$0xff]  ;;  %v2601_v27 = vmax.f32 %v2537_v21, %v2760_v60 }
 0x3a3   : > { %v2475_v29 = vmax.f32 %v2760_v60, %v2824_v41 }
 0x3a4   : > { %v2284_v26 = vpop.f32.mrf.mxu3  ;;  %v2856_v25 = vmax.f32 %v2792_v56, %v2824_v41  ;;  %v2665_v47 = vmax.f32 %v2601_v27, %v2824_v41 }
 0x3a5   : > { %v2285_v42 = vadd.f32 %v9310_v22, %v2284_v26 }
 0x3a7   : > { %2386 = vst.msk [vmem:[#allocation3 + $0x141] sm:$0xff] %vm1923_vm2, %v2285_v42  ;;  %v2263_v16 = vpop.f32.mrf.mxu0 }
 0x3a8   : > { %v2264_v51 = vadd.f32 %v9310_v22, %v2263_v16 }
 0x3a9   : > { %v2888_v57 = vld [vmem:[#allocation3 + $0xda] sm:$0xff] }
 0x3aa   : > { %2379 = vst.msk [vmem:[#allocation3 + $0xf1] sm:$0xff] %vm1923_vm2, %v2264_v51  ;;  %v2920_v31 = vmax.f32 %v2856_v25, %v2888_v57  ;;  %v2539_v6 = vmax.f32 %v2475_v29, %v2888_v57  ;;  %v2729_v54 = vmax.f32 %v2665_v47, %v2888_v57 }
 0x3ac   : > { %v2287_v36 = vpop.f32.mrf.mxu3  ;;  %v3266_v34 = vperm.slane %v2920_v31, %v9589_v39  ;;  %v3261_v1 = vrot.slane %v2920_v31, 4 }
 0x3ad   : > { %v2288_v9 = vadd.f32 %v9310_v22, %v2287_v36 }
 0x3ae   : > { %v3271_v14 = vrot.slane %v3266_v34, 4  ;;  %v9783_v63 = vsel %vm2939_vm12, %v3266_v34, %v3273_v4  ;;  %v3262_v48 = vsel %vm2939_vm12, 0.0, %v3261_v1 }
 0x3af   : > { %2387 = vst.msk [vmem:[#allocation3 + $0x151] sm:$0xff] %vm1923_vm2, %v2288_v9  ;;  %v2266_v24 = vpop.f32.mrf.mxu0  ;;  %v3270_v53 = vperm.slane %v3262_v48, %v9589_v39 }
 0x3b0   : > { %v2267_v55 = vadd.f32 %v9310_v22, %v2266_v24  ;;  %v3272_v19 = vsel %vm2939_vm12, %v3271_v14, %v3256_v32 }
 0x3b1   : > { %v9791_v40 = vperm.slane %v3272_v19, %v9655_v10  ;;  %v3283_v23 = vrot.slane %v3270_v53, 4  ;;  %v9794_v20 = vsel %vm2939_vm12, %v3270_v53, %v3285_v18  ;;  %v2571_v5 = vld [vmem:[#allocation3 + $0xf0] sm:$0xff] }
 0x3b2   : > { %2380 = vst.msk [vmem:[#allocation3 + $0xf9] sm:$0xff] %vm1923_vm2, %v2267_v55  ;;  %v2603_v17 = vmax.f32 %v2539_v6, %v2571_v5  ;;  %v2635_v26 = vld [vmem:[#allocation3 + $0xf1] sm:$0xff]  ;;  %v2794_v8 = vmax.f32 %v2729_v54, %v2571_v5 }
 0x3b3   : > { %v3295_v3 = vrot.slane %v9791_v40, 4  ;;  %v9799_v45 = vsel %vm2939_vm12, %v3283_v23, %v3260_v49  ;;  %v2477_v21 = vmax.f32 %v2571_v5, %v2635_v26 }
 0x3b4   : > { %v2667_v16 = vmax.f32 %v2603_v17, %v2635_v26  ;;  %v2858_v25 = vmax.f32 %v2794_v8, %v2635_v26  ;;  %v7678_v17 = vld [vmem:[%s12097_s2] ss:$0 sm:$0xff] }
 0x3b5   : > { %v2290_v35 = vpop.f32.mrf.mxu3  ;;  %v3296_v46 = vsel %vm2939_vm12, 0.0, %v3295_v3 }
 0x3b6   : > { %v2291_v58 = vadd.f32 %v9310_v22, %v2290_v35  ;;  %3785 = vrot.lane.b32.xlu1 %v3296_v46, %s7691_s26  ;;  %v2421_v54 = vld [vmem:[#allocation3 + $0x150] sm:$0xff] }
 0x3b7   : > { %v2269_v38 = vpop.f32.mrf.mxu0 }
 0x3b8   : > { %2388 = vst.msk [vmem:[#allocation3 + $0x159] sm:$0xff] %vm1923_vm2, %v2291_v58  ;;  %v2270_v28 = vadd.f32 %v9310_v22, %v2269_v38 }
 0x3b9   : > { %v2699_v56 = vld [vmem:[#allocation3 + $0xf2] sm:$0xff] }
 0x3ba   : > { %2381 = vst.msk [vmem:[#allocation3 + $0x109] sm:$0xff] %vm1923_vm2, %v2270_v28  ;;  %v2731_v51 = vmax.f32 %v2667_v16, %v2699_v56  ;;  %v2922_v32 = vmax.f32 %v2858_v25, %v2699_v56  ;;  %v2541_v27 = vmax.f32 %v2477_v21, %v2699_v56 }
 0x3bc   : > { %v3355_v34 = vrot.slane %v2922_v32, 4  ;;  %v9819_v53 = vperm.slane %v2922_v32, %v9589_v39 }
 0x3bd   : > { %v2293_v59 = vpop.f32.mrf.mxu3 }
 0x3be   : > { %v2294_v0 = vadd.f32 %v9310_v22, %v2293_v59  ;;  %v3356_v24 = vsel %vm2939_vm12, 0.0, %v3355_v34 }
 0x3bf   : > { %v2272_v61 = vpop.f32.mrf.mxu0  ;;  %v3364_v35 = vperm.slane %v3356_v24, %v9589_v39  ;;  %v9848_v16 = vld [vmem:[#allocation3 + $0x152] sm:$0xff] }
 0x3c0   : > { %2389 = vst.msk [vmem:[#allocation3 + $0x169] sm:$0xff] %vm1923_vm2, %v2294_v0  ;;  %v2273_v42 = vadd.f32 %v9310_v22, %v2272_v61  ;;  %v9842_v0 = vld [vmem:[#allocation3 + $0x151] sm:$0xff] }
 0x3c1   : > { %v2764_v60 = vld [vmem:[#allocation3 + $0x108] sm:$0xff]  ;;  %v3389_v29 = vrot.slane %v3364_v35, 4  ;;  %v2485_v25 = vmax.f32 %v2421_v54, %v9842_v0 }
 0x3c2   : > { %2382 = vst.msk [vmem:[#allocation3 + $0x111] sm:$0xff] %vm1923_vm2, %v2273_v42  ;;  %v2796_v41 = vmax.f32 %v2731_v51, %v2764_v60  ;;  %v2828_v57 = vld [vmem:[#allocation3 + $0x109] sm:$0xff]  ;;  %v2605_v47 = vmax.f32 %v2541_v27, %v2764_v60 }
 0x3c3   : > { %v2479_v5 = vmax.f32 %v2764_v60, %v2828_v57 }
 0x3c4   : > { %v2860_v49 = vmax.f32 %v2796_v41, %v2828_v57  ;;  %v2669_v51 = vmax.f32 %v2605_v47, %v2828_v57 }
 0x3c7   : > { %v2275_v43 = vpop.f32.mrf.mxu0  ;;  %v2423_v41 = vld [vmem:[#allocation3 + $0x168] sm:$0xff] }
 0x3c8   : > { %v2276_v31 = vadd.f32 %v9310_v22, %v2275_v43  ;;  %v9852_v43 = vld [vmem:[#allocation3 + $0x169] sm:$0xff] }
 0x3c9   : > { %v2892_v36 = vld [vmem:[#allocation3 + $0x10a] sm:$0xff] }
 0x3ca   : > { %2383 = vst.msk [vmem:[#allocation3 + $0x121] sm:$0xff] %vm1923_vm2, %v2276_v31  ;;  %v2924_v4 = vmax.f32 %v2860_v49, %v2892_v36  ;;  %v2543_v42 = vmax.f32 %v2479_v5, %v2892_v36  ;;  %v2733_v32 = vmax.f32 %v2669_v51, %v2892_v36  ;;  %v2549_v31 = vmax.f32 %v2485_v25, %v9848_v16 }
 0x3cc   : > { %v2296_v1 = vpop.f32.mrf.mxu3  ;;  %v9814_v9 = vperm.slane %v2924_v4, %v9589_v39  ;;  %v3365_v14 = vrot.slane %v2924_v4, 4 }
 0x3cd   : > { %v2297_v48 = vadd.f32 %v9310_v22, %v2296_v1 }
 0x3ce   : > { %v3375_v18 = vrot.slane %v9814_v9, 4  ;;  %v3366_v55 = vsel %vm2939_vm12, 0.0, %v3365_v14 }
 0x3cf   : > { %2390 = vst.msk [vmem:[#allocation3 + $0x171] sm:$0xff] %vm1923_vm2, %v2297_v48  ;;  %v2278_v19 = vpop.f32.mrf.mxu0  ;;  %v3374_v23 = vperm.slane %v3366_v55, %v9589_v39  ;;  %v2613_v48 = vmax.f32 %v2549_v31, %v2423_v41 }
 0x3d0   : > { %v2279_v3 = vadd.f32 %v9310_v22, %v2278_v19  ;;  %v3376_v13 = vsel %vm2939_vm12, %v3375_v18, %v9819_v53  ;;  %v2487_v18 = vmax.f32 %v2423_v41, %v9852_v43 }
 0x3d1   : > { %v9830_v46 = vperm.slane %v3376_v13, %v9655_v10  ;;  %v3387_v58 = vrot.slane %v3374_v23, 4  ;;  %v9845_v61 = vsel %vm2939_vm12, %v3374_v23, %v3389_v29  ;;  %v2575_v56 = vld [vmem:[#allocation3 + $0x120] sm:$0xff]  ;;  %v2677_v21 = vmax.f32 %v2613_v48, %v9852_v43 }
 0x3d2   : > { %2384 = vst.msk [vmem:[#allocation3 + $0x129] sm:$0xff] %vm1923_vm2, %v2279_v3  ;;  %v2607_v60 = vmax.f32 %v2543_v42, %v2575_v56  ;;  %v2639_v49 = vld [vmem:[#allocation3 + $0x121] sm:$0xff]  ;;  %v2798_v1 = vmax.f32 %v2733_v32, %v2575_v56  ;;  %v2776_v32 = vld [vmem:[#allocation3 + $0x198] sm:$0xff] }
 0x3d3   : > { %12460 = vst [vmem:[#allocation38_spill] sm:$0xff] %v9830_v46  ;;  %v3399_v38 = vrot.slane %v9830_v46, 4  ;;  %v9835_v28 = vsel %vm2939_vm12, %v3387_v58, %v3364_v35  ;;  %v2481_v19 = vmax.f32 %v2575_v56, %v2639_v49  ;;  %v2840_v48 = vld [vmem:[#allocation3 + $0x199] sm:$0xff] }
 0x3d4   : > { %v2671_v57 = vmax.f32 %v2607_v60, %v2639_v49  ;;  %v2862_v35 = vmax.f32 %v2798_v1, %v2639_v49 }
 0x3d5   : > { %v2299_v22 = vpop.f32.mrf.mxu3  ;;  %v3400_v6 = vsel %vm2939_vm12, 0.0, %v3399_v38 }
 0x3d6   : > { %v2300_v59 = vadd.f32 %v7678_v17, %v2299_v22  ;;  %3787 = vrot.lane.b32.xlu2 %v3400_v6, %s7691_s26  ;;  %v9855_v14 = vld [vmem:[#allocation3 + $0x16a] sm:$0xff] }
 0x3d7   : > { %v2281_v26 = vpop.f32.mrf.mxu0  ;;  %v2551_v23 = vmax.f32 %v2487_v18, %v9855_v14  ;;  %v2741_v47 = vmax.f32 %v2677_v21, %v9855_v14 }
 0x3d8   : > { %2391 = vst.msk [vmem:[#allocation3 + $0x181] sm:$0xff] %vm1923_vm2, %v2300_v59  ;;  %v2282_v8 = vadd.f32 %v7678_v17, %v2281_v26 }
 0x3d9   : > { %v2703_v4 = vld [vmem:[#allocation3 + $0x122] sm:$0xff] }
 0x3da   : > { %2385 = vst.msk [vmem:[#allocation3 + $0x139] sm:$0xff] %vm1923_vm2, %v2282_v8  ;;  %v2735_v36 = vmax.f32 %v2671_v57, %v2703_v4  ;;  %v2545_v58 = vmax.f32 %v2481_v19, %v2703_v4  ;;  %v2926_v6 = vmax.f32 %v2862_v35, %v2703_v4 }
 0x3dc   : > { %v3459_v49 = vrot.slane %v2926_v6, 4 }
 0x3dd   : > { %v2302_v34 = vpop.f32.mrf.mxu3 }
 0x3de   : > { %v2303_v24 = vadd.f32 %v7678_v17, %v2302_v34  ;;  %v3460_v21 = vsel %vm2939_vm12, 0.0, %v3459_v49 }
 0x3df   : > { %v2583_v55 = vld [vmem:[#allocation3 + $0x180] sm:$0xff] }
 0x3e0   : > { %2392 = vst.msk [vmem:[#allocation3 + $0x189] sm:$0xff] %vm1923_vm2, %v2303_v24  ;;  %v2615_v27 = vmax.f32 %v2551_v23, %v2583_v55  ;;  %v2647_v26 = vld [vmem:[#allocation3 + $0x181] sm:$0xff]  ;;  %v2806_v56 = vmax.f32 %v2741_v47, %v2583_v55  ;;  %v9867_v55 = vperm.slane %v2926_v6, %v9589_v39 }
 0x3e1   : > { %v2768_v3 = vld [vmem:[#allocation3 + $0x138] sm:$0xff] }
 0x3e2   : > { %v2832_v13 = vld [vmem:[#allocation3 + $0x139] sm:$0xff]  ;;  %v2800_v38 = vmax.f32 %v2735_v36, %v2768_v3  ;;  %v2609_v17 = vmax.f32 %v2545_v58, %v2768_v3  ;;  %v2679_v51 = vmax.f32 %v2615_v27, %v2647_v26  ;;  %v2870_v24 = vmax.f32 %v2806_v56, %v2647_v26 }
 0x3e3   : > { %v2483_v29 = vmax.f32 %v2768_v3, %v2832_v13  ;;  %v2896_v22 = vld [vmem:[#allocation3 + $0x13a] sm:$0xff] }
 0x3e4   : > { %v2864_v59 = vmax.f32 %v2800_v38, %v2832_v13  ;;  %v2673_v8 = vmax.f32 %v2609_v17, %v2832_v13  ;;  %v2904_v3 = vld [vmem:[#allocation3 + $0x19a] sm:$0xff]  ;;  %v3468_v17 = vperm.slane %v3460_v21, %v9589_v39 }
 0x3e5   : > { %v2547_v5 = vmax.f32 %v2483_v29, %v2896_v22 }
 0x3e6   : > { %v2928_v42 = vmax.f32 %v2864_v59, %v2896_v22  ;;  %v2737_v31 = vmax.f32 %v2673_v8, %v2896_v22 }
 0x3e7   : > { %v2611_v25 = vmax.f32 %v2547_v5, %v2421_v54  ;;  %v2711_v60 = vld [vmem:[#allocation3 + $0x182] sm:$0xff] }
 0x3e8   : > { %v9863_v34 = vperm.slane %v2928_v42, %v9589_v39  ;;  %v2743_v1 = vmax.f32 %v2679_v51, %v2711_v60  ;;  %v2802_v57 = vmax.f32 %v2737_v31, %v2421_v54  ;;  %v3469_v18 = vrot.slane %v2928_v42, 4 }
 0x3e9   : > { %v2675_v4 = vmax.f32 %v2611_v25, %v9842_v0  ;;  %v2934_v13 = vmax.f32 %v2870_v24, %v2711_v60 }
 0x3ea   : > { %v3479_v19 = vrot.slane %v9863_v34, 4  ;;  %v2808_v36 = vmax.f32 %v2743_v1, %v2776_v32  ;;  %v2866_v35 = vmax.f32 %v2802_v57, %v9842_v0  ;;  %v3470_v58 = vsel %vm2939_vm12, 0.0, %v3469_v18 }
 0x3eb   : > { %v2739_v23 = vmax.f32 %v2675_v4, %v9848_v16  ;;  %v3478_v22 = vperm.slane %v3470_v58, %v9589_v39  ;;  %v3667_v26 = vrot.slane %v2934_v13, 4 }
 0x3ec   : > { %v3480_v54 = vsel %vm2939_vm12, %v3479_v19, %v9867_v55  ;;  %v2872_v38 = vmax.f32 %v2808_v36, %v2840_v48  ;;  %v2930_v59 = vmax.f32 %v2866_v35, %v9848_v16  ;;  %v2970_v35 = vperm.slane %v9648_v62, %v9655_v10 }
 0x3ed   : > { %v2804_v27 = vmax.f32 %v2739_v23, %v2423_v41  ;;  %v9877_v29 = vperm.slane %v3480_v54, %v9655_v10  ;;  %v3491_v5 = vrot.slane %v3478_v22, 4  ;;  %v3668_v60 = vsel %vm2939_vm12, 0.0, %v3667_v26 }
 0x3ee   : > { %v2936_v6 = vmax.f32 %v2872_v38, %v2904_v3  ;;  %v3563_v31 = vrot.slane %v2930_v59, 4  ;;  %v3568_v1 = vperm.slane %v2930_v59, %v9589_v39  ;;  %v3676_v18 = vperm.slane %v3668_v60, %v9589_v39 }
 0x3ef   : > { %12461 = vst [vmem:[#allocation11_spill] sm:$0xff] %v9877_v29  ;;  %v2868_v47 = vmax.f32 %v2804_v27, %v9852_v43  ;;  %v3503_v0 = vrot.slane %v9877_v29, 4  ;;  %v9890_v51 = vsel %vm2939_vm12, %v3491_v5, %v3468_v17  ;;  %v3672_v43 = vperm.slane %v2934_v13, %v9589_v39 }
 0x3f0   : > { %v9885_v56 = vperm.slane %v2936_v6, %v9589_v39  ;;  %v3677_v8 = vrot.slane %v2936_v6, 4  ;;  %v3564_v13 = vsel %vm2939_vm12, 0.0, %v3563_v31  ;;  %v3493_v27 = vrot.slane %v3468_v17, 4 }
 0x3f1   : > { %v2932_v41 = vmax.f32 %v2868_v47, %v9855_v14  ;;  %v3504_v42 = vsel %vm2939_vm12, 0.0, %v3503_v0  ;;  %v3572_v6 = vperm.slane %v3564_v13, %v9589_v39  ;;  %v3282_v17 = vperm.slane %v9783_v63, %v9655_v10 }
 0x3f2   : > { %3789 = vrot.lane.b32.xlu0 %v3504_v42, %s7691_s26  ;;  %v3687_v25 = vrot.slane %v9885_v56, 4  ;;  %v3678_v32 = vsel %vm2939_vm12, 0.0, %v3677_v8  ;;  %v9925_v62 = vsel %vm2939_vm12, %v3478_v22, %v3493_v27  ;;  %v3178_v5 = vperm.slane %v9750_v52, %v9655_v10  ;;  %v2428_v27 = vld [vmem:[#allocation3 + $0x21] sm:$0xff] }
 0x3f3   : > { %v3578_v16 = vperm.slane %v2932_v41, %v9589_v39  ;;  %v3573_v14 = vrot.slane %v2932_v41, 4  ;;  %v3686_v48 = vperm.slane %v3678_v32, %v9589_v39  ;;  %v3074_v26 = vperm.slane %v9720_v12, %v9655_v10 }
 0x3f4   : > { %v3688_v49 = vsel %vm2939_vm12, %v3687_v25, %v3672_v43  ;;  %v3597_v22 = vrot.slane %v3572_v6, 4  ;;  %v3585_v41 = vrot.slane %v3568_v1, 4  ;;  %v3481_v8 = vrot.slane %v9867_v55, 4 }
 0x3f5   : > { %v3583_v4 = vrot.slane %v3578_v16, 4  ;;  %v9902_v24 = vperm.slane %v3688_v49, %v9655_v10  ;;  %v3699_v19 = vrot.slane %v3686_v48, 4  ;;  %v3574_v36 = vsel %vm2939_vm12, 0.0, %v3573_v14 }
 0x3f6   : > { %v3582_v58 = vperm.slane %v3574_v36, %v9589_v39  ;;  %v3701_v63 = vrot.slane %v3676_v18, 4  ;;  %v3586_v25 = vsel %vm2939_vm12, %v3578_v16, %v3585_v41  ;;  %v3482_v52 = vsel %vm2939_vm12, %v9863_v34, %v3481_v8 }
 0x3f7   : > { %12462 = vst [vmem:[#allocation55_spill] sm:$0xff] %v9902_v24  ;;  %v3584_v57 = vsel %vm2939_vm12, %v3583_v4, %v3568_v1  ;;  %v3711_v23 = vrot.slane %v9902_v24, 4  ;;  %v9915_v21 = vsel %vm2939_vm12, %v3699_v19, %v3676_v18  ;;  %v3377_v60 = vrot.slane %v9819_v53, 4 }
 0x3f8   : > { %v9909_v3 = vperm.slane %v3584_v57, %v9655_v10  ;;  %v3595_v47 = vrot.slane %v3582_v58, 4  ;;  %v9942_v42 = vsel %vm2939_vm12, %v3582_v58, %v3597_v22  ;;  %v9949_v32 = vsel %vm2939_vm12, %v3686_v48, %v3701_v63  ;;  %v2492_v22 = vld [vmem:[#allocation3 + $0x22] sm:$0xff]  ;;  %v2749_v63 = vld [vmem:[#allocation3 + $0x50] sm:$0xff] }
 0x3f9   : > { %v3712_v54 = vsel %vm2939_vm12, 0.0, %v3711_v23  ;;  %v3378_v12 = vsel %vm2939_vm12, %v9814_v9, %v3377_v60  ;;  %v3594_v55 = vperm.slane %v3586_v25, %v9655_v10  ;;  %v3490_v31 = vperm.slane %v3482_v52, %v9655_v10  ;;  %v2813_v25 = vld [vmem:[#allocation3 + $0x51] sm:$0xff] }
 0x3fa   : > { %12463 = vst [vmem:[#allocation9_spill] sm:$0xff] %v9909_v3  ;;  %v3607_v38 = vrot.slane %v9909_v3, 4  ;;  %3811 = vrot.lane.b32.xlu0 %v2970_v35, %s7694_s29  ;;  %3793 = vrot.lane.b32.xlu2 %v3712_v54, %s7691_s26  ;;  %v9929_v59 = vsel %vm2939_vm12, %v3595_v47, %v3572_v6  ;;  %v3386_v16 = vperm.slane %v3378_v12, %v9655_v10  ;;  %v3089_v34 = vrot.slane %v3074_v26, 4 }
 0x3fb   : > { %v2985_v53 = vrot.slane %v2970_v35, 4  ;;  %v3689_v14 = vrot.slane %v3672_v43, 4  ;;  %v3297_v57 = vrot.slane %v3282_v17, 4  ;;  %v3193_v18 = vrot.slane %v3178_v5, 4 }
 0x3fc   : > { %v3608_v0 = vsel %vm2939_vm12, 0.0, %v3607_v38  ;;  %v3090_v9 = vsel %vm2939_vm12, 0.0, %v3089_v34  ;;  %v3401_v48 = vrot.slane %v3386_v16, 4  ;;  %v3609_v23 = vrot.slane %v3594_v55, 4  ;;  %v2396_v38 = vld [vmem:[#allocation3 + $0x20] sm:$0xff] }
 0x3fd   : > { %3791 = vrot.lane.b32.xlu1 %v3608_v0, %s7691_s26  ;;  %v3690_v49 = vsel %vm2939_vm12, %v9885_v56, %v3689_v14  ;;  %v2986_v1 = vsel %vm2939_vm12, 0.0, %v2985_v53  ;;  %v3298_v56 = vsel %vm2939_vm12, 0.0, %v3297_v57  ;;  %v3194_v19 = vsel %vm2939_vm12, 0.0, %v3193_v18  ;;  %v2877_v53 = vld [vmem:[#allocation3 + $0x52] sm:$0xff] }
 0x3fe   : > { %v3698_v4 = vperm.slane %v3690_v49, %v9655_v10  ;;  %v3402_v43 = vsel %vm2939_vm12, 0.0, %v3401_v48  ;;  %v3505_v13 = vrot.slane %v3490_v31, 4  ;;  %v3610_v58 = vsel %vm2939_vm12, 0.0, %v3609_v23 }
 0x3ff   : > { %v3186_v6 = vperm.slane %v9765_v30, %v9655_v10  ;;  %v9983_v47 = vperm.slane %v9735_v33, %v9655_v10  ;;  %v2978_v0 = vperm.slane %v9691_v37, %v9655_v10  ;;  %v2556_v30 = vld [vmem:[#allocation3 + $0x38] sm:$0xff]  ;;  %v2490_v33 = vld [vmem:[#allocation3 + $0xa] sm:$0xff]  ;;  %v9993_v52 = vperm.slane %v9890_v51, %v9655_v10 }
 0x400   : > { %v3713_v36 = vrot.slane %v3698_v4, 4  ;;  %v3506_v54 = vsel %vm2939_vm12, 0.0, %v3505_v13  ;;  %v9997_v60 = vperm.slane %v9835_v28, %v9655_v10  ;;  %v3290_v12 = vperm.slane %v9799_v45, %v9655_v10  ;;  %v10006_v28 = vld [vmem:[#allocation3 + $0x68] sm:$0xff] }
 0x401   : > { %v2987_v34 = vrot.slane %v2978_v0, 4  ;;  %v3602_v18 = vperm.slane %v9929_v59, %v9655_v10  ;;  %v3195_v13 = vrot.slane %v3186_v6, 4 }
 0x402   : > { %3817 = vrot.lane.b32.xlu0 %v3282_v17, %s7694_s29  ;;  %3815 = vrot.lane.b32.xlu2 %v3178_v5, %s7694_s29  ;;  %v3714_v35 = vsel %vm2939_vm12, 0.0, %v3713_v36  ;;  %v2460_v17 = vmax.f32 %v2396_v38, %v2428_v27  ;;  %v2394_v5 = vld [vmem:[#allocation3 + $0x8] sm:$0xff]  ;;  %v3299_v23 = vrot.slane %v3290_v12, 4 }
 0x403   : > { %v2988_v57 = vsel %vm2939_vm12, 0.0, %v2987_v34 }
 0x404   : > { %v2524_v8 = vmax.f32 %v2460_v17, %v2492_v22  ;;  %v10026_v17 = vld [vmem:[#allocation3 + $0x80] sm:$0xff] }
 0x405   : > { %3813 = vrot.lane.b32.xlu1 %v3074_v26, %s7694_s29  ;;  %v2426_v26 = vld [vmem:[#allocation3 + $0x9] sm:$0xff] }
 0x406   : > { %v2458_v41 = vmax.f32 %v2394_v5, %v2426_v26  ;;  %v2588_v37 = vmax.f32 %v2524_v8, %v2556_v30  ;;  %v3300_v5 = vsel %vm2939_vm12, 0.0, %v3299_v23  ;;  %v3196_v26 = vsel %vm2939_vm12, 0.0, %v3195_v13  ;;  %v10035_v8 = vpop.permute.xlu2 %3781 }
 0x40a   : > { %3823 = vrot.lane.b32.xlu0 %v3594_v55, %s7694_s29  ;;  %3821 = vrot.lane.b32.xlu2 %v3490_v31, %s7694_s29  ;;  %v2522_v55 = vmax.f32 %v2458_v41, %v2490_v33  ;;  %v2464_v31 = vmax.f32 %v2749_v63, %v2813_v25  ;;  %v3611_v33 = vrot.slane %v3602_v18, 4 }
 0x40c   : > { %v2586_v14 = vmax.f32 %v2522_v55, %v2396_v38  ;;  %v2528_v49 = vmax.f32 %v2464_v31, %v2877_v53  ;;  %v3091_v38 = vrot.slane %v9983_v47, 4 }
 0x40d   : > { %3819 = vrot.lane.b32.xlu1 %v3386_v16, %s7694_s29  ;;  %v2620_v16 = vld [vmem:[#allocation3 + $0x39] sm:$0xff] }
 0x40e   : > { %v2652_v51 = vmax.f32 %v2588_v37, %v2620_v16  ;;  %v2462_v48 = vmax.f32 %v2556_v30, %v2620_v16  ;;  %v2592_v45 = vmax.f32 %v2528_v49, %v10006_v28  ;;  %v10039_v37 = vld [vmem:[#allocation3 + $0x81] sm:$0xff] }
 0x412   : > { %3845 = vrot.lane.b32.xlu0 %v3090_v9, %s7699_s30  ;;  %3843 = vrot.lane.b32.xlu2 %v2986_v1, %s7699_s30  ;;  %v2684_v9 = vld [vmem:[#allocation3 + $0x3a] sm:$0xff]  ;;  %v10010_v1 = vperm.slane %v9915_v21, %v9655_v10 }
 0x413   : > { %v2526_v21 = vmax.f32 %v2462_v48, %v2684_v9 }
 0x415   : > { %3825 = vrot.lane.b32.xlu1 %v3698_v4, %s7694_s29  ;;  %v2716_v4 = vmax.f32 %v2652_v51, %v2684_v9 }
 0x41a   : > { %3851 = vrot.lane.b32.xlu0 %v3402_v43, %s7699_s30  ;;  %3849 = vrot.lane.b32.xlu2 %v3298_v56, %s7699_s30  ;;  %v2650_v43 = vmax.f32 %v2586_v14, %v2428_v27  ;;  %v2781_v56 = vmax.f32 %v2716_v4, %v2749_v63  ;;  %v3612_v14 = vsel %vm2939_vm12, 0.0, %v3611_v33 }
 0x41d   : > { %3847 = vrot.lane.b32.xlu1 %v3194_v19, %s7699_s30  ;;  %v10019_v19 = vld [vmem:[#allocation3 + $0x69] sm:$0xff] }
 0x41e   : > { %v2656_v36 = vmax.f32 %v2592_v45, %v10019_v19 }
 0x422   : > { %3857 = vrot.lane.b32.xlu0 %v3714_v35, %s7699_s30  ;;  %3855 = vrot.lane.b32.xlu2 %v3610_v58, %s7699_s30  ;;  %v2714_v35 = vmax.f32 %v2650_v43, %v2492_v22  ;;  %v2845_v58 = vmax.f32 %v2781_v56, %v2813_v25  ;;  %v3715_v43 = vrot.slane %v10010_v1, 4  ;;  %v10066_v56 = vperm.slane %v9730_v44, %v9655_v10 }
 0x424   : > { %v2779_v59 = vmax.f32 %v2714_v35, %v2556_v30  ;;  %v3716_v13 = vsel %vm2939_vm12, 0.0, %v3715_v43  ;;  %v2692_v43 = vld [vmem:[#allocation3 + $0x9a] sm:$0xff] }
 0x425   : > { %3853 = vrot.lane.b32.xlu1 %v3506_v54, %s7699_s30  ;;  %v2590_v54 = vmax.f32 %v2526_v21, %v2749_v63  ;;  %v3507_v63 = vrot.slane %v9993_v52, 4  ;;  %v10070_v21 = vperm.slane %v9679_v2, %v9655_v10  ;;  %v2468_v2 = vmax.f32 %v10026_v17, %v10039_v37 }
 0x426   : > { %v2843_v30 = vmax.f32 %v2779_v59, %v2620_v16  ;;  %v10047_v16 = vld [vmem:[#allocation3 + $0x82] sm:$0xff] }
 0x427   : > { %v2654_v22 = vmax.f32 %v2590_v54, %v2813_v25  ;;  %v3403_v25 = vrot.slane %v9997_v60, 4  ;;  %v3508_v49 = vsel %vm2939_vm12, 0.0, %v3507_v63 }
 0x428   : > { %v2907_v51 = vmax.f32 %v2843_v30, %v2684_v9  ;;  %v2466_v30 = vmax.f32 %v10006_v28, %v10019_v19 }
 0x429   : > { %v2718_v55 = vmax.f32 %v2654_v22, %v2877_v53  ;;  %v3404_v4 = vsel %vm2939_vm12, 0.0, %v3403_v25  ;;  %v2532_v22 = vmax.f32 %v2468_v2, %v10047_v16 }
 0x42a   : > { %3879 = vrot.lane.b32.xlu0 %v3186_v6, %s7700_s12  ;;  %3877 = vrot.lane.b32.xlu2 %v9983_v47, %s7700_s12  ;;  %v2909_v6 = vmax.f32 %v2845_v58, %v2877_v53  ;;  %v3092_v47 = vsel %vm2939_vm12, 0.0, %v3091_v38  ;;  %v2996_v9 = vperm.slane %v2907_v51, %v9589_v39  ;;  %v2991_v54 = vrot.slane %v2907_v51, 4  ;;  %v10114_v51 = vld [vmem:[#allocation3 + $0x99] sm:$0xff] }
 0x42b   : > { %v2783_v34 = vmax.f32 %v2718_v55, %v10006_v28  ;;  %v10116_v28 = vpop.permute.xlu0 %3783 }
 0x42c   : > { %v3001_v45 = vrot.slane %v2909_v6, 4  ;;  %v3013_v35 = vrot.slane %v2996_v9, 4 }
 0x42d   : > { %3875 = vrot.lane.b32.xlu1 %v2978_v0, %s7700_s12  ;;  %v10024_v0 = vld [vmem:[#allocation3 + $0x6a] sm:$0xff]  ;;  %v2847_v48 = vmax.f32 %v2783_v34, %v10019_v19 }
 0x42e   : > { %v2720_v27 = vmax.f32 %v2656_v36, %v10024_v0  ;;  %v3002_v44 = vsel %vm2939_vm12, 0.0, %v3001_v45 }
 0x42f   : > { %v10073_v36 = vmax.f32 %v2847_v48, %v10024_v0 }
 0x430   : > { %v2785_v41 = vmax.f32 %v2720_v27, %v10026_v17 }
 0x431   : > { %v3100_v38 = vperm.slane %v10073_v36, %v9589_v39 }
 0x432   : > { %3885 = vrot.lane.b32.xlu0 %v9993_v52, %s7700_s12  ;;  %3883 = vrot.lane.b32.xlu2 %v9997_v60, %s7700_s12  ;;  %v2849_v31 = vmax.f32 %v2785_v41, %v10039_v37  ;;  %v10055_v60 = vpop.permute.xlu2 %3787 }
 0x433   : > { %12464 = vst [vmem:[#allocation37_spill] sm:$0xff] %v10055_v60  ;;  %v3117_v34 = vrot.slane %v3100_v38, 4 }
 0x434   : > { %v10052_v53 = vmax.f32 %v2849_v31, %v10047_v16  ;;  %v10111_v31 = vperm.slane %v9760_v15, %v9655_v10 }
 0x435   : > { %3881 = vrot.lane.b32.xlu1 %v3290_v12, %s7700_s12  ;;  %v3006_v12 = vperm.slane %v2909_v6, %v9589_v39 }
 0x436   : > { %v3105_v48 = vrot.slane %v10052_v53, 4 }
 0x437   : > { %v3011_v52 = vrot.slane %v3006_v12, 4  ;;  %v3014_v59 = vsel %vm2939_vm12, %v3006_v12, %v3013_v35 }
 0x438   : > { %v3022_v41 = vperm.slane %v3014_v59, %v9655_v10 }
 0x43a   : > { %3907 = vrot.lane.b32.xlu0 %v2988_v57, %s7701_s13  ;;  %3889 = vrot.lane.b32.xlu2 %v10010_v1, %s7700_s12  ;;  %v3012_v57 = vsel %vm2939_vm12, %v3011_v52, %v2996_v9 }
 0x43b   : > { %v10076_v23 = vperm.slane %v3012_v57, %v9655_v10  ;;  %v3037_v57 = vrot.slane %v3022_v41, 4 }
 0x43d   : > { %3887 = vrot.lane.b32.xlu1 %v3602_v18, %s7700_s12  ;;  %v3110_v18 = vperm.slane %v10052_v53, %v9589_v39  ;;  %v3035_v27 = vrot.slane %v10076_v23, 4  ;;  %v3038_v35 = vsel %vm2939_vm12, 0.0, %v3037_v57 }
 0x43f   : > { %v3115_v1 = vrot.slane %v3110_v18, 4  ;;  %v3036_v63 = vsel %vm2939_vm12, 0.0, %v3035_v27  ;;  %v3118_v9 = vsel %vm2939_vm12, %v3110_v18, %v3117_v34  ;;  %v3106_v18 = vsel %vm2939_vm12, 0.0, %v3105_v48 }
 0x440   : > { %v3095_v27 = vrot.slane %v10073_v36, 4 }
 0x441   : > { %v3116_v6 = vsel %vm2939_vm12, %v3115_v1, %v3100_v38 }
 0x442   : > { %3913 = vrot.lane.b32.xlu0 %v3300_v5, %s7701_s13  ;;  %3911 = vrot.lane.b32.xlu2 %v3196_v26, %s7701_s13  ;;  %v3010_v5 = vperm.slane %v3002_v44, %v9589_v39  ;;  %v10094_v26 = vld [vmem:[#allocation3 + $0x98] sm:$0xff]  ;;  %v10105_v55 = vperm.slane %v3116_v6, %v9655_v10  ;;  %v10131_v44 = vld [vmem:[#allocation3 + $0xb0] sm:$0xff] }
 0x443   : > { %v2596_v33 = vmax.f32 %v2532_v22, %v10094_v26 }
 0x444   : > { %v3023_v12 = vrot.slane %v3010_v5, 4  ;;  %v3139_v15 = vrot.slane %v10105_v55, 4 }
 0x445   : > { %3909 = vrot.lane.b32.xlu1 %v3092_v47, %s7701_s13  ;;  %v2992_v47 = vsel %vm2939_vm12, 0.0, %v2991_v54 }
 0x446   : > { %v3000_v25 = vperm.slane %v2992_v47, %v9589_v39  ;;  %v3140_v2 = vsel %vm2939_vm12, 0.0, %v3139_v15  ;;  %v2821_v47 = vld [vmem:[#allocation3 + $0xb1] sm:$0xff] }
 0x448   : > { %v3024_v52 = vsel %vm2939_vm12, %v3023_v12, %v3000_v25  ;;  %v3025_v59 = vrot.slane %v3000_v25, 4  ;;  %v3096_v12 = vsel %vm2939_vm12, 0.0, %v3095_v27 }
 0x449   : > { %v3104_v15 = vperm.slane %v3096_v12, %v9589_v39 }
 0x44a   : > { %3919 = vrot.lane.b32.xlu0 %v3612_v14, %s7701_s13  ;;  %3917 = vrot.lane.b32.xlu2 %v3508_v49, %s7701_s13  ;;  %v2530_v14 = vmax.f32 %v2466_v30, %v10024_v0  ;;  %v2660_v49 = vmax.f32 %v2596_v33, %v10114_v51  ;;  %v3030_v0 = vperm.slane %v3024_v52, %v9655_v10  ;;  %v10158_v52 = vld [vmem:[#allocation3 + $0xb2] sm:$0xff] }
 0x44c   : > { %v2594_v45 = vmax.f32 %v2530_v14, %v10026_v17  ;;  %v2724_v1 = vmax.f32 %v2660_v49, %v2692_v43  ;;  %v3039_v22 = vrot.slane %v3030_v0, 4 }
 0x44d   : > { %3915 = vrot.lane.b32.xlu1 %v3404_v4, %s7701_s13  ;;  %v10126_v4 = vpop.permute.xlu1 %3779 }
 0x44e   : > { %v2658_v53 = vmax.f32 %v2594_v45, %v10039_v37  ;;  %v2789_v17 = vmax.f32 %v2724_v1, %v10131_v44  ;;  %v3026_v37 = vsel %vm2939_vm12, %v3010_v5, %v3025_v59  ;;  %v3040_v36 = vsel %vm2939_vm12, 0.0, %v3039_v22  ;;  %v10172_v1 = vld [vmem:[#allocation3 + $0xc8] sm:$0xff] }
 0x44f   : > { %v3034_v14 = vperm.slane %v3026_v37, %v9655_v10  ;;  %v2472_v5 = vmax.f32 %v10131_v44, %v2821_v47  ;;  %v3129_v22 = vrot.slane %v3104_v15, 4  ;;  %v10185_v37 = vld [vmem:[#allocation3 + $0xc9] sm:$0xff] }
 0x450   : > { %v2722_v33 = vmax.f32 %v2658_v53, %v10047_v16 }
 0x451   : > { %v3041_v57 = vrot.slane %v3034_v14, 4  ;;  %v2536_v53 = vmax.f32 %v2472_v5, %v10158_v52 }
 0x452   : > { %3941 = vrot.lane.b32.xlu0 %v10066_v56, %s7702_s14  ;;  %3939 = vrot.lane.b32.xlu2 %v10070_v21, %s7702_s14  ;;  %v2787_v34 = vmax.f32 %v2722_v33, %v10094_v26 }
 0x453   : > { %v2600_v59 = vmax.f32 %v2536_v53, %v10172_v1  ;;  %v3042_v27 = vsel %vm2939_vm12, 0.0, %v3041_v57  ;;  %v10202_v57 = vld [vmem:[#allocation3 + $0xe0] sm:$0xff] }
 0x454   : > { %v10087_v58 = vpop.permute.xlu2 %3793  ;;  %v2851_v45 = vmax.f32 %v2787_v34, %v10114_v51 }
 0x455   : > { %3921 = vrot.lane.b32.xlu1 %v3716_v13, %s7701_s13  ;;  %12465 = vst [vmem:[#allocation58_spill] sm:$0xff] %v10087_v58  ;;  %v3126_v13 = vperm.slane %v3118_v9, %v9655_v10  ;;  %v10149_v30 = vpop.permute.xlu1 %3785  ;;  %v2664_v12 = vmax.f32 %v2600_v59, %v10185_v37 }
 0x457   : > { %v3141_v6 = vrot.slane %v3126_v13, 4 }
 0x459   : > { %v3142_v25 = vsel %vm2939_vm12, 0.0, %v3141_v6 }
 0x45a   : > { %4035 = vrot.lane.b32.xlu0 %v3022_v41, %s7694_s29  ;;  %4003 = vrot.lane.b32.xlu2 %v3036_v63, %s7691_s26  ;;  %v3114_v41 = vperm.slane %v3106_v18, %v9589_v39  ;;  %v2853_v63 = vmax.f32 %v2789_v17, %v2821_v47 }
 0x45c   : > { %v10120_v19 = vpop.permute.xlu2 %3815  ;;  %v3127_v49 = vrot.slane %v3114_v41, 4  ;;  %v2917_v16 = vmax.f32 %v2853_v63, %v10158_v52  ;;  %v3130_v34 = vsel %vm2939_vm12, %v3114_v41, %v3129_v22  ;;  %v3093_v22 = vrot.slane %v10066_v56, 4 }
 0x45d   : > { %3943 = vrot.lane.b32.xlu1 %v10111_v31, %s7702_s14 }
 0x45e   : > { %v3214_v18 = vperm.slane %v2917_v16, %v9589_v39  ;;  %v3209_v5 = vrot.slane %v2917_v16, 4 }
 0x460   : > { %v3219_v6 = vrot.slane %v3214_v18, 4 }
 0x462   : > { %4099 = vrot.lane.b32.xlu0 %v3030_v0, %s7700_s12  ;;  %4005 = vrot.lane.b32.xlu2 %v3140_v2, %s7691_s26  ;;  %v3128_v0 = vsel %vm2939_vm12, %v3127_v49, %v3104_v15 }
 0x463   : > { %v3134_v17 = vperm.slane %v3128_v0, %v9655_v10 }
 0x464   : > { %v10142_v54 = vpop.permute.xlu0 %3789  ;;  %v10145_v38 = vpop.permute.xlu2 %3821 }
 0x465   : > { %12466 = vst [vmem:[#allocation13_spill] sm:$0xff] %v10142_v54  ;;  %4067 = vrot.lane.b32.xlu1 %v3038_v35, %s7699_s30  ;;  %v2915_v35 = vmax.f32 %v2851_v45, %v2692_v43  ;;  %v3143_v45 = vrot.slane %v3134_v17, 4 }
 0x466   : > { %12467 = vst [vmem:[#allocation36_spill] sm:$0xff] %v10145_v38 }
 0x467   : > { %v3199_v53 = vrot.slane %v2915_v35, 4 }
 0x46a   : > { %4069 = vrot.lane.b32.xlu0 %v3142_v25, %s7699_s30  ;;  %4131 = vrot.lane.b32.xlu2 %v3040_v36, %s7701_s13  ;;  %v2989_v25 = vrot.slane %v10070_v21, 4 }
 0x46c   : > { %v10165_v9 = vpop.permute.xlu0 %3811  ;;  %v10168_v48 = vpop.permute.xlu2 %3843  ;;  %v2990_v41 = vsel %vm2939_vm12, 0.0, %v2989_v25 }
 0x46d   : > { %4037 = vrot.lane.b32.xlu1 %v3126_v13, %s7694_s29  ;;  %v2470_v13 = vmax.f32 %v10094_v26, %v10114_v51  ;;  %v3204_v26 = vperm.slane %v2915_v35, %v9589_v39 }
 0x46f   : > { %v10174_v2 = vpop.permute.xlu1 %3791  ;;  %v2534_v51 = vmax.f32 %v2470_v13, %v2692_v43  ;;  %v3220_v49 = vsel %vm2939_vm12, %v3219_v6, %v3204_v26  ;;  %v3138_v43 = vperm.slane %v3130_v34, %v9655_v10  ;;  %v3144_v13 = vsel %vm2939_vm12, 0.0, %v3143_v45 }
 0x470   : > { %12468 = vst [vmem:[#allocation43_spill] sm:$0xff] %v10174_v2  ;;  %v10208_v21 = vperm.slane %v3220_v49, %v9655_v10  ;;  %v3221_v6 = vrot.slane %v3204_v26, 4 }
 0x471   : > { %v2598_v15 = vmax.f32 %v2534_v51, %v10131_v44  ;;  %v3210_v44 = vsel %vm2939_vm12, 0.0, %v3209_v5  ;;  %v3200_v51 = vsel %vm2939_vm12, 0.0, %v3199_v53 }
 0x472   : > { %4195 = vrot.lane.b32.xlu0 %v3042_v27, %s7703_s15  ;;  %4101 = vrot.lane.b32.xlu2 %v3134_v17, %s7700_s12  ;;  %v3243_v35 = vrot.slane %v10208_v21, 4  ;;  %v3222_v25 = vsel %vm2939_vm12, %v3214_v18, %v3221_v6  ;;  %v3208_v26 = vperm.slane %v3200_v51, %v9589_v39  ;;  %v10251_v51 = vld [vmem:[#allocation3 + $0xf8] sm:$0xff] }
 0x473   : > { %v2662_v16 = vmax.f32 %v2598_v15, %v2821_v47  ;;  %v10224_v47 = vld [vmem:[#allocation3 + $0xe1] sm:$0xff]  ;;  %v3145_v15 = vrot.slane %v3138_v43, 4  ;;  %v3230_v53 = vperm.slane %v3222_v25, %v9655_v10 }
 0x474   : > { %v10187_v33 = vpop.permute.xlu0 %3817  ;;  %v10190_v63 = vpop.permute.xlu2 %3849  ;;  %v3244_v56 = vsel %vm2939_vm12, 0.0, %v3243_v35  ;;  %v2476_v18 = vmax.f32 %v10202_v57, %v10224_v47 }
 0x475   : > { %12469 = vst [vmem:[#allocation5_spill] sm:$0xff] %v10187_v33  ;;  %4163 = vrot.lane.b32.xlu1 %v3034_v14, %s7702_s14  ;;  %v10200_v14 = vld [vmem:[#allocation3 + $0xca] sm:$0xff]  ;;  %v2726_v49 = vmax.f32 %v2662_v16, %v10158_v52 }
 0x476   : > { %12470 = vst [vmem:[#allocation59_spill] sm:$0xff] %v10190_v63  ;;  %v2728_v0 = vmax.f32 %v2664_v12, %v10200_v14  ;;  %v3218_v12 = vperm.slane %v3210_v44, %v9589_v39  ;;  %v10236_v44 = vld [vmem:[#allocation3 + $0xe2] sm:$0xff] }
 0x477   : > { %v10196_v36 = vpop.permute.xlu1 %3813  ;;  %v2791_v45 = vmax.f32 %v2726_v49, %v10172_v1 }
 0x478   : > { %v2793_v17 = vmax.f32 %v2728_v0, %v10202_v57  ;;  %v3094_v0 = vsel %vm2939_vm12, 0.0, %v3093_v22  ;;  %v3245_v22 = vrot.slane %v3230_v53, 4 }
 0x479   : > { %v2855_v6 = vmax.f32 %v2791_v45, %v10185_v37  ;;  %v2474_v45 = vmax.f32 %v10172_v1, %v10185_v37 }
 0x47a   : > { %4165 = vrot.lane.b32.xlu0 %v3138_v43, %s7702_s14  ;;  %3971 = vrot.lane.b32.xlu2 %v2990_v41, %s7703_s15  ;;  %v2857_v5 = vmax.f32 %v2793_v17, %v10224_v47  ;;  %v3231_v41 = vrot.slane %v3218_v12, 4  ;;  %v3146_v43 = vsel %vm2939_vm12, 0.0, %v3145_v15  ;;  %v2540_v15 = vmax.f32 %v2476_v18, %v10236_v44  ;;  %v10268_v18 = vld [vmem:[#allocation3 + $0xf9] sm:$0xff] }
 0x47c   : > { %v10215_v59 = vpop.permute.xlu0 %3823  ;;  %v10218_v27 = vpop.permute.xlu2 %3855  ;;  %v2921_v52 = vmax.f32 %v2857_v5, %v10236_v44  ;;  %v3232_v35 = vsel %vm2939_vm12, %v3231_v41, %v3208_v26  ;;  %v3246_v41 = vsel %vm2939_vm12, 0.0, %v3245_v22 }
 0x47d   : > { %12471 = vst [vmem:[#allocation6_spill] sm:$0xff] %v10215_v59  ;;  %4133 = vrot.lane.b32.xlu1 %v3144_v13, %s7701_s13  ;;  %v3233_v13 = vrot.slane %v3208_v26, 4  ;;  %v2604_v26 = vmax.f32 %v2540_v15, %v10251_v51 }
 0x47e   : > { %12472 = vst [vmem:[#allocation63_spill] sm:$0xff] %v10218_v27  ;;  %v3318_v5 = vperm.slane %v2921_v52, %v9589_v39  ;;  %v10285_v27 = vld [vmem:[#allocation3 + $0x110] sm:$0xff] }
 0x47f   : > { %v10226_v34 = vpop.permute.xlu1 %3819  ;;  %v3234_v49 = vsel %vm2939_vm12, %v3218_v12, %v3233_v13 }
 0x480   : > { %12473 = vst [vmem:[#allocation14_spill] sm:$0xff] %v10226_v34  ;;  %v3323_v12 = vrot.slane %v3318_v5, 4  ;;  %v10413_v34 = vld [vmem:[#allocation3 + $0x159] sm:$0xff] }
 0x482   : > { %4007 = vrot.lane.b32.xlu0 %v3244_v56, %s7691_s26  ;;  %3973 = vrot.lane.b32.xlu2 %v3094_v0, %s7703_s15  ;;  %v3313_v56 = vrot.slane %v2921_v52, 4  ;;  %v3238_v0 = vperm.slane %v3232_v35, %v9655_v10  ;;  %v2668_v35 = vmax.f32 %v2604_v26, %v10268_v18 }
 0x484   : > { %v10244_v16 = vpop.permute.xlu0 %3845  ;;  %v10247_v17 = vpop.permute.xlu2 %3877  ;;  %v3314_v52 = vsel %vm2939_vm12, 0.0, %v3313_v56  ;;  %v3247_v58 = vrot.slane %v3238_v0, 4 }
 0x485   : > { %4197 = vrot.lane.b32.xlu1 %v3146_v43, %s7703_s15  ;;  %v2919_v43 = vmax.f32 %v2855_v6, %v10200_v14  ;;  %v2538_v6 = vmax.f32 %v2474_v45, %v10200_v14 }
 0x487   : > { %v10253_v25 = vpop.permute.xlu1 %3825  ;;  %v3308_v37 = vperm.slane %v2919_v43, %v9589_v39  ;;  %v2602_v24 = vmax.f32 %v2538_v6, %v10202_v57 }
 0x488   : > { %12474 = vst [vmem:[#allocation48_spill] sm:$0xff] %v10253_v25  ;;  %v3242_v25 = vperm.slane %v3234_v49, %v9655_v10  ;;  %v3303_v49 = vrot.slane %v2919_v43, 4 }
 0x489   : > { %v3324_v56 = vsel %vm2939_vm12, %v3323_v12, %v3308_v37  ;;  %v2666_v57 = vmax.f32 %v2602_v24, %v10224_v47  ;;  %v3248_v12 = vsel %vm2939_vm12, 0.0, %v3247_v58  ;;  %v3197_v47 = vrot.slane %v10111_v31, 4 }
 0x48a   : > { %4103 = vrot.lane.b32.xlu0 %v3238_v0, %s7700_s12  ;;  %4071 = vrot.lane.b32.xlu2 %v3246_v41, %s7699_s30  ;;  %v3249_v22 = vrot.slane %v3242_v25, 4  ;;  %v3322_v41 = vperm.slane %v3314_v52, %v9589_v39  ;;  %v10290_v45 = vperm.slane %v3324_v56, %v9655_v10  ;;  %v3304_v43 = vsel %vm2939_vm12, 0.0, %v3303_v49  ;;  %v2829_v56 = vld [vmem:[#allocation3 + $0x111] sm:$0xff] }
 0x48b   : > { %v3325_v52 = vrot.slane %v3308_v37, 4  ;;  %v2730_v58 = vmax.f32 %v2666_v57, %v10236_v44  ;;  %v2480_v44 = vmax.f32 %v10285_v27, %v2829_v56  ;;  %v3198_v31 = vsel %vm2939_vm12, 0.0, %v3197_v47 }
 0x48c   : > { %v10270_v13 = vpop.permute.xlu0 %3851  ;;  %v10273_v1 = vpop.permute.xlu2 %3883  ;;  %v3250_v14 = vsel %vm2939_vm12, 0.0, %v3249_v22  ;;  %v3335_v26 = vrot.slane %v3322_v41, 4  ;;  %v3312_v22 = vperm.slane %v3304_v43, %v9589_v39 }
 0x48d   : > { %12475 = vst [vmem:[#allocation16_spill] sm:$0xff] %v10270_v13  ;;  %4039 = vrot.lane.b32.xlu1 %v3230_v53, %s7694_s29  ;;  %v10283_v53 = vld [vmem:[#allocation3 + $0xfa] sm:$0xff]  ;;  %v3326_v49 = vsel %vm2939_vm12, %v3318_v5, %v3325_v52  ;;  %v10315_v52 = vld [vmem:[#allocation3 + $0x112] sm:$0xff] }
 0x48e   : > { %12476 = vst [vmem:[#allocation64_spill] sm:$0xff] %v10273_v1  ;;  %v2732_v59 = vmax.f32 %v2668_v35, %v10283_v53  ;;  %v3336_v24 = vsel %vm2939_vm12, %v3335_v26, %v3312_v22  ;;  %v3334_v37 = vperm.slane %v3326_v49, %v9655_v10  ;;  %v3337_v49 = vrot.slane %v3312_v22, 4 }
 0x48f   : > { %v10278_v15 = vpop.permute.xlu1 %3847  ;;  %v3342_v5 = vperm.slane %v3336_v24, %v9655_v10  ;;  %v2544_v47 = vmax.f32 %v2480_v44, %v10315_v52  ;;  %v2478_v22 = vmax.f32 %v10251_v51, %v10268_v18 }
 0x490   : > { %v2797_v0 = vmax.f32 %v2732_v59, %v10285_v27 }
 0x491   : > { %v3351_v24 = vrot.slane %v3342_v5, 4 }
 0x492   : > { %4199 = vrot.lane.b32.xlu0 %v3250_v14, %s7703_s15  ;;  %4167 = vrot.lane.b32.xlu2 %v3242_v25, %s7702_s14  ;;  %v3347_v25 = vrot.slane %v10290_v45, 4  ;;  %v2861_v59 = vmax.f32 %v2797_v0, %v2829_v56 }
 0x493   : > { %v3352_v2 = vsel %vm2939_vm12, 0.0, %v3351_v24 }
 0x494   : > { %v10298_v6 = vpop.permute.xlu0 %3857  ;;  %v10301_v35 = vpop.permute.xlu2 %3889  ;;  %v3348_v43 = vsel %vm2939_vm12, 0.0, %v3347_v25  ;;  %v2925_v26 = vmax.f32 %v2861_v59, %v10315_v52  ;;  %v3338_v59 = vsel %vm2939_vm12, %v3322_v41, %v3337_v49 }
 0x495   : > { %12477 = vst [vmem:[#allocation8_spill] sm:$0xff] %v10298_v6  ;;  %4135 = vrot.lane.b32.xlu1 %v3248_v12, %s7701_s13  ;;  %v2795_v12 = vmax.f32 %v2730_v58, %v10251_v51  ;;  %v10328_v58 = vld [vmem:[#allocation3 + $0x128] sm:$0xff]  ;;  %v3349_v6 = vrot.slane %v3334_v37, 4 }
 0x496   : > { %12478 = vst [vmem:[#allocation68_spill] sm:$0xff] %v10301_v35  ;;  %v3417_v3 = vrot.slane %v2925_v26, 4 }
 0x497   : > { %v10306_v14 = vpop.permute.xlu1 %3853  ;;  %v2859_v25 = vmax.f32 %v2795_v12, %v10268_v18  ;;  %v2608_v12 = vmax.f32 %v2544_v47, %v10328_v58  ;;  %v3350_v44 = vsel %vm2939_vm12, 0.0, %v3349_v6 }
 0x498   : > { %12479 = vst [vmem:[#allocation17_spill] sm:$0xff] %v10306_v14  ;;  %v3346_v14 = vperm.slane %v3338_v59, %v9655_v10 }
 0x49a   : > { %4041 = vrot.lane.b32.xlu0 %v3334_v37, %s7694_s29  ;;  %4009 = vrot.lane.b32.xlu2 %v3348_v43, %s7691_s26  ;;  %v3422_v43 = vperm.slane %v2925_v26, %v9589_v39  ;;  %v3418_v37 = vsel %vm2939_vm12, 0.0, %v3417_v3  ;;  %v10345_v26 = vld [vmem:[#allocation3 + $0x129] sm:$0xff] }
 0x49b   : > { %v3426_v6 = vperm.slane %v3418_v37, %v9589_v39 }
 0x49c   : > { %v10322_v57 = vpop.permute.xlu0 %3879  ;;  %v10325_v0 = vpop.permute.xlu2 %3911  ;;  %v3427_v41 = vrot.slane %v3422_v43, 4 }
 0x49d   : > { %3975 = vrot.lane.b32.xlu1 %v3198_v31, %s7703_s15  ;;  %v2923_v31 = vmax.f32 %v2859_v25, %v10283_v53  ;;  %v2542_v25 = vmax.f32 %v2478_v22, %v10283_v53 }
 0x49f   : > { %v10330_v35 = vpop.permute.xlu1 %3875  ;;  %v3412_v18 = vperm.slane %v2923_v31, %v9589_v39  ;;  %v3407_v24 = vrot.slane %v2923_v31, 4  ;;  %v2606_v47 = vmax.f32 %v2542_v25, %v10285_v27 }
 0x4a1   : > { %v3428_v3 = vsel %vm2939_vm12, %v3427_v41, %v3412_v18  ;;  %v3408_v31 = vsel %vm2939_vm12, 0.0, %v3407_v24  ;;  %v2670_v27 = vmax.f32 %v2606_v47, %v2829_v56  ;;  %v3429_v37 = vrot.slane %v3412_v18, 4 }
 0x4a2   : > { %4137 = vrot.lane.b32.xlu0 %v3352_v2, %s7701_s13  ;;  %4105 = vrot.lane.b32.xlu2 %v3342_v5, %s7700_s12  ;;  %v2672_v2 = vmax.f32 %v2608_v12, %v10345_v26  ;;  %v3353_v5 = vrot.slane %v3346_v14, 4  ;;  %v10366_v22 = vperm.slane %v3428_v3, %v9655_v10  ;;  %v3439_v12 = vrot.slane %v3426_v6, 4  ;;  %v2833_v3 = vld [vmem:[#allocation3 + $0x141] sm:$0xff] }
 0x4a4   : > { %v10347_v49 = vpop.permute.xlu0 %3885  ;;  %v10350_v51 = vpop.permute.xlu2 %3917  ;;  %v3354_v53 = vsel %vm2939_vm12, 0.0, %v3353_v5  ;;  %12483 = vst [vmem:[#allocation10_spill] sm:$0xff] %v10366_v22  ;;  %v3430_v5 = vsel %vm2939_vm12, %v3422_v43, %v3429_v37  ;;  %v3451_v24 = vrot.slane %v10366_v22, 4  ;;  %v10389_v37 = vld [vmem:[#allocation3 + $0x142] sm:$0xff] }
 0x4a5   : > { %12480 = vst [vmem:[#allocation53_spill] sm:$0xff] %v10347_v49  ;;  %4073 = vrot.lane.b32.xlu1 %v3350_v44, %s7699_s30  ;;  %v2704_v49 = vld [vmem:[#allocation3 + $0x12a] sm:$0xff]  ;;  %v10360_v44 = vld [vmem:[#allocation3 + $0x140] sm:$0xff] }
 0x4a6   : > { %12481 = vst [vmem:[#allocation19_spill] sm:$0xff] %v10350_v51  ;;  %v3294_v51 = vperm.slane %v9794_v20, %v9655_v10  ;;  %v2736_v38 = vmax.f32 %v2672_v2, %v2704_v49  ;;  %v3416_v2 = vperm.slane %v3408_v31, %v9589_v39  ;;  %v2484_v47 = vmax.f32 %v10360_v44, %v2833_v3 }
 0x4a7   : > { %v10355_v59 = vpop.permute.xlu1 %3881  ;;  %v3452_v31 = vsel %vm2939_vm12, 0.0, %v3451_v24 }
 0x4a8   : > { %12482 = vst [vmem:[#allocation69_spill] sm:$0xff] %v10355_v59  ;;  %v2801_v41 = vmax.f32 %v2736_v38, %v10360_v44  ;;  %v3440_v56 = vsel %vm2939_vm12, %v3439_v12, %v3416_v2  ;;  %v2734_v38 = vmax.f32 %v2670_v27, %v10315_v52  ;;  %v2548_v12 = vmax.f32 %v2484_v47, %v10389_v37 }
 0x4a9   : > { %v3446_v43 = vperm.slane %v3440_v56, %v9655_v10 }
 0x4aa   : > { %3945 = vrot.lane.b32.xlu0 %v3294_v51, %s7702_s14  ;;  %4201 = vrot.lane.b32.xlu2 %v3354_v53, %s7703_s15  ;;  %v2865_v18 = vmax.f32 %v2801_v41, %v2833_v3  ;;  %v3301_v53 = vrot.slane %v3294_v51, 4  ;;  %v2799_v54 = vmax.f32 %v2734_v38, %v10328_v58  ;;  %v10402_v38 = vld [vmem:[#allocation3 + $0x158] sm:$0xff] }
 0x4ab   : > { %v3455_v56 = vrot.slane %v3446_v43, 4 }
 0x4ac   : > { %v10372_v25 = vpop.permute.xlu0 %3907  ;;  %v10375_v20 = vpop.permute.xlu2 %3939  ;;  %v2929_v52 = vmax.f32 %v2865_v18, %v10389_v37  ;;  %v3302_v51 = vsel %vm2939_vm12, 0.0, %v3301_v53  ;;  %v2863_v24 = vmax.f32 %v2799_v54, %v10345_v26  ;;  %v2482_v53 = vmax.f32 %v10328_v58, %v10345_v26 }
 0x4ad   : > { %4169 = vrot.lane.b32.xlu1 %v3346_v14, %s7702_s14  ;;  %v3438_v14 = vperm.slane %v3430_v5, %v9655_v10  ;;  %v3441_v5 = vrot.slane %v3416_v2, 4  ;;  %v3456_v2 = vsel %vm2939_vm12, 0.0, %v3455_v56 }
 0x4ae   : > { %v3526_v47 = vperm.slane %v2929_v52, %v9589_v39  ;;  %v3521_v1 = vrot.slane %v2929_v52, 4  ;;  %v2927_v13 = vmax.f32 %v2863_v24, %v2704_v49 }
 0x4af   : > { %v10380_v29 = vpop.permute.xlu1 %3887  ;;  %v3442_v18 = vsel %vm2939_vm12, %v3426_v6, %v3441_v5  ;;  %v2546_v5 = vmax.f32 %v2482_v53, %v2704_v49 }
 0x4b0   : > { %12484 = vst [vmem:[#allocation73_spill] sm:$0xff] %v10380_v29  ;;  %v3450_v54 = vperm.slane %v3442_v18, %v9655_v10  ;;  %v3531_v6 = vrot.slane %v3526_v47, 4  ;;  %v3522_v26 = vsel %vm2939_vm12, 0.0, %v3521_v1  ;;  %v10427_v18 = vld [vmem:[#allocation3 + $0x15a] sm:$0xff] }
 0x4b1   : > { %v2610_v24 = vmax.f32 %v2546_v5, %v10360_v44  ;;  %v3530_v1 = vperm.slane %v3522_v26, %v9589_v39  ;;  %v10441_v5 = vld [vmem:[#allocation3 + $0x170] sm:$0xff] }
 0x4b2   : > { %4043 = vrot.lane.b32.xlu0 %v3438_v14, %s7694_s29  ;;  %4011 = vrot.lane.b32.xlu2 %v3452_v31, %s7691_s26  ;;  %v2612_v31 = vmax.f32 %v2548_v12, %v10402_v38  ;;  %v3516_v12 = vperm.slane %v2927_v13, %v9589_v39  ;;  %v3457_v56 = vrot.slane %v3450_v54, 4 }
 0x4b4   : > { %v10396_v27 = vpop.permute.xlu0 %3913  ;;  %v10399_v41 = vpop.permute.xlu2 %4003  ;;  %v2676_v46 = vmax.f32 %v2612_v31, %v10413_v34  ;;  %v3532_v53 = vsel %vm2939_vm12, %v3531_v6, %v3516_v12  ;;  %v3543_v6 = vrot.slane %v3530_v1, 4  ;;  %v3533_v26 = vrot.slane %v3516_v12, 4 }
 0x4b5   : > { %12485 = vst [vmem:[#allocation66_spill] sm:$0xff] %v10396_v27  ;;  %3977 = vrot.lane.b32.xlu1 %v3302_v51, %s7703_s15  ;;  %v3453_v51 = vrot.slane %v3438_v14, 4  ;;  %v10438_v44 = vperm.slane %v3532_v53, %v9655_v10  ;;  %v10455_v53 = vld [vmem:[#allocation3 + $0x171] sm:$0xff]  ;;  %v10501_v27 = vld [vmem:[#allocation3 + $0x188] sm:$0xff] }
 0x4b6   : > { %v2740_v31 = vmax.f32 %v2676_v46, %v10427_v18 }
 0x4b7   : > { %v10404_v29 = vpop.permute.xlu1 %3909  ;;  %v3454_v58 = vsel %vm2939_vm12, 0.0, %v3453_v51  ;;  %v3398_v51 = vperm.slane %v9845_v61, %v9655_v10  ;;  %12488 = vst [vmem:[#allocation57_spill] sm:$0xff] %v10438_v44 }
 0x4b8   : > { %v2805_v46 = vmax.f32 %v2740_v31, %v10441_v5 }
 0x4ba   : > { %4139 = vrot.lane.b32.xlu0 %v3456_v2, %s7701_s13  ;;  %4107 = vrot.lane.b32.xlu2 %v3446_v43, %s7700_s12  ;;  %v3511_v43 = vrot.slane %v2927_v13, 4  ;;  %v2674_v2 = vmax.f32 %v2610_v24, %v2833_v3  ;;  %v2869_v31 = vmax.f32 %v2805_v46, %v10455_v53 }
 0x4bc   : > { %v10420_v14 = vpop.permute.xlu0 %3919  ;;  %v10423_v52 = vpop.permute.xlu2 %4005  ;;  %v3512_v13 = vsel %vm2939_vm12, 0.0, %v3511_v43  ;;  %v2738_v24 = vmax.f32 %v2674_v2, %v10389_v37  ;;  %v3555_v43 = vrot.slane %v10438_v44, 4 }
 0x4bd   : > { %12486 = vst [vmem:[#allocation135_spill] sm:$0xff] %v10420_v14  ;;  %4075 = vrot.lane.b32.xlu1 %v3454_v58, %s7699_s30  ;;  %v3458_v58 = vsel %vm2939_vm12, 0.0, %v3457_v56  ;;  %v3520_v3 = vperm.slane %v3512_v13, %v9589_v39  ;;  %v3534_v56 = vsel %vm2939_vm12, %v3526_v47, %v3533_v26  ;;  %v10465_v47 = vld [vmem:[#allocation3 + $0x172] sm:$0xff] }
 0x4be   : > { %v2803_v60 = vmax.f32 %v2738_v24, %v10402_v38  ;;  %v3556_v13 = vsel %vm2939_vm12, 0.0, %v3555_v43  ;;  %v2933_v2 = vmax.f32 %v2869_v31, %v10465_v47 }
 0x4bf   : > { %v10429_v49 = vpop.permute.xlu1 %3915  ;;  %v3544_v12 = vsel %vm2939_vm12, %v3543_v6, %v3520_v3  ;;  %v3545_v26 = vrot.slane %v3520_v3, 4 }
 0x4c0   : > { %12487 = vst [vmem:[#allocation20_spill] sm:$0xff] %v10429_v49  ;;  %v3405_v49 = vrot.slane %v3398_v51, 4  ;;  %v3550_v37 = vperm.slane %v3544_v12, %v9655_v10  ;;  %v2867_v24 = vmax.f32 %v2803_v60, %v10413_v34  ;;  %v3625_v22 = vrot.slane %v2933_v2, 4 }
 0x4c1   : > { %v3546_v12 = vsel %vm2939_vm12, %v3530_v1, %v3545_v26 }
 0x4c2   : > { %3947 = vrot.lane.b32.xlu0 %v3398_v51, %s7702_s14  ;;  %4203 = vrot.lane.b32.xlu2 %v3458_v58, %s7703_s15  ;;  %v3406_v6 = vsel %vm2939_vm12, 0.0, %v3405_v49  ;;  %v2931_v31 = vmax.f32 %v2867_v24, %v10427_v18  ;;  %v3554_v44 = vperm.slane %v3546_v12, %v9655_v10  ;;  %v3502_v12 = vperm.slane %v9925_v62, %v9655_v10 }
 0x4c4   : > { %v10446_v14 = vpop.permute.xlu0 %3941  ;;  %v10449_v61 = vpop.permute.xlu2 %4131  ;;  %v3561_v26 = vrot.slane %v3554_v44, 4  ;;  %v3615_v59 = vrot.slane %v2931_v31, 4 }
 0x4c5   : > { %4171 = vrot.lane.b32.xlu1 %v3450_v54, %s7702_s14  ;;  %v3542_v54 = vperm.slane %v3534_v56, %v9655_v10  ;;  %v3559_v56 = vrot.slane %v3550_v37, 4 }
 0x4c7   : > { %v10457_v58 = vpop.permute.xlu1 %3921  ;;  %v3560_v49 = vsel %vm2939_vm12, 0.0, %v3559_v56 }
 0x4c8   : > { %12489 = vst [vmem:[#allocation96_spill] sm:$0xff] %v10457_v58  ;;  %v3630_v58 = vperm.slane %v2933_v2, %v9589_v39 }
 0x4ca   : > { %4045 = vrot.lane.b32.xlu0 %v3542_v54, %s7694_s29  ;;  %4013 = vrot.lane.b32.xlu2 %v3556_v13, %s7691_s26  ;;  %v3557_v13 = vrot.slane %v3542_v54, 4  ;;  %v3635_v3 = vrot.slane %v3630_v58, 4  ;;  %v3620_v54 = vperm.slane %v2931_v31, %v9589_v39  ;;  %v3509_v31 = vrot.slane %v3502_v12, 4 }
 0x4cc   : > { %v4036_v46 = vpop.permute.xlu0 %4035  ;;  %v10472_v51 = vpop.permute.xlu2 %4101  ;;  %v3558_v60 = vsel %vm2939_vm12, 0.0, %v3557_v13  ;;  %v3636_v56 = vsel %vm2939_vm12, %v3635_v3, %v3620_v54  ;;  %v3562_v13 = vsel %vm2939_vm12, 0.0, %v3561_v26  ;;  %v3637_v2 = vrot.slane %v3620_v54, 4 }
 0x4cd   : > { %3979 = vrot.lane.b32.xlu1 %v3406_v6, %s7703_s15 }
 0x4cf   : > { %v10475_v43 = vpop.permute.xlu1 %3943 }
 0x4d2   : > { %4141 = vrot.lane.b32.xlu0 %v3560_v49, %s7701_s13  ;;  %4109 = vrot.lane.b32.xlu2 %v3550_v37, %s7700_s12  ;;  %v2488_v37 = vmax.f32 %v10441_v5, %v10455_v53  ;;  %v10496_v49 = vperm.slane %v3636_v56, %v9655_v10  ;;  %v3638_v56 = vsel %vm2939_vm12, %v3630_v58, %v3637_v2  ;;  %v3616_v2 = vsel %vm2939_vm12, 0.0, %v3615_v59 }
 0x4d3   : > { %v3646_v58 = vperm.slane %v3638_v56, %v9655_v10  ;;  %v3624_v59 = vperm.slane %v3616_v2, %v9589_v39  ;;  %v2712_v56 = vld [vmem:[#allocation3 + $0x18a] sm:$0xff] }
 0x4d4   : > { %v4100_v6 = vpop.permute.xlu0 %4099  ;;  %v10486_v1 = vpop.permute.xlu2 %3971  ;;  %12490 = vst [vmem:[#allocation115_spill] sm:$0xff] %v10496_v49  ;;  %v2552_v26 = vmax.f32 %v2488_v37, %v10465_v47  ;;  %v3659_v63 = vrot.slane %v10496_v49, 4 }
 0x4d5   : > { %4077 = vrot.lane.b32.xlu1 %v3558_v60, %s7699_s30  ;;  %v3626_v60 = vsel %vm2939_vm12, 0.0, %v3625_v22  ;;  %v4280_v22 = vsel %vm1923_vm2, %v10076_v23, %v10399_v41  ;;  %v10525_v41 = vld [vmem:[#allocation3 + $0x189] sm:$0xff] }
 0x4d6   : > { %v2616_v33 = vmax.f32 %v2552_v26, %v10501_v27  ;;  %v3660_v49 = vsel %vm2939_vm12, 0.0, %v3659_v63 }
 0x4d7   : > { %v4068_v24 = vpop.permute.xlu1 %4067 }
 0x4da   : > { %3949 = vrot.lane.b32.xlu0 %v3502_v12, %s7702_s14  ;;  %4205 = vrot.lane.b32.xlu2 %v3562_v13, %s7703_s15  ;;  %v3634_v13 = vperm.slane %v3626_v60, %v9589_v39  ;;  %v2486_v60 = vmax.f32 %v10402_v38, %v10413_v34  ;;  %v3510_v12 = vsel %vm2939_vm12, 0.0, %v3509_v31 }
 0x4dc   : > { %v10503_v3 = vpop.permute.xlu0 %4069  ;;  %v10506_v62 = vpop.permute.xlu2 %3973  ;;  %v3647_v23 = vrot.slane %v3634_v13, 4  ;;  %v2550_v34 = vmax.f32 %v2486_v60, %v10427_v18  ;;  %v3661_v18 = vrot.slane %v3646_v58, 4 }
 0x4dd   : > { %4173 = vrot.lane.b32.xlu1 %v3554_v44, %s7702_s14  ;;  %v4288_v44 = vsel %vm2055_vm9, %v4280_v22, %v4036_v46  ;;  %v2680_v46 = vmax.f32 %v2616_v33, %v10525_v41 }
 0x4de   : > { %v4296_v37 = vsel %vm4235_vm13, %v4288_v44, %v4068_v24  ;;  %v3648_v38 = vsel %vm2939_vm12, %v3647_v23, %v3624_v59  ;;  %v4219_v44 = vsel %vm1923_vm2, %v9665_v50, %v10126_v4  ;;  %v3649_v23 = vrot.slane %v3624_v59, 4  ;;  %v2905_v59 = vld [vmem:[#allocation3 + $0x1a2] sm:$0xff] }
 0x4df   : > { %v10515_v54 = vpop.permute.xlu1 %4037  ;;  %v4304_v24 = vsel %vm4244_vm14, %v4296_v37, %v4100_v6  ;;  %v2744_v22 = vmax.f32 %v2680_v46, %v2712_v56  ;;  %v2777_v37 = vld [vmem:[#allocation3 + $0x1a0] sm:$0xff]  ;;  %v4227_v2 = vsel %vm2055_vm9, %v4219_v44, %v10165_v9 }
 0x4e0   : > { %v4312_v33 = vsel %vm4253_vm15, %v4304_v24, %v10449_v61  ;;  %v3654_v61 = vperm.slane %v3648_v38, %v9655_v10  ;;  %v2841_v9 = vld [vmem:[#allocation3 + $0x1a1] sm:$0xff] }
 0x4e1   : > { %v2809_v4 = vmax.f32 %v2744_v22, %v2777_v37 }
 0x4e2   : > { %4047 = vrot.lane.b32.xlu0 %v3646_v58, %s7694_s29  ;;  %4015 = vrot.lane.b32.xlu2 %v3660_v49, %s7691_s26  ;;  %v2614_v49 = vmax.f32 %v2550_v34, %v10441_v5  ;;  %v4236_v5 = vsel %vm4235_vm13, %v4227_v2, %v10168_v48  ;;  %v3662_v58 = vsel %vm2939_vm12, 0.0, %v3661_v18  ;;  %v4281_v18 = vsel %vm1923_vm2, %v10105_v55, %v10423_v52 }
 0x4e3   : > { %v4245_v46 = vsel %vm4244_vm14, %v4236_v5, %v10330_v35  ;;  %v2873_v38 = vmax.f32 %v2809_v4, %v2841_v9  ;;  %v4289_v37 = vsel %vm2055_vm9, %v4281_v18, %v10515_v54 }
 0x4e4   : > { %v4196_v26 = vpop.permute.xlu0 %4195  ;;  %v10534_v63 = vpop.permute.xlu2 %4071  ;;  %v2678_v50 = vmax.f32 %v2614_v49, %v10455_v53  ;;  %v3650_v53 = vsel %vm2939_vm12, %v3634_v13, %v3649_v23 }
 0x4e5   : > { %3981 = vrot.lane.b32.xlu1 %v3510_v12, %s7703_s15  ;;  %v3658_v35 = vperm.slane %v3650_v53, %v9655_v10 }
 0x4e6   : > { %v2742_v48 = vmax.f32 %v2678_v50, %v10465_v47  ;;  %v4297_v50 = vsel %vm4235_vm13, %v4289_v37, %v10503_v3  ;;  %v3606_v3 = vperm.slane %v9942_v42, %v9655_v10 }
 0x4e7   : > { %v4164_v6 = vpop.permute.xlu1 %4163  ;;  %v3665_v44 = vrot.slane %v3658_v35, 4  ;;  %v4305_v54 = vsel %vm4244_vm14, %v4297_v50, %v10472_v51 }
 0x4e8   : > { %v4320_v31 = vsel %vm4262_vm0, %v4312_v33, %v4164_v6  ;;  %v3663_v33 = vrot.slane %v3654_v61, 4  ;;  %v2807_v49 = vmax.f32 %v2742_v48, %v10501_v27  ;;  %v3613_v53 = vrot.slane %v3606_v3, 4 }
 0x4e9   : > { %v10548_v60 = vsel %vm4271_vm1, %v4320_v31, %v4196_v26  ;;  %v4254_v26 = vsel %vm4253_vm15, %v4245_v46, %v10372_v25  ;;  %v2937_v25 = vmax.f32 %v2873_v38, %v2905_v59 }
 0x4ea   : > { %4472 = vrot.lane.b32.xlu0 %v10548_v60, %s7694_s29  ;;  %4111 = vrot.lane.b32.xlu2 %v3654_v61, %s7700_s12  ;;  %v4263_v6 = vsel %vm4262_vm0, %v4254_v26, %v10375_v20  ;;  %v3664_v47 = vsel %vm2939_vm12, 0.0, %v3663_v33  ;;  %v2871_v27 = vmax.f32 %v2807_v49, %v10525_v41  ;;  %v3666_v61 = vsel %vm2939_vm12, 0.0, %v3665_v44 }
 0x4eb   : > { %v10573_v22 = vsel %vm4271_vm1, %v4263_v6, %v10486_v1  ;;  %v3734_v1 = vperm.slane %v2937_v25, %v9589_v39  ;;  %v3614_v38 = vsel %vm2939_vm12, 0.0, %v3613_v53  ;;  %v4220_v33 = vsel %vm1923_vm2, %v9727_v7, %v10035_v8 }
 0x4ec   : > { %v4166_v24 = vpop.permute.xlu0 %4165  ;;  %v10561_v12 = vpop.permute.xlu2 %4167  ;;  %v2935_v2 = vmax.f32 %v2871_v27, %v2712_v56  ;;  %v4228_v6 = vsel %vm2055_vm9, %v4220_v33, %v10196_v36 }
 0x4ed   : > { %4079 = vrot.lane.b32.xlu1 %v3662_v58, %s7699_s30  ;;  %v3739_v41 = vrot.slane %v3734_v1, 4 }
 0x4ee   : > { %v3724_v52 = vperm.slane %v2935_v2, %v9589_v39  ;;  %v3719_v27 = vrot.slane %v2935_v2, 4 }
 0x4ef   : > { %v4134_v34 = vpop.permute.xlu1 %4133 }
 0x4f0   : > { %v3740_v5 = vsel %vm2939_vm12, %v3739_v41, %v3724_v52  ;;  %v4313_v58 = vsel %vm4253_vm15, %v4305_v54, %v4134_v34  ;;  %v3720_v37 = vsel %vm2939_vm12, 0.0, %v3719_v27  ;;  %v3710_v27 = vperm.slane %v9949_v32, %v9655_v10 }
 0x4f1   : > { %v10611_v23 = vperm.slane %v3740_v5, %v9655_v10  ;;  %v4321_v9 = vsel %vm4262_vm0, %v4313_v58, %v4166_v24  ;;  %v3729_v24 = vrot.slane %v2937_v25, 4  ;;  %v3741_v25 = vrot.slane %v3724_v52, 4 }
 0x4f2   : > { %4392 = vrot.lane.b32.xlu0 %v10573_v22, %s7694_s29  ;;  %4175 = vrot.lane.b32.xlu2 %v3658_v35, %s7702_s14  ;;  %v3717_v32 = vrot.slane %v3710_v27, 4 }
 0x4f3   : > { %v3763_v42 = vrot.slane %v10611_v23, 4  ;;  %v3730_v59 = vsel %vm2939_vm12, 0.0, %v3729_v24  ;;  %v3742_v7 = vsel %vm2939_vm12, %v3734_v1, %v3741_v25 }
 0x4f4   : > { %v10579_v13 = vpop.permute.xlu0 %4007  ;;  %v10582_v20 = vpop.permute.xlu2 %4009  ;;  %v3738_v8 = vperm.slane %v3730_v59, %v9589_v39  ;;  %v3750_v18 = vperm.slane %v3742_v7, %v9655_v10 }
 0x4f5   : > { %4143 = vrot.lane.b32.xlu1 %v3664_v47, %s7701_s13  ;;  %v3764_v48 = vsel %vm2939_vm12, 0.0, %v3763_v42  ;;  %v4237_v47 = vsel %vm4235_vm13, %v4228_v6, %v10244_v16 }
 0x4f6   : > { %v4246_v36 = vsel %vm4244_vm14, %v4237_v47, %v10247_v17  ;;  %v3751_v16 = vrot.slane %v3738_v8, 4  ;;  %v3765_v2 = vrot.slane %v3750_v18, 4 }
 0x4f7   : > { %v4198_v31 = vpop.permute.xlu1 %4197 }
 0x4f8   : > { %v10618_v51 = vsel %vm4271_vm1, %v4321_v9, %v4198_v31  ;;  %v4255_v31 = vsel %vm4253_vm15, %v4246_v36, %v10404_v29  ;;  %v3766_v52 = vsel %vm2939_vm12, 0.0, %v3765_v2 }
 0x4fa   : > { %4207 = vrot.lane.b32.xlu0 %v3666_v61, %s7703_s15  ;;  %4448 = vrot.lane.b32.xlu2 %v10548_v60, %s7700_s12  ;;  %v4264_v61 = vsel %vm4262_vm0, %v4255_v31, %v10446_v14  ;;  %v3728_v14 = vperm.slane %v3720_v37, %v9589_v39 }
 0x4fb   : > { %v10661_v17 = vsel %vm4271_vm1, %v4264_v61, %v10506_v62  ;;  %v4282_v62 = vsel %vm1923_vm2, %v10208_v21, %v10579_v13  ;;  %v4222_v61 = vsel %vm1923_vm2, %v9791_v40, %v10149_v30 }
 0x4fc   : > { %v10597_v4 = vpop.permute.xlu0 %4103  ;;  %v10601_v55 = vpop.permute.xlu2 %4105  ;;  %v3752_v50 = vsel %vm2939_vm12, %v3751_v16, %v3728_v14  ;;  %v3753_v9 = vrot.slane %v3728_v14, 4  ;;  %v12491_v16 = vld [vmem:[#allocation5_spill] sm:$0xff] }
 0x4fd   : > { %4424 = vrot.lane.b32.xlu1 %v10548_v60, %s7702_s14  ;;  %v3758_v54 = vperm.slane %v3752_v50, %v9655_v10  ;;  %v4230_v14 = vsel %vm2055_vm9, %v4222_v61, %v12491_v16  ;;  %v12504_v61 = vld [vmem:[#allocation11_spill] sm:$0xff] }
 0x4fe   : > { %v3754_v24 = vsel %vm2939_vm12, %v3738_v8, %v3753_v9 }
 0x4ff   : > { %v4040_v56 = vpop.permute.xlu1 %4039  ;;  %v3767_v42 = vrot.slane %v3758_v54, 4  ;;  %v3762_v33 = vperm.slane %v3754_v24, %v9655_v10 }
 0x500   : > { %v4290_v5 = vsel %vm2055_vm9, %v4282_v62, %v4040_v56 }
 0x502   : > { %4344 = vrot.lane.b32.xlu0 %v10573_v22, %s7702_s14  ;;  %3951 = vrot.lane.b32.xlu2 %v3606_v3, %s7702_s14 }
 0x504   : > { %v10620_v46 = vpop.permute.xlu0 %4199  ;;  %v10624_v26 = vpop.permute.xlu2 %4201 }
 0x505   : > { %4474 = vrot.lane.b32.xlu1 %v10618_v51, %s7694_s29 }
 0x507   : > { %v4136_v34 = vpop.permute.xlu1 %4135 }
 0x50a   : > { %4017 = vrot.lane.b32.xlu0 %v3764_v48, %s7691_s26  ;;  %3983 = vrot.lane.b32.xlu2 %v3614_v38, %s7703_s15  ;;  %v4298_v48 = vsel %vm4235_vm13, %v4290_v5, %v10534_v63  ;;  %v3768_v38 = vsel %vm2939_vm12, 0.0, %v3767_v42  ;;  %v3769_v63 = vrot.slane %v3762_v33, 4 }
 0x50b   : > { %v4306_v21 = vsel %vm4244_vm14, %v4298_v48, %v10597_v4  ;;  %v4221_v4 = vsel %vm1923_vm2, %v9757_v11, %v10116_v28 }
 0x50c   : > { %v10637_v35 = vpop.permute.xlu0 %4041  ;;  %v10641_v49 = vpop.permute.xlu2 %4011  ;;  %v4314_v13 = vsel %vm4253_vm15, %v4306_v21, %v4136_v34  ;;  %v3770_v34 = vsel %vm2939_vm12, 0.0, %v3769_v63  ;;  %v4229_v7 = vsel %vm2055_vm9, %v4221_v4, %v10120_v19  ;;  %v12497_v21 = vld [vmem:[#allocation38_spill] sm:$0xff] }
 0x50d   : > { %4368 = vrot.lane.b32.xlu1 %v10573_v22, %s7700_s12  ;;  %v4322_v6 = vsel %vm4262_vm0, %v4314_v13, %v10561_v12  ;;  %v4238_v11 = vsel %vm4235_vm13, %v4229_v7, %v10278_v15  ;;  %v3718_v15 = vsel %vm2939_vm12, 0.0, %v3717_v32  ;;  %v12498_v63 = vld [vmem:[#allocation14_spill] sm:$0xff]  ;;  %v12500_v7 = vld [vmem:[#allocation64_spill] sm:$0xff] }
 0x50e   : > { %v10704_v47 = vsel %vm4271_vm1, %v4322_v6, %v10620_v46  ;;  %v4247_v28 = vsel %vm4244_vm14, %v4238_v11, %v10322_v57  ;;  %v12501_v32 = vld [vmem:[#allocation20_spill] sm:$0xff] }
 0x50f   : > { %v3976_v44 = vpop.permute.xlu1 %3975  ;;  %v4256_v19 = vsel %vm4253_vm15, %v4247_v28, %v10325_v0  ;;  %v4283_v0 = vsel %vm1923_vm2, %v10290_v45, %v10582_v20 }
 0x510   : > { %v4265_v36 = vsel %vm4262_vm0, %v4256_v19, %v10475_v43  ;;  %v4291_v43 = vsel %vm2055_vm9, %v4283_v0, %v10637_v35  ;;  %v12492_v35 = vld [vmem:[#allocation59_spill] sm:$0xff] }
 0x511   : > { %v10726_v31 = vsel %vm4271_vm1, %v4265_v36, %v3976_v44  ;;  %v4239_v40 = vsel %vm4235_vm13, %v4230_v14, %v12492_v35 }
 0x512   : > { %4450 = vrot.lane.b32.xlu0 %v10618_v51, %s7700_s12  ;;  %4426 = vrot.lane.b32.xlu2 %v10618_v51, %s7702_s14 }
 0x514   : > { %v10663_v1 = vpop.permute.xlu0 %4137  ;;  %v10667_v29 = vpop.permute.xlu2 %4107 }
 0x515   : > { %4394 = vrot.lane.b32.xlu1 %v10661_v17, %s7694_s29 }
 0x517   : > { %v4074_v41 = vpop.permute.xlu1 %4073 }
 0x518   : > { %v4299_v37 = vsel %vm4235_vm13, %v4291_v43, %v4074_v41  ;;  %v12493_v41 = vld [vmem:[#allocation69_spill] sm:$0xff] }
 0x519   : > { %v4307_v2 = vsel %vm4244_vm14, %v4299_v37, %v10601_v55  ;;  %v4248_v55 = vsel %vm4244_vm14, %v4239_v40, %v12493_v41 }
 0x51a   : > { %4346 = vrot.lane.b32.xlu0 %v10661_v17, %s7702_s14  ;;  %4081 = vrot.lane.b32.xlu2 %v3766_v52, %s7699_s30  ;;  %v4315_v30 = vsel %vm4253_vm15, %v4307_v2, %v10663_v1  ;;  %v12505_v2 = vld [vmem:[#allocation36_spill] sm:$0xff] }
 0x51c   : > { %v3946_v58 = vpop.permute.xlu0 %3945  ;;  %v10681_v3 = vpop.permute.xlu2 %4203 }
 0x51d   : > { %4049 = vrot.lane.b32.xlu1 %v3750_v18, %s7694_s29 }
 0x51f   : > { %v4170_v53 = vpop.permute.xlu1 %4169 }
 0x520   : > { %v4323_v50 = vsel %vm4262_vm0, %v4315_v30, %v4170_v53  ;;  %v12507_v30 = vld [vmem:[#allocation53_spill] sm:$0xff] }
 0x521   : > { %v10771_v42 = vsel %vm4271_vm1, %v4323_v50, %v10624_v26 }
 0x522   : > { %4145 = vrot.lane.b32.xlu0 %v3768_v38, %s7701_s13  ;;  %4113 = vrot.lane.b32.xlu2 %v3758_v54, %s7700_s12  ;;  %v12494_v54 = vld [vmem:[#allocation66_spill] sm:$0xff] }
 0x523   : > { %v4257_v62 = vsel %vm4253_vm15, %v4248_v55, %v12494_v54 }
 0x524   : > { %v4044_v56 = vpop.permute.xlu0 %4043  ;;  %v10695_v59 = vpop.permute.xlu2 %4013  ;;  %v4266_v5 = vsel %vm4262_vm0, %v4257_v62, %v3946_v58  ;;  %v12495_v58 = vld [vmem:[#allocation10_spill] sm:$0xff]  ;;  %v12508_v62 = vld [vmem:[#allocation19_spill] sm:$0xff] }
 0x525   : > { %4370 = vrot.lane.b32.xlu1 %v10661_v17, %s7700_s12  ;;  %v4284_v24 = vsel %vm1923_vm2, %v12495_v58, %v10641_v49  ;;  %v12499_v49 = vld [vmem:[#allocation16_spill] sm:$0xff] }
 0x526   : > { %v4292_v48 = vsel %vm2055_vm9, %v4284_v24, %v4044_v56 }
 0x527   : > { %v3978_v25 = vpop.permute.xlu1 %3977 }
 0x528   : > { %v10767_v9 = vsel %vm4271_vm1, %v4266_v5, %v3978_v25 }
 0x52a   : > { %4476 = vrot.lane.b32.xlu0 %v10704_v47, %s7694_s29  ;;  %4209 = vrot.lane.b32.xlu2 %v3770_v34, %s7703_s15 }
 0x52c   : > { %v4140_v12 = vpop.permute.xlu0 %4139  ;;  %v10719_v46 = vpop.permute.xlu2 %4109 }
 0x52d   : > { %4177 = vrot.lane.b32.xlu1 %v3762_v33, %s7702_s14  ;;  %v12496_v33 = vld [vmem:[#allocation37_spill] sm:$0xff] }
 0x52e   : > { %v4223_v13 = vsel %vm1923_vm2, %v12497_v21, %v12496_v33  ;;  %v12509_v33 = vld [vmem:[#allocation115_spill] sm:$0xff] }
 0x52f   : > { %v4076_v8 = vpop.permute.xlu1 %4075  ;;  %v4231_v6 = vsel %vm2055_vm9, %v4223_v13, %v12498_v63  ;;  %v12511_v63 = vld [vmem:[#allocation9_spill] sm:$0xff] }
 0x530   : > { %v4300_v26 = vsel %vm4235_vm13, %v4292_v48, %v4076_v8  ;;  %v4240_v56 = vsel %vm4235_vm13, %v4231_v6, %v12499_v49  ;;  %v12512_v49 = vld [vmem:[#allocation6_spill] sm:$0xff] }
 0x531   : > { %v4308_v25 = vsel %vm4244_vm14, %v4300_v26, %v10667_v29  ;;  %v4249_v11 = vsel %vm4244_vm14, %v4240_v56, %v12500_v7  ;;  %v12513_v7 = vld [vmem:[#allocation63_spill] sm:$0xff] }
 0x532   : > { %4396 = vrot.lane.b32.xlu0 %v10726_v31, %s7694_s29  ;;  %3985 = vrot.lane.b32.xlu2 %v3718_v15, %s7703_s15  ;;  %v4258_v8 = vsel %vm4253_vm15, %v4249_v11, %v12501_v32 }
 0x534   : > { %v3948_v57 = vpop.permute.xlu0 %3947  ;;  %v10733_v18 = vpop.permute.xlu2 %4205 }
 0x535   : > { %3953 = vrot.lane.b32.xlu1 %v3710_v27, %s7702_s14  ;;  %v4316_v27 = vsel %vm4253_vm15, %v4308_v25, %v4140_v12  ;;  %v4267_v19 = vsel %vm4262_vm0, %v4258_v8, %v3948_v57  ;;  %v12502_v57 = vld [vmem:[#allocation57_spill] sm:$0xff] }
 0x536   : > { %v4285_v43 = vsel %vm1923_vm2, %v12502_v57, %v10695_v59  ;;  %v12506_v59 = vld [vmem:[#allocation17_spill] sm:$0xff] }
 0x537   : > { %v4172_v44 = vpop.permute.xlu1 %4171 }
 0x538   : > { %v4324_v29 = vsel %vm4262_vm0, %v4316_v27, %v4172_v44 }
 0x539   : > { %v10811_v15 = vsel %vm4271_vm1, %v4324_v29, %v10681_v3  ;;  %v12503_v3 = vld [vmem:[#allocation13_spill] sm:$0xff] }
 0x53a   : > { %4348 = vrot.lane.b32.xlu0 %v10726_v31, %s7702_s14  ;;  %4452 = vrot.lane.b32.xlu2 %v10704_v47, %s7700_s12  ;;  %v4224_v16 = vsel %vm1923_vm2, %v12504_v61, %v12503_v3 }
 0x53b   : > { %v4232_v35 = vsel %vm2055_vm9, %v4224_v16, %v12505_v2 }
 0x53c   : > { %v4046_v45 = vpop.permute.xlu0 %4045  ;;  %v10754_v20 = vpop.permute.xlu2 %4015 }
 0x53d   : > { %4428 = vrot.lane.b32.xlu1 %v10704_v47, %s7702_s14  ;;  %v4293_v44 = vsel %vm2055_vm9, %v4285_v43, %v4046_v45  ;;  %v4241_v45 = vsel %vm4235_vm13, %v4232_v35, %v12506_v59  ;;  %v4286_v21 = vsel %vm1923_vm2, %v12509_v33, %v10754_v20 }
 0x53e   : > { %v4250_v41 = vsel %vm4244_vm14, %v4241_v45, %v12507_v30 }
 0x53f   : > { %v3980_v52 = vpop.permute.xlu1 %3979  ;;  %v4259_v5 = vsel %vm4253_vm15, %v4250_v41, %v12508_v62 }
 0x540   : > { %v10807_v36 = vsel %vm4271_vm1, %v4267_v19, %v3980_v52  ;;  %v12515_v19 = vld [vmem:[#allocation135_spill] sm:$0xff] }
 0x542   : > { %4398 = vrot.lane.b32.xlu0 %v10767_v9, %s7694_s29  ;;  %4478 = vrot.lane.b32.xlu2 %v10771_v42, %s7694_s29 }
 0x544   : > { %v4142_v1 = vpop.permute.xlu0 %4141  ;;  %v4112_v53 = vpop.permute.xlu2 %4111 }
 0x545   : > { %4372 = vrot.lane.b32.xlu1 %v10726_v31, %s7700_s12 }
 0x547   : > { %v4078_v38 = vpop.permute.xlu1 %4077 }
 0x548   : > { %v4301_v14 = vsel %vm4235_vm13, %v4293_v44, %v4078_v38 }
 0x549   : > { %v4309_v40 = vsel %vm4244_vm14, %v4301_v14, %v10719_v46 }
 0x54a   : > { %4350 = vrot.lane.b32.xlu0 %v10767_v9, %s7702_s14  ;;  %4454 = vrot.lane.b32.xlu2 %v10771_v42, %s7700_s12  ;;  %v4317_v52 = vsel %vm4253_vm15, %v4309_v40, %v4142_v1 }
 0x54c   : > { %v3950_v4 = vpop.permute.xlu0 %3949  ;;  %v4176_v34 = vpop.permute.xlu2 %4175 }
 0x54d   : > { %4430 = vrot.lane.b32.xlu1 %v10771_v42, %s7702_s14  ;;  %v4268_v58 = vsel %vm4262_vm0, %v4259_v5, %v3950_v4 }
 0x54f   : > { %v4174_v28 = vpop.permute.xlu1 %4173 }
 0x550   : > { %v4325_v46 = vsel %vm4262_vm0, %v4317_v52, %v4174_v28  ;;  %v12514_v28 = vld [vmem:[#allocation73_spill] sm:$0xff] }
 0x551   : > { %v10851_v48 = vsel %vm4271_vm1, %v4325_v46, %v10733_v18  ;;  %v12510_v18 = vld [vmem:[#allocation43_spill] sm:$0xff] }
 0x552   : > { %4400 = vrot.lane.b32.xlu0 %v10807_v36, %s7694_s29  ;;  %4480 = vrot.lane.b32.xlu2 %v10811_v15, %s7694_s29  ;;  %v4225_v6 = vsel %vm1923_vm2, %v12511_v63, %v12510_v18  ;;  %v4836_v63 = vld [vmem:[%s12098_s3 + $0x80] sm:$0xff] }
 0x553   : > { %v4233_v56 = vsel %vm2055_vm9, %v4225_v6, %v12512_v49 }
 0x554   : > { %v4048_v12 = vpop.permute.xlu0 %4047  ;;  %v4449_v0 = vpop.permute.xlu2 %4448  ;;  %v4242_v11 = vsel %vm4235_vm13, %v4233_v56, %v12513_v7 }
 0x555   : > { %4374 = vrot.lane.b32.xlu1 %v10767_v9, %s7700_s12  ;;  %v4294_v13 = vsel %vm2055_vm9, %v4286_v21, %v4048_v12  ;;  %v4251_v32 = vsel %vm4244_vm14, %v4242_v11, %v12514_v28  ;;  %v4508_v16 = vrot.slane %v4449_v0, 4 }
 0x556   : > { %v4260_v12 = vsel %vm4253_vm15, %v4251_v32, %v12515_v19 }
 0x557   : > { %v3982_v37 = vpop.permute.xlu1 %3981  ;;  %v4509_v35 = vsel %vm2939_vm12, %v4508_v16, %v10548_v60 }
 0x558   : > { %v10847_v24 = vsel %vm4271_vm1, %v4268_v58, %v3982_v37  ;;  %v4513_v30 = vperm.slane %v4509_v35, %v9589_v39 }
 0x55a   : > { %4352 = vrot.lane.b32.xlu0 %v10807_v36, %s7702_s14  ;;  %4456 = vrot.lane.b32.xlu2 %v10811_v15, %s7700_s12 }
 0x55c   : > { %v4473_v55 = vpop.permute.xlu0 %4472  ;;  %v3952_v50 = vpop.permute.xlu2 %3951 }
 0x55d   : > { %4432 = vrot.lane.b32.xlu1 %v10811_v15, %s7702_s14  ;;  %v4269_v57 = vsel %vm4262_vm0, %v4260_v12, %v3952_v50  ;;  %v4514_v43 = vrot.slane %v4473_v55, 4 }
 0x55f   : > { %v4080_v54 = vpop.permute.xlu1 %4079 }
 0x560   : > { %v4302_v25 = vsel %vm4235_vm13, %v4294_v13, %v4080_v54 }
 0x561   : > { %v4310_v4 = vsel %vm4244_vm14, %v4302_v25, %v4112_v53 }
 0x562   : > { %4402 = vrot.lane.b32.xlu0 %v10847_v24, %s7694_s29  ;;  %4482 = vrot.lane.b32.xlu2 %v10851_v48, %s7694_s29 }
 0x564   : > { %v4393_v1 = vpop.permute.xlu0 %4392  ;;  %v3984_v38 = vpop.permute.xlu2 %3983 }
 0x565   : > { %4376 = vrot.lane.b32.xlu1 %v10807_v36, %s7700_s12  ;;  %v10886_v44 = vsel %vm4271_vm1, %v4269_v57, %v3984_v38  ;;  %v4502_v40 = vrot.slane %v4393_v1, 4 }
 0x567   : > { %v4144_v26 = vpop.permute.xlu1 %4143 }
 0x568   : > { %v4318_v29 = vsel %vm4253_vm15, %v4310_v4, %v4144_v26 }
 0x569   : > { %v4326_v53 = vsel %vm4262_vm0, %v4318_v29, %v4176_v34 }
 0x56a   : > { %4354 = vrot.lane.b32.xlu0 %v10847_v24, %s7702_s14  ;;  %4458 = vrot.lane.b32.xlu2 %v10851_v48, %s7700_s12 }
 0x56c   : > { %v4208_v20 = vpop.permute.xlu0 %4207  ;;  %v4427_v27 = vpop.permute.xlu2 %4426 }
 0x56d   : > { %4434 = vrot.lane.b32.xlu1 %v10851_v48, %s7702_s14  ;;  %v10889_v37 = vsel %vm4271_vm1, %v4326_v53, %v4208_v20 }
 0x56f   : > { %v4425_v8 = vpop.permute.xlu1 %4424 }
 0x570   : > { %v4515_v3 = vsel %vm2939_vm12, %v4514_v43, %v4425_v8 }
 0x571   : > { %v4519_v14 = vperm.slane %v4515_v3, %v9589_v39 }
 0x572   : > { %4404 = vrot.lane.b32.xlu0 %v10886_v44, %s7694_s29  ;;  %4484 = vrot.lane.b32.xlu2 %v10889_v37, %s7694_s29 }
 0x573   : > { %v4526_v59 = vrot.slane %v4519_v14, 4 }
 0x574   : > { %v4345_v61 = vpop.permute.xlu0 %4344  ;;  %v4082_v34 = vpop.permute.xlu2 %4081 }
 0x575   : > { %4378 = vrot.lane.b32.xlu1 %v10847_v24, %s7700_s12  ;;  %v4503_v45 = vsel %vm2939_vm12, %v4502_v40, %v4345_v61  ;;  %v4527_v55 = vsel %vm2939_vm12, %v4526_v59, %v4513_v30 }
 0x576   : > { %v4507_v60 = vperm.slane %v4503_v45, %v9589_v39  ;;  %v4531_v46 = vperm.slane %v4527_v55, %v9655_v10 }
 0x577   : > { %v4475_v2 = vpop.permute.xlu1 %4474 }
 0x578   : > { %v4520_v62 = vrot.slane %v4507_v60, 4  ;;  %v4532_v38 = vrot.slane %v4531_v46, 4  ;;  %v4552_v6 = vrot.slane %v4475_v2, 4 }
 0x57a   : > { %4356 = vrot.lane.b32.xlu0 %v10886_v44, %s7702_s14  ;;  %4460 = vrot.lane.b32.xlu2 %v10889_v37, %s7700_s12  ;;  %v4553_v56 = vsel %vm2939_vm12, %v4552_v6, %v4427_v27 }
 0x57b   : > { %v4557_v7 = vperm.slane %v4553_v56, %v9589_v39  ;;  %v10988_v56 = vld [vmem:[#allocation4 + $0x1] sm:$0xff] }
 0x57c   : > { %v4018_v41 = vpop.permute.xlu0 %4017  ;;  %v4114_v0 = vpop.permute.xlu2 %4113 }
 0x57d   : > { %4436 = vrot.lane.b32.xlu1 %v10889_v37, %s7702_s14  ;;  %v4564_v8 = vrot.slane %v4557_v7, 4  ;;  %v4287_v12 = vsel %vm1923_vm2, %v10611_v23, %v4018_v41 }
 0x57f   : > { %v4369_v50 = vpop.permute.xlu1 %4368 }
 0x580   : > { %v4496_v52 = vrot.slane %v4369_v50, 4  ;;  %v12517_v50 = vld [vmem:[#allocation55_spill] sm:$0xff] }
 0x582   : > { %v4497_v54 = vsel %vm2939_vm12, %v4496_v52, %v10573_v22  ;;  %v4837_v22 = vld [vmem:[%s12098_s3 + $0x88] sm:$0xff] }
 0x583   : > { %v4501_v5 = vperm.slane %v4497_v54, %v9589_v39  ;;  %5310 = vmatpush.msra.mxu2 %v4837_v22 }
 0x584   : > { %v4451_v1 = vpop.permute.xlu0 %4450  ;;  %v4210_v33 = vpop.permute.xlu2 %4209 }
 0x585   : > { %v4521_v58 = vsel %vm2939_vm12, %v4520_v62, %v4501_v5  ;;  %4380 = vrot.lane.b32.xlu1 %v10886_v44, %s7700_s12  ;;  %v4546_v25 = vrot.slane %v4451_v1, 4  ;;  %5311 = vmatpush.msra.mxu2 %v4836_v63  ;;  %v12519_v5 = vld [vmem:[#allocation8_spill] sm:$0xff] }
 0x586   : > { %v4525_v26 = vperm.slane %v4521_v58, %v9655_v10 }
 0x587   : > { %v4395_v21 = vpop.permute.xlu1 %4394  ;;  %v4547_v20 = vsel %vm2939_vm12, %v4546_v25, %v10618_v51 }
 0x588   : > { %v10920_v13 = vsel %vm2939_vm12, %v4532_v38, %v4525_v26  ;;  %v4540_v29 = vrot.slane %v4395_v21, 4  ;;  %v4551_v28 = vperm.slane %v4547_v20, %v9589_v39  ;;  %v12520_v26 = vld [vmem:[#allocation68_spill] sm:$0xff] }
 0x589   : > { %v4858_v18 = vmax.f32 %v10920_v13, 0.0  ;;  %v12521_v21 = vld [vmem:[#allocation96_spill] sm:$0xff] }
 0x58a   : > { %v4565_v57 = vsel %vm2939_vm12, %v4564_v8, %v4551_v28 }
 0x58b   : > { %4867 = vst.msk [vmem:[#allocation4 + $0x11] sm:$0xff] %vm1923_vm2, %v4858_v18  ;;  %v4569_v3 = vperm.slane %v4565_v57, %v9655_v10 }
 0x58c   : > { %v4347_v49 = vpop.permute.xlu0 %4346  ;;  %v3986_v11 = vpop.permute.xlu2 %3985 }
 0x58d   : > { %v4541_v32 = vsel %vm2939_vm12, %v4540_v29, %v4347_v49  ;;  %v4570_v59 = vrot.slane %v4569_v3, 4 }
 0x58e   : > { %v4545_v27 = vperm.slane %v4541_v32, %v9589_v39 }
 0x58f   : > { %v4050_v4 = vpop.permute.xlu1 %4049 }
 0x590   : > { %v4295_v51 = vsel %vm2055_vm9, %v4287_v12, %v4050_v4  ;;  %v4558_v16 = vrot.slane %v4545_v27, 4 }
 0x591   : > { %v4303_v14 = vsel %vm4235_vm13, %v4295_v51, %v4082_v34  ;;  %v12516_v34 = vld [vmem:[#allocation58_spill] sm:$0xff] }
 0x592   : > { %v4311_v45 = vsel %vm4244_vm14, %v4303_v14, %v4114_v0  ;;  %v4226_v52 = vsel %vm1923_vm2, %v12517_v50, %v12516_v34  ;;  %v12518_v0 = vld [vmem:[#allocation48_spill] sm:$0xff]  ;;  %v10992_v32 = vld [vmem:[#allocation4 + $0x10] sm:$0xff]  ;;  %v11007_v14 = vld [vmem:[#allocation4 + $0x2] sm:$0xff] }
 0x593   : > { %v4234_v62 = vsel %vm2055_vm9, %v4226_v52, %v12518_v0  ;;  %v4884_v4 = vld [vmem:[#allocation4 + $0x11] sm:$0xff] }
 0x594   : > { %v4146_v19 = vpop.permute.xlu0 %4145  ;;  %v4453_v2 = vpop.permute.xlu2 %4452  ;;  %v4243_v58 = vsel %vm4235_vm13, %v4234_v62, %v12519_v5 }
 0x595   : > { %v4319_v41 = vsel %vm4253_vm15, %v4311_v45, %v4146_v19  ;;  %v4584_v7 = vrot.slane %v4453_v2, 4  ;;  %v7145_v19 = vpack.i.bf16 %v4884_v4, %v10988_v56  ;;  %v4892_v2 = vld [vmem:[#allocation4 + $0x12] sm:$0xff] }
 0x597   : > { %v4371_v53 = vpop.permute.xlu1 %4370  ;;  %v4585_v27 = vsel %vm2939_vm12, %v4584_v7, %v10704_v47 }
 0x598   : > { %v4534_v43 = vrot.slane %v4371_v53, 4  ;;  %v4589_v3 = vperm.slane %v4585_v27, %v9589_v39 }
 0x59a   : > { %v4535_v61 = vsel %vm2939_vm12, %v4534_v43, %v10661_v17 }
 0x59b   : > { %v4539_v35 = vperm.slane %v4535_v61, %v9589_v39 }
 0x59c   : > { %v4477_v40 = vpop.permute.xlu0 %4476  ;;  %v4479_v1 = vpop.permute.xlu2 %4478 }
 0x59d   : > { %v4559_v23 = vsel %vm2939_vm12, %v4558_v16, %v4539_v35 }
 0x59e   : > { %v4563_v30 = vperm.slane %v4559_v23, %v9655_v10 }
 0x59f   : > { %v4178_v55 = vpop.permute.xlu1 %4177 }
 0x5a0   : > { %v10951_v60 = vsel %vm2939_vm12, %v4570_v59, %v4563_v30  ;;  %v4327_v17 = vsel %vm4262_vm0, %v4319_v41, %v4178_v55  ;;  %v7150_v30 = vpack.i.bf16 %v4892_v2, %v11007_v14 }
 0x5a1   : > { %v4859_v46 = vmax.f32 %v10951_v60, 0.0  ;;  %v10959_v54 = vsel %vm4271_vm1, %v4327_v17, %v4210_v33  ;;  %v4252_v33 = vsel %vm4244_vm14, %v4243_v58, %v12520_v26 }
 0x5a2   : > { %4438 = vrot.lane.b32.xlu1 %v10959_v54, %s7702_s14  ;;  %4486 = vrot.lane.b32.xlu2 %v10959_v54, %s7694_s29  ;;  %v4261_v18 = vsel %vm4253_vm15, %v4252_v33, %v12521_v21 }
 0x5a3   : > { %4868 = vst.msk [vmem:[#allocation4 + $0x21] sm:$0xff] %vm1923_vm2, %v4859_v46  ;;  %v4628_v46 = vrot.slane %v4479_v1, 4 }
 0x5a4   : > { %v4397_v38 = vpop.permute.xlu0 %4396  ;;  %v4455_v29 = vpop.permute.xlu2 %4454 }
 0x5a5   : > { %v4578_v53 = vrot.slane %v4397_v38, 4  ;;  %v4622_v0 = vrot.slane %v4455_v29, 4 }
 0x5a7   : > { %v3954_v22 = vpop.permute.xlu1 %3953 }
 0x5a8   : > { %v4270_v63 = vsel %vm4262_vm0, %v4261_v18, %v3954_v22  ;;  %v4623_v18 = vsel %vm2939_vm12, %v4622_v0, %v10771_v42 }
 0x5a9   : > { %v10976_v6 = vsel %vm4271_vm1, %v4270_v63, %v3986_v11  ;;  %v4590_v11 = vrot.slane %v4477_v40, 4 }
 0x5aa   : > { %4462 = vrot.lane.b32.xlu2 %v10959_v54, %s7700_s12  ;;  %4382 = vrot.lane.b32.xlu1 %v10976_v6, %s7700_s12  ;;  %v10982_v25 = vld [vmem:[#allocation4 + $0x22] sm:$0xff] }
 0x5ab   : > { %4406 = vrot.lane.b32.xlu0 %v10976_v6, %s7694_s29  ;;  %7064 = vmatmul.msk.f32.vlgmr.msra.gmra.mxu2 %vm1923_vm2, %v10982_v25  ;;  %v10990_v20 = vld [vmem:[#allocation4 + $0x20] sm:$0xff]  ;;  %v7165_v21 = vpack.i.bf16 %v10982_v25, %v4892_v2 }
 0x5ac   : > { %v4349_v49 = vpop.permute.xlu0 %4348  ;;  %v7155_v12 = vpack.i.bf16 %v10990_v20, %v10992_v32  ;;  %v4908_v16 = vld [vmem:[#allocation4 + $0x21] sm:$0xff]  ;;  %v4481_v45 = vpop.permute.xlu2 %4480 }
 0x5ad   : > { %v4579_v43 = vsel %vm2939_vm12, %v4578_v53, %v4349_v49  ;;  %v7160_v59 = vpack.i.bf16 %v4908_v16, %v4884_v4  ;;  %v4627_v4 = vperm.slane %v4623_v18, %v9589_v39 }
 0x5ae   : > { %v4583_v47 = vperm.slane %v4579_v43, %v9589_v39 }
 0x5af   : > { %v4429_v28 = vpop.permute.xlu1 %4428 }
 0x5b0   : > { %v4591_v8 = vsel %vm2939_vm12, %v4590_v11, %v4429_v28  ;;  %v4596_v17 = vrot.slane %v4583_v47, 4 }
 0x5b1   : > { %v4595_v57 = vperm.slane %v4591_v8, %v9589_v39 }
 0x5b2   : > { %7146 = vrot.lane.b32.xlu2 %v7145_v19, %s7691_s26  ;;  %7156 = vrot.lane.b32.xlu1 %v7155_v12, %s7699_s30 }
 0x5b3   : > { %v4602_v51 = vrot.slane %v4595_v57, 4  ;;  %4358 = vrot.lane.b32.xlu0 %v10976_v6, %s7702_s14 }
 0x5b4   : > { %v4399_v61 = vpop.permute.xlu0 %4398  ;;  %v4457_v22 = vpop.permute.xlu2 %4456 }
 0x5b5   : > { %v4603_v35 = vsel %vm2939_vm12, %v4602_v51, %v4589_v3  ;;  %v4616_v1 = vrot.slane %v4399_v61, 4 }
 0x5b6   : > { %v4607_v41 = vperm.slane %v4603_v35, %v9655_v10  ;;  %v4660_v35 = vrot.slane %v4457_v22, 4 }
 0x5b7   : > { %v4373_v23 = vpop.permute.xlu1 %4372 }
 0x5b8   : > { %v4572_v40 = vrot.slane %v4373_v23, 4  ;;  %v4608_v62 = vrot.slane %v4607_v41, 4 }
 0x5ba   : > { %v4573_v55 = vsel %vm2939_vm12, %v4572_v40, %v10726_v31  ;;  %7161 = vrot.lane.b32.xlu2 %v7160_v59, %s7700_s12 }
 0x5bb   : > { %v4577_v34 = vperm.slane %v4573_v55, %v9589_v39  ;;  %7151 = vrot.lane.b32.xlu0 %v7150_v30, %s7694_s29 }
 0x5bc   : > { %v4351_v52 = vpop.permute.xlu0 %4350  ;;  %v4483_v61 = vpop.permute.xlu2 %4482 }
 0x5bd   : > { %v4597_v50 = vsel %vm2939_vm12, %v4596_v17, %v4577_v34  ;;  %v4617_v49 = vsel %vm2939_vm12, %v4616_v1, %v4351_v52 }
 0x5be   : > { %v4601_v5 = vperm.slane %v4597_v50, %v9655_v10  ;;  %v4621_v11 = vperm.slane %v4617_v49, %v9589_v39 }
 0x5bf   : > { %v4431_v58 = vpop.permute.xlu1 %4430 }
 0x5c0   : > { %v11021_v38 = vsel %vm2939_vm12, %v4608_v62, %v4601_v5  ;;  %v4629_v31 = vsel %vm2939_vm12, %v4628_v46, %v4431_v58  ;;  %v4634_v53 = vrot.slane %v4621_v11, 4 }
 0x5c1   : > { %v4860_v26 = vmax.f32 %v11021_v38, 0.0  ;;  %v4633_v33 = vperm.slane %v4629_v31, %v9589_v39 }
 0x5c3   : > { %4869 = vst.msk [vmem:[#allocation4 + $0x31] sm:$0xff] %vm1923_vm2, %v4860_v26  ;;  %v4640_v63 = vrot.slane %v4633_v33, 4  ;;  %7166 = vrot.lane.b32.xlu0 %v7165_v21, %s7701_s13 }
 0x5c4   : > { %v4401_v7 = vpop.permute.xlu0 %4400  ;;  %v4459_v5 = vpop.permute.xlu2 %4458 }
 0x5c5   : > { %v4641_v29 = vsel %vm2939_vm12, %v4640_v63, %v4627_v4  ;;  %v4654_v41 = vrot.slane %v4401_v7, 4 }
 0x5c6   : > { %v4645_v42 = vperm.slane %v4641_v29, %v9655_v10  ;;  %v4698_v29 = vrot.slane %v4459_v5, 4 }
 0x5c7   : > { %v4375_v28 = vpop.permute.xlu1 %4374 }
 0x5c8   : > { %v4610_v8 = vrot.slane %v4375_v28, 4  ;;  %v4646_v23 = vrot.slane %v4645_v42, 4 }
 0x5ca   : > { %v4611_v19 = vsel %vm2939_vm12, %v4610_v8, %v10767_v9  ;;  %v4941_v12 = vld [vmem:[#allocation4 + $0x32] sm:$0xff]  ;;  %v4666_v9 = vrot.slane %v4481_v45, 4  ;;  %v4661_v45 = vsel %vm2939_vm12, %v4660_v35, %v10811_v15 }
 0x5cb   : > { %v4933_v57 = vld [vmem:[#allocation4 + $0x31] sm:$0xff]  ;;  %v4615_v51 = vperm.slane %v4611_v19, %v9589_v39  ;;  %7065 = vmatmul.msk.f32.gmra.mxu2 %vm1923_vm2, %v4941_v12  ;;  %v7185_v52 = vpack.i.bf16 %v4941_v12, %v10982_v25  ;;  %v4665_v46 = vperm.slane %v4661_v45, %v9589_v39 }
 0x5cc   : > { %v11038_v27 = vld [vmem:[#allocation4 + $0x30] sm:$0xff]  ;;  %v7175_v43 = vpack.i.bf16 %v4933_v57, %v4908_v16  ;;  %v4353_v47 = vpop.permute.xlu0 %4352 }
 0x5cd   : > { %v7170_v3 = vpack.i.bf16 %v11038_v27, %v10990_v20  ;;  %v4635_v2 = vsel %vm2939_vm12, %v4634_v53, %v4615_v51  ;;  %v4655_v34 = vsel %vm2939_vm12, %v4654_v41, %v4353_v47 }
 0x5ce   : > { %7176 = vrot.lane.b32.xlu2 %v7175_v43, %s7703_s15  ;;  %v4639_v40 = vperm.slane %v4635_v2, %v9655_v10  ;;  %7181 = vrot.lane.b32.xlu0 %v7175_v43, %s7691_s26  ;;  %v4659_v62 = vperm.slane %v4655_v34, %v9589_v39  ;;  %v4699_v43 = vsel %vm2939_vm12, %v4698_v29, %v10851_v48 }
 0x5cf   : > { %7171 = vrot.lane.b32.xlu1 %v7170_v3, %s7702_s14  ;;  %v4433_v59 = vpop.permute.xlu1 %4432  ;;  %v4703_v47 = vperm.slane %v4699_v43, %v9589_v39 }
 0x5d0   : > { %v11050_v16 = vsel %vm2939_vm12, %v4646_v23, %v4639_v40  ;;  %v4667_v30 = vsel %vm2939_vm12, %v4666_v9, %v4433_v59  ;;  %v4672_v15 = vrot.slane %v4659_v62, 4 }
 0x5d1   : > { %v4861_v55 = vmax.f32 %v11050_v16, 0.0  ;;  %v4671_v17 = vperm.slane %v4667_v30, %v9589_v39 }
 0x5d3   : > { %4870 = vst.msk [vmem:[#allocation4 + $0x41] sm:$0xff] %vm1923_vm2, %v4861_v55  ;;  %v4678_v50 = vrot.slane %v4671_v17, 4 }
 0x5d4   : > { %v4403_v0 = vpop.permute.xlu0 %4402 }
 0x5d5   : > { %v4679_v58 = vsel %vm2939_vm12, %v4678_v50, %v4665_v46  ;;  %v4692_v3 = vrot.slane %v4403_v0, 4 }
 0x5d6   : > { %v4683_v33 = vperm.slane %v4679_v58, %v9655_v10 }
 0x5d7   : > { %7186 = vrot.lane.b32.xlu1 %v7185_v52, %s7694_s29  ;;  %v4377_v31 = vpop.permute.xlu1 %4376 }
 0x5d8   : > { %v4648_v26 = vrot.slane %v4377_v31, 4  ;;  %v4684_v28 = vrot.slane %v4683_v33, 4 }
 0x5da   : > { %v4649_v21 = vsel %vm2939_vm12, %v4648_v26, %v10807_v36  ;;  %v11067_v18 = vld [vmem:[#allocation4 + $0x42] sm:$0xff]  ;;  %v4704_v36 = vrot.slane %v4483_v61, 4 }
 0x5db   : > { %v4910_v25 = vld [vmem:[#allocation4 + $0x41] sm:$0xff]  ;;  %v4653_v22 = vperm.slane %v4649_v21, %v9589_v39  ;;  %7066 = vmatmul.msk.f32.gmra.mxu2 %vm1923_vm2, %v11067_v18  ;;  %v7200_v63 = vpack.i.bf16 %v11067_v18, %v4941_v12 }
 0x5dc   : > { %v11069_v1 = vld [vmem:[#allocation4 + $0x40] sm:$0xff]  ;;  %v7195_v49 = vpack.i.bf16 %v4910_v25, %v4933_v57  ;;  %v4355_v11 = vpop.permute.xlu0 %4354  ;;  %v4485_v57 = vpop.permute.xlu2 %4484 }
 0x5dd   : > { %v7190_v4 = vpack.i.bf16 %v11069_v1, %v11038_v27  ;;  %v4673_v7 = vsel %vm2939_vm12, %v4672_v15, %v4653_v22  ;;  %v4693_v2 = vsel %vm2939_vm12, %v4692_v3, %v4355_v11 }
 0x5de   : > { %7196 = vrot.lane.b32.xlu0 %v7195_v49, %s7700_s12  ;;  %v4677_v8 = vperm.slane %v4673_v7, %v9655_v10  ;;  %v4697_v35 = vperm.slane %v4693_v2, %v9589_v39 }
 0x5df   : > { %7201 = vrot.lane.b32.xlu1 %v7200_v63, %s7701_s13  ;;  %7191 = vrot.lane.b32.xlu2 %v7190_v4, %s7699_s30  ;;  %v4435_v42 = vpop.permute.xlu1 %4434 }
 0x5e0   : > { %v11083_v19 = vsel %vm2939_vm12, %v4684_v28, %v4677_v8  ;;  %v4705_v12 = vsel %vm2939_vm12, %v4704_v36, %v4435_v42  ;;  %v4710_v34 = vrot.slane %v4697_v35, 4 }
 0x5e1   : > { %v4862_v53 = vmax.f32 %v11083_v19, 0.0  ;;  %v4709_v51 = vperm.slane %v4705_v12, %v9589_v39 }
 0x5e3   : > { %4871 = vst.msk [vmem:[#allocation4 + $0x51] sm:$0xff] %vm1923_vm2, %v4862_v53  ;;  %v4716_v61 = vrot.slane %v4709_v51, 4 }
 0x5e4   : > { %v4405_v9 = vpop.permute.xlu0 %4404  ;;  %v4461_v45 = vpop.permute.xlu2 %4460 }
 0x5e5   : > { %v4717_v23 = vsel %vm2939_vm12, %v4716_v61, %v4703_v47  ;;  %v4736_v62 = vrot.slane %v4461_v45, 4  ;;  %v4730_v21 = vrot.slane %v4405_v9, 4  ;;  %v4834_v45 = vld [vmem:[%s12098_s3 + $0x70] sm:$0xff] }
 0x5e6   : > { %v4721_v30 = vperm.slane %v4717_v23, %v9655_v10 }
 0x5e7   : > { %v4379_v40 = vpop.permute.xlu1 %4378  ;;  %v4737_v63 = vsel %vm2939_vm12, %v4736_v62, %v10889_v37 }
 0x5e8   : > { %v4686_v59 = vrot.slane %v4379_v40, 4  ;;  %v4722_v5 = vrot.slane %v4721_v30, 4  ;;  %v4741_v11 = vperm.slane %v4737_v63, %v9589_v39  ;;  %v4827_v63 = vld [vmem:[%s12098_s3 + $0x38] sm:$0xff] }
 0x5ea   : > { %v4687_v48 = vsel %vm2939_vm12, %v4686_v59, %v10847_v24  ;;  %v4943_v41 = vld [vmem:[#allocation4 + $0x52] sm:$0xff]  ;;  %v4742_v24 = vrot.slane %v4485_v57, 4 }
 0x5eb   : > { %v4935_v55 = vld [vmem:[#allocation4 + $0x51] sm:$0xff]  ;;  %v4691_v50 = vperm.slane %v4687_v48, %v9589_v39  ;;  %7067 = vmatmul.msk.f32.gmra.mxu2 %vm1923_vm2, %v4943_v41  ;;  %v7220_v7 = vpack.i.bf16 %v4943_v41, %v11067_v18 }
 0x5ec   : > { %v11098_v17 = vld [vmem:[#allocation4 + $0x50] sm:$0xff]  ;;  %v7210_v52 = vpack.i.bf16 %v4935_v55, %v4910_v25  ;;  %v4357_v15 = vpop.permute.xlu0 %4356 }
 0x5ed   : > { %v7205_v46 = vpack.i.bf16 %v11098_v17, %v11069_v1  ;;  %v4711_v0 = vsel %vm2939_vm12, %v4710_v34, %v4691_v50  ;;  %v4731_v49 = vsel %vm2939_vm12, %v4730_v21, %v4357_v15  ;;  %v4833_v50 = vld [vmem:[%s12098_s3 + $0x68] sm:$0xff] }
 0x5ee   : > { %7211 = vrot.lane.b32.xlu0 %v7210_v52, %s7703_s15  ;;  %v4715_v58 = vperm.slane %v4711_v0, %v9655_v10  ;;  %7216 = vrot.lane.b32.xlu1 %v7210_v52, %s7691_s26  ;;  %v4735_v36 = vperm.slane %v4731_v49, %v9589_v39  ;;  %v4831_v0 = vld [vmem:[%s12098_s3 + $0x58] sm:$0xff] }
 0x5ef   : > { %7206 = vrot.lane.b32.xlu2 %v7205_v46, %s7702_s14  ;;  %v4437_v31 = vpop.permute.xlu1 %4436  ;;  %v4832_v46 = vld [vmem:[%s12098_s3 + $0x60] sm:$0xff] }
 0x5f0   : > { %v11110_v26 = vsel %vm2939_vm12, %v4722_v5, %v4715_v58  ;;  %v4743_v33 = vsel %vm2939_vm12, %v4742_v24, %v4437_v31  ;;  %v4748_v42 = vrot.slane %v4735_v36, 4  ;;  %v4830_v5 = vld [vmem:[%s12098_s3 + $0x50] sm:$0xff]  ;;  %v4829_v31 = vld [vmem:[%s12098_s3 + $0x48] sm:$0xff] }
 0x5f1   : > { %v4863_v25 = vmax.f32 %v11110_v26, 0.0  ;;  %v4747_v22 = vperm.slane %v4743_v33, %v9589_v39 }
 0x5f3   : > { %4872 = vst.msk [vmem:[#allocation4 + $0x61] sm:$0xff] %vm1923_vm2, %v4863_v25  ;;  %v4754_v4 = vrot.slane %v4747_v22, 4  ;;  %v4828_v25 = vld [vmem:[%s12098_s3 + $0x40] sm:$0xff] }
 0x5f5   : > { %v4755_v29 = vsel %vm2939_vm12, %v4754_v4, %v4741_v11 }
 0x5f6   : > { %v4759_v37 = vperm.slane %v4755_v29, %v9655_v10  ;;  %v4825_v29 = vld [vmem:[%s12098_s3 + $0x28] sm:$0xff] }
 0x5f7   : > { %7221 = vrot.lane.b32.xlu2 %v7220_v7, %s7694_s29  ;;  %v4381_v28 = vpop.permute.xlu1 %4380  ;;  %v4826_v7 = vld [vmem:[%s12098_s3 + $0x30] sm:$0xff] }
 0x5f8   : > { %v4724_v8 = vrot.slane %v4381_v28, 4 }
 0x5fa   : > { %v4725_v12 = vsel %vm2939_vm12, %v4724_v8, %v10886_v44  ;;  %v4944_v57 = vld [vmem:[#allocation4 + $0x62] sm:$0xff]  ;;  %v4760_v44 = vrot.slane %v4759_v37, 4 }
 0x5fb   : > { %v4912_v53 = vld [vmem:[#allocation4 + $0x61] sm:$0xff]  ;;  %v4729_v18 = vperm.slane %v4725_v12, %v9589_v39  ;;  %7068 = vmatmul.msk.f32.gmra.mxu2 %vm1923_vm2, %v4944_v57  ;;  %v7235_v43 = vpack.i.bf16 %v4944_v57, %v4943_v41 }
 0x5fc   : > { %v11127_v51 = vld [vmem:[#allocation4 + $0x60] sm:$0xff]  ;;  %v7230_v3 = vpack.i.bf16 %v4912_v53, %v4935_v55  ;;  %v4487_v41 = vpop.permute.xlu2 %4486  ;;  %v4835_v55 = vld [vmem:[%s12098_s3 + $0x78] sm:$0xff] }
 0x5fd   : > { %v7225_v61 = vpack.i.bf16 %v11127_v51, %v11098_v17  ;;  %v4749_v2 = vsel %vm2939_vm12, %v4748_v42, %v4729_v18  ;;  %5255 = vmatpush.msra.mxu1 %v4835_v55  ;;  %v4780_v24 = vrot.slane %v4487_v41, 4 }
 0x5fe   : > { %7231 = vrot.lane.b32.xlu1 %v7230_v3, %s7700_s12  ;;  %v4753_v47 = vperm.slane %v4749_v2, %v9655_v10  ;;  %v4821_v2 = vld [vmem:[%s12098_s3 + $0x8] sm:$0xff] }
 0x5ff   : > { %7236 = vrot.lane.b32.xlu2 %v7235_v43, %s7701_s13  ;;  %7226 = vrot.lane.b32.xlu0 %v7225_v61, %s7699_s30  ;;  %v4822_v61 = vld [vmem:[%s12098_s3 + $0x10] sm:$0xff] }
 0x600   : > { %v11139_v9 = vsel %vm2939_vm12, %v4760_v44, %v4753_v47  ;;  %5256 = vmatpush.msra.mxu1 %v4834_v45  ;;  %v11223_v45 = vld [vmem:[#allocation4] sm:$0xff] }
 0x601   : > { %v4864_v35 = vmax.f32 %v11139_v9, 0.0 }
 0x602   : > { %5257 = vmatpush.msra.mxu1 %v4833_v50 }
 0x603   : > { %4873 = vst.msk [vmem:[#allocation4 + $0x71] sm:$0xff] %vm1923_vm2, %v4864_v35 }
 0x604   : > { %5258 = vmatpush.msra.mxu1 %v4832_v46  ;;  %v4463_v62 = vpop.permute.xlu2 %4462 }
 0x605   : > { %v4774_v15 = vrot.slane %v4463_v62, 4 }
 0x606   : > { %5259 = vmatpush.msra.mxu1 %v4831_v0 }
 0x607   : > { %v4775_v49 = vsel %vm2939_vm12, %v4774_v15, %v10959_v54  ;;  %v4824_v54 = vld [vmem:[%s12098_s3 + $0x20] sm:$0xff] }
 0x608   : > { %5260 = vmatpush.msra.mxu1 %v4830_v5  ;;  %v4779_v36 = vperm.slane %v4775_v49, %v9589_v39 }
 0x60a   : > { %v4945_v23 = vld [vmem:[#allocation4 + $0x72] sm:$0xff]  ;;  %5261 = vmatpush.msra.mxu1 %v4829_v31 }
 0x60b   : > { %v11143_v40 = vld [vmem:[#allocation4 + $0x71] sm:$0xff]  ;;  %7069 = vmatmul.msk.f32.gmra.mxu2 %vm1923_vm2, %v4945_v23  ;;  %v7255_v34 = vpack.i.bf16 %v4945_v23, %v4944_v57 }
 0x60c   : > { %v11145_v59 = vld [vmem:[#allocation4 + $0x70] sm:$0xff]  ;;  %v7245_v30 = vpack.i.bf16 %v11143_v40, %v4912_v53  ;;  %5262 = vmatpush.msra.mxu1 %v4828_v25  ;;  %v4823_v53 = vld [vmem:[%s12098_s3 + $0x18] sm:$0xff]  ;;  %v7147_v44 = vpop.permute.xlu2 %7146 }
 0x60d   : > { %v7240_v48 = vpack.i.bf16 %v11145_v59, %v11127_v51  ;;  %v7148_v55 = vunpack.i.l.bf16 %v7147_v44 }
 0x60e   : > { %7246 = vrot.lane.b32.xlu1 %v7245_v30, %s7703_s15  ;;  %7251 = vrot.lane.b32.xlu2 %v7245_v30, %s7691_s26 }
 0x60f   : > { %7241 = vrot.lane.b32.xlu0 %v7240_v48, %s7702_s14  ;;  %5263 = vmatpush.msra.mxu1 %v4827_v63  ;;  %v5172_v62 = vsel %vm1923_vm2, %v11223_v45, %v7148_v55 }
 0x611   : > { %5264 = vmatpush.msra.mxu1 %v4826_v7 }
 0x613   : > { %5265 = vmatpush.msra.mxu1 %v4825_v29 }
 0x614   : > { %v4439_v52 = vpop.permute.xlu1 %4438 }
 0x615   : > { %v4781_v58 = vsel %vm2939_vm12, %v4780_v24, %v4439_v52  ;;  %5266 = vmatpush.msra.mxu1 %v4824_v54 }
 0x616   : > { %v4785_v33 = vperm.slane %v4781_v58, %v9589_v39 }
 0x617   : > { %7256 = vrot.lane.b32.xlu0 %v7255_v34, %s7694_s29  ;;  %5267 = vmatpush.msra.mxu1 %v4823_v53  ;;  %v7162_v34 = vpop.permute.xlu2 %7161 }
 0x618   : > { %v4792_v4 = vrot.slane %v4785_v33, 4  ;;  %v7149_v33 = vunpack.i.h.bf16 %v7147_v44  ;;  %v7163_v49 = vunpack.i.l.bf16 %v7162_v34 }
 0x619   : > { %5268 = vmatpush.msra.mxu1 %v4822_v61 }
 0x61a   : > { %v4793_v8 = vsel %vm2939_vm12, %v4792_v4, %v4779_v36 }
 0x61b   : > { %v4797_v18 = vperm.slane %v4793_v8, %v9655_v10  ;;  %5269 = vmatpush.msra.mxu1 %v4821_v2 }
 0x61c   : > { %v4383_v22 = vpop.permute.xlu1 %4382 }
 0x61d   : > { %v4407_v21 = vpop.permute.xlu0 %4406  ;;  %v4762_v11 = vrot.slane %v4383_v22, 4  ;;  %v4798_v47 = vrot.slane %v4797_v18, 4 }
 0x61e   : > { %v4768_v28 = vrot.slane %v4407_v21, 4 }
 0x61f   : > { %5096 = vrot.lane.b32.xlu0 %v4945_v23, %s7701_s13  ;;  %v4763_v37 = vsel %vm2939_vm12, %v4762_v11, %v10976_v6  ;;  %v4820_v23 = vld [vmem:[%s12098_s3] sm:$0xff] }
 0x620   : > { %v4767_v43 = vperm.slane %v4763_v37, %v9589_v39  ;;  %5270 = vmatpush.msra.mxu1 %v4820_v23 }
 0x624   : > { %v7157_v52 = vpop.permute.xlu1 %7156 }
 0x625   : > { %v4359_v42 = vpop.permute.xlu0 %4358  ;;  %v7158_v21 = vunpack.i.l.bf16 %v7157_v52 }
 0x626   : > { %v4769_v12 = vsel %vm2939_vm12, %v4768_v28, %v4359_v42  ;;  %v7159_v28 = vunpack.i.h.bf16 %v7157_v52 }
 0x627   : > { %v4773_v57 = vperm.slane %v4769_v12, %v9589_v39 }
 0x628   : > { %v7177_v4 = vpop.permute.xlu2 %7176 }
 0x629   : > { %v4786_v3 = vrot.slane %v4773_v57, 4  ;;  %v7178_v8 = vunpack.i.l.bf16 %v7177_v4  ;;  %v7164_v57 = vunpack.i.h.bf16 %v7162_v34  ;;  %v7179_v2 = vunpack.i.h.bf16 %v7177_v4 }
 0x62b   : > { %v4787_v6 = vsel %vm2939_vm12, %v4786_v3, %v4767_v43  ;;  %v11247_v3 = vld [vmem:[#allocation4 + $0x90] sm:$0xff] }
 0x62c   : > { %v4791_v35 = vperm.slane %v4787_v6, %v9655_v10  ;;  %v11250_v6 = vld [vmem:[#allocation4 + $0x91] sm:$0xff] }
 0x62d   : > { %v7152_v41 = vpop.permute.xlu0 %7151 }
 0x62e   : > { %v11219_v30 = vsel %vm2939_vm12, %v4798_v47, %v4791_v35  ;;  %v7153_v50 = vunpack.i.l.bf16 %v7152_v41  ;;  %v7154_v25 = vunpack.i.h.bf16 %v7152_v41 }
 0x62f   : > { %v4865_v48 = vmax.f32 %v11219_v30, 0.0 }
 0x630   : > { %v5180_v31 = vsel %vm2055_vm9, %v5172_v62, %v7153_v50 }
 0x631   : > { %4874 = vst.msk [vmem:[#allocation4 + $0x81] sm:$0xff] %vm1923_vm2, %v4865_v48  ;;  %v5188_v22 = vsel %vm4235_vm13, %v5180_v31, %v7158_v21 }
 0x632   : > { %v5196_v29 = vsel %vm4244_vm14, %v5188_v22, %v7163_v49 }
 0x635   : > { %v7167_v15 = vpop.permute.xlu0 %7166 }
 0x636   : > { %v7168_v63 = vunpack.i.l.bf16 %v7167_v15  ;;  %v7169_v12 = vunpack.i.h.bf16 %v7167_v15 }
 0x638   : > { %v4946_v46 = vld [vmem:[#allocation4 + $0x82] sm:$0xff]  ;;  %v5204_v42 = vsel %vm4253_vm15, %v5196_v29, %v7168_v63 }
 0x639   : > { %v4914_v0 = vld [vmem:[#allocation4 + $0x81] sm:$0xff]  ;;  %7070 = vmatmul.msk.f32.gmra.mxu2 %vm1923_vm2, %v4946_v46  ;;  %5098 = vrot.lane.b32.xlu0 %v4946_v46, %s7701_s13  ;;  %v7192_v41 = vpop.permute.xlu2 %7191 }
 0x63a   : > { %v4906_v24 = vld [vmem:[#allocation4 + $0x80] sm:$0xff]  ;;  %v7265_v5 = vpack.i.bf16 %v4914_v0, %v11143_v40  ;;  %v5173_v40 = vsel %vm1923_vm2, %v10992_v32, %v7149_v33  ;;  %v7194_v49 = vunpack.i.h.bf16 %v7192_v41 }
 0x63b   : > { %v7260_v58 = vpack.i.bf16 %v4906_v24, %v11145_v59  ;;  %v5181_v11 = vsel %vm2055_vm9, %v5173_v40, %v7154_v25 }
 0x63c   : > { %7266 = vrot.lane.b32.xlu2 %v7265_v5, %s7700_s12  ;;  %v5189_v37 = vsel %vm4235_vm13, %v5181_v11, %v7159_v28 }
 0x63d   : > { %7261 = vrot.lane.b32.xlu1 %v7260_v58, %s7699_s30  ;;  %v5197_v18 = vsel %vm4244_vm14, %v5189_v37, %v7164_v57 }
 0x63e   : > { %v5205_v43 = vsel %vm4253_vm15, %v5197_v18, %v7169_v12 }
 0x640   : > { %v7182_v47 = vpop.permute.xlu0 %7181 }
 0x641   : > { %v7172_v7 = vpop.permute.xlu1 %7171  ;;  %v7183_v23 = vunpack.i.l.bf16 %v7182_v47 }
 0x642   : > { %v7173_v36 = vunpack.i.l.bf16 %v7172_v7  ;;  %v7174_v53 = vunpack.i.h.bf16 %v7172_v7 }
 0x643   : > { %v5174_v34 = vsel %vm1923_vm2, %v10990_v20, %v7183_v23 }
 0x644   : > { %v5212_v54 = vsel %vm4262_vm0, %v5204_v42, %v7173_v36  ;;  %5160 = vrot.lane.b32.xlu2 %v4914_v0, %s7703_s15  ;;  %v5213_v61 = vsel %vm4262_vm0, %v5205_v43, %v7174_v53  ;;  %v7193_v0 = vunpack.i.l.bf16 %v7192_v41 }
 0x645   : > { %5128 = vrot.lane.b32.xlu1 %v4906_v24, %s7702_s14  ;;  %v5220_v32 = vsel %vm4271_vm1, %v5212_v54, %v7178_v8  ;;  %v5221_v44 = vsel %vm4271_vm1, %v5213_v61, %v7179_v2  ;;  %v7184_v24 = vunpack.i.h.bf16 %v7182_v47 }
 0x646   : > { %5271 = vmatmul.f32.vlgmr.msra.gmra.mxu1 %v5220_v32 }
 0x647   : > { %v5175_v33 = vsel %vm1923_vm2, %v11038_v27, %v7184_v24 }
 0x649   : > { %v7187_v35 = vpop.permute.xlu1 %7186  ;;  %v7207_v15 = vpop.permute.xlu2 %7206 }
 0x64a   : > { %v7188_v48 = vunpack.i.l.bf16 %v7187_v35  ;;  %v7189_v58 = vunpack.i.h.bf16 %v7187_v35  ;;  %v7208_v25 = vunpack.i.l.bf16 %v7207_v15  ;;  %v7209_v8 = vunpack.i.h.bf16 %v7207_v15 }
 0x64c   : > { %5162 = vrot.lane.b32.xlu2 %v11250_v6, %s7703_s15  ;;  %v5182_v50 = vsel %vm2055_vm9, %v5174_v34, %v7188_v48  ;;  %v5183_v20 = vsel %vm2055_vm9, %v5175_v33, %v7189_v58 }
 0x64d   : > { %5130 = vrot.lane.b32.xlu1 %v11247_v3, %s7702_s14  ;;  %v5190_v62 = vsel %vm4235_vm13, %v5182_v50, %v7193_v0  ;;  %v5191_v7 = vsel %vm4235_vm13, %v5183_v20, %v7194_v49  ;;  %v11289_v49 = vld [vmem:[#allocation4 + $0x92] sm:$0xff] }
 0x64e   : > { %5274 = vmatmul.f32.gmra.mxu1 %v5221_v44  ;;  %7071 = vmatmul.msk.f32.gmra.mxu2 %vm1923_vm2, %v11289_v49 }
 0x650   : > { %v7197_v55 = vpop.permute.xlu0 %7196 }
 0x651   : > { %v7198_v52 = vunpack.i.l.bf16 %v7197_v55  ;;  %v7202_v46 = vpop.permute.xlu1 %7201  ;;  %v7199_v22 = vunpack.i.h.bf16 %v7197_v55  ;;  %v7222_v12 = vpop.permute.xlu2 %7221 }
 0x652   : > { %v7203_v5 = vunpack.i.l.bf16 %v7202_v46  ;;  %v7204_v11 = vunpack.i.h.bf16 %v7202_v46  ;;  %v7223_v61 = vunpack.i.l.bf16 %v7222_v12  ;;  %v7224_v55 = vunpack.i.h.bf16 %v7222_v12 }
 0x653   : > { %v5198_v31 = vsel %vm4244_vm14, %v5190_v62, %v7198_v52  ;;  %v5199_v29 = vsel %vm4244_vm14, %v5191_v7, %v7199_v22 }
 0x654   : > { %v5206_v21 = vsel %vm4253_vm15, %v5198_v31, %v7203_v5  ;;  %v5207_v28 = vsel %vm4253_vm15, %v5199_v29, %v7204_v11 }
 0x655   : > { %v5214_v40 = vsel %vm4262_vm0, %v5206_v21, %v7208_v25  ;;  %v5215_v42 = vsel %vm4262_vm0, %v5207_v28, %v7209_v8 }
 0x659   : > { %v7237_v23 = vpop.permute.xlu2 %7236 }
 0x65a   : > { %v7238_v50 = vunpack.i.l.bf16 %v7237_v23  ;;  %v7239_v21 = vunpack.i.h.bf16 %v7237_v23 }
 0x660   : > { %v7212_v63 = vpop.permute.xlu0 %7211  ;;  %v7217_v37 = vpop.permute.xlu1 %7216 }
 0x661   : > { %v7213_v4 = vunpack.i.l.bf16 %v7212_v63  ;;  %v7214_v27 = vunpack.i.h.bf16 %v7212_v63  ;;  %v7218_v32 = vunpack.i.l.bf16 %v7217_v37  ;;  %v7219_v2 = vunpack.i.h.bf16 %v7217_v37 }
 0x663   : > { %v5222_v36 = vsel %vm4271_vm1, %v5214_v40, %v7213_v4  ;;  %v5223_v54 = vsel %vm4271_vm1, %v5215_v42, %v7214_v27  ;;  %v5176_v53 = vsel %vm1923_vm2, %v11069_v1, %v7218_v32  ;;  %v5177_v48 = vsel %vm1923_vm2, %v11098_v17, %v7219_v2 }
 0x664   : > { %5277 = vmatmul.f32.gmra.mxu1 %v5222_v36  ;;  %v5184_v44 = vsel %vm2055_vm9, %v5176_v53, %v7223_v61  ;;  %v5185_v46 = vsel %vm2055_vm9, %v5177_v48, %v7224_v55  ;;  %v4855_v53 = vld [vmem:[%s12100_s5 + $0x80] sm:$0xff] }
 0x668   : > { %v7252_v4 = vpop.permute.xlu2 %7251 }
 0x669   : > { %v7253_v7 = vunpack.i.l.bf16 %v7252_v4  ;;  %v7254_v37 = vunpack.i.h.bf16 %v7252_v4 }
 0x66b   : > { %v5178_v27 = vsel %vm1923_vm2, %v11127_v51, %v7253_v7  ;;  %v5179_v61 = vsel %vm1923_vm2, %v11145_v59, %v7254_v37 }
 0x66c   : > { %5280 = vmatmul.f32.gmra.mxu1 %v5223_v54 }
 0x670   : > { %v7232_v43 = vpop.permute.xlu1 %7231 }
 0x671   : > { %v7227_v57 = vpop.permute.xlu0 %7226  ;;  %v7233_v47 = vunpack.i.l.bf16 %v7232_v43  ;;  %v7234_v0 = vunpack.i.h.bf16 %v7232_v43 }
 0x672   : > { %v7228_v18 = vunpack.i.l.bf16 %v7227_v57  ;;  %v7229_v41 = vunpack.i.h.bf16 %v7227_v57  ;;  %v4856_v57 = vld [vmem:[%s12100_s5 + $0x88] sm:$0xff] }
 0x673   : > { %5787 = vmatpush.msrb.mxu2 %v4856_v57 }
 0x674   : > { %v5192_v35 = vsel %vm4235_vm13, %v5184_v44, %v7228_v18  ;;  %v5193_v5 = vsel %vm4235_vm13, %v5185_v46, %v7229_v41  ;;  %v11317_v46 = vld [vmem:[%s12099_s4] ss:$0 sm:$0xff] }
 0x675   : > { %v5200_v34 = vsel %vm4244_vm14, %v5192_v35, %v7233_v47  ;;  %v5201_v15 = vsel %vm4244_vm14, %v5193_v5, %v7234_v0  ;;  %5788 = vmatpush.msrb.mxu2 %v4855_v53  ;;  %v5313_v5 = vpop.f32.mrf.mxu2 }
 0x676   : > { %v5208_v58 = vsel %vm4253_vm15, %v5200_v34, %v7238_v50  ;;  %v5209_v20 = vsel %vm4253_vm15, %v5201_v15, %v7239_v21 }
 0x680   : > { %v7247_v1 = vpop.permute.xlu1 %7246 }
 0x681   : > { %v7242_v52 = vpop.permute.xlu0 %7241  ;;  %v7248_v62 = vunpack.i.l.bf16 %v7247_v1  ;;  %v7249_v25 = vunpack.i.h.bf16 %v7247_v1 }
 0x682   : > { %v7243_v24 = vunpack.i.l.bf16 %v7242_v52  ;;  %v7244_v33 = vunpack.i.h.bf16 %v7242_v52 }
 0x684   : > { %v5216_v31 = vsel %vm4262_vm0, %v5208_v58, %v7243_v24  ;;  %v5217_v22 = vsel %vm4262_vm0, %v5209_v20, %v7244_v33  ;;  %v5316_v33 = vpop.f32.mrf.mxu2 }
 0x685   : > { %v5224_v17 = vsel %vm4271_vm1, %v5216_v31, %v7248_v62  ;;  %v5225_v63 = vsel %vm4271_vm1, %v5217_v22, %v7249_v25 }
 0x686   : > { %5283 = vmatmul.f32.gmra.mxu1 %v5224_v17 }
 0x689   : > { %v7257_v40 = vpop.permute.xlu0 %7256 }
 0x68a   : > { %v7258_v36 = vunpack.i.l.bf16 %v7257_v40  ;;  %v7259_v12 = vunpack.i.h.bf16 %v7257_v40 }
 0x68c   : > { %v5186_v8 = vsel %vm2055_vm9, %v5178_v27, %v7258_v36  ;;  %v5187_v47 = vsel %vm2055_vm9, %v5179_v61, %v7259_v12 }
 0x68e   : > { %5286 = vmatmul.f32.gmra.mxu1 %v5225_v63 }
 0x691   : > { %v5097_v51 = vpop.permute.xlu0 %5096 }
 0x696   : > { %v7267_v11 = vpop.permute.xlu2 %7266 }
 0x697   : > { %v7268_v42 = vunpack.i.l.bf16 %v7267_v11  ;;  %v7269_v41 = vunpack.i.h.bf16 %v7267_v11 }
 0x69e   : > { %v5161_v43 = vpop.permute.xlu2 %5160 }
 0x6a6   : > { %v5163_v50 = vpop.permute.xlu2 %5162 }
 0x6ab   : > { %v5099_v34 = vpop.permute.xlu0 %5098 }
 0x6af   : > { %v7262_v29 = vpop.permute.xlu1 %7261 }
 0x6b0   : > { %v7263_v28 = vunpack.i.l.bf16 %v7262_v29  ;;  %v7264_v18 = vunpack.i.h.bf16 %v7262_v29 }
 0x6b2   : > { %v5194_v54 = vsel %vm4235_vm13, %v5186_v8, %v7263_v28  ;;  %v5195_v23 = vsel %vm4235_vm13, %v5187_v47, %v7264_v18  ;;  %v5319_v8 = vpop.f32.mrf.mxu2 }
 0x6b3   : > { %v5202_v32 = vsel %vm4244_vm14, %v5194_v54, %v7268_v42  ;;  %v5203_v55 = vsel %vm4244_vm14, %v5195_v23, %v7269_v41 }
 0x6b4   : > { %v5210_v44 = vsel %vm4253_vm15, %v5202_v32, %v5097_v51  ;;  %v5211_v59 = vsel %vm4253_vm15, %v5203_v55, %v5099_v34 }
 0x6b7   : > { %v5129_v2 = vpop.permute.xlu1 %5128 }
 0x6b8   : > { %v5218_v35 = vsel %vm4262_vm0, %v5210_v44, %v5129_v2 }
 0x6b9   : > { %v5226_v48 = vsel %vm4271_vm1, %v5218_v35, %v5161_v43 }
 0x6ba   : > { %5289 = vmatmul.f32.gmra.mxu1 %v5226_v48  ;;  %v5322_v32 = vpop.f32.mrf.mxu2 }
 0x6bf   : > { %v5131_v52 = vpop.permute.xlu1 %5130 }
 0x6c0   : > { %v5219_v1 = vsel %vm4262_vm0, %v5211_v59, %v5131_v52 }
 0x6c1   : > { %v5227_v0 = vsel %vm4271_vm1, %v5219_v1, %v5163_v50 }
 0x6c2   : > { %5292 = vmatmul.f32.gmra.mxu1 %v5227_v0  ;;  %v5325_v52 = vpop.f32.mrf.mxu2 }
 0x6c3   : > { %v5272_v24 = vpop.f32.mrf.mxu1 }
 0x6c4   : > { %v5273_v62 = vadd.f32 %v11317_v46, %v5272_v24 }
 0x6c6   : > { %v5314_v58 = vadd.f32 %v5313_v5, %v5273_v62 }
 0x6c8   : > { %v5337_v31 = vmax.f32 %v5314_v58, 0.0 }
 0x6ca   : > { %5345 = vst.msk [vmem:[#allocation4 + $0x11] sm:$0xff] %vm1923_vm2, %v5337_v31  ;;  %v5328_v62 = vpop.f32.mrf.mxu2 }
 0x6cb   : > { %v5275_v17 = vpop.f32.mrf.mxu1 }
 0x6cc   : > { %v5276_v15 = vadd.f32 %v11317_v46, %v5275_v17 }
 0x6ce   : > { %v5317_v21 = vadd.f32 %v5316_v33, %v5276_v15 }
 0x6d0   : > { %v5338_v25 = vmax.f32 %v5317_v21, 0.0 }
 0x6d1   : > { %v5370_v20 = vld [vmem:[#allocation4 + $0x12] sm:$0xff] }
 0x6d2   : > { %v5362_v22 = vld [vmem:[#allocation4 + $0x11] sm:$0xff]  ;;  %5346 = vst.msk [vmem:[#allocation4 + $0x21] sm:$0xff] %vm1923_vm2, %v5338_v25  ;;  %v7275_v63 = vpack.i.bf16 %v5370_v20, %v11007_v14 }
 0x6d3   : > { %v7270_v4 = vpack.i.bf16 %v5362_v22, %v10988_v56  ;;  %v11328_v40 = vld [vmem:[#allocation4 + $0x10] sm:$0xff] }
 0x6d4   : > { %7276 = vrot.lane.b32.xlu1 %v7275_v63, %s7694_s29 }
 0x6d5   : > { %7271 = vrot.lane.b32.xlu0 %v7270_v4, %s7691_s26 }
 0x6d9   : > { %v5417_v7 = vld [vmem:[#allocation4 + $0x22] sm:$0xff] }
 0x6da   : > { %v11330_v11 = vld [vmem:[#allocation4 + $0x20] sm:$0xff]  ;;  %7072 = vmatmul.msk.f32.vlgmr.msrb.gmra.mxu2 %vm1923_vm2, %v5417_v7  ;;  %v7290_v27 = vpack.i.bf16 %v5417_v7, %v5370_v20 }
 0x6db   : > { %v5386_v36 = vld [vmem:[#allocation4 + $0x21] sm:$0xff]  ;;  %v7280_v29 = vpack.i.bf16 %v11330_v11, %v11328_v40 }
 0x6dc   : > { %v7285_v28 = vpack.i.bf16 %v5386_v36, %v5362_v22  ;;  %7291 = vrot.lane.b32.xlu1 %v7290_v27, %s7701_s13  ;;  %v4853_v27 = vld [vmem:[%s12100_s5 + $0x70] sm:$0xff] }
 0x6dd   : > { %7281 = vrot.lane.b32.xlu2 %v7280_v29, %s7699_s30  ;;  %v4854_v29 = vld [vmem:[%s12100_s5 + $0x78] sm:$0xff] }
 0x6de   : > { %7286 = vrot.lane.b32.xlu0 %v7285_v28, %s7700_s12  ;;  %5732 = vmatpush.msrb.mxu3 %v4854_v29  ;;  %v4852_v28 = vld [vmem:[%s12100_s5 + $0x68] sm:$0xff] }
 0x6e0   : > { %5733 = vmatpush.msrb.mxu3 %v4853_v27 }
 0x6e1   : > { %v5278_v56 = vpop.f32.mrf.mxu1 }
 0x6e2   : > { %v5279_v14 = vadd.f32 %v11317_v46, %v5278_v56  ;;  %5734 = vmatpush.msrb.mxu3 %v4852_v28  ;;  %v4851_v56 = vld [vmem:[%s12100_s5 + $0x60] sm:$0xff] }
 0x6e4   : > { %v5320_v42 = vadd.f32 %v5319_v8, %v5279_v14  ;;  %v4850_v14 = vld [vmem:[%s12100_s5 + $0x58] sm:$0xff]  ;;  %5735 = vmatpush.msrb.mxu3 %v4851_v56  ;;  %v4849_v8 = vld [vmem:[%s12100_s5 + $0x50] sm:$0xff] }
 0x6e6   : > { %v5339_v54 = vmax.f32 %v5320_v42, 0.0  ;;  %5736 = vmatpush.msrb.mxu3 %v4850_v14  ;;  %v4848_v42 = vld [vmem:[%s12100_s5 + $0x48] sm:$0xff] }
 0x6e8   : > { %5347 = vst.msk [vmem:[#allocation4 + $0x31] sm:$0xff] %vm1923_vm2, %v5339_v54  ;;  %v5331_v54 = vpop.f32.mrf.mxu2  ;;  %5737 = vmatpush.msrb.mxu3 %v4849_v8 }
 0x6e9   : > { %v5281_v37 = vpop.f32.mrf.mxu1 }
 0x6ea   : > { %v5282_v12 = vadd.f32 %v11317_v46, %v5281_v37  ;;  %5738 = vmatpush.msrb.mxu3 %v4848_v42 }
 0x6ec   : > { %v5323_v57 = vadd.f32 %v5322_v32, %v5282_v12  ;;  %v4847_v32 = vld [vmem:[%s12100_s5 + $0x40] sm:$0xff] }
 0x6ed   : > { %5739 = vmatpush.msrb.mxu3 %v4847_v32 }
 0x6ee   : > { %v5340_v53 = vmax.f32 %v5323_v57, 0.0 }
 0x6ef   : > { %v5418_v18 = vld [vmem:[#allocation4 + $0x32] sm:$0xff] }
 0x6f0   : > { %v11341_v51 = vld [vmem:[#allocation4 + $0x30] sm:$0xff]  ;;  %5348 = vst.msk [vmem:[#allocation4 + $0x41] sm:$0xff] %vm1923_vm2, %v5340_v53  ;;  %7073 = vmatmul.msk.f32.gmra.mxu2 %vm1923_vm2, %v5418_v18  ;;  %v7310_v23 = vpack.i.bf16 %v5418_v18, %v5417_v7  ;;  %v4846_v53 = vld [vmem:[%s12100_s5 + $0x38] sm:$0xff] }
 0x6f1   : > { %v5364_v43 = vld [vmem:[#allocation4 + $0x31] sm:$0xff]  ;;  %v7295_v61 = vpack.i.bf16 %v11341_v51, %v11330_v11  ;;  %5740 = vmatpush.msrb.mxu3 %v4846_v53 }
 0x6f2   : > { %v7305_v2 = vpack.i.bf16 %v5364_v43, %v5386_v36 }
 0x6f3   : > { %7296 = vrot.lane.b32.xlu2 %v7295_v61, %s7702_s14  ;;  %v4844_v61 = vld [vmem:[%s12100_s5 + $0x28] sm:$0xff] }
 0x6f4   : > { %7306 = vrot.lane.b32.xlu1 %v7305_v2, %s7691_s26  ;;  %7301 = vrot.lane.b32.xlu0 %v7305_v2, %s7703_s15 }
 0x6f7   : > { %v5419_v44 = vld [vmem:[#allocation4 + $0x42] sm:$0xff] }
 0x6f8   : > { %v5388_v47 = vld [vmem:[#allocation4 + $0x41] sm:$0xff]  ;;  %7074 = vmatmul.msk.f32.gmra.mxu2 %vm1923_vm2, %v5419_v44  ;;  %v7325_v55 = vpack.i.bf16 %v5419_v44, %v5418_v18 }
 0x6f9   : > { %v11350_v35 = vld [vmem:[#allocation4 + $0x40] sm:$0xff]  ;;  %v7320_v48 = vpack.i.bf16 %v5388_v47, %v5364_v43  ;;  %v4845_v43 = vld [vmem:[%s12100_s5 + $0x30] sm:$0xff] }
 0x6fa   : > { %v7315_v41 = vpack.i.bf16 %v11350_v35, %v11341_v51  ;;  %5741 = vmatpush.msrb.mxu3 %v4845_v43 }
 0x6fb   : > { %7311 = vrot.lane.b32.xlu2 %v7310_v23, %s7694_s29  ;;  %v4843_v23 = vld [vmem:[%s12100_s5 + $0x20] sm:$0xff] }
 0x6fc   : > { %7321 = vrot.lane.b32.xlu1 %v7320_v48, %s7700_s12  ;;  %7316 = vrot.lane.b32.xlu0 %v7315_v41, %s7699_s30  ;;  %v4842_v41 = vld [vmem:[%s12100_s5 + $0x18] sm:$0xff] }
 0x6fd   : > { %5742 = vmatpush.msrb.mxu3 %v4844_v61 }
 0x6ff   : > { %5743 = vmatpush.msrb.mxu3 %v4843_v23 }
 0x701   : > { %5744 = vmatpush.msrb.mxu3 %v4842_v41 }
 0x703   : > { %v5284_v34 = vpop.f32.mrf.mxu1  ;;  %7326 = vrot.lane.b32.xlu2 %v7325_v55, %s7701_s13 }
 0x704   : > { %v5285_v50 = vadd.f32 %v11317_v46, %v5284_v34  ;;  %v4841_v34 = vld [vmem:[%s12100_s5 + $0x10] sm:$0xff] }
 0x705   : > { %5745 = vmatpush.msrb.mxu3 %v4841_v34 }
 0x706   : > { %v5326_v59 = vadd.f32 %v5325_v52, %v5285_v50 }
 0x708   : > { %v5341_v1 = vmax.f32 %v5326_v59, 0.0 }
 0x70a   : > { %5349 = vst.msk [vmem:[#allocation4 + $0x51] sm:$0xff] %vm1923_vm2, %v5341_v1 }
 0x70b   : > { %v5287_v0 = vpop.f32.mrf.mxu1 }
 0x70c   : > { %v5288_v24 = vadd.f32 %v11317_v46, %v5287_v0  ;;  %v4840_v0 = vld [vmem:[%s12100_s5 + $0x8] sm:$0xff] }
 0x70d   : > { %5746 = vmatpush.msrb.mxu3 %v4840_v0 }
 0x70e   : > { %v5329_v5 = vadd.f32 %v5328_v62, %v5288_v24  ;;  %v4839_v24 = vld [vmem:[%s12100_s5] sm:$0xff] }
 0x70f   : > { %5747 = vmatpush.msrb.mxu3 %v4839_v24 }
 0x710   : > { %v5342_v58 = vmax.f32 %v5329_v5, 0.0 }
 0x711   : > { %v5420_v31 = vld [vmem:[#allocation4 + $0x52] sm:$0xff] }
 0x712   : > { %v5366_v17 = vld [vmem:[#allocation4 + $0x51] sm:$0xff]  ;;  %5350 = vst.msk [vmem:[#allocation4 + $0x61] sm:$0xff] %vm1923_vm2, %v5342_v58  ;;  %7075 = vmatmul.msk.f32.gmra.mxu2 %vm1923_vm2, %v5420_v31  ;;  %v7345_v7 = vpack.i.bf16 %v5420_v31, %v5419_v44  ;;  %v5334_v44 = vpop.f32.mrf.mxu2 }
 0x713   : > { %v11362_v15 = vld [vmem:[#allocation4 + $0x50] sm:$0xff]  ;;  %v7340_v33 = vpack.i.bf16 %v5366_v17, %v5388_v47 }
 0x714   : > { %v7330_v21 = vpack.i.bf16 %v11362_v15, %v11350_v35 }
 0x715   : > { %7341 = vrot.lane.b32.xlu2 %v7340_v33, %s7691_s26  ;;  %7336 = vrot.lane.b32.xlu1 %v7340_v33, %s7703_s15 }
 0x716   : > { %7331 = vrot.lane.b32.xlu0 %v7330_v21, %s7702_s14 }
 0x719   : > { %v11371_v25 = vld [vmem:[#allocation4 + $0x62] sm:$0xff] }
 0x71a   : > { %v5390_v20 = vld [vmem:[#allocation4 + $0x61] sm:$0xff]  ;;  %7076 = vmatmul.msk.f32.gmra.mxu2 %vm1923_vm2, %v11371_v25  ;;  %v7360_v36 = vpack.i.bf16 %v11371_v25, %v5420_v31 }
 0x71b   : > { %v11373_v22 = vld [vmem:[#allocation4 + $0x60] sm:$0xff]  ;;  %v7355_v63 = vpack.i.bf16 %v5390_v20, %v5366_v17 }
 0x71c   : > { %v7350_v4 = vpack.i.bf16 %v11373_v22, %v11362_v15 }
 0x71d   : > { %7356 = vrot.lane.b32.xlu2 %v7355_v63, %s7700_s12 }
 0x71e   : > { %7351 = vrot.lane.b32.xlu1 %v7350_v4, %s7699_s30  ;;  %7346 = vrot.lane.b32.xlu0 %v7345_v7, %s7694_s29 }
 0x726   : > { %7361 = vrot.lane.b32.xlu0 %v7360_v36, %s7701_s13 }
 0x737   : > { %v5290_v37 = vpop.f32.mrf.mxu1  ;;  %v7282_v4 = vpop.permute.xlu2 %7281 }
 0x738   : > { %v5291_v12 = vadd.f32 %v11317_v46, %v5290_v37  ;;  %v7283_v56 = vunpack.i.l.bf16 %v7282_v4 }
 0x73a   : > { %v5332_v57 = vadd.f32 %v5331_v54, %v5291_v12 }
 0x73c   : > { %v5343_v18 = vmax.f32 %v5332_v57, 0.0 }
 0x73e   : > { %5351 = vst.msk [vmem:[#allocation4 + $0x71] sm:$0xff] %vm1923_vm2, %v5343_v18  ;;  %v7284_v18 = vunpack.i.h.bf16 %v7282_v4 }
 0x73f   : > { %v5293_v2 = vpop.f32.mrf.mxu1 }
 0x740   : > { %v5294_v47 = vadd.f32 %v11317_v46, %v5293_v2 }
 0x742   : > { %v5335_v48 = vadd.f32 %v5334_v44, %v5294_v47 }
 0x744   : > { %v5344_v55 = vmax.f32 %v5335_v48, 0.0 }
 0x745   : > { %v5422_v50 = vld [vmem:[#allocation4 + $0x72] sm:$0xff] }
 0x746   : > { %v5414_v52 = vld [vmem:[#allocation4 + $0x71] sm:$0xff]  ;;  %5352 = vst.msk [vmem:[#allocation4 + $0x81] sm:$0xff] %vm1923_vm2, %v5344_v55  ;;  %7077 = vmatmul.msk.f32.gmra.mxu2 %vm1923_vm2, %v5422_v50  ;;  %v7380_v17 = vpack.i.bf16 %v5422_v50, %v11371_v25 }
 0x747   : > { %v11429_v59 = vld [vmem:[#allocation4 + $0x70] sm:$0xff]  ;;  %v7370_v46 = vpack.i.bf16 %v5414_v52, %v5390_v20  ;;  %v7272_v21 = vpop.permute.xlu0 %7271  ;;  %v7277_v20 = vpop.permute.xlu1 %7276 }
 0x748   : > { %v7365_v1 = vpack.i.bf16 %v11429_v59, %v11373_v22  ;;  %v7273_v63 = vunpack.i.l.bf16 %v7272_v21  ;;  %v7278_v25 = vunpack.i.l.bf16 %v7277_v20  ;;  %v7274_v14 = vunpack.i.h.bf16 %v7272_v21 }
 0x749   : > { %7371 = vrot.lane.b32.xlu2 %v7370_v46, %s7703_s15  ;;  %7376 = vrot.lane.b32.xlu0 %v7370_v46, %s7691_s26  ;;  %v7279_v42 = vunpack.i.h.bf16 %v7277_v20 }
 0x74a   : > { %7366 = vrot.lane.b32.xlu1 %v7365_v1, %s7702_s14  ;;  %v5649_v7 = vsel %vm1923_vm2, %v11223_v45, %v7273_v63  ;;  %v5650_v54 = vsel %vm1923_vm2, %v11328_v40, %v7274_v14 }
 0x74b   : > { %v5657_v29 = vsel %vm2055_vm9, %v5649_v7, %v7278_v25  ;;  %v5658_v32 = vsel %vm2055_vm9, %v5650_v54, %v7279_v42 }
 0x74c   : > { %v5665_v8 = vsel %vm4235_vm13, %v5657_v29, %v7283_v56 }
 0x74d   : > { %v5423_v62 = vld [vmem:[#allocation4 + $0x82] sm:$0xff]  ;;  %v7297_v37 = vpop.permute.xlu2 %7296 }
 0x74e   : > { %v5384_v5 = vld [vmem:[#allocation4 + $0x80] sm:$0xff]  ;;  %7078 = vmatmul.msk.f32.gmra.mxu2 %vm1923_vm2, %v5423_v62  ;;  %v7298_v57 = vunpack.i.l.bf16 %v7297_v37  ;;  %v7299_v48 = vunpack.i.h.bf16 %v7297_v37 }
 0x74f   : > { %v5392_v58 = vld [vmem:[#allocation4 + $0x81] sm:$0xff]  ;;  %v7385_v31 = vpack.i.bf16 %v5384_v5, %v11429_v59  ;;  %v7292_v27 = vpop.permute.xlu1 %7291 }
 0x750   : > { %v7390_v33 = vpack.i.bf16 %v5392_v58, %v5414_v52  ;;  %v7287_v36 = vpop.permute.xlu0 %7286  ;;  %v7294_v2 = vunpack.i.h.bf16 %v7292_v27 }
 0x751   : > { %7386 = vrot.lane.b32.xlu2 %v7385_v31, %s7699_s30  ;;  %v7288_v28 = vunpack.i.l.bf16 %v7287_v36  ;;  %v7289_v53 = vunpack.i.h.bf16 %v7287_v36 }
 0x752   : > { %7381 = vrot.lane.b32.xlu1 %v7380_v17, %s7694_s29  ;;  %7391 = vrot.lane.b32.xlu0 %v7390_v33, %s7700_s12 }
 0x753   : > { %v5673_v45 = vsel %vm4244_vm14, %v5665_v8, %v7288_v28 }
 0x756   : > { %7079 = vmatmul.msk.f32.gmra.mxu2 %vm1923_vm2, %v11289_v49  ;;  %v7293_v49 = vunpack.i.l.bf16 %v7292_v27 }
 0x758   : > { %v5681_v12 = vsel %vm4253_vm15, %v5673_v45, %v7293_v49 }
 0x759   : > { %5605 = vrot.lane.b32.xlu2 %v5384_v5, %s7702_s14  ;;  %v5689_v61 = vsel %vm4262_vm0, %v5681_v12, %v7298_v57 }
 0x75a   : > { %5573 = vrot.lane.b32.xlu1 %v5422_v50, %s7701_s13  ;;  %5637 = vrot.lane.b32.xlu0 %v5392_v58, %s7703_s15  ;;  %v7312_v50 = vpop.permute.xlu2 %7311 }
 0x75b   : > { %v7314_v63 = vunpack.i.h.bf16 %v7312_v50 }
 0x761   : > { %5607 = vrot.lane.b32.xlu2 %v11247_v3, %s7702_s14 }
 0x762   : > { %5575 = vrot.lane.b32.xlu1 %v5423_v62, %s7701_s13  ;;  %5639 = vrot.lane.b32.xlu0 %v11250_v6, %s7703_s15  ;;  %v5666_v6 = vsel %vm4235_vm13, %v5658_v32, %v7284_v18  ;;  %v7313_v62 = vunpack.i.l.bf16 %v7312_v50  ;;  %v7327_v33 = vpop.permute.xlu2 %7326 }
 0x763   : > { %v5674_v47 = vsel %vm4244_vm14, %v5666_v6, %v7289_v53  ;;  %v7328_v7 = vunpack.i.l.bf16 %v7327_v33  ;;  %v7329_v45 = vunpack.i.h.bf16 %v7327_v33 }
 0x764   : > { %v5682_v23 = vsel %vm4253_vm15, %v5674_v47, %v7294_v2 }
 0x765   : > { %v5690_v41 = vsel %vm4262_vm0, %v5682_v23, %v7299_v48 }
 0x766   : > { %v7302_v3 = vpop.permute.xlu0 %7301  ;;  %v7307_v34 = vpop.permute.xlu1 %7306 }
 0x767   : > { %v7303_v43 = vunpack.i.l.bf16 %v7302_v3  ;;  %v7304_v40 = vunpack.i.h.bf16 %v7302_v3  ;;  %v7308_v52 = vunpack.i.l.bf16 %v7307_v34  ;;  %v7309_v5 = vunpack.i.h.bf16 %v7307_v34 }
 0x769   : > { %v5697_v44 = vsel %vm4271_vm1, %v5689_v61, %v7303_v43  ;;  %v5698_v55 = vsel %vm4271_vm1, %v5690_v41, %v7304_v40  ;;  %v5651_v0 = vsel %vm1923_vm2, %v11330_v11, %v7308_v52  ;;  %v5652_v21 = vsel %vm1923_vm2, %v11341_v51, %v7309_v5 }
 0x76a   : > { %5748 = vmatmul.f32.vlgmr.msrb.gmra.mxu3 %v5697_v44  ;;  %v5659_v31 = vsel %vm2055_vm9, %v5651_v0, %v7313_v62  ;;  %v5660_v27 = vsel %vm2055_vm9, %v5652_v21, %v7314_v63 }
 0x76e   : > { %v7317_v46 = vpop.permute.xlu0 %7316  ;;  %v7322_v1 = vpop.permute.xlu1 %7321 }
 0x76f   : > { %v7318_v24 = vunpack.i.l.bf16 %v7317_v46  ;;  %v7323_v58 = vunpack.i.l.bf16 %v7322_v1  ;;  %v7319_v20 = vunpack.i.h.bf16 %v7317_v46  ;;  %v7324_v29 = vunpack.i.h.bf16 %v7322_v1  ;;  %v7342_v57 = vpop.permute.xlu2 %7341 }
 0x770   : > { %v7343_v18 = vunpack.i.l.bf16 %v7342_v57  ;;  %v7344_v23 = vunpack.i.h.bf16 %v7342_v57 }
 0x771   : > { %v5667_v17 = vsel %vm4235_vm13, %v5659_v31, %v7318_v24  ;;  %v5668_v56 = vsel %vm4235_vm13, %v5660_v27, %v7319_v20 }
 0x772   : > { %5751 = vmatmul.f32.gmra.mxu3 %v5698_v55  ;;  %v5675_v4 = vsel %vm4244_vm14, %v5667_v17, %v7323_v58  ;;  %v5676_v42 = vsel %vm4244_vm14, %v5668_v56, %v7324_v29  ;;  %v5653_v6 = vsel %vm1923_vm2, %v11350_v35, %v7343_v18  ;;  %v5654_v50 = vsel %vm1923_vm2, %v11362_v15, %v7344_v23 }
 0x773   : > { %v5683_v14 = vsel %vm4253_vm15, %v5675_v4, %v7328_v7  ;;  %v5684_v37 = vsel %vm4253_vm15, %v5676_v42, %v7329_v45 }
 0x777   : > { %v7357_v3 = vpop.permute.xlu2 %7356 }
 0x778   : > { %v7358_v34 = vunpack.i.l.bf16 %v7357_v3  ;;  %v7359_v21 = vunpack.i.h.bf16 %v7357_v3 }
 0x787   : > { %v7337_v25 = vpop.permute.xlu1 %7336 }
 0x788   : > { %v7338_v36 = vunpack.i.l.bf16 %v7337_v25  ;;  %v7332_v11 = vpop.permute.xlu0 %7331  ;;  %v7339_v54 = vunpack.i.h.bf16 %v7337_v25 }
 0x789   : > { %v7333_v28 = vunpack.i.l.bf16 %v7332_v11  ;;  %v7334_v8 = vunpack.i.h.bf16 %v7332_v11 }
 0x78b   : > { %v5691_v49 = vsel %vm4262_vm0, %v5683_v14, %v7333_v28  ;;  %v5692_v12 = vsel %vm4262_vm0, %v5684_v37, %v7334_v8 }
 0x78c   : > { %v5699_v51 = vsel %vm4271_vm1, %v5691_v49, %v7338_v36  ;;  %v5700_v32 = vsel %vm4271_vm1, %v5692_v12, %v7339_v54 }
 0x78d   : > { %5754 = vmatmul.f32.gmra.mxu3 %v5699_v51 }
 0x790   : > { %v7347_v53 = vpop.permute.xlu0 %7346  ;;  %v7352_v43 = vpop.permute.xlu1 %7351 }
 0x791   : > { %v7348_v61 = vunpack.i.l.bf16 %v7347_v53  ;;  %v7353_v44 = vunpack.i.l.bf16 %v7352_v43  ;;  %v7349_v48 = vunpack.i.h.bf16 %v7347_v53  ;;  %v7354_v52 = vunpack.i.h.bf16 %v7352_v43 }
 0x793   : > { %v5661_v47 = vsel %vm2055_vm9, %v5653_v6, %v7348_v61  ;;  %v5662_v1 = vsel %vm2055_vm9, %v5654_v50, %v7349_v48  ;;  %v5790_v50 = vpop.f32.mrf.mxu2 }
 0x794   : > { %v5669_v41 = vsel %vm4235_vm13, %v5661_v47, %v7353_v44  ;;  %v5670_v31 = vsel %vm4235_vm13, %v5662_v1, %v7354_v52 }
 0x795   : > { %5757 = vmatmul.f32.gmra.mxu3 %v5700_v32  ;;  %v5677_v35 = vsel %vm4244_vm14, %v5669_v41, %v7358_v34  ;;  %v5678_v25 = vsel %vm4244_vm14, %v5670_v31, %v7359_v21  ;;  %v7647_v41 = vld [vmem:[%s12101_s6] ss:$0 sm:$0xff] }
 0x798   : > { %v7362_v2 = vpop.permute.xlu0 %7361 }
 0x799   : > { %v7363_v55 = vunpack.i.l.bf16 %v7362_v2  ;;  %v7364_v17 = vunpack.i.h.bf16 %v7362_v2 }
 0x79b   : > { %v5685_v5 = vsel %vm4253_vm15, %v5677_v35, %v7363_v55  ;;  %v5686_v7 = vsel %vm4253_vm15, %v5678_v25, %v7364_v17  ;;  %v5793_v35 = vpop.f32.mrf.mxu2 }
 0x7a3   : > { %v7372_v40 = vpop.permute.xlu2 %7371 }
 0x7a4   : > { %v7373_v62 = vunpack.i.l.bf16 %v7372_v40  ;;  %v7374_v27 = vunpack.i.h.bf16 %v7372_v40 }
 0x7ab   : > { %v7387_v15 = vpop.permute.xlu2 %7386 }
 0x7ac   : > { %v7388_v56 = vunpack.i.l.bf16 %v7387_v15  ;;  %v7389_v18 = vunpack.i.h.bf16 %v7387_v15 }
 0x7b3   : > { %v5606_v54 = vpop.permute.xlu2 %5605 }
 0x7bb   : > { %v7377_v24 = vpop.permute.xlu0 %7376  ;;  %v5608_v6 = vpop.permute.xlu2 %5607 }
 0x7bc   : > { %v7367_v46 = vpop.permute.xlu1 %7366  ;;  %v7378_v63 = vunpack.i.l.bf16 %v7377_v24  ;;  %v7379_v51 = vunpack.i.h.bf16 %v7377_v24 }
 0x7bd   : > { %v7368_v0 = vunpack.i.l.bf16 %v7367_v46  ;;  %v7369_v20 = vunpack.i.h.bf16 %v7367_v46 }
 0x7be   : > { %v5655_v28 = vsel %vm1923_vm2, %v11373_v22, %v7378_v63  ;;  %v5656_v32 = vsel %vm1923_vm2, %v11429_v59, %v7379_v51 }
 0x7bf   : > { %v5693_v58 = vsel %vm4262_vm0, %v5685_v5, %v7368_v0  ;;  %v5694_v29 = vsel %vm4262_vm0, %v5686_v7, %v7369_v20 }
 0x7c0   : > { %v5701_v33 = vsel %vm4271_vm1, %v5693_v58, %v7373_v62  ;;  %v5702_v49 = vsel %vm4271_vm1, %v5694_v29, %v7374_v27 }
 0x7c1   : > { %5760 = vmatmul.f32.gmra.mxu3 %v5701_v33  ;;  %v5796_v33 = vpop.f32.mrf.mxu2 }
 0x7c4   : > { %v7382_v4 = vpop.permute.xlu1 %7381  ;;  %v7392_v11 = vpop.permute.xlu0 %7391 }
 0x7c5   : > { %v7383_v36 = vunpack.i.l.bf16 %v7382_v4  ;;  %v7384_v42 = vunpack.i.h.bf16 %v7382_v4  ;;  %v7393_v45 = vunpack.i.l.bf16 %v7392_v11  ;;  %v7394_v2 = vunpack.i.h.bf16 %v7392_v11 }
 0x7c7   : > { %v5663_v14 = vsel %vm2055_vm9, %v5655_v28, %v7383_v36  ;;  %v5664_v53 = vsel %vm2055_vm9, %v5656_v32, %v7384_v42 }
 0x7c8   : > { %v5671_v8 = vsel %vm4235_vm13, %v5663_v14, %v7388_v56  ;;  %v5672_v61 = vsel %vm4235_vm13, %v5664_v53, %v7389_v18 }
 0x7c9   : > { %5763 = vmatmul.f32.gmra.mxu3 %v5702_v49  ;;  %v5679_v12 = vsel %vm4244_vm14, %v5671_v8, %v7393_v45  ;;  %v5680_v47 = vsel %vm4244_vm14, %v5672_v61, %v7394_v2  ;;  %v5799_v25 = vpop.f32.mrf.mxu2 }
 0x7cc   : > { %v5574_v37 = vpop.permute.xlu1 %5573  ;;  %v5638_v57 = vpop.permute.xlu0 %5637 }
 0x7cd   : > { %v5687_v22 = vsel %vm4253_vm15, %v5679_v12, %v5574_v37 }
 0x7ce   : > { %v5695_v3 = vsel %vm4262_vm0, %v5687_v22, %v5606_v54 }
 0x7cf   : > { %v5703_v43 = vsel %vm4271_vm1, %v5695_v3, %v5638_v57 }
 0x7d1   : > { %5766 = vmatmul.f32.gmra.mxu3 %v5703_v43  ;;  %v5802_v36 = vpop.f32.mrf.mxu2 }
 0x7d4   : > { %v5576_v44 = vpop.permute.xlu1 %5575  ;;  %v5640_v40 = vpop.permute.xlu0 %5639 }
 0x7d5   : > { %v5688_v59 = vsel %vm4253_vm15, %v5680_v47, %v5576_v44 }
 0x7d6   : > { %v5696_v23 = vsel %vm4262_vm0, %v5688_v59, %v5608_v6 }
 0x7d7   : > { %v5704_v48 = vsel %vm4271_vm1, %v5696_v23, %v5640_v40 }
 0x7d9   : > { %5769 = vmatmul.f32.gmra.mxu3 %v5704_v48  ;;  %v5805_v28 = vpop.f32.mrf.mxu2 }
 0x7e1   : > { %v5808_v42 = vpop.f32.mrf.mxu2 }
 0x7e9   : > { %v5811_v22 = vpop.f32.mrf.mxu2 }
 0x7ed   : > { %v5749_v55 = vpop.f32.mrf.mxu3 }
 0x7ee   : > { %v5750_v34 = vadd.f32 %v7647_v41, %v5749_v55  ;;  %v11594_v55 = vld [vmem:[#allocation4 + $0x1] sm:$0xff] }
 0x7f0   : > { %v5791_v52 = vadd.f32 %v5790_v50, %v5750_v34  ;;  %v11596_v50 = vld [vmem:[#allocation4 + $0x91] sm:$0xff] }
 0x7f2   : > { %v11528_v46 = vadd.f32 %v5791_v52, %v10920_v13 }
 0x7f4   : > { %v5860_v1 = vmax.f32 %v11528_v46, 0.0 }
 0x7f5   : > { %v5752_v0 = vpop.f32.mrf.mxu3 }
 0x7f6   : > { %5868 = vst.msk [vmem:[#allocation4 + $0x11] sm:$0xff] %vm1923_vm2, %v5860_v1  ;;  %v5753_v24 = vadd.f32 %v7647_v41, %v5752_v0 }
 0x7f8   : > { %v5794_v62 = vadd.f32 %v5793_v35, %v5753_v24  ;;  %v11604_v24 = vld [vmem:[#allocation4 + $0x2] sm:$0xff] }
 0x7fa   : > { %v11533_v5 = vadd.f32 %v5794_v62, %v10951_v60 }
 0x7fc   : > { %v5861_v58 = vmax.f32 %v11533_v5, 0.0 }
 0x7fd   : > { %v5885_v34 = vld [vmem:[#allocation4 + $0x11] sm:$0xff] }
 0x7fe   : > { %5869 = vst.msk [vmem:[#allocation4 + $0x21] sm:$0xff] %vm1923_vm2, %v5861_v58  ;;  %v7420_v1 = vpack.i.bf16 %v5885_v34, %v11594_v55  ;;  %v5893_v35 = vld [vmem:[#allocation4 + $0x12] sm:$0xff] }
 0x805   : > { %v5909_v62 = vld [vmem:[#allocation4 + $0x21] sm:$0xff] }
 0x806   : > { %v11606_v58 = vld [vmem:[#allocation4 + $0x20] sm:$0xff] }
 0x810   : > { %v5755_v31 = vpop.f32.mrf.mxu3 }
 0x811   : > { %v5756_v17 = vadd.f32 %v7647_v41, %v5755_v31  ;;  %v7430_v31 = vpack.i.bf16 %v5893_v35, %v11604_v24 }
 0x813   : > { %v5797_v13 = vadd.f32 %v5796_v33, %v5756_v17  ;;  %v7445_v17 = vpack.i.bf16 %v5909_v62, %v5885_v34  ;;  %v11609_v33 = vld [vmem:[#allocation4 + $0x10] sm:$0xff]  ;;  %v5827_v34 = vld [vmem:[%s12102_s7 + $0x28] sm:$0xff] }
 0x815   : > { %v11538_v21 = vadd.f32 %v5797_v13, %v11021_v38  ;;  %v7440_v13 = vpack.i.bf16 %v11606_v58, %v11609_v33 }
 0x817   : > { %v5862_v15 = vmax.f32 %v11538_v21, 0.0 }
 0x818   : > { %v5758_v20 = vpop.f32.mrf.mxu3 }
 0x819   : > { %5870 = vst.msk [vmem:[#allocation4 + $0x31] sm:$0xff] %vm1923_vm2, %v5862_v15  ;;  %v5759_v63 = vadd.f32 %v7647_v41, %v5758_v20  ;;  %v11616_v15 = vld [vmem:[#allocation4 + $0x22] sm:$0xff] }
 0x81b   : > { %v5800_v60 = vadd.f32 %v5799_v25, %v5759_v63  ;;  %v7450_v25 = vpack.i.bf16 %v11616_v15, %v5893_v35 }
 0x81d   : > { %v11543_v4 = vadd.f32 %v5800_v60, %v11050_v16 }
 0x81f   : > { %v5863_v7 = vmax.f32 %v11543_v4, 0.0 }
 0x820   : > { %v5933_v20 = vld [vmem:[#allocation4 + $0x31] sm:$0xff] }
 0x821   : > { %5871 = vst.msk [vmem:[#allocation4 + $0x41] sm:$0xff] %vm1923_vm2, %v5863_v7  ;;  %v11618_v63 = vld [vmem:[#allocation4 + $0x30] sm:$0xff]  ;;  %v7460_v60 = vpack.i.bf16 %v5933_v20, %v5909_v62  ;;  %v5839_v62 = vld [vmem:[%s12102_s7 + $0x88] sm:$0xff] }
 0x822   : > { %v7455_v7 = vpack.i.bf16 %v11618_v63, %v11606_v58 }
 0x844   : > { %v5761_v11 = vpop.f32.mrf.mxu3 }
 0x845   : > { %v5762_v29 = vadd.f32 %v7647_v41, %v5761_v11  ;;  %v11628_v11 = vld [vmem:[#allocation4 + $0x32] sm:$0xff] }
 0x847   : > { %v5803_v38 = vadd.f32 %v5802_v36, %v5762_v29  ;;  %v11626_v36 = vld [vmem:[#allocation4 + $0x40] sm:$0xff] }
 0x848   : > { %v7475_v29 = vpack.i.bf16 %v11626_v36, %v11618_v63 }
 0x849   : > { %v11548_v27 = vadd.f32 %v5803_v38, %v11083_v19  ;;  %v7470_v38 = vpack.i.bf16 %v11628_v11, %v11616_v15 }
 0x84b   : > { %v5864_v56 = vmax.f32 %v11548_v27, 0.0 }
 0x84c   : > { %v5764_v14 = vpop.f32.mrf.mxu3 }
 0x84d   : > { %5872 = vst.msk [vmem:[#allocation4 + $0x51] sm:$0xff] %vm1923_vm2, %v5864_v56  ;;  %v5765_v49 = vadd.f32 %v7647_v41, %v5764_v14  ;;  %v5836_v56 = vld [vmem:[%s12102_s7 + $0x70] sm:$0xff] }
 0x84f   : > { %v5806_v16 = vadd.f32 %v5805_v28, %v5765_v49  ;;  %v5837_v28 = vld [vmem:[%s12102_s7 + $0x78] sm:$0xff]  ;;  %v5911_v49 = vld [vmem:[#allocation4 + $0x41] sm:$0xff] }
 0x850   : > { %7104 = vmatpush.msra.mxu3 %v5837_v28  ;;  %6255 = vmatpush.msrb.mxu1 %v5837_v28 }
 0x851   : > { %v11553_v51 = vadd.f32 %v5806_v16, %v11110_v26  ;;  %v11645_v16 = vld [vmem:[#allocation4 + $0x42] sm:$0xff] }
 0x852   : > { %7105 = vmatpush.msra.mxu3 %v5836_v56  ;;  %6256 = vmatpush.msrb.mxu1 %v5836_v56 }
 0x853   : > { %v5865_v8 = vmax.f32 %v11553_v51, 0.0 }
 0x854   : > { %v5767_v45 = vpop.f32.mrf.mxu3  ;;  %v11643_v14 = vld [vmem:[#allocation4 + $0x50] sm:$0xff] }
 0x855   : > { %5873 = vst.msk [vmem:[#allocation4 + $0x61] sm:$0xff] %vm1923_vm2, %v5865_v8  ;;  %v5768_v54 = vadd.f32 %v7647_v41, %v5767_v45  ;;  %v7490_v8 = vpack.i.bf16 %v11643_v14, %v11626_v36  ;;  %v7485_v45 = vpack.i.bf16 %v11645_v16, %v11628_v11 }
 0x857   : > { %v5809_v19 = vadd.f32 %v5808_v42, %v5768_v54  ;;  %v7480_v42 = vpack.i.bf16 %v5911_v49, %v5933_v20  ;;  %v5835_v54 = vld [vmem:[%s12102_s7 + $0x68] sm:$0xff] }
 0x858   : > { %7106 = vmatpush.msra.mxu3 %v5835_v54  ;;  %6257 = vmatpush.msrb.mxu1 %v5835_v54 }
 0x859   : > { %v11558_v37 = vadd.f32 %v5809_v19, %v11139_v9  ;;  %v5834_v19 = vld [vmem:[%s12102_s7 + $0x60] sm:$0xff] }
 0x85a   : > { %7107 = vmatpush.msra.mxu3 %v5834_v19  ;;  %6258 = vmatpush.msrb.mxu1 %v5834_v19 }
 0x85b   : > { %v5866_v12 = vmax.f32 %v11558_v37, 0.0 }
 0x85c   : > { %v5770_v32 = vpop.f32.mrf.mxu3  ;;  %v11566_v18 = vld [vmem:[#allocation4 + $0x62] sm:$0xff] }
 0x85d   : > { %5874 = vst.msk [vmem:[#allocation4 + $0x71] sm:$0xff] %vm1923_vm2, %v5866_v12  ;;  %v5771_v57 = vadd.f32 %v7647_v41, %v5770_v32  ;;  %v11570_v61 = vld [vmem:[#allocation4 + $0x61] sm:$0xff]  ;;  %v11592_v41 = vld [vmem:[#allocation4 + $0x90] sm:$0xff] }
 0x85e   : > { %v11660_v12 = vld [vmem:[#allocation4 + $0x52] sm:$0xff] }
 0x85f   : > { %v5812_v26 = vadd.f32 %v5811_v22, %v5771_v57  ;;  %v5889_v32 = vld [vmem:[#allocation4 + $0x51] sm:$0xff]  ;;  %v7505_v57 = vpack.i.bf16 %v11660_v12, %v11645_v16 }
 0x860   : > { %v5833_v22 = vld [vmem:[%s12102_s7 + $0x58] sm:$0xff] }
 0x861   : > { %v11563_v53 = vadd.f32 %v5812_v26, %v11219_v30  ;;  %v7500_v26 = vpack.i.bf16 %v5889_v32, %v5911_v49  ;;  %7108 = vmatpush.msra.mxu3 %v5833_v22  ;;  %6259 = vmatpush.msrb.mxu1 %v5833_v22 }
 0x863   : > { %v5867_v3 = vmax.f32 %v11563_v53, 0.0 }
 0x864   : > { %v11568_v43 = vld [vmem:[#allocation4 + $0x72] sm:$0xff] }
 0x865   : > { %v11572_v9 = vld [vmem:[#allocation4 + $0x71] sm:$0xff]  ;;  %5875 = vst.msk [vmem:[#allocation4 + $0x81] sm:$0xff] %vm1923_vm2, %v5867_v3  ;;  %v7400_v2 = vpack.i.bf16 %v11568_v43, %v11566_v18  ;;  %v5905_v3 = vld [vmem:[#allocation4 + $0x60] sm:$0xff] }
 0x866   : > { %v7395_v6 = vpack.i.bf16 %v11572_v9, %v11570_v61  ;;  %v11581_v30 = vld [vmem:[#allocation4 + $0x70] sm:$0xff] }
 0x867   : > { %7401 = vrot.lane.b32.xlu2 %v7400_v2, %s7694_s29  ;;  %v5832_v2 = vld [vmem:[%s12102_s7 + $0x50] sm:$0xff] }
 0x868   : > { %7396 = vrot.lane.b32.xlu1 %v7395_v6, %s7691_s26  ;;  %v5831_v6 = vld [vmem:[%s12102_s7 + $0x48] sm:$0xff]  ;;  %7109 = vmatpush.msra.mxu3 %v5832_v2 }
 0x869   : > { %6260 = vmatpush.msrb.mxu1 %v5832_v2 }
 0x86a   : > { %7110 = vmatpush.msra.mxu3 %v5831_v6 }
 0x86b   : > { %6261 = vmatpush.msrb.mxu1 %v5831_v6 }
 0x86c   : > { %v5907_v44 = vld [vmem:[#allocation4 + $0x80] sm:$0xff] }
 0x86d   : > { %v11583_v47 = vld [vmem:[#allocation4 + $0x82] sm:$0xff]  ;;  %v7405_v40 = vpack.i.bf16 %v5907_v44, %v11581_v30  ;;  %v7425_v52 = vpack.i.bf16 %v11592_v41, %v5907_v44  ;;  %v7510_v44 = vpack.i.bf16 %v5905_v3, %v11643_v14 }
 0x86e   : > { %v5915_v59 = vld [vmem:[#allocation4 + $0x81] sm:$0xff]  ;;  %v7415_v23 = vpack.i.bf16 %v11583_v47, %v11568_v43 }
 0x86f   : > { %v7410_v48 = vpack.i.bf16 %v5915_v59, %v11572_v9  ;;  %7406 = vrot.lane.b32.xlu0 %v7405_v40, %s7699_s30  ;;  %v7435_v0 = vpack.i.bf16 %v11596_v50, %v5915_v59  ;;  %v7515_v59 = vpack.i.bf16 %v11570_v61, %v5889_v32  ;;  %v5830_v40 = vld [vmem:[%s12102_s7 + $0x40] sm:$0xff] }
 0x870   : > { %7416 = vrot.lane.b32.xlu2 %v7415_v23, %s7701_s13  ;;  %v5829_v23 = vld [vmem:[%s12102_s7 + $0x38] sm:$0xff]  ;;  %7111 = vmatpush.msra.mxu3 %v5830_v40 }
 0x871   : > { %7411 = vrot.lane.b32.xlu1 %v7410_v48, %s7700_s12  ;;  %6262 = vmatpush.msrb.mxu1 %v5830_v40  ;;  %v5828_v48 = vld [vmem:[%s12102_s7 + $0x30] sm:$0xff] }
 0x872   : > { %7112 = vmatpush.msra.mxu3 %v5829_v23 }
 0x873   : > { %6263 = vmatpush.msrb.mxu1 %v5829_v23 }
 0x874   : > { %7113 = vmatpush.msra.mxu3 %v5828_v48 }
 0x875   : > { %6264 = vmatpush.msrb.mxu1 %v5828_v48 }
 0x876   : > { %7114 = vmatpush.msra.mxu3 %v5827_v34 }
 0x877   : > { %7426 = vrot.lane.b32.xlu0 %v7425_v52, %s7702_s14  ;;  %6265 = vmatpush.msrb.mxu1 %v5827_v34  ;;  %v5825_v52 = vld [vmem:[%s12102_s7 + $0x18] sm:$0xff] }
 0x878   : > { %7421 = vrot.lane.b32.xlu2 %v7420_v1, %s7691_s26  ;;  %v5824_v1 = vld [vmem:[%s12102_s7 + $0x10] sm:$0xff] }
 0x879   : > { %7436 = vrot.lane.b32.xlu1 %v7435_v0, %s7703_s15  ;;  %v5822_v0 = vld [vmem:[%s12102_s7] sm:$0xff] }
 0x87f   : > { %7431 = vrot.lane.b32.xlu0 %v7430_v31, %s7694_s29  ;;  %v5838_v31 = vld [vmem:[%s12102_s7 + $0x80] sm:$0xff] }
 0x880   : > { %7446 = vrot.lane.b32.xlu2 %v7445_v17, %s7700_s12 }
 0x881   : > { %7441 = vrot.lane.b32.xlu1 %v7440_v13, %s7699_s30 }
 0x887   : > { %7451 = vrot.lane.b32.xlu0 %v7450_v25, %s7701_s13 }
 0x888   : > { %7461 = vrot.lane.b32.xlu2 %v7460_v60, %s7703_s15 }
 0x889   : > { %7456 = vrot.lane.b32.xlu1 %v7455_v7, %s7702_s14 }
 0x88f   : > { %7466 = vrot.lane.b32.xlu0 %v7460_v60, %s7691_s26 }
 0x890   : > { %7476 = vrot.lane.b32.xlu2 %v7475_v29, %s7699_s30 }
 0x891   : > { %7471 = vrot.lane.b32.xlu1 %v7470_v38, %s7694_s29 }
 0x897   : > { %7481 = vrot.lane.b32.xlu0 %v7480_v42, %s7700_s12 }
 0x898   : > { %7491 = vrot.lane.b32.xlu2 %v7490_v8, %s7702_s14 }
 0x899   : > { %7486 = vrot.lane.b32.xlu1 %v7485_v45, %s7701_s13 }
 0x89f   : > { %7496 = vrot.lane.b32.xlu0 %v7500_v26, %s7703_s15 }
 0x8a0   : > { %7506 = vrot.lane.b32.xlu2 %v7505_v57, %s7694_s29 }
 0x8a1   : > { %7501 = vrot.lane.b32.xlu1 %v7500_v26, %s7691_s26 }
 0x8a7   : > { %7511 = vrot.lane.b32.xlu0 %v7510_v44, %s7699_s30 }
 0x8a8   : > { %6092 = vrot.lane.b32.xlu2 %v11660_v12, %s7701_s13 }
 0x8a9   : > { %7516 = vrot.lane.b32.xlu1 %v7515_v59, %s7700_s12 }
 0x8af   : > { %6124 = vrot.lane.b32.xlu0 %v5905_v3, %s7702_s14 }
 0x8b0   : > { %6094 = vrot.lane.b32.xlu2 %v11566_v18, %s7701_s13 }
 0x8b1   : > { %6156 = vrot.lane.b32.xlu1 %v11570_v61, %s7703_s15  ;;  %v5826_v61 = vld [vmem:[%s12102_s7 + $0x20] sm:$0xff] }
 0x8b2   : > { %7115 = vmatpush.msra.mxu3 %v5826_v61  ;;  %6266 = vmatpush.msrb.mxu1 %v5826_v61 }
 0x8b4   : > { %7116 = vmatpush.msra.mxu3 %v5825_v52  ;;  %6267 = vmatpush.msrb.mxu1 %v5825_v52 }
 0x8b6   : > { %7117 = vmatpush.msra.mxu3 %v5824_v1  ;;  %6268 = vmatpush.msrb.mxu1 %v5824_v1 }
 0x8b7   : > { %6126 = vrot.lane.b32.xlu0 %v11581_v30, %s7702_s14 }
 0x8b9   : > { %6158 = vrot.lane.b32.xlu1 %v11572_v9, %s7703_s15  ;;  %v5823_v9 = vld [vmem:[%s12102_s7 + $0x8] sm:$0xff] }
 0x8ba   : > { %7118 = vmatpush.msra.mxu3 %v5823_v9  ;;  %6269 = vmatpush.msrb.mxu1 %v5823_v9  ;;  %v11736_v9 = vld [vmem:[#allocation4] sm:$0xff] }
 0x8bc   : > { %7119 = vmatpush.msra.mxu3 %v5822_v0  ;;  %6270 = vmatpush.msrb.mxu1 %v5822_v0 }
 0x8be   : > { %6310 = vmatpush.msrb.mxu3 %v5839_v62 }
 0x8c0   : > { %6311 = vmatpush.msrb.mxu3 %v5838_v31 }
 0x8c1   : > { %v7402_v35 = vpop.permute.xlu2 %7401 }
 0x8c2   : > { %v7403_v7 = vunpack.i.l.bf16 %v7402_v35  ;;  %v7404_v19 = vunpack.i.h.bf16 %v7402_v35 }
 0x8ca   : > { %v7417_v17 = vpop.permute.xlu2 %7416 }
 0x8cb   : > { %v7418_v22 = vunpack.i.l.bf16 %v7417_v17  ;;  %v7419_v52 = vunpack.i.h.bf16 %v7417_v17 }
 0x8d2   : > { %v7422_v29 = vpop.permute.xlu2 %7421 }
 0x8d3   : > { %v7423_v1 = vunpack.i.l.bf16 %v7422_v29 }
 0x8da   : > { %v7397_v13 = vpop.permute.xlu1 %7396  ;;  %v7447_v23 = vpop.permute.xlu2 %7446 }
 0x8db   : > { %v7398_v20 = vunpack.i.l.bf16 %v7397_v13  ;;  %v7399_v56 = vunpack.i.h.bf16 %v7397_v13 }
 0x8dd   : > { %v6178_v25 = vsel %vm1923_vm2, %v5905_v3, %v7398_v20  ;;  %v6179_v45 = vsel %vm1923_vm2, %v11581_v30, %v7399_v56 }
 0x8de   : > { %v6186_v49 = vsel %vm2055_vm9, %v6178_v25, %v7403_v7  ;;  %v6187_v26 = vsel %vm2055_vm9, %v6179_v45, %v7404_v19  ;;  %v7424_v25 = vunpack.i.h.bf16 %v7422_v29  ;;  %v7448_v45 = vunpack.i.l.bf16 %v7447_v23 }
 0x8e1   : > { %v7407_v60 = vpop.permute.xlu0 %7406 }
 0x8e2   : > { %v7408_v38 = vunpack.i.l.bf16 %v7407_v60  ;;  %v7409_v54 = vunpack.i.h.bf16 %v7407_v60  ;;  %v6172_v60 = vsel %vm1923_vm2, %v11736_v9, %v7423_v1  ;;  %v7462_v56 = vpop.permute.xlu2 %7461 }
 0x8e3   : > { %v7412_v28 = vpop.permute.xlu1 %7411 }
 0x8e4   : > { %v7413_v8 = vunpack.i.l.bf16 %v7412_v28  ;;  %v6194_v42 = vsel %vm4235_vm13, %v6186_v49, %v7408_v38  ;;  %v7414_v3 = vunpack.i.h.bf16 %v7412_v28  ;;  %v6195_v44 = vsel %vm4235_vm13, %v6187_v26, %v7409_v54 }
 0x8e5   : > { %v6173_v49 = vsel %vm1923_vm2, %v11609_v33, %v7424_v25  ;;  %v7463_v26 = vunpack.i.l.bf16 %v7462_v56 }
 0x8e6   : > { %v6202_v32 = vsel %vm4244_vm14, %v6194_v42, %v7413_v8  ;;  %v6203_v34 = vsel %vm4244_vm14, %v6195_v44, %v7414_v3  ;;  %v7449_v44 = vunpack.i.h.bf16 %v7447_v23  ;;  %v7464_v23 = vunpack.i.h.bf16 %v7462_v56 }
 0x8e7   : > { %v6210_v40 = vsel %vm4253_vm15, %v6202_v32, %v7418_v22  ;;  %v6211_v62 = vsel %vm4253_vm15, %v6203_v34, %v7419_v52 }
 0x8e9   : > { %v7427_v57 = vpop.permute.xlu0 %7426 }
 0x8ea   : > { %v7428_v2 = vunpack.i.l.bf16 %v7427_v57  ;;  %v7429_v61 = vunpack.i.h.bf16 %v7427_v57 }
 0x8eb   : > { %v7437_v6 = vpop.permute.xlu1 %7436 }
 0x8ec   : > { %v7438_v59 = vunpack.i.l.bf16 %v7437_v6  ;;  %v6218_v48 = vsel %vm4262_vm0, %v6210_v40, %v7428_v2  ;;  %v7439_v0 = vunpack.i.h.bf16 %v7437_v6  ;;  %v6219_v20 = vsel %vm4262_vm0, %v6211_v62, %v7429_v61 }
 0x8ee   : > { %v6226_v30 = vsel %vm4271_vm1, %v6218_v48, %v7438_v59  ;;  %v6227_v17 = vsel %vm4271_vm1, %v6219_v20, %v7439_v0 }
 0x8ef   : > { %6289 = vmatmul.f32.vlgmr.msra.gmra.mxu3 %v6226_v30  ;;  %v7477_v30 = vpop.permute.xlu2 %7476 }
 0x8f0   : > { %v7478_v20 = vunpack.i.l.bf16 %v7477_v30 }
 0x8f1   : > { %v7432_v35 = vpop.permute.xlu0 %7431 }
 0x8f2   : > { %v7433_v31 = vunpack.i.l.bf16 %v7432_v35  ;;  %v7434_v38 = vunpack.i.h.bf16 %v7432_v35 }
 0x8f3   : > { %v7442_v13 = vpop.permute.xlu1 %7441 }
 0x8f4   : > { %v7443_v7 = vunpack.i.l.bf16 %v7442_v13  ;;  %v6180_v28 = vsel %vm2055_vm9, %v6172_v60, %v7433_v31  ;;  %v7444_v8 = vunpack.i.h.bf16 %v7442_v13  ;;  %v6181_v29 = vsel %vm2055_vm9, %v6173_v49, %v7434_v38 }
 0x8f6   : > { %v6188_v42 = vsel %vm4235_vm13, %v6180_v28, %v7443_v7  ;;  %v6189_v3 = vsel %vm4235_vm13, %v6181_v29, %v7444_v8 }
 0x8f7   : > { %6292 = vmatmul.f32.gmra.mxu3 %v6227_v17  ;;  %v6196_v57 = vsel %vm4244_vm14, %v6188_v42, %v7448_v45  ;;  %v6197_v48 = vsel %vm4244_vm14, %v6189_v3, %v7449_v44  ;;  %v7492_v25 = vpop.permute.xlu2 %7491 }
 0x8f8   : > { %v7493_v8 = vunpack.i.l.bf16 %v7492_v25 }
 0x8f9   : > { %v7452_v54 = vpop.permute.xlu0 %7451 }
 0x8fa   : > { %v7453_v19 = vunpack.i.l.bf16 %v7452_v54  ;;  %v7454_v2 = vunpack.i.h.bf16 %v7452_v54  ;;  %v7479_v54 = vunpack.i.h.bf16 %v7477_v30 }
 0x8fb   : > { %v7457_v32 = vpop.permute.xlu1 %7456 }
 0x8fc   : > { %v7458_v22 = vunpack.i.l.bf16 %v7457_v32  ;;  %v6204_v6 = vsel %vm4253_vm15, %v6196_v57, %v7453_v19  ;;  %v7459_v40 = vunpack.i.h.bf16 %v7457_v32  ;;  %v6205_v34 = vsel %vm4253_vm15, %v6197_v48, %v7454_v2 }
 0x8fe   : > { %v6212_v33 = vsel %vm4262_vm0, %v6204_v6, %v7458_v22  ;;  %v6213_v0 = vsel %vm4262_vm0, %v6205_v34, %v7459_v40 }
 0x8ff   : > { %7080 = vmatmul.msk.f32.vlgmr.msrb.gmra.mxu3 %vm1923_vm2, %v11616_v15  ;;  %v6220_v59 = vsel %vm4271_vm1, %v6212_v33, %v7463_v26  ;;  %v6221_v15 = vsel %vm4271_vm1, %v6213_v0, %v7464_v23  ;;  %v7507_v57 = vpop.permute.xlu2 %7506 }
 0x900   : > { %6271 = vmatmul.f32.vlgmr.msrb.gmra.mxu1 %v6220_v59  ;;  %v7494_v59 = vunpack.i.h.bf16 %v7492_v25  ;;  %v7508_v40 = vunpack.i.l.bf16 %v7507_v57 }
 0x901   : > { %v7467_v61 = vpop.permute.xlu0 %7466 }
 0x902   : > { %v7468_v1 = vunpack.i.l.bf16 %v7467_v61  ;;  %v7469_v60 = vunpack.i.h.bf16 %v7467_v61 }
 0x903   : > { %v7472_v52 = vpop.permute.xlu1 %7471 }
 0x904   : > { %v7473_v35 = vunpack.i.l.bf16 %v7472_v52  ;;  %v6174_v62 = vsel %vm1923_vm2, %v11606_v58, %v7468_v1  ;;  %v7474_v56 = vunpack.i.h.bf16 %v7472_v52 }
 0x906   : > { %v6182_v31 = vsel %vm2055_vm9, %v6174_v62, %v7473_v35 }
 0x907   : > { %7081 = vmatmul.msk.f32.gmra.mxu3 %vm1923_vm2, %v11628_v11  ;;  %v6190_v17 = vsel %vm4235_vm13, %v6182_v31, %v7478_v20  ;;  %v6175_v11 = vsel %vm1923_vm2, %v11618_v63, %v7469_v60  ;;  %v7509_v31 = vunpack.i.h.bf16 %v7507_v57 }
 0x908   : > { %6274 = vmatmul.f32.gmra.mxu1 %v6221_v15  ;;  %v6183_v42 = vsel %vm2055_vm9, %v6175_v11, %v7474_v56 }
 0x909   : > { %v7482_v13 = vpop.permute.xlu0 %7481  ;;  %v6191_v3 = vsel %vm4235_vm13, %v6183_v42, %v7479_v54  ;;  %v11803_v42 = vld [vmem:[#allocation4 + $0x92] sm:$0xff]  ;;  %v5857_v54 = vld [vmem:[%s12104_s9 + $0x80] sm:$0xff] }
 0x90a   : > { %v7483_v38 = vunpack.i.l.bf16 %v7482_v13  ;;  %v7484_v45 = vunpack.i.h.bf16 %v7482_v13 }
 0x90b   : > { %v7487_v7 = vpop.permute.xlu1 %7486 }
 0x90c   : > { %v7488_v28 = vunpack.i.l.bf16 %v7487_v7  ;;  %v6198_v58 = vsel %vm4244_vm14, %v6190_v17, %v7483_v38  ;;  %v7489_v26 = vunpack.i.h.bf16 %v7487_v7 }
 0x90e   : > { %v6206_v49 = vsel %vm4253_vm15, %v6198_v58, %v7488_v28 }
 0x90f   : > { %7082 = vmatmul.msk.f32.gmra.mxu3 %vm1923_vm2, %v11645_v16  ;;  %v6214_v22 = vsel %vm4262_vm0, %v6206_v49, %v7493_v8  ;;  %v6199_v16 = vsel %vm4244_vm14, %v6191_v3, %v7484_v45 }
 0x910   : > { %v6207_v33 = vsel %vm4253_vm15, %v6199_v16, %v7489_v26 }
 0x911   : > { %v7497_v29 = vpop.permute.xlu0 %7496  ;;  %v6215_v0 = vsel %vm4262_vm0, %v6207_v33, %v7494_v59 }
 0x912   : > { %v7498_v32 = vunpack.i.l.bf16 %v7497_v29  ;;  %v7499_v44 = vunpack.i.h.bf16 %v7497_v29  ;;  %v5858_v29 = vld [vmem:[%s12104_s9 + $0x88] sm:$0xff] }
 0x913   : > { %v7502_v19 = vpop.permute.xlu1 %7501  ;;  %6787 = vmatpush.msra.mxu1 %v5858_v29 }
 0x914   : > { %v7503_v63 = vunpack.i.l.bf16 %v7502_v19  ;;  %v6222_v2 = vsel %vm4271_vm1, %v6214_v22, %v7498_v32  ;;  %v7504_v61 = vunpack.i.h.bf16 %v7502_v19 }
 0x915   : > { %6277 = vmatmul.f32.gmra.mxu1 %v6222_v2 }
 0x916   : > { %v6176_v6 = vsel %vm1923_vm2, %v11626_v36, %v7503_v63  ;;  %v6093_v36 = vpop.permute.xlu2 %6092  ;;  %v6177_v62 = vsel %vm1923_vm2, %v11643_v14, %v7504_v61  ;;  %6788 = vmatpush.msra.mxu1 %v5857_v54 }
 0x917   : > { %7083 = vmatmul.msk.f32.gmra.mxu3 %vm1923_vm2, %v11660_v12  ;;  %v6184_v1 = vsel %vm2055_vm9, %v6176_v6, %v7508_v40  ;;  %v6223_v12 = vsel %vm4271_vm1, %v6215_v0, %v7499_v44  ;;  %v6185_v60 = vsel %vm2055_vm9, %v6177_v62, %v7509_v31 }
 0x919   : > { %v7512_v48 = vpop.permute.xlu0 %7511 }
 0x91a   : > { %v7513_v34 = vunpack.i.l.bf16 %v7512_v48  ;;  %v7514_v15 = vunpack.i.h.bf16 %v7512_v48 }
 0x91b   : > { %v7517_v30 = vpop.permute.xlu1 %7516 }
 0x91c   : > { %v7518_v52 = vunpack.i.l.bf16 %v7517_v30  ;;  %v6192_v23 = vsel %vm4235_vm13, %v6184_v1, %v7513_v34  ;;  %v7519_v25 = vunpack.i.h.bf16 %v7517_v30  ;;  %v6193_v28 = vsel %vm4235_vm13, %v6185_v60, %v7514_v15 }
 0x91d   : > { %6280 = vmatmul.f32.gmra.mxu1 %v6223_v12 }
 0x91e   : > { %v6200_v35 = vsel %vm4244_vm14, %v6192_v23, %v7518_v52  ;;  %v6201_v14 = vsel %vm4244_vm14, %v6193_v28, %v7519_v25  ;;  %v6095_v17 = vpop.permute.xlu2 %6094 }
 0x91f   : > { %7084 = vmatmul.msk.f32.gmra.mxu3 %vm1923_vm2, %v11566_v18  ;;  %v6208_v20 = vsel %vm4253_vm15, %v6200_v35, %v6093_v36  ;;  %v6209_v58 = vsel %vm4253_vm15, %v6201_v14, %v6095_v17 }
 0x921   : > { %v6125_v13 = vpop.permute.xlu0 %6124 }
 0x922   : > { %v6216_v38 = vsel %vm4262_vm0, %v6208_v20, %v6125_v13 }
 0x923   : > { %v6157_v7 = vpop.permute.xlu1 %6156 }
 0x924   : > { %v6224_v18 = vsel %vm4271_vm1, %v6216_v38, %v6157_v7 }
 0x925   : > { %6283 = vmatmul.f32.gmra.mxu1 %v6224_v18 }
 0x927   : > { %7085 = vmatmul.msk.f32.gmra.mxu3 %vm1923_vm2, %v11568_v43 }
 0x929   : > { %v6127_v56 = vpop.permute.xlu0 %6126 }
 0x92a   : > { %v6217_v49 = vsel %vm4262_vm0, %v6209_v58, %v6127_v56 }
 0x92b   : > { %v6159_v11 = vpop.permute.xlu1 %6158 }
 0x92c   : > { %v6225_v8 = vsel %vm4271_vm1, %v6217_v49, %v6159_v11 }
 0x92d   : > { %6286 = vmatmul.f32.gmra.mxu1 %v6225_v8 }
 0x92f   : > { %7086 = vmatmul.msk.f32.gmra.mxu3 %vm1923_vm2, %v11583_v47  ;;  %v11820_v47 = vld [vmem:[%s12103_s8] ss:$0 sm:$0xff] }
 0x937   : > { %7087 = vmatmul.msk.f32.gmra.mxu3 %vm1923_vm2, %v11803_v42 }
 0x972   : > { %v11807_v43 = vpop.f32.mrf.mxu3 }
 0x97a   : > { %v11809_v45 = vpop.f32.mrf.mxu3 }
 0x97d   : > { %v6272_v19 = vpop.f32.mrf.mxu1 }
 0x97e   : > { %v6273_v32 = vadd.f32 %v11820_v47, %v6272_v19 }
 0x982   : > { %v6313_v22 = vpop.f32.mrf.mxu3 }
 0x983   : > { %v6314_v57 = vadd.f32 %v6313_v22, %v6273_v32 }
 0x985   : > { %v6337_v26 = vmax.f32 %v6314_v57, 0.0  ;;  %v6275_v3 = vpop.f32.mrf.mxu1 }
 0x986   : > { %v6276_v63 = vadd.f32 %v11820_v47, %v6275_v3  ;;  %v6291_v3 = vadd.f32 %v11820_v47, %v11807_v43 }
 0x987   : > { %6345 = vst.msk [vmem:[#allocation4 + $0x11] sm:$0xff] %vm1923_vm2, %v6337_v26 }
 0x98a   : > { %v6316_v2 = vpop.f32.mrf.mxu3 }
 0x98b   : > { %v6317_v16 = vadd.f32 %v6316_v2, %v6276_v63 }
 0x98d   : > { %v6338_v6 = vmax.f32 %v6317_v16, 0.0 }
 0x98e   : > { %v6362_v44 = vld [vmem:[#allocation4 + $0x11] sm:$0xff] }
 0x98f   : > { %v6370_v33 = vld [vmem:[#allocation4 + $0x12] sm:$0xff]  ;;  %6346 = vst.msk [vmem:[#allocation4 + $0x21] sm:$0xff] %vm1923_vm2, %v6338_v6  ;;  %v7520_v59 = vpack.i.bf16 %v6362_v44, %v11594_v55 }
 0x990   : > { %v7525_v40 = vpack.i.bf16 %v6370_v33, %v11604_v24  ;;  %v11831_v61 = vld [vmem:[#allocation4 + $0x10] sm:$0xff] }
 0x991   : > { %7521 = vrot.lane.b32.xlu2 %v7520_v59, %s7691_s26 }
 0x992   : > { %7526 = vrot.lane.b32.xlu0 %v7525_v40, %s7694_s29  ;;  %v6319_v48 = vpop.f32.mrf.mxu3  ;;  %v6278_v30 = vpop.f32.mrf.mxu1 }
 0x993   : > { %v6279_v34 = vadd.f32 %v11820_v47, %v6278_v30 }
 0x995   : > { %v6320_v52 = vadd.f32 %v6319_v48, %v6279_v34  ;;  %v6294_v48 = vadd.f32 %v11820_v47, %v11809_v45  ;;  %v5856_v45 = vld [vmem:[%s12104_s9 + $0x78] sm:$0xff] }
 0x996   : > { %v6417_v1 = vld [vmem:[#allocation4 + $0x22] sm:$0xff]  ;;  %6732 = vmatpush.msra.mxu2 %v5856_v45 }
 0x997   : > { %v6386_v0 = vld [vmem:[#allocation4 + $0x21] sm:$0xff]  ;;  %7088 = vmatmul.msk.f32.vlgmr.msra.gmra.mxu1 %vm1923_vm2, %v6417_v1  ;;  %v7540_v55 = vpack.i.bf16 %v6417_v1, %v6370_v33  ;;  %v6339_v36 = vmax.f32 %v6320_v52, 0.0 }
 0x998   : > { %v11833_v23 = vld [vmem:[#allocation4 + $0x20] sm:$0xff]  ;;  %v7535_v12 = vpack.i.bf16 %v6386_v0, %v6362_v44 }
 0x999   : > { %v7530_v24 = vpack.i.bf16 %v11833_v23, %v11831_v61  ;;  %6347 = vst.msk [vmem:[#allocation4 + $0x31] sm:$0xff] %vm1923_vm2, %v6339_v36 }
 0x99a   : > { %7541 = vrot.lane.b32.xlu0 %v7540_v55, %s7701_s13  ;;  %7536 = vrot.lane.b32.xlu2 %v7535_v12, %s7700_s12  ;;  %v6322_v35 = vpop.f32.mrf.mxu3  ;;  %v6281_v62 = vpop.f32.mrf.mxu1 }
 0x99b   : > { %7531 = vrot.lane.b32.xlu1 %v7530_v24, %s7699_s30  ;;  %v6282_v15 = vadd.f32 %v11820_v47, %v6281_v62 }
 0x99d   : > { %v6323_v31 = vadd.f32 %v6322_v35, %v6282_v15 }
 0x99f   : > { %v6340_v13 = vmax.f32 %v6323_v31, 0.0  ;;  %v5855_v31 = vld [vmem:[%s12104_s9 + $0x70] sm:$0xff] }
 0x9a0   : > { %v6418_v20 = vld [vmem:[#allocation4 + $0x32] sm:$0xff]  ;;  %6733 = vmatpush.msra.mxu2 %v5855_v31 }
 0x9a1   : > { %v6410_v25 = vld [vmem:[#allocation4 + $0x31] sm:$0xff]  ;;  %6348 = vst.msk [vmem:[#allocation4 + $0x41] sm:$0xff] %vm1923_vm2, %v6340_v13  ;;  %7089 = vmatmul.msk.f32.gmra.mxu1 %vm1923_vm2, %v6418_v20  ;;  %v7560_v54 = vpack.i.bf16 %v6418_v20, %v6417_v1  ;;  %v5854_v13 = vld [vmem:[%s12104_s9 + $0x68] sm:$0xff] }
 0x9a2   : > { %v11843_v60 = vld [vmem:[#allocation4 + $0x30] sm:$0xff]  ;;  %v6325_v7 = vpop.f32.mrf.mxu3  ;;  %v7550_v38 = vpack.i.bf16 %v6410_v25, %v6386_v0  ;;  %v6284_v18 = vpop.f32.mrf.mxu1  ;;  %6734 = vmatpush.msra.mxu2 %v5854_v13 }
 0x9a3   : > { %v7545_v28 = vpack.i.bf16 %v11843_v60, %v11833_v23  ;;  %v6285_v14 = vadd.f32 %v11820_v47, %v6284_v18  ;;  %v5852_v18 = vld [vmem:[%s12104_s9 + $0x58] sm:$0xff] }
 0x9a4   : > { %7551 = vrot.lane.b32.xlu2 %v7550_v38, %s7703_s15  ;;  %7556 = vrot.lane.b32.xlu0 %v7550_v38, %s7691_s26 }
 0x9a5   : > { %7546 = vrot.lane.b32.xlu1 %v7545_v28, %s7702_s14  ;;  %v6326_v17 = vadd.f32 %v6325_v7, %v6285_v14  ;;  %v5853_v28 = vld [vmem:[%s12104_s9 + $0x60] sm:$0xff] }
 0x9a6   : > { %6735 = vmatpush.msra.mxu2 %v5853_v28 }
 0x9a7   : > { %v6341_v56 = vmax.f32 %v6326_v17, 0.0 }
 0x9a8   : > { %v6419_v58 = vld [vmem:[#allocation4 + $0x42] sm:$0xff]  ;;  %6736 = vmatpush.msra.mxu2 %v5852_v18 }
 0x9a9   : > { %v11853_v11 = vld [vmem:[#allocation4 + $0x40] sm:$0xff]  ;;  %6349 = vst.msk [vmem:[#allocation4 + $0x51] sm:$0xff] %vm1923_vm2, %v6341_v56  ;;  %7090 = vmatmul.msk.f32.gmra.mxu1 %vm1923_vm2, %v6419_v58  ;;  %v7575_v33 = vpack.i.bf16 %v6419_v58, %v6418_v20 }
 0x9aa   : > { %v6388_v49 = vld [vmem:[#allocation4 + $0x41] sm:$0xff]  ;;  %v6328_v8 = vpop.f32.mrf.mxu3  ;;  %v7565_v29 = vpack.i.bf16 %v11853_v11, %v11843_v60  ;;  %v6287_v32 = vpop.f32.mrf.mxu1 }
 0x9ab   : > { %v7570_v19 = vpack.i.bf16 %v6388_v49, %v6410_v25  ;;  %v6288_v22 = vadd.f32 %v11820_v47, %v6287_v32  ;;  %v5845_v32 = vld [vmem:[%s12104_s9 + $0x20] sm:$0xff] }
 0x9ac   : > { %7566 = vrot.lane.b32.xlu2 %v7565_v29, %s7699_s30  ;;  %v5849_v29 = vld [vmem:[%s12104_s9 + $0x40] sm:$0xff] }
 0x9ad   : > { %7561 = vrot.lane.b32.xlu1 %v7560_v54, %s7694_s29  ;;  %7571 = vrot.lane.b32.xlu0 %v7570_v19, %s7700_s12  ;;  %v6329_v57 = vadd.f32 %v6328_v8, %v6288_v22  ;;  %v5850_v8 = vld [vmem:[%s12104_s9 + $0x48] sm:$0xff]  ;;  %v5847_v54 = vld [vmem:[%s12104_s9 + $0x30] sm:$0xff] }
 0x9ae   : > { %v5846_v19 = vld [vmem:[%s12104_s9 + $0x28] sm:$0xff] }
 0x9af   : > { %v6342_v26 = vmax.f32 %v6329_v57, 0.0  ;;  %v5842_v57 = vld [vmem:[%s12104_s9 + $0x8] sm:$0xff] }
 0x9b0   : > { %v6420_v63 = vld [vmem:[#allocation4 + $0x52] sm:$0xff] }
 0x9b1   : > { %v11865_v2 = vld [vmem:[#allocation4 + $0x50] sm:$0xff]  ;;  %6350 = vst.msk [vmem:[#allocation4 + $0x61] sm:$0xff] %vm1923_vm2, %v6342_v26  ;;  %7091 = vmatmul.msk.f32.gmra.mxu1 %vm1923_vm2, %v6420_v63  ;;  %v7595_v1 = vpack.i.bf16 %v6420_v63, %v6419_v58  ;;  %v5841_v26 = vld [vmem:[%s12104_s9] sm:$0xff] }
 0x9b2   : > { %v6412_v16 = vld [vmem:[#allocation4 + $0x51] sm:$0xff]  ;;  %v6331_v6 = vpop.f32.mrf.mxu3  ;;  %v7580_v44 = vpack.i.bf16 %v11865_v2, %v11853_v11 }
 0x9b3   : > { %v7585_v59 = vpack.i.bf16 %v6412_v16, %v6388_v49  ;;  %v6332_v40 = vadd.f32 %v6331_v6, %v6291_v3  ;;  %v5851_v49 = vld [vmem:[%s12104_s9 + $0x50] sm:$0xff] }
 0x9b4   : > { %7581 = vrot.lane.b32.xlu2 %v7580_v44, %s7702_s14  ;;  %6737 = vmatpush.msra.mxu2 %v5851_v49 }
 0x9b5   : > { %7576 = vrot.lane.b32.xlu1 %v7575_v33, %s7701_s13  ;;  %v6343_v43 = vmax.f32 %v6332_v40, 0.0  ;;  %7586 = vrot.lane.b32.xlu0 %v7585_v59, %s7703_s15 }
 0x9b6   : > { %6738 = vmatpush.msra.mxu2 %v5850_v8 }
 0x9b7   : > { %6351 = vst.msk [vmem:[#allocation4 + $0x71] sm:$0xff] %vm1923_vm2, %v6343_v43 }
 0x9b8   : > { %v6421_v30 = vld [vmem:[#allocation4 + $0x62] sm:$0xff]  ;;  %6739 = vmatpush.msra.mxu2 %v5849_v29 }
 0x9b9   : > { %v11877_v34 = vld [vmem:[#allocation4 + $0x60] sm:$0xff]  ;;  %7092 = vmatmul.msk.f32.gmra.mxu1 %vm1923_vm2, %v6421_v30  ;;  %v7610_v35 = vpack.i.bf16 %v6421_v30, %v6420_v63 }
 0x9ba   : > { %v6334_v52 = vpop.f32.mrf.mxu3  ;;  %v7600_v0 = vpack.i.bf16 %v11877_v34, %v11865_v2  ;;  %v6390_v47 = vld [vmem:[#allocation4 + $0x61] sm:$0xff] }
 0x9bb   : > { %v6335_v55 = vadd.f32 %v6334_v52, %v6294_v48  ;;  %v7605_v62 = vpack.i.bf16 %v6390_v47, %v6412_v16 }
 0x9bc   : > { %7596 = vrot.lane.b32.xlu2 %v7595_v1, %s7694_s29 }
 0x9bd   : > { %7591 = vrot.lane.b32.xlu1 %v7585_v59, %s7691_s26  ;;  %v6344_v12 = vmax.f32 %v6335_v55, 0.0  ;;  %7601 = vrot.lane.b32.xlu0 %v7600_v0, %s7699_s30 }
 0x9be   : > { %v11889_v24 = vld [vmem:[#allocation4 + $0x70] sm:$0xff] }
 0x9bf   : > { %6352 = vst.msk [vmem:[#allocation4 + $0x81] sm:$0xff] %vm1923_vm2, %v6344_v12  ;;  %v6422_v36 = vld [vmem:[#allocation4 + $0x72] sm:$0xff]  ;;  %v7615_v15 = vpack.i.bf16 %v11889_v24, %v11877_v34 }
 0x9c0   : > { %v6368_v20 = vld [vmem:[#allocation4 + $0x71] sm:$0xff]  ;;  %v7630_v38 = vpack.i.bf16 %v6422_v36, %v6421_v30 }
 0x9c1   : > { %7093 = vmatmul.msk.f32.gmra.mxu1 %vm1923_vm2, %v6422_v36  ;;  %v7625_v7 = vpack.i.bf16 %v6368_v20, %v6390_v47 }
 0x9c4   : > { %7611 = vrot.lane.b32.xlu2 %v7610_v35, %s7701_s13 }
 0x9c5   : > { %7606 = vrot.lane.b32.xlu1 %v7605_v62, %s7700_s12  ;;  %7616 = vrot.lane.b32.xlu0 %v7615_v15, %s7702_s14 }
 0x9c6   : > { %v6423_v25 = vld [vmem:[#allocation4 + $0x82] sm:$0xff] }
 0x9c7   : > { %v6392_v14 = vld [vmem:[#allocation4 + $0x81] sm:$0xff] }
 0x9c8   : > { %v6384_v17 = vld [vmem:[#allocation4 + $0x80] sm:$0xff]  ;;  %v7640_v56 = vpack.i.bf16 %v6392_v14, %v6368_v20 }
 0x9c9   : > { %7094 = vmatmul.msk.f32.gmra.mxu1 %vm1923_vm2, %v6423_v25  ;;  %v7635_v58 = vpack.i.bf16 %v6384_v17, %v11889_v24 }
 0x9cc   : > { %7626 = vrot.lane.b32.xlu2 %v7625_v7, %s7691_s26 }
 0x9cd   : > { %7621 = vrot.lane.b32.xlu1 %v7625_v7, %s7703_s15  ;;  %7631 = vrot.lane.b32.xlu0 %v7630_v38, %s7694_s29 }
 0x9d1   : > { %7095 = vmatmul.msk.f32.gmra.mxu1 %vm1923_vm2, %v11803_v42  ;;  %v5848_v42 = vld [vmem:[%s12104_s9 + $0x38] sm:$0xff] }
 0x9d2   : > { %6740 = vmatpush.msra.mxu2 %v5848_v42 }
 0x9d4   : > { %7641 = vrot.lane.b32.xlu2 %v7640_v56, %s7700_s12  ;;  %6741 = vmatpush.msra.mxu2 %v5847_v54 }
 0x9d5   : > { %7636 = vrot.lane.b32.xlu1 %v7635_v58, %s7699_s30  ;;  %6573 = vrot.lane.b32.xlu0 %v6422_v36, %s7701_s13 }
 0x9d6   : > { %6742 = vmatpush.msra.mxu2 %v5846_v19 }
 0x9d8   : > { %6743 = vmatpush.msra.mxu2 %v5845_v32 }
 0x9dc   : > { %6637 = vrot.lane.b32.xlu2 %v6392_v14, %s7703_s15 }
 0x9dd   : > { %6605 = vrot.lane.b32.xlu1 %v6384_v17, %s7702_s14  ;;  %6575 = vrot.lane.b32.xlu0 %v6423_v25, %s7701_s13 }
 0x9e4   : > { %6639 = vrot.lane.b32.xlu2 %v11596_v50, %s7703_s15  ;;  %v5843_v50 = vld [vmem:[%s12104_s9 + $0x10] sm:$0xff] }
 0x9e5   : > { %6607 = vrot.lane.b32.xlu1 %v11592_v41, %s7702_s14  ;;  %v5844_v41 = vld [vmem:[%s12104_s9 + $0x18] sm:$0xff] }
 0x9e6   : > { %6744 = vmatpush.msra.mxu2 %v5844_v41 }
 0x9e8   : > { %6745 = vmatpush.msra.mxu2 %v5843_v50 }
 0x9ea   : > { %6746 = vmatpush.msra.mxu2 %v5842_v57 }
 0x9eb   : > { %v7522_v22 = vpop.permute.xlu2 %7521 }
 0x9ec   : > { %6747 = vmatpush.msra.mxu2 %v5841_v26  ;;  %v7523_v6 = vunpack.i.l.bf16 %v7522_v22  ;;  %v7524_v52 = vunpack.i.h.bf16 %v7522_v22 }
 0x9ee   : > { %v6649_v43 = vsel %vm1923_vm2, %v11736_v9, %v7523_v6  ;;  %v6650_v47 = vsel %vm1923_vm2, %v11831_v61, %v7524_v52 }
 0x9f4   : > { %v7537_v3 = vpop.permute.xlu2 %7536 }
 0x9f5   : > { %v7538_v0 = vunpack.i.l.bf16 %v7537_v3  ;;  %v7539_v25 = vunpack.i.h.bf16 %v7537_v3 }
 0x9fe   : > { %v7552_v16 = vpop.permute.xlu2 %7551 }
 0x9ff   : > { %v7553_v31 = vunpack.i.l.bf16 %v7552_v16  ;;  %v7554_v42 = vunpack.i.h.bf16 %v7552_v16 }
 0xa04   : > { %v7527_v63 = vpop.permute.xlu0 %7526 }
 0xa05   : > { %v7528_v33 = vunpack.i.l.bf16 %v7527_v63  ;;  %v7529_v55 = vunpack.i.h.bf16 %v7527_v63 }
 0xa06   : > { %v7567_v30 = vpop.permute.xlu2 %7566 }
 0xa07   : > { %v6657_v48 = vsel %vm2055_vm9, %v6649_v43, %v7528_v33  ;;  %v6658_v62 = vsel %vm2055_vm9, %v6650_v47, %v7529_v55  ;;  %v7568_v22 = vunpack.i.l.bf16 %v7567_v30 }
 0xa0c   : > { %v7542_v40 = vpop.permute.xlu0 %7541 }
 0xa0d   : > { %v7532_v44 = vpop.permute.xlu1 %7531  ;;  %v7543_v36 = vunpack.i.l.bf16 %v7542_v40  ;;  %v7544_v14 = vunpack.i.h.bf16 %v7542_v40 }
 0xa0e   : > { %v7533_v59 = vunpack.i.l.bf16 %v7532_v44  ;;  %v7534_v12 = vunpack.i.h.bf16 %v7532_v44  ;;  %v7582_v28 = vpop.permute.xlu2 %7581  ;;  %v7569_v44 = vunpack.i.h.bf16 %v7567_v30 }
 0xa10   : > { %v6665_v1 = vsel %vm4235_vm13, %v6657_v48, %v7533_v59  ;;  %v6666_v13 = vsel %vm4235_vm13, %v6658_v62, %v7534_v12  ;;  %v7583_v59 = vunpack.i.l.bf16 %v7582_v28 }
 0xa11   : > { %v6673_v45 = vsel %vm4244_vm14, %v6665_v1, %v7538_v0  ;;  %v6674_v61 = vsel %vm4244_vm14, %v6666_v13, %v7539_v25 }
 0xa12   : > { %v6681_v20 = vsel %vm4253_vm15, %v6673_v45, %v7543_v36  ;;  %v6682_v58 = vsel %vm4253_vm15, %v6674_v61, %v7544_v14  ;;  %v7584_v45 = vunpack.i.h.bf16 %v7582_v28 }
 0xa16   : > { %v7557_v9 = vpop.permute.xlu0 %7556  ;;  %v7597_v57 = vpop.permute.xlu2 %7596 }
 0xa17   : > { %v7547_v35 = vpop.permute.xlu1 %7546  ;;  %v7558_v17 = vunpack.i.l.bf16 %v7557_v9  ;;  %v7559_v54 = vunpack.i.h.bf16 %v7557_v9 }
 0xa18   : > { %v7548_v15 = vunpack.i.l.bf16 %v7547_v35  ;;  %v7549_v18 = vunpack.i.h.bf16 %v7547_v35 }
 0xa19   : > { %v6651_v19 = vsel %vm1923_vm2, %v11833_v23, %v7558_v17  ;;  %v6652_v26 = vsel %vm1923_vm2, %v11843_v60, %v7559_v54 }
 0xa1a   : > { %v6689_v7 = vsel %vm4262_vm0, %v6681_v20, %v7548_v15  ;;  %v6690_v29 = vsel %vm4262_vm0, %v6682_v58, %v7549_v18  ;;  %v7598_v20 = vunpack.i.l.bf16 %v7597_v57 }
 0xa1b   : > { %v6697_v38 = vsel %vm4271_vm1, %v6689_v7, %v7553_v31  ;;  %v6698_v50 = vsel %vm4271_vm1, %v6690_v29, %v7554_v42 }
 0xa1c   : > { %6748 = vmatmul.f32.vlgmr.msra.gmra.mxu2 %v6697_v38 }
 0xa1e   : > { %v7612_v36 = vpop.permute.xlu2 %7611 }
 0xa1f   : > { %v7562_v56 = vpop.permute.xlu1 %7561  ;;  %v7572_v8 = vpop.permute.xlu0 %7571  ;;  %v7613_v58 = vunpack.i.l.bf16 %v7612_v36 }
 0xa20   : > { %v7563_v49 = vunpack.i.l.bf16 %v7562_v56  ;;  %v7564_v32 = vunpack.i.h.bf16 %v7562_v56  ;;  %v7573_v16 = vunpack.i.l.bf16 %v7572_v8  ;;  %v7574_v0 = vunpack.i.h.bf16 %v7572_v8 }
 0xa22   : > { %v6659_v41 = vsel %vm2055_vm9, %v6651_v19, %v7563_v49  ;;  %v6660_v63 = vsel %vm2055_vm9, %v6652_v26, %v7564_v32  ;;  %v7599_v49 = vunpack.i.h.bf16 %v7597_v57 }
 0xa23   : > { %v6667_v3 = vsel %vm4235_vm13, %v6659_v41, %v7568_v22  ;;  %v6668_v43 = vsel %vm4235_vm13, %v6660_v63, %v7569_v44 }
 0xa24   : > { %6751 = vmatmul.f32.gmra.mxu2 %v6698_v50  ;;  %v6675_v40 = vsel %vm4244_vm14, %v6667_v3, %v7573_v16  ;;  %v6676_v12 = vsel %vm4244_vm14, %v6668_v43, %v7574_v0 }
 0xa26   : > { %v7627_v14 = vpop.permute.xlu2 %7626 }
 0xa27   : > { %v7577_v6 = vpop.permute.xlu1 %7576  ;;  %v7587_v23 = vpop.permute.xlu0 %7586  ;;  %v7628_v57 = vunpack.i.l.bf16 %v7627_v14 }
 0xa28   : > { %v7578_v33 = vunpack.i.l.bf16 %v7577_v6  ;;  %v7579_v48 = vunpack.i.h.bf16 %v7577_v6  ;;  %v7588_v52 = vunpack.i.l.bf16 %v7587_v23  ;;  %v7589_v9 = vunpack.i.h.bf16 %v7587_v23 }
 0xa2a   : > { %v6683_v1 = vsel %vm4253_vm15, %v6675_v40, %v7578_v33  ;;  %v6684_v30 = vsel %vm4253_vm15, %v6676_v12, %v7579_v48  ;;  %v6655_v40 = vsel %vm1923_vm2, %v11877_v34, %v7628_v57 }
 0xa2b   : > { %v6691_v60 = vsel %vm4262_vm0, %v6683_v1, %v7583_v59  ;;  %v6692_v15 = vsel %vm4262_vm0, %v6684_v30, %v7584_v45  ;;  %v7629_v30 = vunpack.i.h.bf16 %v7627_v14 }
 0xa2c   : > { %v6699_v55 = vsel %vm4271_vm1, %v6691_v60, %v7588_v52  ;;  %v6700_v13 = vsel %vm4271_vm1, %v6692_v15, %v7589_v9 }
 0xa2d   : > { %6754 = vmatmul.f32.gmra.mxu2 %v6699_v55  ;;  %v6656_v15 = vsel %vm1923_vm2, %v11889_v24, %v7629_v30  ;;  %v6790_v24 = vpop.f32.mrf.mxu1 }
 0xa2e   : > { %v7642_v16 = vpop.permute.xlu2 %7641 }
 0xa2f   : > { %v7592_v47 = vpop.permute.xlu1 %7591  ;;  %v7602_v62 = vpop.permute.xlu0 %7601  ;;  %v7643_v1 = vunpack.i.l.bf16 %v7642_v16 }
 0xa30   : > { %v7593_v35 = vunpack.i.l.bf16 %v7592_v47  ;;  %v7594_v38 = vunpack.i.h.bf16 %v7592_v47  ;;  %v7603_v18 = vunpack.i.l.bf16 %v7602_v62  ;;  %v7604_v32 = vunpack.i.h.bf16 %v7602_v62 }
 0xa32   : > { %v6653_v31 = vsel %vm1923_vm2, %v11853_v11, %v7593_v35  ;;  %v6654_v11 = vsel %vm1923_vm2, %v11865_v2, %v7594_v38  ;;  %v7614_v2 = vunpack.i.h.bf16 %v7612_v36 }
 0xa33   : > { %v6661_v25 = vsel %vm2055_vm9, %v6653_v31, %v7598_v20  ;;  %v6662_v29 = vsel %vm2055_vm9, %v6654_v11, %v7599_v49  ;;  %v7644_v20 = vunpack.i.h.bf16 %v7642_v16 }
 0xa34   : > { %v6669_v17 = vsel %vm4235_vm13, %v6661_v25, %v7603_v18  ;;  %v6670_v26 = vsel %vm4235_vm13, %v6662_v29, %v7604_v32 }
 0xa35   : > { %6757 = vmatmul.f32.gmra.mxu2 %v6700_v13 }
 0xa36   : > { %v6638_v45 = vpop.permute.xlu2 %6637 }
 0xa37   : > { %v7607_v7 = vpop.permute.xlu1 %7606  ;;  %v7617_v61 = vpop.permute.xlu0 %7616 }
 0xa38   : > { %v7608_v28 = vunpack.i.l.bf16 %v7607_v7  ;;  %v7609_v42 = vunpack.i.h.bf16 %v7607_v7  ;;  %v7618_v54 = vunpack.i.l.bf16 %v7617_v61  ;;  %v7619_v23 = vunpack.i.h.bf16 %v7617_v61 }
 0xa3a   : > { %v6677_v56 = vsel %vm4244_vm14, %v6669_v17, %v7608_v28  ;;  %v6678_v63 = vsel %vm4244_vm14, %v6670_v26, %v7609_v42 }
 0xa3b   : > { %v6685_v8 = vsel %vm4253_vm15, %v6677_v56, %v7613_v58  ;;  %v6686_v33 = vsel %vm4253_vm15, %v6678_v63, %v7614_v2  ;;  %v6793_v56 = vpop.f32.mrf.mxu1 }
 0xa3c   : > { %v6693_v22 = vsel %vm4262_vm0, %v6685_v8, %v7618_v54  ;;  %v6694_v52 = vsel %vm4262_vm0, %v6686_v33, %v7619_v23 }
 0xa3e   : > { %v6640_v38 = vpop.permute.xlu2 %6639 }
 0xa3f   : > { %v7622_v19 = vpop.permute.xlu1 %7621  ;;  %v7632_v50 = vpop.permute.xlu0 %7631 }
 0xa40   : > { %v7623_v41 = vunpack.i.l.bf16 %v7622_v19  ;;  %v7633_v6 = vunpack.i.l.bf16 %v7632_v50  ;;  %v7624_v44 = vunpack.i.h.bf16 %v7622_v19  ;;  %v7634_v47 = vunpack.i.h.bf16 %v7632_v50  ;;  %v7649_v19 = vld [vmem:[%s12105_s10] ss:$0 sm:$0xff] }
 0xa42   : > { %v6701_v3 = vsel %vm4271_vm1, %v6693_v22, %v7623_v41  ;;  %v6663_v48 = vsel %vm2055_vm9, %v6655_v40, %v7633_v6  ;;  %v6702_v55 = vsel %vm4271_vm1, %v6694_v52, %v7624_v44  ;;  %v6664_v31 = vsel %vm2055_vm9, %v6656_v15, %v7634_v47 }
 0xa43   : > { %6760 = vmatmul.f32.gmra.mxu2 %v6701_v3  ;;  %v6796_v11 = vpop.f32.mrf.mxu1 }
 0xa47   : > { %v7637_v59 = vpop.permute.xlu1 %7636  ;;  %v6574_v0 = vpop.permute.xlu0 %6573 }
 0xa48   : > { %v7638_v43 = vunpack.i.l.bf16 %v7637_v59  ;;  %v7639_v36 = vunpack.i.h.bf16 %v7637_v59 }
 0xa4a   : > { %v6671_v60 = vsel %vm4235_vm13, %v6663_v48, %v7638_v43  ;;  %v6672_v13 = vsel %vm4235_vm13, %v6664_v31, %v7639_v36 }
 0xa4b   : > { %6763 = vmatmul.f32.gmra.mxu2 %v6702_v55  ;;  %v6679_v12 = vsel %vm4244_vm14, %v6671_v60, %v7643_v1  ;;  %v6680_v7 = vsel %vm4244_vm14, %v6672_v13, %v7644_v20  ;;  %v6799_v8 = vpop.f32.mrf.mxu1 }
 0xa4c   : > { %v6687_v34 = vsel %vm4253_vm15, %v6679_v12, %v6574_v0 }
 0xa4f   : > { %v6606_v35 = vpop.permute.xlu1 %6605  ;;  %v6576_v25 = vpop.permute.xlu0 %6575 }
 0xa50   : > { %v6695_v62 = vsel %vm4262_vm0, %v6687_v34, %v6606_v35  ;;  %v6688_v18 = vsel %vm4253_vm15, %v6680_v7, %v6576_v25 }
 0xa51   : > { %v6703_v9 = vsel %vm4271_vm1, %v6695_v62, %v6638_v45 }
 0xa53   : > { %6766 = vmatmul.f32.gmra.mxu2 %v6703_v9  ;;  %v6802_v42 = vpop.f32.mrf.mxu1 }
 0xa57   : > { %v6608_v28 = vpop.permute.xlu1 %6607 }
 0xa58   : > { %v6696_v61 = vsel %vm4262_vm0, %v6688_v18, %v6608_v28 }
 0xa59   : > { %v6704_v14 = vsel %vm4271_vm1, %v6696_v61, %v6640_v38 }
 0xa5b   : > { %6769 = vmatmul.f32.gmra.mxu2 %v6704_v14  ;;  %v6805_v50 = vpop.f32.mrf.mxu1 }
 0xa63   : > { %v6808_v59 = vpop.f32.mrf.mxu1 }
 0xa6b   : > { %v6811_v35 = vpop.f32.mrf.mxu1 }
 0xa9f   : > { %v6749_v17 = vpop.f32.mrf.mxu2 }
 0xaa0   : > { %v6750_v2 = vadd.f32 %v7649_v19, %v6749_v17 }
 0xaa2   : > { %v6791_v33 = vadd.f32 %v6790_v24, %v6750_v2 }
 0xaa4   : > { %v6814_v60 = vadd.f32 %v6791_v33, %v11528_v46 }
 0xaa7   : > { %v6752_v58 = vpop.f32.mrf.mxu2 }
 0xaa8   : > { %v6753_v26 = vadd.f32 %v7649_v19, %v6752_v58 }
 0xaaa   : > { %v6794_v16 = vadd.f32 %v6793_v56, %v6753_v26 }
 0xaac   : > { %v6815_v40 = vadd.f32 %v6794_v16, %v11533_v5 }
 0xaae   : > { %v6836_v31 = vrot.slane %v6815_v40, 4 }
 0xab0   : > { %v6755_v49 = vpop.f32.mrf.mxu2 }
 0xab1   : > { %v6756_v41 = vadd.f32 %v7649_v19, %v6755_v49 }
 0xab3   : > { %v6797_v63 = vadd.f32 %v6796_v11, %v6756_v41 }
 0xab5   : > { %v6816_v6 = vadd.f32 %v6797_v63, %v11538_v21 }
 0xab7   : > { %v6822_v48 = vrot.slane %v6816_v6, 4 }
 0xab8   : > { %v6758_v29 = vpop.f32.mrf.mxu2 }
 0xab9   : > { %v6759_v32 = vadd.f32 %v7649_v19, %v6758_v29 }
 0xabb   : > { %v6800_v22 = vadd.f32 %v6799_v8, %v6759_v32 }
 0xabd   : > { %v6817_v57 = vadd.f32 %v6800_v22, %v11543_v4  ;;  %v6823_v4 = vsel %vm2939_vm12, %v6822_v48, %v6814_v60 }
 0xabe   : > { %v6829_v36 = vperm.slane %v6823_v4, %v9589_v39 }
 0xabf   : > { %v6834_v23 = vrot.slane %v6817_v57, 4  ;;  %v6837_v7 = vsel %vm2939_vm12, %v6817_v57, %v6836_v31 }
 0xac0   : > { %v6872_v25 = vrot.slane %v6829_v36, 4  ;;  %v6845_v58 = vperm.slane %v6837_v7, %v9589_v39 }
 0xac1   : > { %v6835_v55 = vsel %vm2939_vm12, %v6834_v23, %v6815_v40 }
 0xac2   : > { %v6841_v47 = vperm.slane %v6835_v55, %v9589_v39  ;;  %v6882_v41 = vrot.slane %v6845_v58, 4 }
 0xac4   : > { %v6870_v9 = vrot.slane %v6841_v47, 4 }
 0xac6   : > { %v6761_v54 = vpop.f32.mrf.mxu2  ;;  %v6871_v14 = vsel %vm2939_vm12, %v6870_v9, %v6829_v36 }
 0xac7   : > { %v6762_v44 = vadd.f32 %v7649_v19, %v6761_v54  ;;  %v6877_v8 = vperm.slane %v6871_v14, %v9655_v10 }
 0xac9   : > { %v6803_v52 = vadd.f32 %v6802_v42, %v6762_v44  ;;  %v6920_v57 = vrot.slane %v6877_v8, 4 }
 0xacb   : > { %v6818_v21 = vadd.f32 %v6803_v52, %v11548_v27 }
 0xacd   : > { %v6848_v62 = vrot.slane %v6818_v21, 4 }
 0xace   : > { %v6764_v3 = vpop.f32.mrf.mxu2 }
 0xacf   : > { %v6765_v1 = vadd.f32 %v7649_v19, %v6764_v3 }
 0xad1   : > { %v6806_v30 = vadd.f32 %v6805_v50, %v6765_v1 }
 0xad3   : > { %v6819_v46 = vadd.f32 %v6806_v30, %v11553_v51  ;;  %v6873_v51 = vsel %vm2939_vm12, %v6841_v47, %v6872_v25 }
 0xad5   : > { %v6860_v38 = vrot.slane %v6819_v46, 4 }
 0xad6   : > { %v6767_v43 = vpop.f32.mrf.mxu2 }
 0xad7   : > { %v6768_v0 = vadd.f32 %v7649_v19, %v6767_v43 }
 0xad9   : > { %v6809_v12 = vadd.f32 %v6808_v59, %v6768_v0 }
 0xadb   : > { %v6820_v45 = vadd.f32 %v6809_v12, %v11558_v37  ;;  %v6824_v37 = vrot.slane %v6814_v60, 4 }
 0xadd   : > { %v6846_v5 = vrot.slane %v6820_v45, 4  ;;  %v6849_v27 = vsel %vm2939_vm12, %v6820_v45, %v6848_v62  ;;  %v6825_v56 = vsel %vm2939_vm12, %v6816_v6, %v6824_v37 }
 0xade   : > { %v6770_v34 = vpop.f32.mrf.mxu2  ;;  %v6857_v61 = vperm.slane %v6849_v27, %v9589_v39  ;;  %v6833_v32 = vperm.slane %v6825_v56, %v9589_v39 }
 0xadf   : > { %v6771_v15 = vadd.f32 %v7649_v19, %v6770_v34  ;;  %v6847_v13 = vsel %vm2939_vm12, %v6846_v5, %v6818_v21 }
 0xae0   : > { %v6853_v28 = vperm.slane %v6847_v13, %v9589_v39  ;;  %v6908_v29 = vrot.slane %v6857_v61, 4  ;;  %v6884_v23 = vrot.slane %v6833_v32, 4  ;;  %v6883_v59 = vsel %vm2939_vm12, %v6882_v41, %v6833_v32 }
 0xae1   : > { %v6812_v20 = vadd.f32 %v6811_v35, %v6771_v15  ;;  %v6889_v0 = vperm.slane %v6883_v59, %v9655_v10 }
 0xae2   : > { %v6896_v19 = vrot.slane %v6853_v28, 4  ;;  %v6885_v52 = vsel %vm2939_vm12, %v6845_v58, %v6884_v23 }
 0xae3   : > { %v6821_v18 = vadd.f32 %v6812_v20, %v11563_v53  ;;  %v6881_v53 = vperm.slane %v6873_v51, %v9655_v10  ;;  %v6893_v60 = vperm.slane %v6885_v52, %v9655_v10  ;;  %v6928_v4 = vrot.slane %v6889_v0, 4 }
 0xae5   : > { %v6858_v24 = vrot.slane %v6821_v18, 4  ;;  %v6861_v17 = vsel %vm2939_vm12, %v6821_v18, %v6860_v38  ;;  %v6924_v63 = vrot.slane %v6881_v53, 4  ;;  %v6932_v5 = vrot.slane %v6893_v60, 4 }
 0xae6   : > { %v6869_v11 = vperm.slane %v6861_v17, %v9589_v39 }
 0xae7   : > { %v6859_v49 = vsel %vm2939_vm12, %v6858_v24, %v6819_v46 }
 0xae8   : > { %v6865_v42 = vperm.slane %v6859_v49, %v9589_v39  ;;  %v6906_v54 = vrot.slane %v6869_v11, 4  ;;  %v6909_v26 = vsel %vm2939_vm12, %v6869_v11, %v6908_v29 }
 0xae9   : > { %v6917_v39 = vperm.slane %v6909_v26, %v9655_v10 }
 0xaea   : > { %v6894_v50 = vrot.slane %v6865_v42, 4  ;;  %v6897_v22 = vsel %vm2939_vm12, %v6865_v42, %v6896_v19  ;;  %v6907_v16 = vsel %vm2939_vm12, %v6906_v54, %v6857_v61 }
 0xaeb   : > { %v6905_v3 = vperm.slane %v6897_v22, %v9655_v10  ;;  %v6913_v48 = vperm.slane %v6907_v16, %v9655_v10  ;;  %v6930_v1 = vrot.slane %v6917_v39, 4 }
 0xaec   : > { %v6895_v2 = vsel %vm2939_vm12, %v6894_v50, %v6853_v28 }
 0xaed   : > { %v6925_v6 = vsel %vm2939_vm12, %v6905_v3, %v6924_v63  ;;  %v6922_v44 = vrot.slane %v6905_v3, 4  ;;  %v6901_v33 = vperm.slane %v6895_v2, %v9655_v10  ;;  %v6926_v55 = vrot.slane %v6913_v48, 4 }
 0xaee   : > { %6943 = vrot.lane.b32.xlu2 %v6925_v6, %s7699_s30  ;;  %v6931_v12 = vsel %vm2939_vm12, %v6930_v1, %v6893_v60  ;;  %v6929_v30 = vsel %vm2939_vm12, %v6913_v48, %v6928_v4  ;;  %v6933_v10 = vsel %vm2939_vm12, %v6917_v39, %v6932_v5 }
 0xaef   : > { %v6923_v40 = vsel %vm2939_vm12, %v6922_v44, %v6881_v53  ;;  %v6921_v43 = vsel %vm2939_vm12, %v6901_v33, %v6920_v57  ;;  %v6918_v21 = vrot.slane %v6901_v33, 4  ;;  %v6927_v45 = vsel %vm2939_vm12, %v6926_v55, %v6889_v0 }
 0xaf0   : > { %6939 = vrot.lane.b32.xlu1 %v6923_v40, %s7694_s29  ;;  %6935 = vrot.lane.b32.xlu0 %v6921_v43, %s7691_s26  ;;  %s7030_s26 = sshll.u32 %s12523_s18, 3 }
 0xaf1   : > { %v6919_v47 = vsel %vm2939_vm12, %v6918_v21, %v6877_v8 }
 0xaf6   : > { %6955 = vrot.lane.b32.xlu2 %v6931_v12, %s7702_s14 }
 0xaf8   : > { %6951 = vrot.lane.b32.xlu1 %v6929_v30, %s7701_s13  ;;  %6947 = vrot.lane.b32.xlu0 %v6927_v45, %s7700_s12  ;;  %s384_s12 = scalar_lea.vmem %s12106_s11, %s7030_s26 }
 0xb00   : > { %6959 = vrot.lane.b32.xlu0 %v6933_v10, %s7703_s15 }
 0xb48   : > { %v6944_v62 = vpop.permute.xlu2 %6943 }
 0xb50   : > { %v6956_v20 = vpop.permute.xlu2 %6955 }
 0xb62   : > { %v6940_v36 = vpop.permute.xlu1 %6939  ;;  %v6936_v34 = vpop.permute.xlu0 %6935 }
 0xb63   : > { %v6962_v35 = vsel %vm1923_vm2, %v6919_v47, %v6936_v34 }
 0xb64   : > { %v6963_v46 = vsel %vm2055_vm9, %v6962_v35, %v6940_v36 }
 0xb65   : > { %v6964_v9 = vsel %vm4235_vm13, %v6963_v46, %v6944_v62 }
 0xb6a   : > { %v6948_v15 = vpop.permute.xlu0 %6947  ;;  %v6952_v31 = vpop.permute.xlu1 %6951 }
 0xb6b   : > { %v6965_v13 = vsel %vm4244_vm14, %v6964_v9, %v6948_v15 }
 0xb6c   : > { %v6966_v27 = vsel %vm4253_vm15, %v6965_v13, %v6952_v31 }
 0xb6d   : > { %v6967_v37 = vsel %vm4262_vm0, %v6966_v27, %v6956_v20 }
 0xb72   : > { %v6960_v25 = vpop.permute.xlu0 %6959 }
 0xb73   : > { %v6968_v7 = vsel %vm4271_vm1, %v6967_v37, %v6960_v25 }
 0xb74   : > { %6969 = vst [vmem:[%s384_s12] sm:$0xff] %v6968_v7 }
 0xb75 PF: > { %s21_s17 = sadd.s32 1, %s7685_s17  }
 0xb76   : > { %p18_p4 = scmp.ge.s32.totalorder %s21_s17, 4  }
 0xb78   :  { %20 = sbr.rel (!%p18_p4) target bundleno = 1 (0x1), region = 100 }

</bundles_post_ra>
